<compile_context>
chip_gen: v5e
topology: v5e:2x2
jax: 0.10.0
libtpu: 0.0.40
codegen_flags: <defaults>
</compile_context>

<pallas_src>
import functools

import jax
import jax.numpy as jnp
from jax.experimental import pallas as pl
from jax.experimental.pallas import tpu as pltpu

_VMEM_LIMIT = 32 * 1024 * 1024  # explicit scoped-VMEM cap (safe on v5e/v6e/v7x)


# ----------------------------------------------------------------------------
# small helpers
# ----------------------------------------------------------------------------

def _pad_dim(a, axis, size):
    """Zero-pad `a` along `axis` up to `size` (no-op if already that size)."""
    if a.shape[axis] == size:
        return a
    pad = [(0, 0)] * a.ndim
    pad[axis] = (0, size - a.shape[axis])
    return jnp.pad(a, pad)


def _round_up(n, m):
    return ((n + m - 1) // m) * m


# ----------------------------------------------------------------------------
# Kernel 1: fused per-point MLP chain + max-over-points reduction
#   grid = (B, cdiv(N, TN)); an (8, C_last) running-max accumulator lives in VMEM,
#   initialized to -inf on the first N-tile, collapsed 8->1 and stored on the last tile.
# ----------------------------------------------------------------------------

def _point_mlp_max_kernel(*refs, relus, n_valid, padded_total, tile_n):
    n_layers = len(relus)
    x_ref = refs[0]
    wb = refs[1:1 + 2 * n_layers]
    o_ref = refs[1 + 2 * n_layers]
    acc_ref = refs[2 + 2 * n_layers]

    nt = pl.program_id(1)

    @pl.when(nt == 0)
    def _():
        # -inf init: the encoder's last layer has no ReLU, values can be negative.
        acc_ref[...] = jnp.full(acc_ref.shape, -jnp.inf, acc_ref.dtype)

    h = x_ref[0]  # (TN, Cin), f32
    for l in range(n_layers):
        w_ref, b_ref = wb[2 * l], wb[2 * l + 1]
        w = w_ref[0] if len(w_ref.shape) == 3 else w_ref[...]   # per-batch vs shared weight
        lhs = h.astype(jnp.bfloat16) if w.dtype == jnp.bfloat16 else h
        h = jnp.dot(lhs, w, preferred_element_type=jnp.float32) + b_ref[...]
        if relus[l]:
            h = jnp.maximum(h, 0.0)

    # Mask tail rows (only exist on the last tile when TN does not divide N):
    # out-of-range rows may hold garbage, and padded points must not contaminate the max.
    if padded_total != n_valid:
        row = nt * tile_n + jax.lax.broadcasted_iota(jnp.int32, h.shape, 0)
        h = jnp.where(row < n_valid, h, -jnp.inf)

    # (TN, C) -> (8, C) partial max, then full-vreg elementwise max into the accumulator.
    c = h.shape[-1]
    h8 = jnp.max(h.reshape(tile_n // 8, 8, c), axis=0)
    acc_ref[...] = jnp.maximum(acc_ref[...], h8)

    @pl.when(nt == pl.num_programs(1) - 1)
    def _():
        o_ref[0] = jnp.max(acc_ref[...], axis=0, keepdims=True)


def point_mlp_max(x, layers, tile_n=None, max_tile=1024):
    """x: (B, N, Cin).  layers: list of (w, b, relu); w is (Cin, Cout) shared or
    (B, Cin, Cout) per-batch (f32 or bf16), b is (Cout,) f32.
    Returns max over N of the fused MLP: (B, Cout_last) f32."""
    B, N, cin = x.shape
    if N % 8 != 0:                       # keep sublane-aligned blocks; tail rows are masked
        x = _pad_dim(x, 1, _round_up(N, 8))
    n_padded = x.shape[1]
    TN = tile_n or min(max_tile, n_padded)
    TN = _round_up(TN, 8)
    grid_n = pl.cdiv(n_padded, TN)
    padded_total = grid_n * TN
    c_last = layers[-1][0].shape[-1]
    relus = tuple(bool(r) for _, _, r in layers)

    in_specs = [pl.BlockSpec((1, TN, cin), lambda b, n: (b, n, 0))]
    args = [x]
    for w, bvec, _ in layers:
        if w.ndim == 3:
            in_specs.append(pl.BlockSpec((1,) + w.shape[1:], lambda b, n: (b, 0, 0)))
        else:
            in_specs.append(pl.BlockSpec(w.shape, lambda b, n: (0, 0)))
        in_specs.append(pl.BlockSpec((1, bvec.shape[0]), lambda b, n: (0, 0)))
        args += [w, bvec.reshape(1, -1)]

    out = pl.pallas_call(
        functools.partial(_point_mlp_max_kernel, relus=relus, n_valid=N,
                          padded_total=padded_total, tile_n=TN),
        out_shape=jax.ShapeDtypeStruct((B, 1, c_last), jnp.float32),
        grid=(B, grid_n),
        in_specs=in_specs,
        out_specs=pl.BlockSpec((1, 1, c_last), lambda b, n: (b, 0, 0)),
        scratch_shapes=[pltpu.VMEM((8, c_last), jnp.float32)],
        compiler_params=pltpu.CompilerParams(
            dimension_semantics=("parallel", "arbitrary"),
            vmem_limit_bytes=_VMEM_LIMIT),
    )(*args)
    return out.reshape(B, c_last)


# ----------------------------------------------------------------------------
# Kernel 2: fused 3-layer MLP head (fc1+ReLU -> fc2+ReLU -> fc3)
#   grid = (512 // TK,) over fc1 output-column blocks; the fc2 pre-activation is
#   accumulated in a (Bp, 256) VMEM scratch; fc3 runs in the last-step epilogue.
# ----------------------------------------------------------------------------

def _head_kernel(g_ref, w1_ref, b1_ref, w2_ref, b2_ref, w3_ref, b3_ref, o_ref, acc_ref):
    k = pl.program_id(0)

    @pl.when(k == 0)
    def _():
        acc_ref[...] = jnp.zeros_like(acc_ref)

    g = g_ref[...]
    w1 = w1_ref[...]
    lhs = g.astype(jnp.bfloat16) if w1.dtype == jnp.bfloat16 else g
    h1 = jnp.dot(lhs, w1, preferred_element_type=jnp.float32) + b1_ref[...]
    h1 = jnp.maximum(h1, 0.0)

    w2 = w2_ref[...]
    h1c = h1.astype(jnp.bfloat16) if w2.dtype == jnp.bfloat16 else h1
    acc_ref[...] += jnp.dot(h1c, w2, preferred_element_type=jnp.float32)

    @pl.when(k == pl.num_programs(0) - 1)
    def _():
        h2 = jnp.maximum(acc_ref[...] + b2_ref[...], 0.0)
        w3 = w3_ref[...]
        h2c = h2.astype(jnp.bfloat16) if w3.dtype == jnp.bfloat16 else h2
        o_ref[...] = jnp.dot(h2c, w3, preferred_element_type=jnp.float32) + b3_ref[...]


def fused_head(g, w1, b1, w2, b2, w3, b3, out_dim, tile_k=128):
    """g: (B, 1024) -> (B, out_dim).  The batch rows are padded to the 8-sublane
    granularity and the fc3 output is lane-padded to a multiple of 128 (unmasked stores);
    both paddings are sliced off in the wrapper."""
    B, k_in = g.shape
    Bp = _round_up(max(B, 8), 8)
    gp = _pad_dim(g, 0, Bp)
    hidden1 = w1.shape[1]
    hidden2 = w2.shape[1]
    n_pad = _round_up(out_dim, 128)
    w3p = _pad_dim(w3, 1, n_pad)
    b3p = _pad_dim(b3.reshape(1, -1), 1, n_pad)

    TK = min(tile_k, hidden1)
    assert hidden1 % TK == 0
    grid_k = hidden1 // TK

    out = pl.pallas_call(
        _head_kernel,
        out_shape=jax.ShapeDtypeStruct((Bp, n_pad), jnp.float32),
        grid=(grid_k,),
        in_specs=[
            pl.BlockSpec((Bp, k_in), lambda k: (0, 0)),          # g
            pl.BlockSpec((k_in, TK), lambda k: (0, k)),          # fc1 weight column block
            pl.BlockSpec((1, TK), lambda k: (0, k)),             # fc1 bias block
            pl.BlockSpec((TK, hidden2), lambda k: (k, 0)),       # fc2 weight row block
            pl.BlockSpec((1, hidden2), lambda k: (0, 0)),        # fc2 bias
            pl.BlockSpec(w3p.shape, lambda k: (0, 0)),           # fc3 weight (lane-padded)
            pl.BlockSpec(b3p.shape, lambda k: (0, 0)),           # fc3 bias
        ],
        out_specs=pl.BlockSpec((Bp, n_pad), lambda k: (0, 0)),
        scratch_shapes=[pltpu.VMEM((Bp, hidden2), jnp.float32)],
        compiler_params=pltpu.CompilerParams(
            dimension_semantics=("arbitrary",),
            vmem_limit_bytes=_VMEM_LIMIT),
    )(gp, w1, b1.reshape(1, -1), w2, b2.reshape(1, -1), w3p, b3p)
    return out[:B, :out_dim]


# ----------------------------------------------------------------------------
# Parameter construction (deterministic, synthetic; BN folded into matmuls;
# large weights stored in bf16, small/narrow ones in f32)
# ----------------------------------------------------------------------------

def _init_linear(key, cin, cout, scale=0.1):
    k1, k2 = jax.random.split(key)
    w = jax.random.normal(k1, (cout, cin), jnp.float32) * scale  # torch (out, in) layout
    b = jax.random.normal(k2, (cout,), jnp.float32) * scale
    return w, b


def _init_bn(key, c):
    k1, k2, k3, k4 = jax.random.split(key, 4)
    gamma = 1.0 + 0.1 * jax.random.normal(k1, (c,), jnp.float32)
    beta = 0.1 * jax.random.normal(k2, (c,), jnp.float32)
    mean = 0.1 * jax.random.normal(k3, (c,), jnp.float32)
    var = jnp.abs(1.0 + 0.1 * jax.random.normal(k4, (c,), jnp.float32))
    return gamma, beta, mean, var


def _fold_bn(w, b, gamma, beta, mean, var, eps=1e-5):
    """Fold eval-mode BatchNorm1d into the preceding Conv1d(k=1)/Linear."""
    s = gamma / jnp.sqrt(var + eps)
    w_eff = (w * s[:, None]).T           # (Cin, Cout)
    b_eff = b * s + beta - mean * s      # (Cout,)
    return w_eff, b_eff


def _init_stn(key, cin, out_dim):
    k = jax.random.split(key, 11)
    p = {"out_dim": out_dim}
    w, b = _init_linear(k[0], cin, 64)
    p["c1_w"], p["c1_b"] = _fold_bn(w, b, *_init_bn(k[1], 64))
    w, b = _init_linear(k[2], 64, 128)
    p["c2_w"], p["c2_b"] = _fold_bn(w, b, *_init_bn(k[3], 128))
    w, b = _init_linear(k[4], 128, 1024)
    w3, b3 = _fold_bn(w, b, *_init_bn(k[5], 1024))
    p["c3_w"], p["c3_b"] = w3.astype(jnp.bfloat16), b3          # bf16: 128x1024
    w, b = _init_linear(k[6], 1024, 512)
    wf, bf = _fold_bn(w, b, *_init_bn(k[7], 512))
    p["f1_w"], p["f1_b"] = wf.astype(jnp.bfloat16), bf          # bf16: 1024x512
    w, b = _init_linear(k[8], 512, 256)
    wf, bf = _fold_bn(w, b, *_init_bn(k[9], 256))
    p["f2_w"], p["f2_b"] = wf.astype(jnp.bfloat16), bf          # bf16: 512x256
    w, b = _init_linear(k[10], 256, out_dim * out_dim)
    p["f3_w"], p["f3_b"] = w.T, b                                # narrow: keep f32
    return p


def init_params(key, input_dim=3, point_dim=3, output_dim=1):
    k_stn, k_fstn, k_rest = jax.random.split(key, 3)
    k = jax.random.split(k_rest, 11)
    feat = {"stn": _init_stn(k_stn, input_dim, point_dim),
            "fstn": _init_stn(k_fstn, 64, 64)}
    w, b = _init_linear(k[0], input_dim, 64)
    feat["c1_w"], feat["c1_b"] = _fold_bn(w, b, *_init_bn(k[1], 64))
    w, b = _init_linear(k[2], 64, 128)
    feat["c2_w"], feat["c2_b"] = _fold_bn(w, b, *_init_bn(k[3], 128))
    w, b = _init_linear(k[4], 128, 1024)
    w3, b3 = _fold_bn(w, b, *_init_bn(k[5], 1024))
    feat["c3_w"], feat["c3_b"] = w3.astype(jnp.bfloat16), b3     # bf16: 128x1024

    params = {"feat": feat, "point_dim": point_dim, "output_dim": output_dim}
    w, b = _init_linear(k[6], 1024, 512)
    wf, bf = _fold_bn(w, b, *_init_bn(k[7], 512))
    params["fc1_w"], params["fc1_b"] = wf.astype(jnp.bfloat16), bf   # bf16
    w, b = _init_linear(k[8], 512, 256)
    wf, bf = _fold_bn(w, b, *_init_bn(k[9], 256))
    params["fc2_w"], params["fc2_b"] = wf.astype(jnp.bfloat16), bf   # bf16
    w, b = _init_linear(k[10], 256, output_dim)
    params["fc3_w"], params["fc3_b"] = w.T, b                        # narrow: keep f32
    return params


# ----------------------------------------------------------------------------
# Forward pass (hot path in fused Pallas kernels; tiny glue in JAX)
# ----------------------------------------------------------------------------

def stn_forward(p, x_pts, pre_layers=None):
    """x_pts: (B, N, Cp).  pre_layers: optional per-point layers executed before this STN's
    own convs (used to recompute the encoder's conv1 in-kernel, no HBM round-trip)."""
    B, _, cp = x_pts.shape
    d = p["out_dim"]
    if pre_layers:
        layers = list(pre_layers)
        c1_w = p["c1_w"]
    else:
        layers = []
        c1_w = _pad_dim(p["c1_w"], 0, cp)     # zero rows for the lane-padded input channels
    layers += [(c1_w, p["c1_b"], True),
               (p["c2_w"], p["c2_b"], True),
               (p["c3_w"], p["c3_b"], True)]
    g = point_mlp_max(x_pts, layers)
    t = fused_head(g, p["f1_w"], p["f1_b"], p["f2_w"], p["f2_b"],
                   p["f3_w"], p["f3_b"], d * d)
    return t.reshape(B, d, d) + jnp.eye(d, dtype=jnp.float32)


def encoder_forward(p, x):
    # x: (B, D, N) with D == point_dim == 3  (PyTorch NCW layout)
    B, D, N = x.shape
    x_pts = jnp.transpose(x, (0, 2, 1))                       # (B, N, 3)
    cp = _round_up(max(D, 8), 8)
    x_pad = _pad_dim(x_pts, 2, cp)                            # lane-pad degenerate K=3 -> 8

    trans = stn_forward(p["stn"], x_pad)                      # (B, 3, 3)

    # Fold the input transform into conv1: (x @ T) @ W1 == x @ (T @ W1).
    w1_b = jnp.einsum("bij,jk->bik", trans, p["c1_w"])        # (B, 3, 64) per-batch weight
    w1_b = _pad_dim(w1_b, 1, cp)                              # (B, 8, 64)
    conv1_layer = (w1_b, p["c1_b"], True)

    # Feature STN: conv1 is recomputed inside the fused chain (no (B,N,64) HBM round-trip).
    trans_feat = stn_forward(p["fstn"], x_pad, pre_layers=[conv1_layer])   # (B, 64, 64)

    # Fold the feature transform into conv2, then conv1->conv2->conv3(no ReLU)+max, fused.
    w2_b = jnp.einsum("bij,jk->bik", trans_feat, p["c2_w"])   # (B, 64, 128) per-batch weight
    g = point_mlp_max(x_pad, [conv1_layer,
                              (w2_b, p["c2_b"], True),
                              (p["c3_w"], p["c3_b"], False)])  # (B, 1024)
    return g, trans, trans_feat


def classifier_forward(params, x):
    g, trans, trans_feat = encoder_forward(params["feat"], x)
    # Dropout(p=0.4) is identity in eval mode.
    out = fused_head(g, params["fc1_w"], params["fc1_b"],
                     params["fc2_w"], params["fc2_b"],
                     params["fc3_w"], params["fc3_b"], params["output_dim"])
    return out, trans_feat


# ----------------------------------------------------------------------------
# Pure-JAX reference (same folded params and bf16-weight / f32-accumulate policy)
# for a correctness check
# ----------------------------------------------------------------------------

def _ref_linear(x, w, b, relu):
    lhs = x.astype(jnp.bfloat16) if w.dtype == jnp.bfloat16 else x
    y = jnp.dot(lhs, w, preferred_element_type=jnp.float32) + b
    return jnp.maximum(y, 0.0) if relu else y


def _ref_stn(p, x_pts, B, N):
    h = _ref_linear(x_pts, p["c1_w"], p["c1_b"], True)
    h = _ref_linear(h, p["c2_w"], p["c2_b"], True)
    h = _ref_linear(h, p["c3_w"], p["c3_b"], True)
    g = jnp.max(h.reshape(B, N, 1024), axis=1)
    g = _ref_linear(g, p["f1_w"], p["f1_b"], True)
    g = _ref_linear(g, p["f2_w"], p["f2_b"], True)
    g = _ref_linear(g, p["f3_w"], p["f3_b"], False)
    d = p["out_dim"]
    return g.reshape(B, d, d) + jnp.eye(d, dtype=jnp.float32)


def _ref_forward(params, x):
    p = params["feat"]
    B, D, N = x.shape
    x_pts = jnp.transpose(x, (0, 2, 1)).reshape(B * N, D)
    trans = _ref_stn(p["stn"], x_pts, B, N)
    xt = jnp.einsum("bnk,bkj->bnj", x_pts.reshape(B, N, D), trans)
    h = _ref_linear(xt.reshape(B * N, D), p["c1_w"], p["c1_b"], True)
    trans_feat = _ref_stn(p["fstn"], h, B, N)
    h = jnp.einsum("bnk,bkj->bnj", h.reshape(B, N, 64), trans_feat).reshape(B * N, 64)
    h = _ref_linear(h, p["c2_w"], p["c2_b"], True)
    h = _ref_linear(h, p["c3_w"], p["c3_b"], False)
    g = jnp.max(h.reshape(B, N, 1024), axis=1)
    h = _ref_linear(g, params["fc1_w"], params["fc1_b"], True)
    h = _ref_linear(h, params["fc2_w"], params["fc2_b"], True)
    out = _ref_linear(h, params["fc3_w"], params["fc3_b"], False)
    return out, trans_feat


# ----------------------------------------------------------------------------

if __name__ == "__main__":
    key = jax.random.PRNGKey(0)
    pkey, xkey = jax.random.split(key)

    B, D, N = 2, 3, 32  # batch=2, input_dim=point_dim=3, 32 points
    params = init_params(pkey, input_dim=D, point_dim=3, output_dim=1)
    x = jax.random.normal(xkey, (B, D, N), jnp.float32)

    fwd = jax.jit(lambda xx: classifier_forward(params, xx))
    out, trans_feat = fwd(x)
    out = jax.block_until_ready(out)
    trans_feat = jax.block_until_ready(trans_feat)

    ref_out, ref_tf = _ref_forward(params, x)
    assert out.shape == (B, 1) and trans_feat.shape == (B, 64, 64)
    assert jnp.allclose(out, ref_out, rtol=2e-2, atol=2e-2)
    assert jnp.allclose(trans_feat, ref_tf, rtol=2e-2, atol=2e-2)

    print("KERNEL_OK")
</pallas_src>

<mosaic_0001>
module attributes {stable_mosaic.version = 11 : i64} {
  func.func @_point_mlp_max_kernel(%arg0: i32, %arg1: i32, %arg2: memref<1x32x8xf32, #tpu.memory_space<vmem>>, %arg3: memref<8x64xf32, #tpu.memory_space<vmem>>, %arg4: memref<1x64xf32, #tpu.memory_space<vmem>>, %arg5: memref<64x128xf32, #tpu.memory_space<vmem>>, %arg6: memref<1x128xf32, #tpu.memory_space<vmem>>, %arg7: memref<128x1024xbf16, #tpu.memory_space<vmem>>, %arg8: memref<1x1024xf32, #tpu.memory_space<vmem>>, %arg9: memref<1x1x1024xf32, #tpu.memory_space<vmem>>, %arg10: memref<8x1024xf32, #tpu.memory_space<vmem>>) attributes {dimension_semantics = [#tpu.dimension_semantics<parallel>, #tpu.dimension_semantics<arbitrary>], iteration_bounds = array<i64: 2, 1>, scalar_prefetch = 0 : i64, scratch_operands = 1 : i64, tpu.core_type = #tpu.core_type<tc>, window_params = [{transform_indices = @transform_0, window_bounds = array<i64: 1, 32, 8>}, {pipeline_mode = #tpu.pipeline_mode<synchronous>, transform_indices = @transform_1, window_bounds = array<i64: 8, 64>}, {pipeline_mode = #tpu.pipeline_mode<synchronous>, transform_indices = @transform_2, window_bounds = array<i64: 1, 64>}, {pipeline_mode = #tpu.pipeline_mode<synchronous>, transform_indices = @transform_3, window_bounds = array<i64: 64, 128>}, {pipeline_mode = #tpu.pipeline_mode<synchronous>, transform_indices = @transform_4, window_bounds = array<i64: 1, 128>}, {pipeline_mode = #tpu.pipeline_mode<synchronous>, transform_indices = @transform_5, window_bounds = array<i64: 128, 1024>}, {pipeline_mode = #tpu.pipeline_mode<synchronous>, transform_indices = @transform_6, window_bounds = array<i64: 1, 1024>}, {transform_indices = @transform_7, window_bounds = array<i64: 1, 1, 1024>}]} {
    %c0_i32 = arith.constant 0 : i32
    %0 = arith.cmpi eq, %arg1, %c0_i32 : i32
    %1 = arith.extui %0 : i1 to i32
    %c0_i32_0 = arith.constant 0 : i32
    %2 = arith.cmpi ne, %1, %c0_i32_0 : i32
    scf.if %2 {
      %cst_27 = arith.constant 0xFF800000 : f32
      %35 = vector.broadcast %cst_27 : f32 to vector<8x1024xf32>
      %c0_28 = arith.constant 0 : index
      %c0_29 = arith.constant 0 : index
      %36 = vector.load %arg10[%c0_28, %c0_29] : memref<8x1024xf32, #tpu.memory_space<vmem>>, vector<8x1024xf32>
      tpu.vector_store %arg10[%c0_28, %c0_29], %35 {strides = array<i32>} : memref<8x1024xf32, #tpu.memory_space<vmem>>, vector<8x1024xf32>,
    } else {
    }
    %c0 = arith.constant 0 : index
    %c0_1 = arith.constant 0 : index
    %c0_2 = arith.constant 0 : index
    %3 = vector.load %arg2[%c0, %c0_1, %c0_2] : memref<1x32x8xf32, #tpu.memory_space<vmem>>, vector<1x32x8xf32>
    %4 = vector.shape_cast %3 : vector<1x32x8xf32> to vector<32x8xf32>
    %c0_3 = arith.constant 0 : index
    %c0_4 = arith.constant 0 : index
    %5 = vector.load %arg3[%c0_3, %c0_4] : memref<8x64xf32, #tpu.memory_space<vmem>>, vector<8x64xf32>
    %cst = arith.constant dense<0.000000e+00> : vector<32x64xf32>
    %6 = tpu.matmul %4, %5, %cst {dimension_numbers = #tpu.dot_dimension_numbers<[1], [0], [0], [1], [0, 0, 1, 1], [], []>} : vector<32x8xf32>, vector<8x64xf32>, vector<32x64xf32> -> vector<32x64xf32>
    %c0_5 = arith.constant 0 : index
    %c0_6 = arith.constant 0 : index
    %7 = vector.load %arg4[%c0_5, %c0_6] : memref<1x64xf32, #tpu.memory_space<vmem>>, vector<1x64xf32>
    %8 = vector.broadcast %7 : vector<1x64xf32> to vector<32x64xf32>
    %9 = arith.addf %6, %8 : vector<32x64xf32>
    %cst_7 = arith.constant 0.000000e+00 : f32
    %10 = vector.broadcast %cst_7 : f32 to vector<32x64xf32>
    %11 = arith.maximumf %9, %10 : vector<32x64xf32>
    %c0_8 = arith.constant 0 : index
    %c0_9 = arith.constant 0 : index
    %12 = vector.load %arg5[%c0_8, %c0_9] : memref<64x128xf32, #tpu.memory_space<vmem>>, vector<64x128xf32>
    %cst_10 = arith.constant dense<0.000000e+00> : vector<32x128xf32>
    %13 = tpu.matmul %11, %12, %cst_10 {dimension_numbers = #tpu.dot_dimension_numbers<[1], [0], [0], [1], [0, 0, 1, 1], [], []>} : vector<32x64xf32>, vector<64x128xf32>, vector<32x128xf32> -> vector<32x128xf32>
    %c0_11 = arith.constant 0 : index
    %c0_12 = arith.constant 0 : index
    %14 = vector.load %arg6[%c0_11, %c0_12] : memref<1x128xf32, #tpu.memory_space<vmem>>, vector<1x128xf32>
    %15 = vector.broadcast %14 : vector<1x128xf32> to vector<32x128xf32>
    %16 = arith.addf %13, %15 : vector<32x128xf32>
    %cst_13 = arith.constant 0.000000e+00 : f32
    %17 = vector.broadcast %cst_13 : f32 to vector<32x128xf32>
    %18 = arith.maximumf %16, %17 : vector<32x128xf32>
    %c0_14 = arith.constant 0 : index
    %c0_15 = arith.constant 0 : index
    %19 = vector.load %arg7[%c0_14, %c0_15] : memref<128x1024xbf16, #tpu.memory_space<vmem>>, vector<128x1024xbf16>
    %20 = arith.truncf %18 : vector<32x128xf32> to vector<32x128xbf16>
    %cst_16 = arith.constant dense<0.000000e+00> : vector<32x1024xf32>
    %21 = tpu.matmul %20, %19, %cst_16 {dimension_numbers = #tpu.dot_dimension_numbers<[1], [0], [0], [1], [0, 0, 1, 1], [], []>} : vector<32x128xbf16>, vector<128x1024xbf16>, vector<32x1024xf32> -> vector<32x1024xf32>
    %c0_17 = arith.constant 0 : index
    %c0_18 = arith.constant 0 : index
    %22 = vector.load %arg8[%c0_17, %c0_18] : memref<1x1024xf32, #tpu.memory_space<vmem>>, vector<1x1024xf32>
    %23 = vector.broadcast %22 : vector<1x1024xf32> to vector<32x1024xf32>
    %24 = arith.addf %21, %23 : vector<32x1024xf32>
    %cst_19 = arith.constant 0.000000e+00 : f32
    %25 = vector.broadcast %cst_19 : f32 to vector<32x1024xf32>
    %26 = arith.maximumf %24, %25 : vector<32x1024xf32>
    %27 = vector.shape_cast %26 : vector<32x1024xf32> to vector<4x8x1024xf32>
    %cst_20 = arith.constant dense<0xFF800000> : vector<8x1024xf32>
    %28 = vector.multi_reduction <maximumf>, %27, %cst_20 [0] : vector<4x8x1024xf32> to vector<8x1024xf32>
    %c0_21 = arith.constant 0 : index
    %c0_22 = arith.constant 0 : index
    %29 = vector.load %arg10[%c0_21, %c0_22] : memref<8x1024xf32, #tpu.memory_space<vmem>>, vector<8x1024xf32>
    %30 = arith.maximumf %29, %28 : vector<8x1024xf32>
    %c0_23 = arith.constant 0 : index
    %c0_24 = arith.constant 0 : index
    %31 = vector.load %arg10[%c0_23, %c0_24] : memref<8x1024xf32, #tpu.memory_space<vmem>>, vector<8x1024xf32>
    tpu.vector_store %arg10[%c0_23, %c0_24], %30 {strides = array<i32>} : memref<8x1024xf32, #tpu.memory_space<vmem>>, vector<8x1024xf32>,
    %c0_i32_25 = arith.constant 0 : i32
    %32 = arith.cmpi eq, %arg1, %c0_i32_25 : i32
    %33 = arith.extui %32 : i1 to i32
    %c0_i32_26 = arith.constant 0 : i32
    %34 = arith.cmpi ne, %33, %c0_i32_26 : i32
    scf.if %34 {
      %c0_27 = arith.constant 0 : index
      %c0_28 = arith.constant 0 : index
      %35 = vector.load %arg10[%c0_27, %c0_28] : memref<8x1024xf32, #tpu.memory_space<vmem>>, vector<8x1024xf32>
      %cst_29 = arith.constant dense<0xFF800000> : vector<1024xf32>
      %36 = vector.multi_reduction <maximumf>, %35, %cst_29 [0] : vector<8x1024xf32> to vector<1024xf32>
      %37 = vector.shape_cast %36 : vector<1024xf32> to vector<1x1024xf32>
      %c0_30 = arith.constant 0 : index
      %c0_31 = arith.constant 0 : index
      %c0_32 = arith.constant 0 : index
      %38 = vector.load %arg9[%c0_30, %c0_31, %c0_32] : memref<1x1x1024xf32, #tpu.memory_space<vmem>>, vector<1x1x1024xf32>
      %39 = vector.shape_cast %38 : vector<1x1x1024xf32> to vector<1x1024xf32>
      %40 = vector.shape_cast %37 : vector<1x1024xf32> to vector<1x1x1024xf32>
      tpu.vector_store %arg9[%c0_30, %c0_31, %c0_32], %40 {strides = array<i32>} : memref<1x1x1024xf32, #tpu.memory_space<vmem>>, vector<1x1x1024xf32>,
    } else {
    }
    return
  }
  func.func @transform_0(%arg0: i32, %arg1: i32) -> (i32, i32, i32) {
    %c0_i32 = arith.constant 0 : i32
    %c0_i32_0 = arith.constant 0 : i32
    return %arg0, %arg1, %c0_i32 : i32, i32, i32
  }
  func.func @transform_1(%arg0: i32, %arg1: i32) -> (i32, i32) {
    %c0_i32 = arith.constant 0 : i32
    %c0_i32_0 = arith.constant 0 : i32
    %c0_i32_1 = arith.constant 0 : i32
    return %c0_i32, %c0_i32_0 : i32, i32
  }
  func.func @transform_2(%arg0: i32, %arg1: i32) -> (i32, i32) {
    %c0_i32 = arith.constant 0 : i32
    %c0_i32_0 = arith.constant 0 : i32
    %c0_i32_1 = arith.constant 0 : i32
    return %c0_i32, %c0_i32_0 : i32, i32
  }
  func.func @transform_3(%arg0: i32, %arg1: i32) -> (i32, i32) {
    %c0_i32 = arith.constant 0 : i32
    %c0_i32_0 = arith.constant 0 : i32
    %c0_i32_1 = arith.constant 0 : i32
    return %c0_i32, %c0_i32_0 : i32, i32
  }
  func.func @transform_4(%arg0: i32, %arg1: i32) -> (i32, i32) {
    %c0_i32 = arith.constant 0 : i32
    %c0_i32_0 = arith.constant 0 : i32
    %c0_i32_1 = arith.constant 0 : i32
    return %c0_i32, %c0_i32_0 : i32, i32
  }
  func.func @transform_5(%arg0: i32, %arg1: i32) -> (i32, i32) {
    %c0_i32 = arith.constant 0 : i32
    %c0_i32_0 = arith.constant 0 : i32
    %c0_i32_1 = arith.constant 0 : i32
    return %c0_i32, %c0_i32_0 : i32, i32
  }
  func.func @transform_6(%arg0: i32, %arg1: i32) -> (i32, i32) {
    %c0_i32 = arith.constant 0 : i32
    %c0_i32_0 = arith.constant 0 : i32
    %c0_i32_1 = arith.constant 0 : i32
    return %c0_i32, %c0_i32_0 : i32, i32
  }
  func.func @transform_7(%arg0: i32, %arg1: i32) -> (i32, i32, i32) {
    %c0_i32 = arith.constant 0 : i32
    %c0_i32_0 = arith.constant 0 : i32
    %c0_i32_1 = arith.constant 0 : i32
    return %arg0, %c0_i32, %c0_i32_0 : i32, i32, i32
  }
}

module attributes {stable_mosaic.version = 11 : i64} {
  func.func @_head_kernel(%arg0: i32, %arg1: memref<8x1024xf32, #tpu.memory_space<vmem>>, %arg2: memref<1024x128xbf16, #tpu.memory_space<vmem>>, %arg3: memref<1x128xf32, #tpu.memory_space<vmem>>, %arg4: memref<128x256xbf16, #tpu.memory_space<vmem>>, %arg5: memref<1x256xf32, #tpu.memory_space<vmem>>, %arg6: memref<256x128xf32, #tpu.memory_space<vmem>>, %arg7: memref<1x128xf32, #tpu.memory_space<vmem>>, %arg8: memref<8x128xf32, #tpu.memory_space<vmem>>, %arg9: memref<8x256xf32, #tpu.memory_space<vmem>>) attributes {dimension_semantics = [#tpu.dimension_semantics<arbitrary>], iteration_bounds = array<i64: 4>, scalar_prefetch = 0 : i64, scratch_operands = 1 : i64, tpu.core_type = #tpu.core_type<tc>, window_params = [{pipeline_mode = #tpu.pipeline_mode<synchronous>, transform_indices = @transform_0, window_bounds = array<i64: 8, 1024>}, {transform_indices = @transform_1, window_bounds = array<i64: 1024, 128>}, {transform_indices = @transform_2, window_bounds = array<i64: 1, 128>}, {transform_indices = @transform_3, window_bounds = array<i64: 128, 256>}, {pipeline_mode = #tpu.pipeline_mode<synchronous>, transform_indices = @transform_4, window_bounds = array<i64: 1, 256>}, {pipeline_mode = #tpu.pipeline_mode<synchronous>, transform_indices = @transform_5, window_bounds = array<i64: 256, 128>}, {pipeline_mode = #tpu.pipeline_mode<synchronous>, transform_indices = @transform_6, window_bounds = array<i64: 1, 128>}, {pipeline_mode = #tpu.pipeline_mode<synchronous>, transform_indices = @transform_7, window_bounds = array<i64: 8, 128>}]} {
    %c0_i32 = arith.constant 0 : i32
    %0 = arith.cmpi eq, %arg0, %c0_i32 : i32
    %1 = arith.extui %0 : i1 to i32
    %c0_i32_0 = arith.constant 0 : i32
    %2 = arith.cmpi ne, %1, %c0_i32_0 : i32
    scf.if %2 {
      %cst_15 = arith.constant 0.000000e+00 : f32
      %21 = vector.broadcast %cst_15 : f32 to vector<8x256xf32>
      %c0_16 = arith.constant 0 : index
      %c0_17 = arith.constant 0 : index
      %22 = vector.load %arg9[%c0_16, %c0_17] : memref<8x256xf32, #tpu.memory_space<vmem>>, vector<8x256xf32>
      tpu.vector_store %arg9[%c0_16, %c0_17], %21 {strides = array<i32>} : memref<8x256xf32, #tpu.memory_space<vmem>>, vector<8x256xf32>,
    } else {
    }
    %c0 = arith.constant 0 : index
    %c0_1 = arith.constant 0 : index
    %3 = vector.load %arg1[%c0, %c0_1] : memref<8x1024xf32, #tpu.memory_space<vmem>>, vector<8x1024xf32>
    %c0_2 = arith.constant 0 : index
    %c0_3 = arith.constant 0 : index
    %4 = vector.load %arg2[%c0_2, %c0_3] : memref<1024x128xbf16, #tpu.memory_space<vmem>>, vector<1024x128xbf16>
    %5 = arith.truncf %3 : vector<8x1024xf32> to vector<8x1024xbf16>
    %cst = arith.constant dense<0.000000e+00> : vector<8x128xf32>
    %6 = tpu.matmul %5, %4, %cst {dimension_numbers = #tpu.dot_dimension_numbers<[1], [0], [0], [1], [0, 0, 1, 1], [], []>} : vector<8x1024xbf16>, vector<1024x128xbf16>, vector<8x128xf32> -> vector<8x128xf32>
    %c0_4 = arith.constant 0 : index
    %c0_5 = arith.constant 0 : index
    %7 = vector.load %arg3[%c0_4, %c0_5] : memref<1x128xf32, #tpu.memory_space<vmem>>, vector<1x128xf32>
    %8 = vector.broadcast %7 : vector<1x128xf32> to vector<8x128xf32>
    %9 = arith.addf %6, %8 : vector<8x128xf32>
    %cst_6 = arith.constant 0.000000e+00 : f32
    %10 = vector.broadcast %cst_6 : f32 to vector<8x128xf32>
    %11 = arith.maximumf %9, %10 : vector<8x128xf32>
    %c0_7 = arith.constant 0 : index
    %c0_8 = arith.constant 0 : index
    %12 = vector.load %arg4[%c0_7, %c0_8] : memref<128x256xbf16, #tpu.memory_space<vmem>>, vector<128x256xbf16>
    %13 = arith.truncf %11 : vector<8x128xf32> to vector<8x128xbf16>
    %c0_9 = arith.constant 0 : index
    %c0_10 = arith.constant 0 : index
    %14 = vector.load %arg9[%c0_9, %c0_10] : memref<8x256xf32, #tpu.memory_space<vmem>>, vector<8x256xf32>
    %cst_11 = arith.constant dense<0.000000e+00> : vector<8x256xf32>
    %15 = tpu.matmul %13, %12, %cst_11 {dimension_numbers = #tpu.dot_dimension_numbers<[1], [0], [0], [1], [0, 0, 1, 1], [], []>} : vector<8x128xbf16>, vector<128x256xbf16>, vector<8x256xf32> -> vector<8x256xf32>
    %16 = arith.addf %14, %15 : vector<8x256xf32>
    %c0_12 = arith.constant 0 : index
    %c0_13 = arith.constant 0 : index
    %17 = vector.load %arg9[%c0_12, %c0_13] : memref<8x256xf32, #tpu.memory_space<vmem>>, vector<8x256xf32>
    tpu.vector_store %arg9[%c0_12, %c0_13], %16 {strides = array<i32>} : memref<8x256xf32, #tpu.memory_space<vmem>>, vector<8x256xf32>,
    %c3_i32 = arith.constant 3 : i32
    %18 = arith.cmpi eq, %arg0, %c3_i32 : i32
    %19 = arith.extui %18 : i1 to i32
    %c0_i32_14 = arith.constant 0 : i32
    %20 = arith.cmpi ne, %19, %c0_i32_14 : i32
    scf.if %20 {
      %c0_15 = arith.constant 0 : index
      %c0_16 = arith.constant 0 : index
      %21 = vector.load %arg9[%c0_15, %c0_16] : memref<8x256xf32, #tpu.memory_space<vmem>>, vector<8x256xf32>
      %c0_17 = arith.constant 0 : index
      %c0_18 = arith.constant 0 : index
      %22 = vector.load %arg5[%c0_17, %c0_18] : memref<1x256xf32, #tpu.memory_space<vmem>>, vector<1x256xf32>
      %23 = vector.broadcast %22 : vector<1x256xf32> to vector<8x256xf32>
      %24 = arith.addf %21, %23 : vector<8x256xf32>
      %cst_19 = arith.constant 0.000000e+00 : f32
      %25 = vector.broadcast %cst_19 : f32 to vector<8x256xf32>
      %26 = arith.maximumf %24, %25 : vector<8x256xf32>
      %c0_20 = arith.constant 0 : index
      %c0_21 = arith.constant 0 : index
      %27 = vector.load %arg6[%c0_20, %c0_21] : memref<256x128xf32, #tpu.memory_space<vmem>>, vector<256x128xf32>
      %cst_22 = arith.constant dense<0.000000e+00> : vector<8x128xf32>
      %28 = tpu.matmul %26, %27, %cst_22 {dimension_numbers = #tpu.dot_dimension_numbers<[1], [0], [0], [1], [0, 0, 1, 1], [], []>} : vector<8x256xf32>, vector<256x128xf32>, vector<8x128xf32> -> vector<8x128xf32>
      %c0_23 = arith.constant 0 : index
      %c0_24 = arith.constant 0 : index
      %29 = vector.load %arg7[%c0_23, %c0_24] : memref<1x128xf32, #tpu.memory_space<vmem>>, vector<1x128xf32>
      %30 = vector.broadcast %29 : vector<1x128xf32> to vector<8x128xf32>
      %31 = arith.addf %28, %30 : vector<8x128xf32>
      %c0_25 = arith.constant 0 : index
      %c0_26 = arith.constant 0 : index
      %32 = vector.load %arg8[%c0_25, %c0_26] : memref<8x128xf32, #tpu.memory_space<vmem>>, vector<8x128xf32>
      tpu.vector_store %arg8[%c0_25, %c0_26], %31 {strides = array<i32>} : memref<8x128xf32, #tpu.memory_space<vmem>>, vector<8x128xf32>,
    } else {
    }
    return
  }
  func.func @transform_0(%arg0: i32) -> (i32, i32) {
    %c0_i32 = arith.constant 0 : i32
    %c0_i32_0 = arith.constant 0 : i32
    %c0_i32_1 = arith.constant 0 : i32
    return %c0_i32, %c0_i32_0 : i32, i32
  }
  func.func @transform_1(%arg0: i32) -> (i32, i32) {
    %c0_i32 = arith.constant 0 : i32
    %c0_i32_0 = arith.constant 0 : i32
    return %c0_i32, %arg0 : i32, i32
  }
  func.func @transform_2(%arg0: i32) -> (i32, i32) {
    %c0_i32 = arith.constant 0 : i32
    %c0_i32_0 = arith.constant 0 : i32
    return %c0_i32, %arg0 : i32, i32
  }
  func.func @transform_3(%arg0: i32) -> (i32, i32) {
    %c0_i32 = arith.constant 0 : i32
    %c0_i32_0 = arith.constant 0 : i32
    return %arg0, %c0_i32 : i32, i32
  }
  func.func @transform_4(%arg0: i32) -> (i32, i32) {
    %c0_i32 = arith.constant 0 : i32
    %c0_i32_0 = arith.constant 0 : i32
    %c0_i32_1 = arith.constant 0 : i32
    return %c0_i32, %c0_i32_0 : i32, i32
  }
  func.func @transform_5(%arg0: i32) -> (i32, i32) {
    %c0_i32 = arith.constant 0 : i32
    %c0_i32_0 = arith.constant 0 : i32
    %c0_i32_1 = arith.constant 0 : i32
    return %c0_i32, %c0_i32_0 : i32, i32
  }
  func.func @transform_6(%arg0: i32) -> (i32, i32) {
    %c0_i32 = arith.constant 0 : i32
    %c0_i32_0 = arith.constant 0 : i32
    %c0_i32_1 = arith.constant 0 : i32
    return %c0_i32, %c0_i32_0 : i32, i32
  }
  func.func @transform_7(%arg0: i32) -> (i32, i32) {
    %c0_i32 = arith.constant 0 : i32
    %c0_i32_0 = arith.constant 0 : i32
    %c0_i32_1 = arith.constant 0 : i32
    return %c0_i32, %c0_i32_0 : i32, i32
  }
}

module attributes {stable_mosaic.version = 11 : i64} {
  func.func @_point_mlp_max_kernel(%arg0: i32, %arg1: i32, %arg2: memref<1x32x8xf32, #tpu.memory_space<vmem>>, %arg3: memref<1x8x64xf32, #tpu.memory_space<vmem>>, %arg4: memref<1x64xf32, #tpu.memory_space<vmem>>, %arg5: memref<64x64xf32, #tpu.memory_space<vmem>>, %arg6: memref<1x64xf32, #tpu.memory_space<vmem>>, %arg7: memref<64x128xf32, #tpu.memory_space<vmem>>, %arg8: memref<1x128xf32, #tpu.memory_space<vmem>>, %arg9: memref<128x1024xbf16, #tpu.memory_space<vmem>>, %arg10: memref<1x1024xf32, #tpu.memory_space<vmem>>, %arg11: memref<1x1x1024xf32, #tpu.memory_space<vmem>>, %arg12: memref<8x1024xf32, #tpu.memory_space<vmem>>) attributes {dimension_semantics = [#tpu.dimension_semantics<parallel>, #tpu.dimension_semantics<arbitrary>], iteration_bounds = array<i64: 2, 1>, scalar_prefetch = 0 : i64, scratch_operands = 1 : i64, tpu.core_type = #tpu.core_type<tc>, window_params = [{transform_indices = @transform_0, window_bounds = array<i64: 1, 32, 8>}, {transform_indices = @transform_1, window_bounds = array<i64: 1, 8, 64>}, {pipeline_mode = #tpu.pipeline_mode<synchronous>, transform_indices = @transform_2, window_bounds = array<i64: 1, 64>}, {pipeline_mode = #tpu.pipeline_mode<synchronous>, transform_indices = @transform_3, window_bounds = array<i64: 64, 64>}, {pipeline_mode = #tpu.pipeline_mode<synchronous>, transform_indices = @transform_4, window_bounds = array<i64: 1, 64>}, {pipeline_mode = #tpu.pipeline_mode<synchronous>, transform_indices = @transform_5, window_bounds = array<i64: 64, 128>}, {pipeline_mode = #tpu.pipeline_mode<synchronous>, transform_indices = @transform_6, window_bounds = array<i64: 1, 128>}, {pipeline_mode = #tpu.pipeline_mode<synchronous>, transform_indices = @transform_7, window_bounds = array<i64: 128, 1024>}, {pipeline_mode = #tpu.pipeline_mode<synchronous>, transform_indices = @transform_8, window_bounds = array<i64: 1, 1024>}, {transform_indices = @transform_9, window_bounds = array<i64: 1, 1, 1024>}]} {
    %c0_i32 = arith.constant 0 : i32
    %0 = arith.cmpi eq, %arg1, %c0_i32 : i32
    %1 = arith.extui %0 : i1 to i32
    %c0_i32_0 = arith.constant 0 : i32
    %2 = arith.cmpi ne, %1, %c0_i32_0 : i32
    scf.if %2 {
      %cst_34 = arith.constant 0xFF800000 : f32
      %43 = vector.broadcast %cst_34 : f32 to vector<8x1024xf32>
      %c0_35 = arith.constant 0 : index
      %c0_36 = arith.constant 0 : index
      %44 = vector.load %arg12[%c0_35, %c0_36] : memref<8x1024xf32, #tpu.memory_space<vmem>>, vector<8x1024xf32>
      tpu.vector_store %arg12[%c0_35, %c0_36], %43 {strides = array<i32>} : memref<8x1024xf32, #tpu.memory_space<vmem>>, vector<8x1024xf32>,
    } else {
    }
    %c0 = arith.constant 0 : index
    %c0_1 = arith.constant 0 : index
    %c0_2 = arith.constant 0 : index
    %3 = vector.load %arg2[%c0, %c0_1, %c0_2] : memref<1x32x8xf32, #tpu.memory_space<vmem>>, vector<1x32x8xf32>
    %4 = vector.shape_cast %3 : vector<1x32x8xf32> to vector<32x8xf32>
    %c0_3 = arith.constant 0 : index
    %c0_4 = arith.constant 0 : index
    %c0_5 = arith.constant 0 : index
    %5 = vector.load %arg3[%c0_3, %c0_4, %c0_5] : memref<1x8x64xf32, #tpu.memory_space<vmem>>, vector<1x8x64xf32>
    %6 = vector.shape_cast %5 : vector<1x8x64xf32> to vector<8x64xf32>
    %cst = arith.constant dense<0.000000e+00> : vector<32x64xf32>
    %7 = tpu.matmul %4, %6, %cst {dimension_numbers = #tpu.dot_dimension_numbers<[1], [0], [0], [1], [0, 0, 1, 1], [], []>} : vector<32x8xf32>, vector<8x64xf32>, vector<32x64xf32> -> vector<32x64xf32>
    %c0_6 = arith.constant 0 : index
    %c0_7 = arith.constant 0 : index
    %8 = vector.load %arg4[%c0_6, %c0_7] : memref<1x64xf32, #tpu.memory_space<vmem>>, vector<1x64xf32>
    %9 = vector.broadcast %8 : vector<1x64xf32> to vector<32x64xf32>
    %10 = arith.addf %7, %9 : vector<32x64xf32>
    %cst_8 = arith.constant 0.000000e+00 : f32
    %11 = vector.broadcast %cst_8 : f32 to vector<32x64xf32>
    %12 = arith.maximumf %10, %11 : vector<32x64xf32>
    %c0_9 = arith.constant 0 : index
    %c0_10 = arith.constant 0 : index
    %13 = vector.load %arg5[%c0_9, %c0_10] : memref<64x64xf32, #tpu.memory_space<vmem>>, vector<64x64xf32>
    %cst_11 = arith.constant dense<0.000000e+00> : vector<32x64xf32>
    %14 = tpu.matmul %12, %13, %cst_11 {dimension_numbers = #tpu.dot_dimension_numbers<[1], [0], [0], [1], [0, 0, 1, 1], [], []>} : vector<32x64xf32>, vector<64x64xf32>, vector<32x64xf32> -> vector<32x64xf32>
    %c0_12 = arith.constant 0 : index
    %c0_13 = arith.constant 0 : index
    %15 = vector.load %arg6[%c0_12, %c0_13] : memref<1x64xf32, #tpu.memory_space<vmem>>, vector<1x64xf32>
    %16 = vector.broadcast %15 : vector<1x64xf32> to vector<32x64xf32>
    %17 = arith.addf %14, %16 : vector<32x64xf32>
    %cst_14 = arith.constant 0.000000e+00 : f32
    %18 = vector.broadcast %cst_14 : f32 to vector<32x64xf32>
    %19 = arith.maximumf %17, %18 : vector<32x64xf32>
    %c0_15 = arith.constant 0 : index
    %c0_16 = arith.constant 0 : index
    %20 = vector.load %arg7[%c0_15, %c0_16] : memref<64x128xf32, #tpu.memory_space<vmem>>, vector<64x128xf32>
    %cst_17 = arith.constant dense<0.000000e+00> : vector<32x128xf32>
    %21 = tpu.matmul %19, %20, %cst_17 {dimension_numbers = #tpu.dot_dimension_numbers<[1], [0], [0], [1], [0, 0, 1, 1], [], []>} : vector<32x64xf32>, vector<64x128xf32>, vector<32x128xf32> -> vector<32x128xf32>
    %c0_18 = arith.constant 0 : index
    %c0_19 = arith.constant 0 : index
    %22 = vector.load %arg8[%c0_18, %c0_19] : memref<1x128xf32, #tpu.memory_space<vmem>>, vector<1x128xf32>
    %23 = vector.broadcast %22 : vector<1x128xf32> to vector<32x128xf32>
    %24 = arith.addf %21, %23 : vector<32x128xf32>
    %cst_20 = arith.constant 0.000000e+00 : f32
    %25 = vector.broadcast %cst_20 : f32 to vector<32x128xf32>
    %26 = arith.maximumf %24, %25 : vector<32x128xf32>
    %c0_21 = arith.constant 0 : index
    %c0_22 = arith.constant 0 : index
    %27 = vector.load %arg9[%c0_21, %c0_22] : memref<128x1024xbf16, #tpu.memory_space<vmem>>, vector<128x1024xbf16>
    %28 = arith.truncf %26 : vector<32x128xf32> to vector<32x128xbf16>
    %cst_23 = arith.constant dense<0.000000e+00> : vector<32x1024xf32>
    %29 = tpu.matmul %28, %27, %cst_23 {dimension_numbers = #tpu.dot_dimension_numbers<[1], [0], [0], [1], [0, 0, 1, 1], [], []>} : vector<32x128xbf16>, vector<128x1024xbf16>, vector<32x1024xf32> -> vector<32x1024xf32>
    %c0_24 = arith.constant 0 : index
    %c0_25 = arith.constant 0 : index
    %30 = vector.load %arg10[%c0_24, %c0_25] : memref<1x1024xf32, #tpu.memory_space<vmem>>, vector<1x1024xf32>
    %31 = vector.broadcast %30 : vector<1x1024xf32> to vector<32x1024xf32>
    %32 = arith.addf %29, %31 : vector<32x1024xf32>
    %cst_26 = arith.constant 0.000000e+00 : f32
    %33 = vector.broadcast %cst_26 : f32 to vector<32x1024xf32>
    %34 = arith.maximumf %32, %33 : vector<32x1024xf32>
    %35 = vector.shape_cast %34 : vector<32x1024xf32> to vector<4x8x1024xf32>
    %cst_27 = arith.constant dense<0xFF800000> : vector<8x1024xf32>
    %36 = vector.multi_reduction <maximumf>, %35, %cst_27 [0] : vector<4x8x1024xf32> to vector<8x1024xf32>
    %c0_28 = arith.constant 0 : index
    %c0_29 = arith.constant 0 : index
    %37 = vector.load %arg12[%c0_28, %c0_29] : memref<8x1024xf32, #tpu.memory_space<vmem>>, vector<8x1024xf32>
    %38 = arith.maximumf %37, %36 : vector<8x1024xf32>
    %c0_30 = arith.constant 0 : index
    %c0_31 = arith.constant 0 : index
    %39 = vector.load %arg12[%c0_30, %c0_31] : memref<8x1024xf32, #tpu.memory_space<vmem>>, vector<8x1024xf32>
    tpu.vector_store %arg12[%c0_30, %c0_31], %38 {strides = array<i32>} : memref<8x1024xf32, #tpu.memory_space<vmem>>, vector<8x1024xf32>,
    %c0_i32_32 = arith.constant 0 : i32
    %40 = arith.cmpi eq, %arg1, %c0_i32_32 : i32
    %41 = arith.extui %40 : i1 to i32
    %c0_i32_33 = arith.constant 0 : i32
    %42 = arith.cmpi ne, %41, %c0_i32_33 : i32
    scf.if %42 {
      %c0_34 = arith.constant 0 : index
      %c0_35 = arith.constant 0 : index
      %43 = vector.load %arg12[%c0_34, %c0_35] : memref<8x1024xf32, #tpu.memory_space<vmem>>, vector<8x1024xf32>
      %cst_36 = arith.constant dense<0xFF800000> : vector<1024xf32>
      %44 = vector.multi_reduction <maximumf>, %43, %cst_36 [0] : vector<8x1024xf32> to vector<1024xf32>
      %45 = vector.shape_cast %44 : vector<1024xf32> to vector<1x1024xf32>
      %c0_37 = arith.constant 0 : index
      %c0_38 = arith.constant 0 : index
      %c0_39 = arith.constant 0 : index
      %46 = vector.load %arg11[%c0_37, %c0_38, %c0_39] : memref<1x1x1024xf32, #tpu.memory_space<vmem>>, vector<1x1x1024xf32>
      %47 = vector.shape_cast %46 : vector<1x1x1024xf32> to vector<1x1024xf32>
      %48 = vector.shape_cast %45 : vector<1x1024xf32> to vector<1x1x1024xf32>
      tpu.vector_store %arg11[%c0_37, %c0_38, %c0_39], %48 {strides = array<i32>} : memref<1x1x1024xf32, #tpu.memory_space<vmem>>, vector<1x1x1024xf32>,
    } else {
    }
    return
  }
  func.func @transform_0(%arg0: i32, %arg1: i32) -> (i32, i32, i32) {
    %c0_i32 = arith.constant 0 : i32
    %c0_i32_0 = arith.constant 0 : i32
    return %arg0, %arg1, %c0_i32 : i32, i32, i32
  }
  func.func @transform_1(%arg0: i32, %arg1: i32) -> (i32, i32, i32) {
    %c0_i32 = arith.constant 0 : i32
    %c0_i32_0 = arith.constant 0 : i32
    %c0_i32_1 = arith.constant 0 : i32
    return %arg0, %c0_i32, %c0_i32_0 : i32, i32, i32
  }
  func.func @transform_2(%arg0: i32, %arg1: i32) -> (i32, i32) {
    %c0_i32 = arith.constant 0 : i32
    %c0_i32_0 = arith.constant 0 : i32
    %c0_i32_1 = arith.constant 0 : i32
    return %c0_i32, %c0_i32_0 : i32, i32
  }
  func.func @transform_3(%arg0: i32, %arg1: i32) -> (i32, i32) {
    %c0_i32 = arith.constant 0 : i32
    %c0_i32_0 = arith.constant 0 : i32
    %c0_i32_1 = arith.constant 0 : i32
    return %c0_i32, %c0_i32_0 : i32, i32
  }
  func.func @transform_4(%arg0: i32, %arg1: i32) -> (i32, i32) {
    %c0_i32 = arith.constant 0 : i32
    %c0_i32_0 = arith.constant 0 : i32
    %c0_i32_1 = arith.constant 0 : i32
    return %c0_i32, %c0_i32_0 : i32, i32
  }
  func.func @transform_5(%arg0: i32, %arg1: i32) -> (i32, i32) {
    %c0_i32 = arith.constant 0 : i32
    %c0_i32_0 = arith.constant 0 : i32
    %c0_i32_1 = arith.constant 0 : i32
    return %c0_i32, %c0_i32_0 : i32, i32
  }
  func.func @transform_6(%arg0: i32, %arg1: i32) -> (i32, i32) {
    %c0_i32 = arith.constant 0 : i32
    %c0_i32_0 = arith.constant 0 : i32
    %c0_i32_1 = arith.constant 0 : i32
    return %c0_i32, %c0_i32_0 : i32, i32
  }
  func.func @transform_7(%arg0: i32, %arg1: i32) -> (i32, i32) {
    %c0_i32 = arith.constant 0 : i32
    %c0_i32_0 = arith.constant 0 : i32
    %c0_i32_1 = arith.constant 0 : i32
    return %c0_i32, %c0_i32_0 : i32, i32
  }
  func.func @transform_8(%arg0: i32, %arg1: i32) -> (i32, i32) {
    %c0_i32 = arith.constant 0 : i32
    %c0_i32_0 = arith.constant 0 : i32
    %c0_i32_1 = arith.constant 0 : i32
    return %c0_i32, %c0_i32_0 : i32, i32
  }
  func.func @transform_9(%arg0: i32, %arg1: i32) -> (i32, i32, i32) {
    %c0_i32 = arith.constant 0 : i32
    %c0_i32_0 = arith.constant 0 : i32
    %c0_i32_1 = arith.constant 0 : i32
    return %arg0, %c0_i32, %c0_i32_0 : i32, i32, i32
  }
}

module attributes {stable_mosaic.version = 11 : i64} {
  func.func @_head_kernel(%arg0: i32, %arg1: memref<8x1024xf32, #tpu.memory_space<vmem>>, %arg2: memref<1024x128xbf16, #tpu.memory_space<vmem>>, %arg3: memref<1x128xf32, #tpu.memory_space<vmem>>, %arg4: memref<128x256xbf16, #tpu.memory_space<vmem>>, %arg5: memref<1x256xf32, #tpu.memory_space<vmem>>, %arg6: memref<256x4096xf32, #tpu.memory_space<vmem>>, %arg7: memref<1x4096xf32, #tpu.memory_space<vmem>>, %arg8: memref<8x4096xf32, #tpu.memory_space<vmem>>, %arg9: memref<8x256xf32, #tpu.memory_space<vmem>>) attributes {dimension_semantics = [#tpu.dimension_semantics<arbitrary>], iteration_bounds = array<i64: 4>, scalar_prefetch = 0 : i64, scratch_operands = 1 : i64, tpu.core_type = #tpu.core_type<tc>, window_params = [{pipeline_mode = #tpu.pipeline_mode<synchronous>, transform_indices = @transform_0, window_bounds = array<i64: 8, 1024>}, {transform_indices = @transform_1, window_bounds = array<i64: 1024, 128>}, {transform_indices = @transform_2, window_bounds = array<i64: 1, 128>}, {transform_indices = @transform_3, window_bounds = array<i64: 128, 256>}, {pipeline_mode = #tpu.pipeline_mode<synchronous>, transform_indices = @transform_4, window_bounds = array<i64: 1, 256>}, {pipeline_mode = #tpu.pipeline_mode<synchronous>, transform_indices = @transform_5, window_bounds = array<i64: 256, 4096>}, {pipeline_mode = #tpu.pipeline_mode<synchronous>, transform_indices = @transform_6, window_bounds = array<i64: 1, 4096>}, {pipeline_mode = #tpu.pipeline_mode<synchronous>, transform_indices = @transform_7, window_bounds = array<i64: 8, 4096>}]} {
    %c0_i32 = arith.constant 0 : i32
    %0 = arith.cmpi eq, %arg0, %c0_i32 : i32
    %1 = arith.extui %0 : i1 to i32
    %c0_i32_0 = arith.constant 0 : i32
    %2 = arith.cmpi ne, %1, %c0_i32_0 : i32
    scf.if %2 {
      %cst_15 = arith.constant 0.000000e+00 : f32
      %21 = vector.broadcast %cst_15 : f32 to vector<8x256xf32>
      %c0_16 = arith.constant 0 : index
      %c0_17 = arith.constant 0 : index
      %22 = vector.load %arg9[%c0_16, %c0_17] : memref<8x256xf32, #tpu.memory_space<vmem>>, vector<8x256xf32>
      tpu.vector_store %arg9[%c0_16, %c0_17], %21 {strides = array<i32>} : memref<8x256xf32, #tpu.memory_space<vmem>>, vector<8x256xf32>,
    } else {
    }
    %c0 = arith.constant 0 : index
    %c0_1 = arith.constant 0 : index
    %3 = vector.load %arg1[%c0, %c0_1] : memref<8x1024xf32, #tpu.memory_space<vmem>>, vector<8x1024xf32>
    %c0_2 = arith.constant 0 : index
    %c0_3 = arith.constant 0 : index
    %4 = vector.load %arg2[%c0_2, %c0_3] : memref<1024x128xbf16, #tpu.memory_space<vmem>>, vector<1024x128xbf16>
    %5 = arith.truncf %3 : vector<8x1024xf32> to vector<8x1024xbf16>
    %cst = arith.constant dense<0.000000e+00> : vector<8x128xf32>
    %6 = tpu.matmul %5, %4, %cst {dimension_numbers = #tpu.dot_dimension_numbers<[1], [0], [0], [1], [0, 0, 1, 1], [], []>} : vector<8x1024xbf16>, vector<1024x128xbf16>, vector<8x128xf32> -> vector<8x128xf32>
    %c0_4 = arith.constant 0 : index
    %c0_5 = arith.constant 0 : index
    %7 = vector.load %arg3[%c0_4, %c0_5] : memref<1x128xf32, #tpu.memory_space<vmem>>, vector<1x128xf32>
    %8 = vector.broadcast %7 : vector<1x128xf32> to vector<8x128xf32>
    %9 = arith.addf %6, %8 : vector<8x128xf32>
    %cst_6 = arith.constant 0.000000e+00 : f32
    %10 = vector.broadcast %cst_6 : f32 to vector<8x128xf32>
    %11 = arith.maximumf %9, %10 : vector<8x128xf32>
    %c0_7 = arith.constant 0 : index
    %c0_8 = arith.constant 0 : index
    %12 = vector.load %arg4[%c0_7, %c0_8] : memref<128x256xbf16, #tpu.memory_space<vmem>>, vector<128x256xbf16>
    %13 = arith.truncf %11 : vector<8x128xf32> to vector<8x128xbf16>
    %c0_9 = arith.constant 0 : index
    %c0_10 = arith.constant 0 : index
    %14 = vector.load %arg9[%c0_9, %c0_10] : memref<8x256xf32, #tpu.memory_space<vmem>>, vector<8x256xf32>
    %cst_11 = arith.constant dense<0.000000e+00> : vector<8x256xf32>
    %15 = tpu.matmul %13, %12, %cst_11 {dimension_numbers = #tpu.dot_dimension_numbers<[1], [0], [0], [1], [0, 0, 1, 1], [], []>} : vector<8x128xbf16>, vector<128x256xbf16>, vector<8x256xf32> -> vector<8x256xf32>
    %16 = arith.addf %14, %15 : vector<8x256xf32>
    %c0_12 = arith.constant 0 : index
    %c0_13 = arith.constant 0 : index
    %17 = vector.load %arg9[%c0_12, %c0_13] : memref<8x256xf32, #tpu.memory_space<vmem>>, vector<8x256xf32>
    tpu.vector_store %arg9[%c0_12, %c0_13], %16 {strides = array<i32>} : memref<8x256xf32, #tpu.memory_space<vmem>>, vector<8x256xf32>,
    %c3_i32 = arith.constant 3 : i32
    %18 = arith.cmpi eq, %arg0, %c3_i32 : i32
    %19 = arith.extui %18 : i1 to i32
    %c0_i32_14 = arith.constant 0 : i32
    %20 = arith.cmpi ne, %19, %c0_i32_14 : i32
    scf.if %20 {
      %c0_15 = arith.constant 0 : index
      %c0_16 = arith.constant 0 : index
      %21 = vector.load %arg9[%c0_15, %c0_16] : memref<8x256xf32, #tpu.memory_space<vmem>>, vector<8x256xf32>
      %c0_17 = arith.constant 0 : index
      %c0_18 = arith.constant 0 : index
      %22 = vector.load %arg5[%c0_17, %c0_18] : memref<1x256xf32, #tpu.memory_space<vmem>>, vector<1x256xf32>
      %23 = vector.broadcast %22 : vector<1x256xf32> to vector<8x256xf32>
      %24 = arith.addf %21, %23 : vector<8x256xf32>
      %cst_19 = arith.constant 0.000000e+00 : f32
      %25 = vector.broadcast %cst_19 : f32 to vector<8x256xf32>
      %26 = arith.maximumf %24, %25 : vector<8x256xf32>
      %c0_20 = arith.constant 0 : index
      %c0_21 = arith.constant 0 : index
      %27 = vector.load %arg6[%c0_20, %c0_21] : memref<256x4096xf32, #tpu.memory_space<vmem>>, vector<256x4096xf32>
      %cst_22 = arith.constant dense<0.000000e+00> : vector<8x4096xf32>
      %28 = tpu.matmul %26, %27, %cst_22 {dimension_numbers = #tpu.dot_dimension_numbers<[1], [0], [0], [1], [0, 0, 1, 1], [], []>} : vector<8x256xf32>, vector<256x4096xf32>, vector<8x4096xf32> -> vector<8x4096xf32>
      %c0_23 = arith.constant 0 : index
      %c0_24 = arith.constant 0 : index
      %29 = vector.load %arg7[%c0_23, %c0_24] : memref<1x4096xf32, #tpu.memory_space<vmem>>, vector<1x4096xf32>
      %30 = vector.broadcast %29 : vector<1x4096xf32> to vector<8x4096xf32>
      %31 = arith.addf %28, %30 : vector<8x4096xf32>
      %c0_25 = arith.constant 0 : index
      %c0_26 = arith.constant 0 : index
      %32 = vector.load %arg8[%c0_25, %c0_26] : memref<8x4096xf32, #tpu.memory_space<vmem>>, vector<8x4096xf32>
      tpu.vector_store %arg8[%c0_25, %c0_26], %31 {strides = array<i32>} : memref<8x4096xf32, #tpu.memory_space<vmem>>, vector<8x4096xf32>,
    } else {
    }
    return
  }
  func.func @transform_0(%arg0: i32) -> (i32, i32) {
    %c0_i32 = arith.constant 0 : i32
    %c0_i32_0 = arith.constant 0 : i32
    %c0_i32_1 = arith.constant 0 : i32
    return %c0_i32, %c0_i32_0 : i32, i32
  }
  func.func @transform_1(%arg0: i32) -> (i32, i32) {
    %c0_i32 = arith.constant 0 : i32
    %c0_i32_0 = arith.constant 0 : i32
    return %c0_i32, %arg0 : i32, i32
  }
  func.func @transform_2(%arg0: i32) -> (i32, i32) {
    %c0_i32 = arith.constant 0 : i32
    %c0_i32_0 = arith.constant 0 : i32
    return %c0_i32, %arg0 : i32, i32
  }
  func.func @transform_3(%arg0: i32) -> (i32, i32) {
    %c0_i32 = arith.constant 0 : i32
    %c0_i32_0 = arith.constant 0 : i32
    return %arg0, %c0_i32 : i32, i32
  }
  func.func @transform_4(%arg0: i32) -> (i32, i32) {
    %c0_i32 = arith.constant 0 : i32
    %c0_i32_0 = arith.constant 0 : i32
    %c0_i32_1 = arith.constant 0 : i32
    return %c0_i32, %c0_i32_0 : i32, i32
  }
  func.func @transform_5(%arg0: i32) -> (i32, i32) {
    %c0_i32 = arith.constant 0 : i32
    %c0_i32_0 = arith.constant 0 : i32
    %c0_i32_1 = arith.constant 0 : i32
    return %c0_i32, %c0_i32_0 : i32, i32
  }
  func.func @transform_6(%arg0: i32) -> (i32, i32) {
    %c0_i32 = arith.constant 0 : i32
    %c0_i32_0 = arith.constant 0 : i32
    %c0_i32_1 = arith.constant 0 : i32
    return %c0_i32, %c0_i32_0 : i32, i32
  }
  func.func @transform_7(%arg0: i32) -> (i32, i32) {
    %c0_i32 = arith.constant 0 : i32
    %c0_i32_0 = arith.constant 0 : i32
    %c0_i32_1 = arith.constant 0 : i32
    return %c0_i32, %c0_i32_0 : i32, i32
  }
}

module attributes {stable_mosaic.version = 11 : i64} {
  func.func @_point_mlp_max_kernel(%arg0: i32, %arg1: i32, %arg2: memref<1x32x8xf32, #tpu.memory_space<vmem>>, %arg3: memref<1x8x64xf32, #tpu.memory_space<vmem>>, %arg4: memref<1x64xf32, #tpu.memory_space<vmem>>, %arg5: memref<1x64x128xf32, #tpu.memory_space<vmem>>, %arg6: memref<1x128xf32, #tpu.memory_space<vmem>>, %arg7: memref<128x1024xbf16, #tpu.memory_space<vmem>>, %arg8: memref<1x1024xf32, #tpu.memory_space<vmem>>, %arg9: memref<1x1x1024xf32, #tpu.memory_space<vmem>>, %arg10: memref<8x1024xf32, #tpu.memory_space<vmem>>) attributes {dimension_semantics = [#tpu.dimension_semantics<parallel>, #tpu.dimension_semantics<arbitrary>], iteration_bounds = array<i64: 2, 1>, scalar_prefetch = 0 : i64, scratch_operands = 1 : i64, tpu.core_type = #tpu.core_type<tc>, window_params = [{transform_indices = @transform_0, window_bounds = array<i64: 1, 32, 8>}, {transform_indices = @transform_1, window_bounds = array<i64: 1, 8, 64>}, {pipeline_mode = #tpu.pipeline_mode<synchronous>, transform_indices = @transform_2, window_bounds = array<i64: 1, 64>}, {transform_indices = @transform_3, window_bounds = array<i64: 1, 64, 128>}, {pipeline_mode = #tpu.pipeline_mode<synchronous>, transform_indices = @transform_4, window_bounds = array<i64: 1, 128>}, {pipeline_mode = #tpu.pipeline_mode<synchronous>, transform_indices = @transform_5, window_bounds = array<i64: 128, 1024>}, {pipeline_mode = #tpu.pipeline_mode<synchronous>, transform_indices = @transform_6, window_bounds = array<i64: 1, 1024>}, {transform_indices = @transform_7, window_bounds = array<i64: 1, 1, 1024>}]} {
    %c0_i32 = arith.constant 0 : i32
    %0 = arith.cmpi eq, %arg1, %c0_i32 : i32
    %1 = arith.extui %0 : i1 to i32
    %c0_i32_0 = arith.constant 0 : i32
    %2 = arith.cmpi ne, %1, %c0_i32_0 : i32
    scf.if %2 {
      %cst_28 = arith.constant 0xFF800000 : f32
      %35 = vector.broadcast %cst_28 : f32 to vector<8x1024xf32>
      %c0_29 = arith.constant 0 : index
      %c0_30 = arith.constant 0 : index
      %36 = vector.load %arg10[%c0_29, %c0_30] : memref<8x1024xf32, #tpu.memory_space<vmem>>, vector<8x1024xf32>
      tpu.vector_store %arg10[%c0_29, %c0_30], %35 {strides = array<i32>} : memref<8x1024xf32, #tpu.memory_space<vmem>>, vector<8x1024xf32>,
    } else {
    }
    %c0 = arith.constant 0 : index
    %c0_1 = arith.constant 0 : index
    %c0_2 = arith.constant 0 : index
    %3 = vector.load %arg2[%c0, %c0_1, %c0_2] : memref<1x32x8xf32, #tpu.memory_space<vmem>>, vector<1x32x8xf32>
    %4 = vector.shape_cast %3 : vector<1x32x8xf32> to vector<32x8xf32>
    %c0_3 = arith.constant 0 : index
    %c0_4 = arith.constant 0 : index
    %c0_5 = arith.constant 0 : index
    %5 = vector.load %arg3[%c0_3, %c0_4, %c0_5] : memref<1x8x64xf32, #tpu.memory_space<vmem>>, vector<1x8x64xf32>
    %6 = vector.shape_cast %5 : vector<1x8x64xf32> to vector<8x64xf32>
    %cst = arith.constant dense<0.000000e+00> : vector<32x64xf32>
    %7 = tpu.matmul %4, %6, %cst {dimension_numbers = #tpu.dot_dimension_numbers<[1], [0], [0], [1], [0, 0, 1, 1], [], []>} : vector<32x8xf32>, vector<8x64xf32>, vector<32x64xf32> -> vector<32x64xf32>
    %c0_6 = arith.constant 0 : index
    %c0_7 = arith.constant 0 : index
    %8 = vector.load %arg4[%c0_6, %c0_7] : memref<1x64xf32, #tpu.memory_space<vmem>>, vector<1x64xf32>
    %9 = vector.broadcast %8 : vector<1x64xf32> to vector<32x64xf32>
    %10 = arith.addf %7, %9 : vector<32x64xf32>
    %cst_8 = arith.constant 0.000000e+00 : f32
    %11 = vector.broadcast %cst_8 : f32 to vector<32x64xf32>
    %12 = arith.maximumf %10, %11 : vector<32x64xf32>
    %c0_9 = arith.constant 0 : index
    %c0_10 = arith.constant 0 : index
    %c0_11 = arith.constant 0 : index
    %13 = vector.load %arg5[%c0_9, %c0_10, %c0_11] : memref<1x64x128xf32, #tpu.memory_space<vmem>>, vector<1x64x128xf32>
    %14 = vector.shape_cast %13 : vector<1x64x128xf32> to vector<64x128xf32>
    %cst_12 = arith.constant dense<0.000000e+00> : vector<32x128xf32>
    %15 = tpu.matmul %12, %14, %cst_12 {dimension_numbers = #tpu.dot_dimension_numbers<[1], [0], [0], [1], [0, 0, 1, 1], [], []>} : vector<32x64xf32>, vector<64x128xf32>, vector<32x128xf32> -> vector<32x128xf32>
    %c0_13 = arith.constant 0 : index
    %c0_14 = arith.constant 0 : index
    %16 = vector.load %arg6[%c0_13, %c0_14] : memref<1x128xf32, #tpu.memory_space<vmem>>, vector<1x128xf32>
    %17 = vector.broadcast %16 : vector<1x128xf32> to vector<32x128xf32>
    %18 = arith.addf %15, %17 : vector<32x128xf32>
    %cst_15 = arith.constant 0.000000e+00 : f32
    %19 = vector.broadcast %cst_15 : f32 to vector<32x128xf32>
    %20 = arith.maximumf %18, %19 : vector<32x128xf32>
    %c0_16 = arith.constant 0 : index
    %c0_17 = arith.constant 0 : index
    %21 = vector.load %arg7[%c0_16, %c0_17] : memref<128x1024xbf16, #tpu.memory_space<vmem>>, vector<128x1024xbf16>
    %22 = arith.truncf %20 : vector<32x128xf32> to vector<32x128xbf16>
    %cst_18 = arith.constant dense<0.000000e+00> : vector<32x1024xf32>
    %23 = tpu.matmul %22, %21, %cst_18 {dimension_numbers = #tpu.dot_dimension_numbers<[1], [0], [0], [1], [0, 0, 1, 1], [], []>} : vector<32x128xbf16>, vector<128x1024xbf16>, vector<32x1024xf32> -> vector<32x1024xf32>
    %c0_19 = arith.constant 0 : index
    %c0_20 = arith.constant 0 : index
    %24 = vector.load %arg8[%c0_19, %c0_20] : memref<1x1024xf32, #tpu.memory_space<vmem>>, vector<1x1024xf32>
    %25 = vector.broadcast %24 : vector<1x1024xf32> to vector<32x1024xf32>
    %26 = arith.addf %23, %25 : vector<32x1024xf32>
    %27 = vector.shape_cast %26 : vector<32x1024xf32> to vector<4x8x1024xf32>
    %cst_21 = arith.constant dense<0xFF800000> : vector<8x1024xf32>
    %28 = vector.multi_reduction <maximumf>, %27, %cst_21 [0] : vector<4x8x1024xf32> to vector<8x1024xf32>
    %c0_22 = arith.constant 0 : index
    %c0_23 = arith.constant 0 : index
    %29 = vector.load %arg10[%c0_22, %c0_23] : memref<8x1024xf32, #tpu.memory_space<vmem>>, vector<8x1024xf32>
    %30 = arith.maximumf %29, %28 : vector<8x1024xf32>
    %c0_24 = arith.constant 0 : index
    %c0_25 = arith.constant 0 : index
    %31 = vector.load %arg10[%c0_24, %c0_25] : memref<8x1024xf32, #tpu.memory_space<vmem>>, vector<8x1024xf32>
    tpu.vector_store %arg10[%c0_24, %c0_25], %30 {strides = array<i32>} : memref<8x1024xf32, #tpu.memory_space<vmem>>, vector<8x1024xf32>,
    %c0_i32_26 = arith.constant 0 : i32
    %32 = arith.cmpi eq, %arg1, %c0_i32_26 : i32
    %33 = arith.extui %32 : i1 to i32
    %c0_i32_27 = arith.constant 0 : i32
    %34 = arith.cmpi ne, %33, %c0_i32_27 : i32
    scf.if %34 {
      %c0_28 = arith.constant 0 : index
      %c0_29 = arith.constant 0 : index
      %35 = vector.load %arg10[%c0_28, %c0_29] : memref<8x1024xf32, #tpu.memory_space<vmem>>, vector<8x1024xf32>
      %cst_30 = arith.constant dense<0xFF800000> : vector<1024xf32>
      %36 = vector.multi_reduction <maximumf>, %35, %cst_30 [0] : vector<8x1024xf32> to vector<1024xf32>
      %37 = vector.shape_cast %36 : vector<1024xf32> to vector<1x1024xf32>
      %c0_31 = arith.constant 0 : index
      %c0_32 = arith.constant 0 : index
      %c0_33 = arith.constant 0 : index
      %38 = vector.load %arg9[%c0_31, %c0_32, %c0_33] : memref<1x1x1024xf32, #tpu.memory_space<vmem>>, vector<1x1x1024xf32>
      %39 = vector.shape_cast %38 : vector<1x1x1024xf32> to vector<1x1024xf32>
      %40 = vector.shape_cast %37 : vector<1x1024xf32> to vector<1x1x1024xf32>
      tpu.vector_store %arg9[%c0_31, %c0_32, %c0_33], %40 {strides = array<i32>} : memref<1x1x1024xf32, #tpu.memory_space<vmem>>, vector<1x1x1024xf32>,
    } else {
    }
    return
  }
  func.func @transform_0(%arg0: i32, %arg1: i32) -> (i32, i32, i32) {
    %c0_i32 = arith.constant 0 : i32
    %c0_i32_0 = arith.constant 0 : i32
    return %arg0, %arg1, %c0_i32 : i32, i32, i32
  }
  func.func @transform_1(%arg0: i32, %arg1: i32) -> (i32, i32, i32) {
    %c0_i32 = arith.constant 0 : i32
    %c0_i32_0 = arith.constant 0 : i32
    %c0_i32_1 = arith.constant 0 : i32
    return %arg0, %c0_i32, %c0_i32_0 : i32, i32, i32
  }
  func.func @transform_2(%arg0: i32, %arg1: i32) -> (i32, i32) {
    %c0_i32 = arith.constant 0 : i32
    %c0_i32_0 = arith.constant 0 : i32
    %c0_i32_1 = arith.constant 0 : i32
    return %c0_i32, %c0_i32_0 : i32, i32
  }
  func.func @transform_3(%arg0: i32, %arg1: i32) -> (i32, i32, i32) {
    %c0_i32 = arith.constant 0 : i32
    %c0_i32_0 = arith.constant 0 : i32
    %c0_i32_1 = arith.constant 0 : i32
    return %arg0, %c0_i32, %c0_i32_0 : i32, i32, i32
  }
  func.func @transform_4(%arg0: i32, %arg1: i32) -> (i32, i32) {
    %c0_i32 = arith.constant 0 : i32
    %c0_i32_0 = arith.constant 0 : i32
    %c0_i32_1 = arith.constant 0 : i32
    return %c0_i32, %c0_i32_0 : i32, i32
  }
  func.func @transform_5(%arg0: i32, %arg1: i32) -> (i32, i32) {
    %c0_i32 = arith.constant 0 : i32
    %c0_i32_0 = arith.constant 0 : i32
    %c0_i32_1 = arith.constant 0 : i32
    return %c0_i32, %c0_i32_0 : i32, i32
  }
  func.func @transform_6(%arg0: i32, %arg1: i32) -> (i32, i32) {
    %c0_i32 = arith.constant 0 : i32
    %c0_i32_0 = arith.constant 0 : i32
    %c0_i32_1 = arith.constant 0 : i32
    return %c0_i32, %c0_i32_0 : i32, i32
  }
  func.func @transform_7(%arg0: i32, %arg1: i32) -> (i32, i32, i32) {
    %c0_i32 = arith.constant 0 : i32
    %c0_i32_0 = arith.constant 0 : i32
    %c0_i32_1 = arith.constant 0 : i32
    return %arg0, %c0_i32, %c0_i32_0 : i32, i32, i32
  }
}

</mosaic_0001>

<bundles_post_ra>
// kernel: _lambda_.6
= control target key start
LH: loop header
LB: loop body
LE: loop exit
PB: predicated region body
PF: predicated region fallthrough
CT: control target
= control target key end

     0   :  { %12 = vsyncpa [#allocation4], 0  ;;  %s2224_s0 = inlined_call_operand.vmem [shape: f32[2,32,8], index: 0, kind: input, shape index: {}]   ;;  %s2225_s1 = inlined_call_operand.hbm [shape: f32[8,64], index: 1, kind: input, shape index: {}]   ;;  %s2226_s2 = inlined_call_operand.hbm [shape: f32[1,64], index: 2, kind: input, shape index: {}]   ;;  %s2227_s3 = inlined_call_operand.hbm [shape: f32[64,128], index: 3, kind: input, shape index: {}]   ;;  %s2228_s4 = inlined_call_operand.hbm [shape: f32[1,128], index: 4, kind: input, shape index: {}]   ;;  %s2229_s5 = inlined_call_operand.hbm [shape: bf16[128,1024], index: 5, kind: input, shape index: {}]   ;;  %s2230_s6 = inlined_call_operand.hbm [shape: f32[1,1024], index: 6, kind: input, shape index: {}]   ;;  %s2231_s7 = inlined_call_operand.vmem [shape: f32[2,1,1024], index: 7, kind: output, shape index: {}]  }
   0x1   :  { %13 = vsyncpa [#allocation6], 0 }
   0x2   :  { %14 = vsyncpa [#allocation9], 0 }
   0x3   :  { %15 = vsyncpa [#allocation12], 0  ;;  %s2088_s24 = smov 0   ;;  %s2090_s25 = smov 0  }
   0x4   :  { %s2092_s26 = smov 0  }
   0x5 LB: > { %s242_s29 = sshll.u32 %s2226_s2, 4  ;;  %s1376_s30 = sadd.s32 4294967295, %s2036_s26   ;;  %s2036_s26 = sphi %s2092_s26, %s21_s26   ;;  %s2032_s25 = sphi %s2090_s25, %s2236_s25   ;;  %s2028_s24 = sphi %s2088_s24, %s2235_s24   ;;  %s243_s29 = int_to_ptr.hbm [resolvable:$true] %s242_s29 }
   0x6   : > { %p1378_p0 = scmp.ge.s32.totalorder %s2036_s26, 1  ;;  %p218_p1 = scmp.lt.s32.totalorder %s2036_s26, 3 }
   0x7   : > { %p2109_p2 = scmp.eq.s32.totalorder %s1376_s30, 0  ;;  %s2038_s10 = smov [#allocation5]  }
   0x8   : > { %p2113_p3 = pnand %p1378_p0, %p218_p1  ;;  %s244_s11 = sshll.u32 %s2038_s10, 4  ;;  %s245_s11 = int_to_ptr.vmem [resolvable:$true] %s244_s11 }
   0x9   : > { %s268_s14 = sshll.u32 %s2228_s4, 4  ;;  %s2039_s16 = smov [#allocation8]   ;;  %s269_s14 = int_to_ptr.hbm [resolvable:$true] %s268_s14 }
   0xa   : > { %p1751_p4 = pneg %p2113_p3  ;;  %s270_s17 = sshll.u32 %s2039_s16, 4  ;;  %s271_s17 = int_to_ptr.vmem [resolvable:$true] %s270_s17 }
   0xb   : > { %s33_s18 = sadd.s32 1, %s2032_s25  ;;  %s230_s21 = sshll.u32 %s2225_s1, 4  ;;  %s231_s21 = int_to_ptr.hbm [resolvable:$true] %s230_s21 }
   0xc   : > { %p2124_p5 = pnand %p2109_p2, %p1751_p4  ;;  %p35_p6 = scmp.ge.s32.totalorder %s33_s18, 2 }
   0xd   : > { %s2040_s22 = smov [#allocation3]   ;;  %s253_s30 = sshll.u32 %s2227_s3, 4  ;;  %s254_s30 = int_to_ptr.hbm [resolvable:$true] %s253_s30 }
   0xe   : > { %1757 = dma.hbm_to_vmem [thread:$0]  (!%p2124_p5), %s243_s29, 16, %s245_s11, [#allocation6]  }
   0xf   : > { %1763 = dma.hbm_to_vmem [thread:$0]  (!%p2124_p5), %s269_s14, 16, %s271_s17, [#allocation9]  }
  0x10   : > { %s2238_s18 = smov (%p35_p6, %s33_s18), 0  ;;  %s232_s23 = sshll.u32 %s2040_s22, 4  ;;  %s233_s23 = int_to_ptr.vmem [resolvable:$true] %s232_s23 }
  0x11   : > { %1754 = dma.hbm_to_vmem [thread:$0]  (!%p2124_p5), %s231_s21, 128, %s233_s23, [#allocation4]  }
  0x12   : > { %s2041_s29 = smov [#allocation7]   ;;  %s279_s13 = sshll.u32 %s2229_s5, 4  ;;  %s280_s13 = int_to_ptr.hbm [resolvable:$true] %s279_s13 }
  0x13   : > { %s255_s10 = sshll.u32 %s2041_s29, 4  ;;  %s2042_s14 = smov 128   ;;  %s256_s10 = int_to_ptr.vmem [resolvable:$true] %s255_s10 }
  0x14   : > { %s2043_s16 = smov 8   ;;  %s2044_s17 = smov [#allocation10]  }
  0x15   : > { %1760 = dma.hbm_to_vmem [thread:$0]  (!%p2124_p5), %s254_s30, 1024, %s256_s10, [#allocation6], %s2042_s14, %s2042_s14, %s2043_s16  }
  0x16   : > { %s281_s19 = sshll.u32 %s2044_s17, 4  ;;  %s2045_s20 = smov 512   ;;  %s282_s19 = int_to_ptr.vmem [resolvable:$true] %s281_s19 }
  0x17   : > { %s2046_s22 = smov 32   ;;  %s294_s27 = sshll.u32 %s2230_s6, 4  ;;  %s295_s27 = int_to_ptr.hbm [resolvable:$true] %s294_s27 }
  0x18   : > { %1766 = dma.hbm_to_vmem [thread:$0]  (!%p2124_p5), %s280_s13, 8192, %s282_s19, [#allocation9], %s2045_s20, %s2045_s20, %s2046_s22  }
  0x19   : > { %s2047_s28 = smov [#allocation11]   ;;  %322 = sbr.rel (%p2113_p3) target bundleno = 525 (0x20d), region = 48 }
  0x1a   : > { %s296_s29 = sshll.u32 %s2047_s28, 4  ;;  %s297_s29 = int_to_ptr.vmem [resolvable:$true] %s296_s29 }
  0x1b   : > { %1769 = dma.hbm_to_vmem [thread:$0]  (!%p2124_p5), %s295_s27, 128, %s297_s29, [#allocation12]  }
  0x1e   : > { %2011 = dma.done.wait (%p2109_p2), [#allocation4], 128  }
  0x1f   : > { %2013 = vsyncadd (%p2109_p2), [#allocation4], 4294967168 }
  0x20   : > { %2015 = dma.done.wait (%p2109_p2), [#allocation6], 1040  }
  0x21   : > { %2017 = vsyncadd (%p2109_p2), [#allocation6], 4294966256 }
  0x22   : > { %2019 = dma.done.wait (%p2109_p2), [#allocation9], 8208  }
  0x23   : > { %2021 = vsyncadd (%p2109_p2), [#allocation9], 4294959088 }
  0x24   : > { %2023 = dma.done.wait (%p2109_p2), [#allocation12], 128  }
  0x25   : > { %2025 = vsyncadd (%p2109_p2), [#allocation12], 4294967168  ;;  %p384_p7 = scmp.lt.s32.totalorder %s2028_s24, 1  ;;  %vm418_vm0 = vcmask 64512   ;;  %v413_v0 = vld [vmem:[#allocation3] sm:$0xff]  ;;  %v469_v4 = vld [vmem:[#allocation7 + $0x28] sm:$0xff] }
  0x26   : > { %446 = vmatpush.msra.mxu0 %v413_v0  ;;  %v471_v2 = vld [vmem:[#allocation7 + $0x38] sm:$0xff]  ;;  %v470_v3 = vld [vmem:[#allocation7 + $0x30] sm:$0xff]  ;;  %v468_v5 = vld [vmem:[#allocation7 + $0x20] sm:$0xff]  ;;  %vm476_vm1 = vcmask 523264   ;;  %vm1232_vm2 = vcmask 1040384   ;;  %vm1234_vm3 = vcmask 1042434  }
  0x27   : > { %s2240_s24 = smov (!%p384_p7, %s2028_s24), 1  ;;  %497 = vmatpush.msra.mxu1 %v471_v2  ;;  %v467_v7 = vld [vmem:[#allocation7 + $0x18] sm:$0xff]  ;;  %v466_v10 = vld [vmem:[#allocation7 + $0x10] sm:$0xff]  ;;  %v465_v11 = vld [vmem:[#allocation7 + $0x8] sm:$0xff]  ;;  %vm1236_vm4 = vcmask 1041408   ;;  %vm1240_vm5 = vcmask 1046534  }
  0x28   : > { %s1662_s9 = sshll.u32 %s2240_s24, 5  ;;  %v464_v12 = vld [vmem:[#allocation7] sm:$0xff]  ;;  %v2185_v13 = vld [vmem:[#allocation5] ss:$0 sm:$0xff]  ;;  %v1638_v19 = vld [vmem:[#allocation10 + $0x1c8] sm:$0xf] }
  0x29   : > { %s391_s10 = scalar_lea.vmem %s2224_s0, %s1662_s9  ;;  %498 = vmatpush.msra.mxu1 %v470_v3  ;;  %v1630_v14 = vld [vmem:[#allocation10 + $0x1c0] sm:$0xf]  ;;  %v1719_v16 = vld [vmem:[#allocation10 + $0x1c4] sm:$0xf]  ;;  %v1724_v20 = vld [vmem:[#allocation10 + $0x1e4] sm:$0xf0] }
  0x2a   : > { %v409_v1 = vld [vmem:[%s391_s10] sm:$0xff]  ;;  %v410_v6 = vld [vmem:[%s391_s10 + $0x8] sm:$0xff]  ;;  %v411_v8 = vld [vmem:[%s391_s10 + $0x10] sm:$0xff]  ;;  %v1639_v22 = vor.u32 %v1724_v20, %v1638_v19  ;;  %s1395_s8 = sshll.u32 %s2240_s24, 3  ;;  %vm1238_vm6 = vcmask 1044484   ;;  %vm1242_vm7 = vcmask 1045508  }
  0x2b   : > { %1396 = vmatmul.msk.f32.vlgmr.msra.gmra.mxu0 %vm418_vm0, %v409_v1  ;;  %499 = vmatpush.msra.mxu1 %v469_v4  ;;  %v412_v9 = vld [vmem:[%s391_s10 + $0x18] sm:$0xff]  ;;  %v1723_v15 = vld [vmem:[#allocation10 + $0x1dc] sm:$0xf0]  ;;  %v1632_v18 = vld [vmem:[#allocation10 + $0x1e0] sm:$0xf0]  ;;  %vm1244_vm8 = vcmask 1043456   ;;  %s396_s13 = scalar_lea.vmem %s2231_s7, %s1395_s8 }
  0x2c   : > { %v1631_v17 = vor.u32 %v1723_v15, %v1630_v14  ;;  %v1635_v21 = vor.u32 %v1719_v16, %v1632_v18  ;;  %v1720_v23 = vld [vmem:[#allocation10 + $0x1cc] sm:$0xf]  ;;  %v1598_v25 = vld [vmem:[#allocation10 + $0x180] sm:$0xf]  ;;  %v1711_v29 = vld [vmem:[#allocation10 + $0x184] sm:$0xf]  ;;  %964 = vmatpush.bf16.msrb.mxu0 %v1639_v22 }
  0x2d   : > { %500 = vmatpush.msra.mxu1 %v468_v5  ;;  %v1640_v24 = vld [vmem:[#allocation10 + $0x1e8] sm:$0xf0]  ;;  %v1715_v28 = vld [vmem:[#allocation10 + $0x19c] sm:$0xf0]  ;;  %v1600_v30 = vld [vmem:[#allocation10 + $0x1a0] sm:$0xf0] }
  0x2e   : > { %926 = vmatpush.bf16.msra.mxu2 %v1631_v17  ;;  %v1643_v27 = vor.u32 %v1720_v23, %v1640_v24  ;;  %945 = vmatpush.bf16.msra.mxu3 %v1635_v21  ;;  %v1599_v32 = vor.u32 %v1715_v28, %v1598_v25  ;;  %v1603_v33 = vor.u32 %v1711_v29, %v1600_v30  ;;  %v1606_v34 = vld [vmem:[#allocation10 + $0x188] sm:$0xf]  ;;  %v1712_v36 = vld [vmem:[#allocation10 + $0x18c] sm:$0xf]  ;;  %v1566_v39 = vld [vmem:[#allocation10 + $0x140] sm:$0xf] }
  0x2f   : > { %501 = vmatpush.msra.mxu1 %v467_v7  ;;  %v1716_v35 = vld [vmem:[#allocation10 + $0x1a4] sm:$0xf0]  ;;  %v1608_v38 = vld [vmem:[#allocation10 + $0x1a8] sm:$0xf0]  ;;  %v1707_v40 = vld [vmem:[#allocation10 + $0x15c] sm:$0xf0] }
  0x30   : > { %v1607_v37 = vor.u32 %v1716_v35, %v1606_v34  ;;  %v1611_v42 = vor.u32 %v1712_v36, %v1608_v38  ;;  %v1703_v43 = vld [vmem:[#allocation10 + $0x144] sm:$0xf]  ;;  %v1567_v45 = vor.u32 %v1707_v40, %v1566_v39  ;;  %v1574_v46 = vld [vmem:[#allocation10 + $0x148] sm:$0xf]  ;;  %v1704_v48 = vld [vmem:[#allocation10 + $0x14c] sm:$0xf] }
  0x31   : > { %502 = vmatpush.msra.mxu1 %v466_v10  ;;  %v1568_v44 = vld [vmem:[#allocation10 + $0x160] sm:$0xf0]  ;;  %v1708_v47 = vld [vmem:[#allocation10 + $0x164] sm:$0xf0]  ;;  %v1576_v50 = vld [vmem:[#allocation10 + $0x168] sm:$0xf0] }
  0x32   : > { %927 = vmatpush.bf16.msra.mxu2 %v1599_v32  ;;  %946 = vmatpush.bf16.msra.mxu3 %v1603_v33  ;;  %v1571_v49 = vor.u32 %v1703_v43, %v1568_v44  ;;  %v1534_v51 = vld [vmem:[#allocation10 + $0x100] sm:$0xf]  ;;  %v1575_v53 = vor.u32 %v1708_v47, %v1574_v46  ;;  %v1579_v54 = vor.u32 %v1704_v48, %v1576_v50  ;;  %v1695_v55 = vld [vmem:[#allocation10 + $0x104] sm:$0xf]  ;;  %v1542_v57 = vld [vmem:[#allocation10 + $0x108] sm:$0xf] }
  0x33   : > { %1397 = vmatmul.msk.f32.gmra.mxu0 %vm418_vm0, %v410_v6  ;;  %503 = vmatpush.msra.mxu1 %v465_v11  ;;  %v1699_v52 = vld [vmem:[#allocation10 + $0x11c] sm:$0xf0]  ;;  %v1536_v56 = vld [vmem:[#allocation10 + $0x120] sm:$0xf0]  ;;  %v1700_v58 = vld [vmem:[#allocation10 + $0x124] sm:$0xf0] }
  0x34   : > { %965 = vmatpush.bf16.msrb.mxu0 %v1607_v37  ;;  %v1696_v59 = vld [vmem:[#allocation10 + $0x10c] sm:$0xf]  ;;  %v1535_v62 = vor.u32 %v1699_v52, %v1534_v51  ;;  %v1539_v0 = vor.u32 %v1695_v55, %v1536_v56  ;;  %v1543_v1 = vor.u32 %v1700_v58, %v1542_v57  ;;  %v1502_v10 = vld [vmem:[#allocation10 + $0xc0] sm:$0xf]  ;;  %v1504_v15 = vld [vmem:[#allocation10 + $0xe0] sm:$0xf0] }
  0x35   : > { %504 = vmatpush.msra.mxu1 %v464_v12  ;;  %v1544_v60 = vld [vmem:[#allocation10 + $0x128] sm:$0xf0]  ;;  %v1691_v11 = vld [vmem:[#allocation10 + $0xdc] sm:$0xf0]  ;;  %v1687_v12 = vld [vmem:[#allocation10 + $0xc4] sm:$0xf] }
  0x36   : > { %928 = vmatpush.bf16.msra.mxu2 %v1567_v45  ;;  %947 = vmatpush.bf16.msra.mxu3 %v1571_v49  ;;  %v1547_v2 = vor.u32 %v1696_v59, %v1544_v60  ;;  %v1503_v14 = vor.u32 %v1691_v11, %v1502_v10  ;;  %v1510_v16 = vld [vmem:[#allocation10 + $0xc8] sm:$0xf]  ;;  %v1507_v18 = vor.u32 %v1687_v12, %v1504_v15  ;;  %v1688_v20 = vld [vmem:[#allocation10 + $0xcc] sm:$0xf]  ;;  %v1470_v23 = vld [vmem:[#allocation10 + $0x80] sm:$0xf] }
  0x37   : > { %983 = vmatpush.bf16.msrb.mxu1 %v1643_v27  ;;  %v1692_v17 = vld [vmem:[#allocation10 + $0xe4] sm:$0xf0]  ;;  %v1512_v21 = vld [vmem:[#allocation10 + $0xe8] sm:$0xf0]  ;;  %v1679_v24 = vld [vmem:[#allocation10 + $0x84] sm:$0xf] }
  0x38   : > { %966 = vmatpush.bf16.msrb.mxu0 %v1575_v53  ;;  %v1511_v19 = vor.u32 %v1692_v17, %v1510_v16  ;;  %v1515_v22 = vor.u32 %v1688_v20, %v1512_v21  ;;  %v1478_v27 = vld [vmem:[#allocation10 + $0x88] sm:$0xf]  ;;  %v1480_v32 = vld [vmem:[#allocation10 + $0xa8] sm:$0xf0]  ;;  %v1438_v34 = vld [vmem:[#allocation10 + $0x40] sm:$0xf] }
  0x39   : > { %v1684_v28 = vld [vmem:[#allocation10 + $0xa4] sm:$0xf0]  ;;  %v1675_v35 = vld [vmem:[#allocation10 + $0x5c] sm:$0xf0]  ;;  %v1671_v36 = vld [vmem:[#allocation10 + $0x44] sm:$0xf] }
  0x3a   : > { %929 = vmatpush.bf16.msra.mxu2 %v1535_v62  ;;  %948 = vmatpush.bf16.msra.mxu3 %v1539_v0  ;;  %v1479_v30 = vor.u32 %v1684_v28, %v1478_v27  ;;  %v1439_v37 = vor.u32 %v1675_v35, %v1438_v34  ;;  %v1440_v38 = vld [vmem:[#allocation10 + $0x60] sm:$0xf0]  ;;  %v1446_v39 = vld [vmem:[#allocation10 + $0x48] sm:$0xf]  ;;  %v1672_v43 = vld [vmem:[#allocation10 + $0x4c] sm:$0xf] }
  0x3b   : > { %1398 = vmatmul.msk.f32.gmra.mxu0 %vm418_vm0, %v411_v8  ;;  %984 = vmatpush.bf16.msrb.mxu1 %v1611_v42  ;;  %v1676_v40 = vld [vmem:[#allocation10 + $0x64] sm:$0xf0]  ;;  %v1448_v44 = vld [vmem:[#allocation10 + $0x68] sm:$0xf0]  ;;  %v1406_v46 = vld [vmem:[#allocation10] sm:$0xf] }
  0x3c   : > { %967 = vmatpush.bf16.msrb.mxu0 %v1543_v1  ;;  %v1447_v42 = vor.u32 %v1676_v40, %v1446_v39  ;;  %v1451_v45 = vor.u32 %v1672_v43, %v1448_v44  ;;  %v1667_v47 = vld [vmem:[#allocation10 + $0x1c] sm:$0xf0]  ;;  %v1663_v48 = vld [vmem:[#allocation10 + $0x4] sm:$0xf]  ;;  %v1414_v51 = vld [vmem:[#allocation10 + $0x8] sm:$0xf] }
  0x3d   : > { %v1407_v49 = vor.u32 %v1667_v47, %v1406_v46  ;;  %v1408_v50 = vld [vmem:[#allocation10 + $0x20] sm:$0xf0]  ;;  %v1668_v52 = vld [vmem:[#allocation10 + $0x24] sm:$0xf0]  ;;  %v1664_v55 = vld [vmem:[#allocation10 + $0xc] sm:$0xf] }
  0x3e   : > { %930 = vmatpush.bf16.msra.mxu2 %v1503_v14  ;;  %949 = vmatpush.bf16.msra.mxu3 %v1507_v18  ;;  %v1411_v53 = vor.u32 %v1663_v48, %v1408_v50  ;;  %v1416_v56 = vld [vmem:[#allocation10 + $0x28] sm:$0xf0]  ;;  %v1646_v58 = vld [vmem:[#allocation10 + $0x1d0] sm:$0xf]  ;;  %v1721_v60 = vld [vmem:[#allocation10 + $0x1d4] sm:$0xf] }
  0x3f   : > { %985 = vmatpush.bf16.msrb.mxu1 %v1579_v54  ;;  %v1415_v54 = vor.u32 %v1668_v52, %v1414_v51  ;;  %v1419_v57 = vor.u32 %v1664_v55, %v1416_v56  ;;  %v1725_v59 = vld [vmem:[#allocation10 + $0x1ec] sm:$0xf0]  ;;  %v1648_v62 = vld [vmem:[#allocation10 + $0x1f0] sm:$0xf0]  ;;  %v1726_v0 = vld [vmem:[#allocation10 + $0x1f4] sm:$0xf0] }
  0x40   : > { %968 = vmatpush.bf16.msrb.mxu0 %v1511_v19  ;;  %v1651_v1 = vor.u32 %v1721_v60, %v1648_v62  ;;  %v1616_v10 = vld [vmem:[#allocation10 + $0x1b0] sm:$0xf0]  ;;  %v1622_v11 = vld [vmem:[#allocation10 + $0x198] sm:$0xf]  ;;  %v1714_v16 = vld [vmem:[#allocation10 + $0x19c] sm:$0xf] }
  0x41   : > { %v1718_v12 = vld [vmem:[#allocation10 + $0x1b4] sm:$0xf0]  ;;  %v1624_v17 = vld [vmem:[#allocation10 + $0x1b8] sm:$0xf0]  ;;  %v1582_v18 = vld [vmem:[#allocation10 + $0x150] sm:$0xf] }
  0x42   : > { %v1623_v15 = vor.u32 %v1718_v12, %v1622_v11  ;;  %v1627_v19 = vor.u32 %v1714_v16, %v1624_v17  ;;  %v1709_v20 = vld [vmem:[#allocation10 + $0x16c] sm:$0xf0]  ;;  %v1705_v21 = vld [vmem:[#allocation10 + $0x154] sm:$0xf]  ;;  %v1592_v28 = vld [vmem:[#allocation10 + $0x178] sm:$0xf0] }
  0x43   : > { %1399 = vmatmul.msk.f32.gmra.mxu0 %vm418_vm0, %v412_v9  ;;  %986 = vmatpush.bf16.msrb.mxu1 %v1547_v2  ;;  %v1552_v34 = vld [vmem:[#allocation10 + $0x130] sm:$0xf0]  ;;  %v1558_v35 = vld [vmem:[#allocation10 + $0x118] sm:$0xf]  ;;  %v1698_v39 = vld [vmem:[#allocation10 + $0x11c] sm:$0xf] }
  0x44   : > { %969 = vmatpush.bf16.msrb.mxu0 %v1479_v30  ;;  %v1550_v30 = vld [vmem:[#allocation10 + $0x110] sm:$0xf]  ;;  %v1560_v40 = vld [vmem:[#allocation10 + $0x138] sm:$0xf0]  ;;  %v1689_v44 = vld [vmem:[#allocation10 + $0xd4] sm:$0xf] }
  0x45   : > { %v1693_v43 = vld [vmem:[#allocation10 + $0xec] sm:$0xf0]  ;;  %v1520_v46 = vld [vmem:[#allocation10 + $0xf0] sm:$0xf0]  ;;  %v1526_v47 = vld [vmem:[#allocation10 + $0xd8] sm:$0xf] }
  0x46   : > { %v1694_v48 = vld [vmem:[#allocation10 + $0xf4] sm:$0xf0]  ;;  %v1523_v50 = vor.u32 %v1689_v44, %v1520_v46  ;;  %v1690_v52 = vld [vmem:[#allocation10 + $0xdc] sm:$0xf]  ;;  %v1685_v56 = vld [vmem:[#allocation10 + $0xac] sm:$0xf0] }
  0x47   : > { %987 = vmatpush.bf16.msrb.mxu1 %v1515_v22  ;;  %v1584_v22 = vld [vmem:[#allocation10 + $0x170] sm:$0xf0]  ;;  %v1527_v51 = vor.u32 %v1694_v48, %v1526_v47  ;;  %v1686_v62 = vld [vmem:[#allocation10 + $0xb4] sm:$0xf0]  ;;  %v1674_v11 = vld [vmem:[#allocation10 + $0x5c] sm:$0xf] }
  0x48   : > { %970 = vmatpush.bf16.msrb.mxu0 %v1447_v42  ;;  %v1518_v42 = vld [vmem:[#allocation10 + $0xd0] sm:$0xf] }
  0x49   : > { %v1422_v16 = vld [vmem:[#allocation10 + $0x10] sm:$0xf] }
  0x4a   : > { %v1669_v17 = vld [vmem:[#allocation10 + $0x2c] sm:$0xf0] }
  0x4c   : > { %971 = vmatpush.bf16.msrb.mxu0 %v1415_v54  ;;  %v1486_v54 = vld [vmem:[#allocation10 + $0x90] sm:$0xf] }
  0xa8   : > { %v448_v26 = vpop.f32.mrf.mxu0 }
  0xa9   : > { %v449_v31 = vadd.f32 %v2185_v13, %v448_v26  ;;  %v1472_v26 = vld [vmem:[#allocation10 + $0xa0] sm:$0xf0] }
  0xaa   : > { %v1475_v29 = vor.u32 %v1679_v24, %v1472_v26  ;;  %v1590_v24 = vld [vmem:[#allocation10 + $0x158] sm:$0xf]  ;;  %v1706_v26 = vld [vmem:[#allocation10 + $0x15c] sm:$0xf] }
  0xab   : > { %v460_v41 = vmax.f32 %v449_v31, 0.0  ;;  %v1680_v31 = vld [vmem:[#allocation10 + $0x8c] sm:$0xf] }
  0xac   : > { %v1483_v33 = vor.u32 %v1680_v31, %v1480_v32  ;;  %950 = vmatpush.bf16.msra.mxu3 %v1475_v29  ;;  %v1595_v29 = vor.u32 %v1706_v26, %v1592_v28  ;;  %v1701_v31 = vld [vmem:[#allocation10 + $0x12c] sm:$0xf0]  ;;  %v1697_v32 = vld [vmem:[#allocation10 + $0x114] sm:$0xf]  ;;  %v1666_v28 = vld [vmem:[#allocation10 + $0x1c] sm:$0xf] }
  0xad   : > { %1400 = vmatmul.msk.f32.vlgmr.msra.gmra.mxu1 %vm476_vm1, %v460_v41  ;;  %v1443_v41 = vor.u32 %v1671_v36, %v1440_v38  ;;  %v1702_v36 = vld [vmem:[#allocation10 + $0x134] sm:$0xf0] }
  0xae   : > { %988 = vmatpush.bf16.msrb.mxu1 %v1483_v33  ;;  %v1551_v33 = vor.u32 %v1701_v31, %v1550_v30  ;;  %v1559_v38 = vor.u32 %v1702_v36, %v1558_v35 }
  0xb0   : > { %v451_v61 = vpop.f32.mrf.mxu0  ;;  %951 = vmatpush.bf16.msra.mxu3 %v1443_v41  ;;  %v1563_v41 = vor.u32 %v1698_v39, %v1560_v40 }
  0xb1   : > { %v452_v63 = vadd.f32 %v2185_v13, %v451_v61  ;;  %v1647_v61 = vor.u32 %v1725_v59, %v1646_v58  ;;  %v1488_v58 = vld [vmem:[#allocation10 + $0xb0] sm:$0xf0]  ;;  %v1487_v59 = vor.u32 %v1685_v56, %v1486_v54 }
  0xb2   : > { %989 = vmatpush.bf16.msrb.mxu1 %v1451_v45  ;;  %v1519_v45 = vor.u32 %v1693_v43, %v1518_v42 }
  0xb3   : > { %v461_v3 = vmax.f32 %v452_v63, 0.0  ;;  %v1654_v63 = vld [vmem:[#allocation10 + $0x1d8] sm:$0xf] }
  0xb4   : > { %952 = vmatpush.bf16.msra.mxu3 %v1411_v53  ;;  %v1655_v2 = vor.u32 %v1726_v0, %v1654_v63  ;;  %v1528_v53 = vld [vmem:[#allocation10 + $0xf8] sm:$0xf0] }
  0xb5   : > { %1401 = vmatmul.msk.f32.gmra.mxu1 %vm476_vm1, %v461_v3  ;;  %v1722_v3 = vld [vmem:[#allocation10 + $0x1dc] sm:$0xf]  ;;  %v1531_v55 = vor.u32 %v1690_v52, %v1528_v53 }
  0xb6   : > { %990 = vmatpush.bf16.msrb.mxu1 %v1419_v57  ;;  %1040 = vmatpush.bf16.msra.mxu0 %v1655_v2  ;;  %v1681_v57 = vld [vmem:[#allocation10 + $0x94] sm:$0xf]  ;;  %v1682_v63 = vld [vmem:[#allocation10 + $0x9c] sm:$0xf] }
  0xb7   : > { %v1491_v60 = vor.u32 %v1681_v57, %v1488_v58  ;;  %v1817_v0 = vld [vmem:[#allocation8] ss:$0 sm:$0xff] }
  0xb8   : > { %v454_v4 = vpop.f32.mrf.mxu0  ;;  %1021 = vmatpush.bf16.msrb.mxu3 %v1651_v1  ;;  %v1496_v2 = vld [vmem:[#allocation10 + $0xb8] sm:$0xf0] }
  0xb9   : > { %v455_v5 = vadd.f32 %v2185_v13, %v454_v4  ;;  %v1656_v4 = vld [vmem:[#allocation10 + $0x1f8] sm:$0xf0] }
  0xba   : > { %1041 = vmatpush.bf16.msra.mxu0 %v1623_v15  ;;  %v1464_v15 = vld [vmem:[#allocation10 + $0x78] sm:$0xf0] }
  0xbb   : > { %v462_v6 = vmax.f32 %v455_v5, 0.0  ;;  %v1659_v5 = vor.u32 %v1722_v3, %v1656_v4  ;;  %v1454_v3 = vld [vmem:[#allocation10 + $0x50] sm:$0xf]  ;;  %v1499_v4 = vor.u32 %v1682_v63, %v1496_v2 }
  0xbd   : > { %1402 = vmatmul.msk.f32.gmra.mxu1 %vm476_vm1, %v462_v6  ;;  %v1614_v6 = vld [vmem:[#allocation10 + $0x190] sm:$0xf] }
  0xbe   : > { %1059 = vmatpush.bf16.msra.mxu1 %v1659_v5  ;;  %v1677_v5 = vld [vmem:[#allocation10 + $0x6c] sm:$0xf0] }
  0xc0   : > { %v457_v7 = vpop.f32.mrf.mxu0 }
  0xc1   : > { %v458_v8 = vadd.f32 %v2185_v13, %v457_v7  ;;  %v1683_v13 = vld [vmem:[#allocation10 + $0x9c] sm:$0xf0]  ;;  %v1717_v7 = vld [vmem:[#allocation10 + $0x1ac] sm:$0xf0] }
  0xc2   : > { %v1471_v25 = vor.u32 %v1683_v13, %v1470_v23  ;;  %v1583_v23 = vor.u32 %v1709_v20, %v1582_v18  ;;  %v1587_v13 = vor.u32 %v1705_v21, %v1584_v22  ;;  %1060 = vmatpush.bf16.msra.mxu1 %v1627_v19  ;;  %v1467_v19 = vor.u32 %v1674_v11, %v1464_v15  ;;  %v1665_v20 = vld [vmem:[#allocation10 + $0x14] sm:$0xf]  ;;  %v1430_v22 = vld [vmem:[#allocation10 + $0x18] sm:$0xf] }
  0xc3   : > { %v463_v9 = vmax.f32 %v458_v8, 0.0  ;;  %v1713_v8 = vld [vmem:[#allocation10 + $0x194] sm:$0xf] }
  0xc4   : > { %931 = vmatpush.bf16.msra.mxu2 %v1471_v25  ;;  %v1619_v14 = vor.u32 %v1713_v8, %v1616_v10  ;;  %v1710_v25 = vld [vmem:[#allocation10 + $0x174] sm:$0xf0]  ;;  %v1455_v8 = vor.u32 %v1677_v5, %v1454_v3  ;;  %v1424_v21 = vld [vmem:[#allocation10 + $0x30] sm:$0xf0] }
  0xc5   : > { %1403 = vmatmul.msk.f32.gmra.mxu1 %vm476_vm1, %v463_v9  ;;  %v1615_v9 = vor.u32 %v1717_v7, %v1614_v6  ;;  %v1591_v27 = vor.u32 %v1710_v25, %v1590_v24  ;;  %v1673_v6 = vld [vmem:[#allocation10 + $0x54] sm:$0xf]  ;;  %v1678_v10 = vld [vmem:[#allocation10 + $0x74] sm:$0xf0]  ;;  %v1423_v25 = vor.u32 %v1669_v17, %v1422_v16  ;;  %v1427_v26 = vor.u32 %v1665_v20, %v1424_v21 }
  0xc6   : > { %1022 = vmatpush.bf16.msrb.mxu3 %v1619_v14  ;;  %1061 = vmatpush.bf16.msra.mxu1 %v1595_v29  ;;  %v1456_v7 = vld [vmem:[#allocation10 + $0x70] sm:$0xf0]  ;;  %v1432_v29 = vld [vmem:[#allocation10 + $0x38] sm:$0xf0] }
  0xc7   : > { %1042 = vmatpush.bf16.msra.mxu0 %v1591_v27  ;;  %v1459_v12 = vor.u32 %v1673_v6, %v1456_v7 }
  0xc8   : > { %932 = vmatpush.bf16.msra.mxu2 %v1439_v37  ;;  %v1555_v37 = vor.u32 %v1697_v32, %v1552_v34 }
  0xca   : > { %1023 = vmatpush.bf16.msrb.mxu3 %v1587_v13  ;;  %1062 = vmatpush.bf16.msra.mxu1 %v1563_v41  ;;  %v1670_v13 = vld [vmem:[#allocation10 + $0x34] sm:$0xf0] }
  0xcb   : > { %1043 = vmatpush.bf16.msra.mxu0 %v1559_v38  ;;  %v1431_v27 = vor.u32 %v1670_v13, %v1430_v22 }
  0xcc   : > { %933 = vmatpush.bf16.msra.mxu2 %v1407_v49 }
  0xce   : > { %1024 = vmatpush.bf16.msrb.mxu3 %v1555_v37  ;;  %1063 = vmatpush.bf16.msra.mxu1 %v1531_v55  ;;  %v2195_v55 = vld [vmem:[#allocation11] sm:$0xff] }
  0xcf   : > { %1044 = vmatpush.bf16.msra.mxu0 %v1527_v51  ;;  %v592_v58 = vperm.slane %v2195_v55, 2  ;;  %v590_v6 = vperm.slane %v2195_v55, 0 }
  0xd0   : > { %1002 = vmatpush.bf16.msrb.mxu2 %v1647_v61  ;;  %v1494_v61 = vld [vmem:[#allocation10 + $0x98] sm:$0xf] }
  0xd1   : > { %v1495_v1 = vor.u32 %v1686_v62, %v1494_v61 }
  0xd2   : > { %1025 = vmatpush.bf16.msrb.mxu3 %v1523_v50  ;;  %1064 = vmatpush.bf16.msra.mxu1 %v1499_v4 }
  0xd3   : > { %1045 = vmatpush.bf16.msra.mxu0 %v1495_v1 }
  0xd4   : > { %1003 = vmatpush.bf16.msrb.mxu2 %v1615_v9  ;;  %v1462_v9 = vld [vmem:[#allocation10 + $0x58] sm:$0xf] }
  0xd5   : > { %v1463_v14 = vor.u32 %v1678_v10, %v1462_v9 }
  0xd6   : > { %1026 = vmatpush.bf16.msrb.mxu3 %v1491_v60  ;;  %1065 = vmatpush.bf16.msra.mxu1 %v1467_v19  ;;  %v591_v60 = vperm.slane %v2195_v55, 1 }
  0xd7   : > { %1046 = vmatpush.bf16.msra.mxu0 %v1463_v14 }
  0xd8   : > { %1004 = vmatpush.bf16.msrb.mxu2 %v1583_v23 }
  0xda   : > { %1027 = vmatpush.bf16.msrb.mxu3 %v1459_v12 }
  0xdb   : > { %1047 = vmatpush.bf16.msra.mxu0 %v1431_v27 }
  0xdc   : > { %1005 = vmatpush.bf16.msrb.mxu2 %v1551_v33  ;;  %v1435_v33 = vor.u32 %v1666_v28, %v1432_v29 }
  0xde   : > { %1028 = vmatpush.bf16.msrb.mxu3 %v1427_v26  ;;  %1066 = vmatpush.bf16.msra.mxu1 %v1435_v33 }
  0xe0   : > { %1006 = vmatpush.bf16.msrb.mxu2 %v1519_v45 }
  0xe4   : > { %1007 = vmatpush.bf16.msrb.mxu2 %v1487_v59  ;;  %v593_v59 = vperm.slane %v2195_v55, 3 }
  0xe8   : > { %1008 = vmatpush.bf16.msrb.mxu2 %v1455_v8 }
  0xec   : > { %1009 = vmatpush.bf16.msrb.mxu2 %v1423_v25 }
 0x12a   : > { %v506_v49 = vpop.f32.mrf.mxu1 }
 0x12b   : > { %v507_v18 = vadd.f32 %v1817_v0, %v506_v49 }
 0x12d   : > { %v518_v30 = vmax.f32 %v507_v18, 0.0 }
 0x132   : > { %v509_v23 = vpop.f32.mrf.mxu1 }
 0x133   : > { %v510_v24 = vadd.f32 %v1817_v0, %v509_v23 }
 0x135   : > { %v519_v31 = vmax.f32 %v510_v24, 0.0 }
 0x137   : > { %v586_v32 = vpack.c.bf16 %v519_v31, %v518_v30 }
 0x139   : > { %934 = vmatmul.bf16.vlgmr.msra.gmra.mxu2 %v586_v32  ;;  %953 = vmatmul.bf16.vlgmr.msra.gmra.mxu3 %v586_v32 }
 0x13a   : > { %972 = vmatmul.bf16.vlgmr.msrb.gmra.mxu0 %v586_v32  ;;  %991 = vmatmul.bf16.vlgmr.msrb.gmra.mxu1 %v586_v32  ;;  %v512_v34 = vpop.f32.mrf.mxu1 }
 0x13b   : > { %v513_v35 = vadd.f32 %v1817_v0, %v512_v34 }
 0x13d   : > { %v520_v38 = vmax.f32 %v513_v35, 0.0 }
 0x142   : > { %v515_v36 = vpop.f32.mrf.mxu1 }
 0x143   : > { %v516_v37 = vadd.f32 %v1817_v0, %v515_v36 }
 0x145   : > { %v521_v39 = vmax.f32 %v516_v37, 0.0 }
 0x147   : > { %v587_v40 = vpack.c.bf16 %v521_v39, %v520_v38 }
 0x149   : > { %939 = vmatmul.bf16.gmra.mxu2 %v587_v40  ;;  %958 = vmatmul.bf16.gmra.mxu3 %v587_v40 }
 0x14a   : > { %977 = vmatmul.bf16.gmra.mxu0 %v587_v40  ;;  %996 = vmatmul.bf16.gmra.mxu1 %v587_v40 }
 0x159   : > { %1010 = vmatmul.bf16.vlgmr.msrb.gmra.mxu2 %v586_v32  ;;  %1029 = vmatmul.bf16.vlgmr.msrb.gmra.mxu3 %v586_v32 }
 0x15a   : > { %1048 = vmatmul.bf16.vlgmr.msra.gmra.mxu0 %v586_v32  ;;  %1067 = vmatmul.bf16.vlgmr.msra.gmra.mxu1 %v586_v32 }
 0x169   : > { %1015 = vmatmul.bf16.gmra.mxu2 %v587_v40  ;;  %1034 = vmatmul.bf16.gmra.mxu3 %v587_v40 }
 0x16a   : > { %1053 = vmatmul.bf16.gmra.mxu0 %v587_v40  ;;  %1072 = vmatmul.bf16.gmra.mxu1 %v587_v40 }
 0x1b7   : > { %v973_v41 = vpop.f32.mrf.mxu0  ;;  %v992_v42 = vpop.f32.mrf.mxu1 }
 0x1b8   : > { %v974_v2 = vadd.f32 %v973_v41, %v592_v58  ;;  %v993_v3 = vadd.f32 %v992_v42, %v593_v59 }
 0x1ba   : > { %v1080_v19 = vmax.f32 %v974_v2, 0.0  ;;  %v1081_v20 = vmax.f32 %v993_v3, 0.0  ;;  %v594_v2 = vperm.slane %v2195_v55, 4  ;;  %v595_v3 = vperm.slane %v2195_v55, 5 }
 0x1bc   : > { %v935_v43 = vpop.f32.mrf.mxu2  ;;  %v954_v44 = vpop.f32.mrf.mxu3 }
 0x1bd   : > { %v955_v7 = vadd.f32 %v954_v44, %v591_v60  ;;  %v936_v23 = vadd.f32 %v935_v43, %v590_v6 }
 0x1bf   : > { %v975_v45 = vpop.f32.mrf.mxu0  ;;  %v994_v46 = vpop.f32.mrf.mxu1  ;;  %v1079_v13 = vmax.f32 %v955_v7, 0.0  ;;  %v1078_v38 = vmax.f32 %v936_v23, 0.0 }
 0x1c0   : > { %v976_v63 = vadd.f32 %v975_v45, %v592_v58  ;;  %v995_v0 = vadd.f32 %v994_v46, %v593_v59 }
 0x1c2   : > { %v1088_v9 = vmax.f32 %v976_v63, 0.0  ;;  %v1089_v10 = vmax.f32 %v995_v0, 0.0 }
 0x1c4   : > { %v937_v47 = vpop.f32.mrf.mxu2  ;;  %v956_v48 = vpop.f32.mrf.mxu3  ;;  %v1116_v28 = vmax.f32 %v1080_v19, %v1088_v9  ;;  %v1119_v29 = vmax.f32 %v1081_v20, %v1089_v10 }
 0x1c5   : > { %v957_v1 = vadd.f32 %v956_v48, %v591_v60  ;;  %v938_v16 = vadd.f32 %v937_v47, %v590_v6  ;;  %v596_v47 = vperm.slane %v2195_v55, 6 }
 0x1c7   : > { %v978_v49 = vpop.f32.mrf.mxu0  ;;  %v997_v50 = vpop.f32.mrf.mxu1  ;;  %v1087_v17 = vmax.f32 %v957_v1, 0.0  ;;  %v1086_v32 = vmax.f32 %v938_v16, 0.0 }
 0x1c8   : > { %v979_v4 = vadd.f32 %v978_v49, %v592_v58  ;;  %v998_v5 = vadd.f32 %v997_v50, %v593_v59  ;;  %v597_v49 = vperm.slane %v2195_v55, 7 }
 0x1c9   : > { %v1113_v33 = vmax.f32 %v1079_v13, %v1087_v17  ;;  %v1110_v45 = vmax.f32 %v1078_v38, %v1086_v32 }
 0x1ca   : > { %v1096_v21 = vmax.f32 %v979_v4, 0.0  ;;  %v1097_v22 = vmax.f32 %v998_v5, 0.0 }
 0x1cc   : > { %v940_v51 = vpop.f32.mrf.mxu2  ;;  %v959_v52 = vpop.f32.mrf.mxu3  ;;  %v1117_v35 = vmax.f32 %v1116_v28, %v1096_v21  ;;  %v1120_v36 = vmax.f32 %v1119_v29, %v1097_v22 }
 0x1cd   : > { %v960_v8 = vadd.f32 %v959_v52, %v591_v60  ;;  %v941_v24 = vadd.f32 %v940_v51, %v590_v6 }
 0x1cf   : > { %v980_v53 = vpop.f32.mrf.mxu0  ;;  %v999_v54 = vpop.f32.mrf.mxu1  ;;  %v1095_v25 = vmax.f32 %v960_v8, 0.0  ;;  %v1094_v39 = vmax.f32 %v941_v24, 0.0 }
 0x1d0   : > { %v981_v11 = vadd.f32 %v980_v53, %v592_v58  ;;  %v1000_v12 = vadd.f32 %v999_v54, %v593_v59 }
 0x1d1   : > { %v1114_v40 = vmax.f32 %v1113_v33, %v1095_v25  ;;  %v1111_v50 = vmax.f32 %v1110_v45, %v1094_v39 }
 0x1d2   : > { %v1104_v30 = vmax.f32 %v981_v11, 0.0  ;;  %v1105_v31 = vmax.f32 %v1000_v12, 0.0 }
 0x1d4   : > { %v942_v56 = vpop.f32.mrf.mxu2  ;;  %v961_v57 = vpop.f32.mrf.mxu3  ;;  %v1118_v41 = vmax.f32 %v1117_v35, %v1104_v30  ;;  %v1121_v42 = vmax.f32 %v1120_v36, %v1105_v31 }
 0x1d5   : > { %v962_v18 = vadd.f32 %v961_v57, %v591_v60  ;;  %v943_v37 = vadd.f32 %v942_v56, %v590_v6 }
 0x1d6   : > { %v1181_v53 = vrot.slane %v1118_v41, 4  ;;  %v1187_v54 = vrot.slane %v1121_v42, 4 }
 0x1d7   : > { %v1049_v61 = vpop.f32.mrf.mxu0  ;;  %v1068_v62 = vpop.f32.mrf.mxu1  ;;  %v1103_v34 = vmax.f32 %v962_v18, 0.0  ;;  %v1102_v48 = vmax.f32 %v943_v37, 0.0 }
 0x1d8   : > { %v1050_v59 = vadd.f32 %v1049_v61, %v596_v47  ;;  %v1069_v63 = vadd.f32 %v1068_v62, %v597_v49  ;;  %v1182_v4 = vmax.f32 %v1118_v41, %v1181_v53  ;;  %v1188_v5 = vmax.f32 %v1121_v42, %v1187_v54 }
 0x1d9   : > { %v1115_v46 = vmax.f32 %v1114_v40, %v1103_v34  ;;  %v1112_v60 = vmax.f32 %v1111_v50, %v1102_v48 }
 0x1da   : > { %v1084_v11 = vmax.f32 %v1050_v59, 0.0  ;;  %v1085_v61 = vmax.f32 %v1069_v63, 0.0  ;;  %v1189_v37 = vrot.slane %v1188_v5, 2 }
 0x1db   : > { %v1175_v58 = vrot.slane %v1115_v46, 4  ;;  %v1169_v17 = vrot.slane %v1112_v60, 4 }
 0x1dc   : > { %v2201_v14 = vpop.f32.mrf.mxu2  ;;  %v2203_v15 = vpop.f32.mrf.mxu3 }
 0x1dd   : > { %v1176_v10 = vmax.f32 %v1115_v46, %v1175_v58  ;;  %v1012_v19 = vadd.f32 %v2201_v14, %v594_v2  ;;  %v1031_v20 = vadd.f32 %v2203_v15, %v595_v3  ;;  %v1170_v38 = vmax.f32 %v1112_v60, %v1169_v17 }
 0x1df   : > { %v1051_v26 = vpop.f32.mrf.mxu0  ;;  %v1070_v27 = vpop.f32.mrf.mxu1  ;;  %v1177_v28 = vrot.slane %v1176_v10, 2  ;;  %v1082_v35 = vmax.f32 %v1012_v19, 0.0  ;;  %v1083_v14 = vmax.f32 %v1031_v20, 0.0 }
 0x1e0   : > { %v1052_v56 = vadd.f32 %v1051_v26, %v596_v47  ;;  %v1071_v57 = vadd.f32 %v1070_v27, %v597_v49  ;;  %v1183_v27 = vrot.slane %v1182_v4, 2 }
 0x1e1   : > { %v1178_v48 = vmax.f32 %v1176_v10, %v1177_v28 }
 0x1e2   : > { %v1092_v6 = vmax.f32 %v1052_v56, 0.0  ;;  %v1093_v7 = vmax.f32 %v1071_v57, 0.0  ;;  %v1190_v56 = vmax.f32 %v1188_v5, %v1189_v37  ;;  %v1171_v57 = vrot.slane %v1170_v38, 2 }
 0x1e4   : > { %v1013_v43 = vpop.f32.mrf.mxu2  ;;  %v1032_v44 = vpop.f32.mrf.mxu3  ;;  %v1128_v13 = vmax.f32 %v1084_v11, %v1092_v6  ;;  %v1131_v24 = vmax.f32 %v1085_v61, %v1093_v7  ;;  %v1179_v7 = vrot.slane %v1178_v48, 1 }
 0x1e5   : > { %v1014_v12 = vadd.f32 %v1013_v43, %v594_v2  ;;  %v1033_v16 = vadd.f32 %v1032_v44, %v595_v3 }
 0x1e6   : > { %v1180_v5 = vmax.f32 %v1178_v48, %v1179_v7 }
 0x1e7   : > { %v1054_v51 = vpop.f32.mrf.mxu0  ;;  %v1073_v52 = vpop.f32.mrf.mxu1  ;;  %v1090_v29 = vmax.f32 %v1014_v12, 0.0  ;;  %v1091_v30 = vmax.f32 %v1033_v16, 0.0 }
 0x1e8   : > { %v1055_v0 = vadd.f32 %v1054_v51, %v596_v47  ;;  %v1074_v1 = vadd.f32 %v1073_v52, %v597_v49 }
 0x1e9   : > { %v1122_v43 = vmax.f32 %v1082_v35, %v1090_v29  ;;  %v1125_v44 = vmax.f32 %v1083_v14, %v1091_v30 }
 0x1ea   : > { %v1100_v18 = vmax.f32 %v1055_v0, 0.0  ;;  %v1101_v62 = vmax.f32 %v1074_v1, 0.0 }
 0x1ec   : > { %v1016_v8 = vpop.f32.mrf.mxu2  ;;  %v1035_v9 = vpop.f32.mrf.mxu3  ;;  %v1129_v31 = vmax.f32 %v1128_v13, %v1100_v18  ;;  %v1132_v32 = vmax.f32 %v1131_v24, %v1101_v62  ;;  %v1225_v13 = vrot.slane %v1180_v5, 7 }
 0x1ed   : > { %v1017_v21 = vadd.f32 %v1016_v8, %v594_v2  ;;  %v1036_v55 = vadd.f32 %v1035_v9, %v595_v3  ;;  %v1172_v8 = vmax.f32 %v1170_v38, %v1171_v57 }
 0x1ef   : > { %v1056_v22 = vpop.f32.mrf.mxu0  ;;  %v1075_v23 = vpop.f32.mrf.mxu1  ;;  %v1098_v36 = vmax.f32 %v1017_v21, 0.0  ;;  %v1099_v15 = vmax.f32 %v1036_v55, 0.0  ;;  %v1173_v20 = vrot.slane %v1172_v8, 1 }
 0x1f0   : > { %v1057_v25 = vadd.f32 %v1056_v22, %v596_v47  ;;  %v1076_v26 = vadd.f32 %v1075_v23, %v597_v49  ;;  %v1184_v47 = vmax.f32 %v1182_v4, %v1183_v27  ;;  %v1191_v4 = vrot.slane %v1190_v56, 1 }
 0x1f1   : > { %v1123_v51 = vmax.f32 %v1122_v43, %v1098_v36  ;;  %v1126_v52 = vmax.f32 %v1125_v44, %v1099_v15  ;;  %v1174_v28 = vmax.f32 %v1172_v8, %v1173_v20 }
 0x1f2   : > { %v1108_v33 = vmax.f32 %v1057_v25, 0.0  ;;  %v1109_v34 = vmax.f32 %v1076_v26, 0.0  ;;  %v1185_v6 = vrot.slane %v1184_v47, 1  ;;  %v1192_v19 = vmax.f32 %v1190_v56, %v1191_v4 }
 0x1f4   : > { %v1130_v39 = vmax.f32 %v1129_v31, %v1108_v33  ;;  %v1133_v40 = vmax.f32 %v1132_v32, %v1109_v34  ;;  %v1018_v41 = vpop.f32.mrf.mxu2  ;;  %v1037_v42 = vpop.f32.mrf.mxu3  ;;  %v1186_v62 = vmax.f32 %v1184_v47, %v1185_v6  ;;  %v1227_v27 = vrot.slane %v1192_v19, 5 }
 0x1f5   : > { %v1019_v45 = vadd.f32 %v1018_v41, %v594_v2  ;;  %v1038_v46 = vadd.f32 %v1037_v42, %v595_v3  ;;  %v1233_v33 = vsel %vm1232_vm2, %v1174_v28, %v1225_v13 }
 0x1f6   : > { %v1205_v49 = vrot.slane %v1130_v39, 4  ;;  %v1211_v50 = vrot.slane %v1133_v40, 4  ;;  %v1226_v26 = vrot.slane %v1186_v62, 6 }
 0x1f7   : > { %v1106_v53 = vmax.f32 %v1019_v45, 0.0  ;;  %v1107_v54 = vmax.f32 %v1038_v46, 0.0 }
 0x1f8   : > { %v1206_v58 = vmax.f32 %v1130_v39, %v1205_v49  ;;  %v1212_v59 = vmax.f32 %v1133_v40, %v1211_v50  ;;  %v1235_v14 = vsel %vm1234_vm3, %v1226_v26, %v1227_v27 }
 0x1f9   : > { %v1124_v60 = vmax.f32 %v1123_v51, %v1106_v53  ;;  %v1127_v63 = vmax.f32 %v1126_v52, %v1107_v54  ;;  %v1237_v37 = vsel %vm1236_vm4, %v1233_v33, %v1235_v14 }
 0x1fa   : > { %v1207_v0 = vrot.slane %v1206_v58, 2  ;;  %v1213_v1 = vrot.slane %v1212_v59, 2 }
 0x1fb   : > { %v1193_v2 = vrot.slane %v1124_v60, 4  ;;  %v1199_v3 = vrot.slane %v1127_v63, 4 }
 0x1fc   : > { %v1208_v9 = vmax.f32 %v1206_v58, %v1207_v0  ;;  %v1214_v10 = vmax.f32 %v1212_v59, %v1213_v1 }
 0x1fd   : > { %v1194_v11 = vmax.f32 %v1124_v60, %v1193_v2  ;;  %v1200_v12 = vmax.f32 %v1127_v63, %v1199_v3 }
 0x1fe   : > { %v1209_v16 = vrot.slane %v1208_v9, 1  ;;  %v1215_v17 = vrot.slane %v1214_v10, 1 }
 0x1ff   : > { %v1195_v61 = vrot.slane %v1194_v11, 2  ;;  %v1201_v18 = vrot.slane %v1200_v12, 2 }
 0x200   : > { %v1210_v21 = vmax.f32 %v1208_v9, %v1209_v16  ;;  %v1216_v55 = vmax.f32 %v1214_v10, %v1215_v17 }
 0x201   : > { %v1196_v22 = vmax.f32 %v1194_v11, %v1195_v61  ;;  %v1202_v23 = vmax.f32 %v1200_v12, %v1201_v18 }
 0x202   : > { %v1230_v29 = vrot.slane %v1210_v21, 2  ;;  %v1231_v30 = vrot.slane %v1216_v55, 1 }
 0x203   : > { %v1197_v24 = vrot.slane %v1196_v22, 1  ;;  %v1203_v25 = vrot.slane %v1202_v23, 1 }
 0x204   : > { %v1241_v36 = vsel %vm1240_vm5, %v1230_v29, %v1231_v30 }
 0x205   : > { %v1198_v31 = vmax.f32 %v1196_v22, %v1197_v24  ;;  %v1204_v32 = vmax.f32 %v1202_v23, %v1203_v25 }
 0x207   : > { %v1228_v34 = vrot.slane %v1198_v31, 4  ;;  %v1229_v35 = vrot.slane %v1204_v32, 3 }
 0x209   : > { %v1239_v15 = vsel %vm1238_vm6, %v1228_v34, %v1229_v35 }
 0x20a   : > { %v1243_v38 = vsel %vm1242_vm7, %v1239_v15, %v1241_v36 }
 0x20b   : > { %v1245_v39 = vsel %vm1244_vm8, %v1237_v37, %v1243_v38 }
 0x20c   : > { %1247 = vst [vmem:[%s396_s13] sm:$0xff] %v1245_v39 }
 0x20d PF: > { %s21_s26 = sadd.s32 1, %s2036_s26   ;;  %s2235_s24 = smov %s2032_s25 }
 0x20e   : > { %p18_p8 = scmp.ge.s32.totalorder %s21_s26, 4   ;;  %s2236_s25 = smov %s2238_s18 }
 0x210   :  { %20 = sbr.rel (!%p18_p8) target bundleno = 5 (0x5), region = 111 }
 0x215   :  { %1267 = vsyncpa [#allocation4], 1 }
 0x216   :  { %1269 = vsyncpa [#allocation4 + $0x1], 1 }
 0x217   :  { %1270 = vsyncpa [#allocation6], 1 }
 0x218   :  { %1271 = vsyncpa [#allocation9], 1 }
 0x219   :  { %1272 = vsyncpa [#allocation12], 1 }

// kernel: _lambda_.7
= control target key start
LH: loop header
LB: loop body
LE: loop exit
PB: predicated region body
PF: predicated region fallthrough
CT: control target
= control target key end

     0   :  { %s2484_s0 = inlined_call_operand.vmem [shape: f32[8,1024], index: 0, kind: input, shape index: {}]   ;;  %s2485_s1 = inlined_call_operand.hbm [shape: bf16[1024,512], index: 1, kind: input, shape index: {}]   ;;  %s2486_s2 = inlined_call_operand.hbm [shape: f32[1,512], index: 2, kind: input, shape index: {}]   ;;  %s2487_s3 = inlined_call_operand.hbm [shape: bf16[512,256], index: 3, kind: input, shape index: {}]   ;;  %s2488_s4 = inlined_call_operand.hbm [shape: f32[1,256], index: 4, kind: input, shape index: {}]   ;;  %s2489_s5 = inlined_call_operand.hbm [shape: f32[256,128], index: 5, kind: input, shape index: {}]   ;;  %s2490_s6 = inlined_call_operand.hbm [shape: f32[1,128], index: 6, kind: input, shape index: {}]   ;;  %s2491_s7 = inlined_call_operand.vmem [shape: f32[8,128], index: 7, kind: output, shape index: {}]  }
   0x1   :  { %2493 = sst [smem:[#allocation18_spill]] %s2486_s2 }
   0x2   :  { %2494 = sst [smem:[#allocation19_spill]] %s2488_s4 }
   0x3   :  { %2495 = sst [smem:[#allocation20_spill]] %s2489_s5 }
   0x4   :  { %2496 = sst [smem:[#allocation21_spill]] %s2490_s6 }
   0x5   :  { %12 = vsyncpa [#allocation4], 0 }
   0x6   :  { %14 = vsyncpa [#allocation4 + $0x1], 0 }
   0x7   :  { %15 = vsyncpa [#allocation6], 0 }
   0x8   :  { %17 = vsyncpa [#allocation6 + $0x1], 0 }
   0x9   :  { %18 = vsyncpa [#allocation9], 0 }
   0xa   :  { %19 = vsyncpa [#allocation12], 0  ;;  %s2168_s24 = smov 0   ;;  %s2170_s25 = smov 0  }
   0xb   :  { %s2172_s26 = smov 0   ;;  %s2174_s27 = smov 0  }
   0xc LB: > { %s2187_s28 = sadd.s32 4294967295, %s2117_s27   ;;  %p66_p0 = scmp.ne.s32.totalorder %s2109_s25, %s2105_s24  ;;  %s2117_s27 = sphi %s2174_s27, %s2513_s27   ;;  %s2113_s26 = sphi %s2172_s26, %s2512_s26   ;;  %s2109_s25 = sphi %s2170_s25, %s2511_s25   ;;  %s2105_s24 = sphi %s2168_s24, %s2510_s24  }
   0xd   : > { %p67_p1 = scmp.eq.s32.totalorder %s2187_s28, 0  ;;  %p1380_p2 = scmp.ge.s32.totalorder %s2117_s27, 1 }
   0xe   : > { %p213_p3 = scmp.lt.s32.totalorder %s2117_s27, 5  ;;  %p1381_p4 = scmp.ne.s32.totalorder %s2187_s28, 0 }
   0xf   : > { %p2196_p5 = por %p67_p1, %p66_p0  ;;  %s2498_s4 = sld [smem:[#allocation19_spill]] }
  0x10   : > { %p2203_p6 = pnand %p1380_p2, %p213_p3  ;;  %s2119_s11 = smov [#allocation8]  }
  0x11   : > { %s230_s12 = sshll.u32 %s2119_s11, 4  ;;  %s2216_s14 = sadd.s32 1, %s2117_s27   ;;  %s231_s12 = int_to_ptr.vmem [resolvable:$true] %s230_s12 }
  0x12   : > { %p1821_p7 = pneg %p2203_p6  ;;  %s53_s15 = sadd.s32 1, %s2113_s26 }
  0x13   : > { %s50_s16 = ssub.s32 %s2117_s27, %s2216_s14  ;;  %p60_p10 = scmp.ne.s32.totalorder %s2113_s26, %s2109_s25 }
  0x14   : > { %p2211_p8 = pnand %p1821_p7, %p67_p1  ;;  %p51_p9 = scmp.eq.s32.totalorder %s50_s16, 0 }
  0x15   : > { %s228_s9 = sshll.u32 %s2498_s4, 4  ;;  %p61_p11 = scmp.eq.s32.totalorder %s2117_s27, 0  ;;  %s229_s9 = int_to_ptr.hbm [resolvable:$true] %s228_s9 }
  0x16   : > { %1824 = dma.hbm_to_vmem [thread:$0]  (!%p2211_p8), %s229_s9, 32, %s231_s12, [#allocation9]  }
  0x17   : > { %p1844_p12 = scmp.lt.s32.totalorder %s2117_s27, 4  ;;  %p62_p13 = por %p61_p11, %p60_p10 }
  0x18   : > { %s2228_s17 = scalar_select %p51_p9, %s2113_s26, %s53_s15  }
  0x19   : > { %s2231_s18 = sand.u32 1, %s2113_s26   ;;  %s288_s20 = sand.u32 1, %s2117_s27  }
  0x1a   : > { %2501 = sst [smem:[#allocation17_spill]] %s2228_s17  ;;  %p2235_p0 = pnand %p1844_p12, %p62_p13 }
  0x1b   : > { %s2503_s2 = sld [smem:[#allocation18_spill]]  ;;  %s291_s8 = scalar_lea.vmem [#allocation5], %s2231_s18 }
  0x1c   : > { %s298_s9 = sshll.u32 %s291_s8, 4  ;;  %s2245_s12 = scalar_lea.sflag [#allocation6], %s288_s20  ;;  %s299_s9 = int_to_ptr.vmem [resolvable:$true] %s298_s9 }
  0x1d   : > { %p1925_p3 = pneg %p2235_p0 }
  0x21   : > { %s294_s24 = scalar_lea.hbm %s2503_s2, %s2117_s27 }
  0x22   : > { %s296_s30 = sshll.u32 %s294_s24, 4  ;;  %s1928_s24 = scalar_lea.hbm %s2503_s2, 4  ;;  %s297_s30 = int_to_ptr.hbm [resolvable:$true] %s296_s30 }
  0x23   : > { %s1921_s15 = sshra.s32 %s297_s30, 4  ;;  %s1922_s15 = int_to_ptr.hbm [resolvable:$true] %s1921_s15 }
  0x24   : > { %s1923_s16 = scalar_lea.hbm %s1922_s15, 1  ;;  %p1929_p10 = scmp.lt.s32.totalorder %s1922_s15, %s2503_s2 }
  0x25   : > { %p1924_p2 = scmp.ne.s32.totalorder %s1922_s15, %s1923_s16  ;;  %p1930_p11 = scmp.lt.s32.totalorder %s1928_s24, %s1923_s16 }
  0x27   : > { %p1926_p7 = pnand %p1925_p3, %p1924_p2  ;;  %p1931_p12 = por %p1930_p11, %p1929_p10 }
  0x29   : > { %p1927_p9 = pneg %p1926_p7 }
  0x2b   : > { %p1932_p13 = pnand %p1931_p12, %p1927_p9 }
  0x2d   : > { %1935 = shalt.err (!%p1932_p13)
}
  0x2e   : > { %1837 = dma.hbm_to_vmem [thread:$0]  (!%p2235_p0), %s297_s30, 16, %s299_s9, %s2245_s12  }
  0x2f   : > { %s2504_s5 = sld [smem:[#allocation20_spill]]  ;;  %s2120_s23 = smov [#allocation10]  }
  0x30   : > { %s241_s19 = sshll.u32 %s2120_s23, 4  ;;  %s2505_s6 = sld [smem:[#allocation21_spill]]  ;;  %s242_s19 = int_to_ptr.vmem [resolvable:$true] %s241_s19 }
  0x31   : > { %s2492_s8 = smov 128   ;;  %s2122_s2 = smov 8  }
  0x32   : > { %s2123_s30 = smov [#allocation11]   ;;  %s1386_s11 = sshll.u32 %s2117_s27, 2 }
  0x33   : > { %s256_s9 = sshll.u32 %s2123_s30, 4  ;;  %s2506_s20 = sshll.u32 %s2231_s18, 9  ;;  %s257_s9 = int_to_ptr.vmem [resolvable:$true] %s256_s9 }
  0x34   : > { %s271_s23 = scalar_lea.vmem [#allocation3], %s2506_s20  ;;  %s268_s17 = scalar_lea.sflag [#allocation4], %s2231_s18 }
  0x35   : > { %s239_s22 = sshll.u32 %s2504_s5, 4  ;;  %s278_s15 = sshll.u32 %s271_s23, 4  ;;  %s240_s22 = int_to_ptr.hbm [resolvable:$true] %s239_s22  ;;  %s279_s15 = int_to_ptr.vmem [resolvable:$true] %s278_s15 }
  0x36   : > { %s254_s24 = sshll.u32 %s2505_s6, 4  ;;  %s275_s5 = scalar_lea.hbm %s2485_s1, %s1386_s11  ;;  %s255_s24 = int_to_ptr.hbm [resolvable:$true] %s254_s24 }
  0x37   : > { %1827 = dma.hbm_to_vmem [thread:$0]  (!%p2211_p8), %s240_s22, 4096, %s242_s19, [#allocation9], %s2492_s8, %s2492_s8, %s2122_s2  }
  0x38   : > { %1830 = dma.hbm_to_vmem [thread:$0]  (!%p2211_p8), %s255_s24, 16, %s257_s9, [#allocation12]  }
  0x39   : > { %s276_s6 = sshll.u32 %s275_s5, 4  ;;  %s2018_s30 = scalar_lea.hbm %s2485_s1, 2048  ;;  %s277_s6 = int_to_ptr.hbm [resolvable:$true] %s276_s6 }
  0x3a   : > { %s2011_s22 = sshra.s32 %s277_s6, 4  ;;  %s2012_s22 = int_to_ptr.hbm [resolvable:$true] %s2011_s22 }
  0x3b   : > { %s2013_s19 = scalar_lea.hbm %s2012_s22, 512  ;;  %p2019_p9 = scmp.lt.s32.totalorder %s2012_s22, %s2485_s1 }
  0x3c   : > { %p2014_p2 = scmp.ne.s32.totalorder %s2012_s22, %s2013_s19  ;;  %p2020_p10 = scmp.lt.s32.totalorder %s2018_s30, %s2013_s19 }
  0x3e   : > { %p2016_p7 = pnand %p2014_p2, %p1925_p3  ;;  %p2021_p11 = por %p2020_p10, %p2019_p9 }
  0x40   : > { %p2017_p8 = pneg %p2016_p7 }
  0x42   : > { %p2022_p12 = pnand %p2021_p11, %p2017_p8 }
  0x44   : > { %2025 = shalt.err (!%p2022_p12)
}
  0x45   : > { %s2124_s4 = smov 256   ;;  %s2125_s5 = smov 64  }
  0x46   : > { %s2126_s11 = smov 4   ;;  %s1722_s23 = sshll.u32 %s2117_s27, 7 }
  0x47   : > { %1834 = dma.hbm_to_vmem [thread:$0]  (!%p2235_p0), %s277_s6, 8192, %s279_s15, %s268_s17, %s2124_s4, %s2125_s5, %s2126_s11  }
  0x48   : > { %s2507_s16 = sshll.u32 %s2231_s18, 7  ;;  %s315_s22 = scalar_lea.hbm %s2487_s3, %s1722_s23 }
  0x49   : > { %s309_s13 = scalar_lea.vmem [#allocation7], %s2507_s16  ;;  %s316_s19 = sshll.u32 %s315_s22, 4  ;;  %s317_s19 = int_to_ptr.hbm [resolvable:$true] %s316_s19 }
  0x4a   : > { %s318_s24 = sshll.u32 %s309_s13, 4  ;;  %s2041_s30 = sshra.s32 %s317_s19, 4  ;;  %s319_s24 = int_to_ptr.vmem [resolvable:$true] %s318_s24  ;;  %s2042_s30 = int_to_ptr.hbm [resolvable:$true] %s2041_s30 }
  0x4b   : > { %s2043_s20 = scalar_lea.hbm %s2042_s30, 128  ;;  %s2048_s17 = scalar_lea.hbm %s2487_s3, 512 }
  0x4c   : > { %p2044_p13 = scmp.ne.s32.totalorder %s2042_s30, %s2043_s20  ;;  %p2049_p8 = scmp.lt.s32.totalorder %s2042_s30, %s2487_s3 }
  0x4d   : > { %p2050_p9 = scmp.lt.s32.totalorder %s2048_s17, %s2043_s20 }
  0x4e   : > { %p2046_p2 = pnand %p2044_p13, %p1925_p3 }
  0x4f   : > { %p2051_p10 = por %p2050_p9, %p2049_p8 }
  0x50   : > { %p2047_p7 = pneg %p2046_p2 }
  0x52   : > { %p2052_p11 = pnand %p2051_p10, %p2047_p7 }
  0x54   : > { %2055 = shalt.err (!%p2052_p11)
}
  0x55   : > { %s2508_s8 = smov 128   ;;  %330 = sbr.rel (%p2203_p6) target bundleno = 610 (0x262), region = 48 }
  0x56   : > { %1840 = dma.hbm_to_vmem [thread:$0]  (!%p2235_p0), %s317_s19, 2048, %s319_s24, %s2245_s12, %s2508_s8, %s2508_s8, %s2122_s2  }
  0x57   : > { %s2316_s4 = sand.u32 (!%p2203_p6), 1, %s2109_s25  }
  0x58   : > { %s1392_s5 = sshll.u32 (!%p2203_p6), %s2316_s4, 9  ;;  %s333_s11 = scalar_lea.sflag (!%p2203_p6), [#allocation4], %s2316_s4 }
  0x59   : > { %s2320_s23 = scalar_lea.vmem (!%p2203_p6), [#allocation3], %s1392_s5 }
  0x5a   : > { %2088 = dma.done.wait (%p2196_p5), %s333_s11, 8192  }
  0x5b   : > { %2090 = vsyncadd (%p2196_p5), %s333_s11, 4294959104  ;;  %s342_s2 = sand.u32 1, %s2187_s28   ;;  %s345_s21 = scalar_lea.vmem [#allocation5], %s2316_s4 }
  0x5c   : > { %s343_s10 = scalar_lea.sflag [#allocation6], %s342_s2 }
  0x5d   : > { %2092 = dma.done.wait (%p2196_p5), %s343_s10, 2064  }
  0x5e   : > { %2094 = vsyncadd (%p2196_p5), %s343_s10, 4294965232  ;;  %s1393_s12 = sshll.u32 %s2316_s4, 7 }
  0x5f   : > { %s2333_s16 = scalar_lea.vmem [#allocation7], %s1393_s12 }
  0x60   : > { %2096 = dma.done.wait (%p67_p1), [#allocation9], 4128  }
  0x61   : > { %2098 = vsyncadd (%p67_p1), [#allocation9], 4294963168 }
  0x62   : > { %2100 = dma.done.wait (%p67_p1), [#allocation12], 16  }
  0x63   : > { %2102 = vsyncadd (%p67_p1), [#allocation12], 4294967280  ;;  %410 = sbr.rel (%p1381_p4) target bundleno = 107 (0x6b), region = 76 }
  0x68   : > { %v2127_v0 = vmov 0.0  }
  0x69   : > { %411 = vst [vmem:[#allocation2] sm:$0xff] %v2127_v0 }
  0x6a   : > { %412 = vst [vmem:[#allocation2 + $0x8] sm:$0xff] %v2127_v0 }
  0x6b PF: > { %v1730_v1 = vld [vmem:[%s2320_s23 + $0x38] sm:$0xff]  ;;  %v1729_v5 = vld [vmem:[%s2320_s23 + $0x30] sm:$0xff]  ;;  %v1728_v9 = vld [vmem:[%s2320_s23 + $0x28] sm:$0xff]  ;;  %p1718_p1 = scmp.ne.s32.totalorder %s2187_s28, 3 }
  0x6c   : > { %v1738_v2 = vld [vmem:[%s2320_s23 + $0x78] sm:$0xff]  ;;  %945 = vmatpush.bf16.msra.mxu0 %v1730_v1  ;;  %v1737_v6 = vld [vmem:[%s2320_s23 + $0x70] sm:$0xff]  ;;  %v1736_v10 = vld [vmem:[%s2320_s23 + $0x68] sm:$0xff] }
  0x6d   : > { %v1746_v3 = vld [vmem:[%s2320_s23 + $0xb8] sm:$0xff]  ;;  %958 = vmatpush.bf16.msra.mxu1 %v1738_v2  ;;  %v1745_v7 = vld [vmem:[%s2320_s23 + $0xb0] sm:$0xff]  ;;  %v1744_v11 = vld [vmem:[%s2320_s23 + $0xa8] sm:$0xff] }
  0x6e   : > { %v1754_v4 = vld [vmem:[%s2320_s23 + $0xf8] sm:$0xff]  ;;  %971 = vmatpush.bf16.msra.mxu2 %v1746_v3  ;;  %v1753_v8 = vld [vmem:[%s2320_s23 + $0xf0] sm:$0xff]  ;;  %v1752_v12 = vld [vmem:[%s2320_s23 + $0xe8] sm:$0xff] }
  0x6f   : > { %984 = vmatpush.bf16.msra.mxu3 %v1754_v4  ;;  %v1727_v13 = vld [vmem:[%s2320_s23 + $0x20] sm:$0xff]  ;;  %v1726_v17 = vld [vmem:[%s2320_s23 + $0x18] sm:$0xff]  ;;  %v1725_v21 = vld [vmem:[%s2320_s23 + $0x10] sm:$0xff] }
  0x70   : > { %946 = vmatpush.bf16.msra.mxu0 %v1729_v5  ;;  %v1735_v14 = vld [vmem:[%s2320_s23 + $0x60] sm:$0xff]  ;;  %v1734_v18 = vld [vmem:[%s2320_s23 + $0x58] sm:$0xff]  ;;  %v1733_v22 = vld [vmem:[%s2320_s23 + $0x50] sm:$0xff] }
  0x71   : > { %959 = vmatpush.bf16.msra.mxu1 %v1737_v6  ;;  %v1743_v15 = vld [vmem:[%s2320_s23 + $0xa0] sm:$0xff]  ;;  %v1742_v19 = vld [vmem:[%s2320_s23 + $0x98] sm:$0xff]  ;;  %v1741_v23 = vld [vmem:[%s2320_s23 + $0x90] sm:$0xff] }
  0x72   : > { %972 = vmatpush.bf16.msra.mxu2 %v1745_v7  ;;  %v1751_v16 = vld [vmem:[%s2320_s23 + $0xe0] sm:$0xff]  ;;  %v1750_v20 = vld [vmem:[%s2320_s23 + $0xd8] sm:$0xff]  ;;  %v1749_v24 = vld [vmem:[%s2320_s23 + $0xd0] sm:$0xff] }
  0x73   : > { %985 = vmatpush.bf16.msra.mxu3 %v1753_v8  ;;  %v1724_v25 = vld [vmem:[%s2320_s23 + $0x8] sm:$0xff]  ;;  %v1723_v29 = vld [vmem:[%s2320_s23] sm:$0xff]  ;;  %v1762_v33 = vld [vmem:[%s2320_s23 + $0x138] sm:$0xff] }
  0x74   : > { %947 = vmatpush.bf16.msra.mxu0 %v1728_v9  ;;  %v1732_v26 = vld [vmem:[%s2320_s23 + $0x48] sm:$0xff]  ;;  %v1731_v30 = vld [vmem:[%s2320_s23 + $0x40] sm:$0xff]  ;;  %v413_v35 = vld [vmem:[%s2484_s0] sm:$0xff] }
  0x75   : > { %960 = vmatpush.bf16.msra.mxu1 %v1736_v10  ;;  %v1740_v27 = vld [vmem:[%s2320_s23 + $0x88] sm:$0xff]  ;;  %v1739_v31 = vld [vmem:[%s2320_s23 + $0x80] sm:$0xff]  ;;  %v1770_v36 = vld [vmem:[%s2320_s23 + $0x178] sm:$0xff]  ;;  %v549_v42 = vpack.c.bf16 %v413_v35, %v413_v35 }
  0x76   : > { %973 = vmatpush.bf16.msra.mxu2 %v1744_v11  ;;  %v1748_v28 = vld [vmem:[%s2320_s23 + $0xc8] sm:$0xff]  ;;  %v1747_v32 = vld [vmem:[%s2320_s23 + $0xc0] sm:$0xff]  ;;  %v414_v38 = vld [vmem:[%s2484_s0 + $0x8] sm:$0xff] }
  0x77   : > { %986 = vmatpush.bf16.msra.mxu3 %v1752_v12  ;;  %v415_v34 = vld [vmem:[%s2484_s0 + $0x10] sm:$0xff]  ;;  %v416_v37 = vld [vmem:[%s2484_s0 + $0x18] sm:$0xff]  ;;  %v1778_v39 = vld [vmem:[%s2320_s23 + $0x1b8] sm:$0xff]  ;;  %v550_v44 = vpack.c.bf16 %v414_v38, %v414_v38 }
  0x78   : > { %948 = vmatpush.bf16.msra.mxu0 %v1727_v13  ;;  %v1786_v40 = vld [vmem:[%s2320_s23 + $0x1f8] sm:$0xff]  ;;  %v551_v41 = vpack.c.bf16 %v415_v34, %v415_v34  ;;  %v552_v43 = vpack.c.bf16 %v416_v37, %v416_v37  ;;  %v1761_v45 = vld [vmem:[%s2320_s23 + $0x130] sm:$0xff]  ;;  %v1760_v49 = vld [vmem:[%s2320_s23 + $0x128] sm:$0xff] }
  0x79   : > { %961 = vmatpush.bf16.msra.mxu1 %v1735_v14  ;;  %v1769_v46 = vld [vmem:[%s2320_s23 + $0x170] sm:$0xff]  ;;  %v1768_v50 = vld [vmem:[%s2320_s23 + $0x168] sm:$0xff]  ;;  %v1759_v53 = vld [vmem:[%s2320_s23 + $0x120] sm:$0xff] }
  0x7a   : > { %974 = vmatpush.bf16.msra.mxu2 %v1743_v15  ;;  %v1777_v47 = vld [vmem:[%s2320_s23 + $0x1b0] sm:$0xff]  ;;  %v1776_v51 = vld [vmem:[%s2320_s23 + $0x1a8] sm:$0xff]  ;;  %v1767_v54 = vld [vmem:[%s2320_s23 + $0x160] sm:$0xff] }
  0x7b   : > { %987 = vmatpush.bf16.msra.mxu3 %v1751_v16  ;;  %v1785_v48 = vld [vmem:[%s2320_s23 + $0x1f0] sm:$0xff]  ;;  %v1784_v52 = vld [vmem:[%s2320_s23 + $0x1e8] sm:$0xff]  ;;  %v1775_v55 = vld [vmem:[%s2320_s23 + $0x1a0] sm:$0xff] }
  0x7c   : > { %949 = vmatpush.bf16.msra.mxu0 %v1726_v17  ;;  %v1783_v56 = vld [vmem:[%s2320_s23 + $0x1e0] sm:$0xff]  ;;  %v1758_v57 = vld [vmem:[%s2320_s23 + $0x118] sm:$0xff]  ;;  %v1757_v61 = vld [vmem:[%s2320_s23 + $0x110] sm:$0xff] }
  0x7d   : > { %962 = vmatpush.bf16.msra.mxu1 %v1734_v18  ;;  %v1766_v58 = vld [vmem:[%s2320_s23 + $0x158] sm:$0xff]  ;;  %v1765_v62 = vld [vmem:[%s2320_s23 + $0x150] sm:$0xff]  ;;  %v1756_v1 = vld [vmem:[%s2320_s23 + $0x108] sm:$0xff] }
  0x7e   : > { %975 = vmatpush.bf16.msra.mxu2 %v1742_v19  ;;  %v1774_v59 = vld [vmem:[%s2320_s23 + $0x198] sm:$0xff]  ;;  %v1773_v63 = vld [vmem:[%s2320_s23 + $0x190] sm:$0xff]  ;;  %v1764_v2 = vld [vmem:[%s2320_s23 + $0x148] sm:$0xff] }
  0x7f   : > { %988 = vmatpush.bf16.msra.mxu3 %v1750_v20  ;;  %v1782_v60 = vld [vmem:[%s2320_s23 + $0x1d8] sm:$0xff]  ;;  %v1781_v0 = vld [vmem:[%s2320_s23 + $0x1d0] sm:$0xff]  ;;  %v1772_v3 = vld [vmem:[%s2320_s23 + $0x188] sm:$0xff] }
  0x80   : > { %950 = vmatpush.bf16.msra.mxu0 %v1725_v21  ;;  %v1780_v4 = vld [vmem:[%s2320_s23 + $0x1c8] sm:$0xff]  ;;  %v1755_v5 = vld [vmem:[%s2320_s23 + $0x100] sm:$0xff]  ;;  %v417_v8 = vld [vmem:[%s2484_s0 + $0x20] sm:$0xff] }
  0x81   : > { %963 = vmatpush.bf16.msra.mxu1 %v1733_v22  ;;  %v1763_v6 = vld [vmem:[%s2320_s23 + $0x140] sm:$0xff]  ;;  %v418_v9 = vld [vmem:[%s2484_s0 + $0x28] sm:$0xff]  ;;  %v420_v12 = vld [vmem:[%s2484_s0 + $0x38] sm:$0xff]  ;;  %v553_v13 = vpack.c.bf16 %v417_v8, %v417_v8 }
  0x82   : > { %976 = vmatpush.bf16.msra.mxu2 %v1741_v23  ;;  %v1771_v7 = vld [vmem:[%s2320_s23 + $0x180] sm:$0xff]  ;;  %v554_v14 = vpack.c.bf16 %v418_v9, %v418_v9  ;;  %v556_v16 = vpack.c.bf16 %v420_v12, %v420_v12  ;;  %v1712_v17 = vld [vmem:[%s2333_s16 + $0x70] sm:$0xf]  ;;  %v1802_v18 = vld [vmem:[%s2333_s16 + $0x74] sm:$0xf0] }
  0x83   : > { %989 = vmatpush.bf16.msra.mxu3 %v1749_v24  ;;  %v1779_v10 = vld [vmem:[%s2320_s23 + $0x1c0] sm:$0xff]  ;;  %v1801_v19 = vld [vmem:[%s2333_s16 + $0x74] sm:$0xf]  ;;  %v1713_v20 = vor.u32 %v1802_v18, %v1712_v17  ;;  %v1800_v23 = vld [vmem:[%s2333_s16 + $0x64] sm:$0xf0] }
  0x84   : > { %951 = vmatpush.bf16.msra.mxu0 %v1724_v25  ;;  %v419_v11 = vld [vmem:[%s2484_s0 + $0x30] sm:$0xff]  ;;  %v1690_v38 = vld [vmem:[%s2333_s16 + $0x48] sm:$0xf0] }
  0x85   : > { %964 = vmatpush.bf16.msra.mxu1 %v1732_v26  ;;  %v555_v15 = vpack.c.bf16 %v419_v11, %v419_v11  ;;  %v1714_v21 = vld [vmem:[%s2333_s16 + $0x78] sm:$0xf0]  ;;  %v1704_v22 = vld [vmem:[%s2333_s16 + $0x60] sm:$0xf]  ;;  %v1799_v25 = vld [vmem:[%s2333_s16 + $0x64] sm:$0xf] }
  0x86   : > { %977 = vmatpush.bf16.msra.mxu2 %v1740_v27  ;;  %v1717_v24 = vor.u32 %v1801_v19, %v1714_v21  ;;  %v1706_v26 = vld [vmem:[%s2333_s16 + $0x68] sm:$0xf0]  ;;  %v1705_v27 = vor.u32 %v1800_v23, %v1704_v22  ;;  %v1688_v35 = vld [vmem:[%s2333_s16 + $0x40] sm:$0xf]  ;;  %v1795_v37 = vld [vmem:[%s2333_s16 + $0x44] sm:$0xf] }
  0x87   : > { %990 = vmatpush.bf16.msra.mxu3 %v1748_v28  ;;  %v1709_v28 = vor.u32 %v1799_v25, %v1706_v26 }
  0x88   : > { %952 = vmatpush.bf16.msra.mxu0 %v1723_v29  ;;  %v1696_v29 = vld [vmem:[%s2333_s16 + $0x50] sm:$0xf] }
  0x89   : > { %965 = vmatpush.bf16.msra.mxu1 %v1731_v30  ;;  %v1798_v30 = vld [vmem:[%s2333_s16 + $0x54] sm:$0xf0] }
  0x8a   : > { %978 = vmatpush.bf16.msra.mxu2 %v1739_v31  ;;  %v1797_v31 = vld [vmem:[%s2333_s16 + $0x54] sm:$0xf] }
  0x8b   : > { %991 = vmatpush.bf16.msra.mxu3 %v1747_v32  ;;  %953 = vmatmul.bf16.vlgmr.msra.gmra.mxu0 %v549_v42  ;;  %v1697_v32 = vor.u32 %v1798_v30, %v1696_v29  ;;  %v1794_v42 = vld [vmem:[%s2333_s16 + $0x34] sm:$0xf0] }
  0x8c   : > { %997 = vmatpush.bf16.msrb.mxu0 %v1762_v33  ;;  %966 = vmatmul.bf16.vlgmr.msra.gmra.mxu1 %v550_v44  ;;  %v1698_v33 = vld [vmem:[%s2333_s16 + $0x58] sm:$0xf0] }
  0x8d   : > { %1010 = vmatpush.bf16.msrb.mxu1 %v1770_v36  ;;  %979 = vmatmul.bf16.vlgmr.msra.gmra.mxu2 %v551_v41  ;;  %v1701_v34 = vor.u32 %v1797_v31, %v1698_v33  ;;  %v1796_v36 = vld [vmem:[%s2333_s16 + $0x44] sm:$0xf0]  ;;  %v1680_v41 = vld [vmem:[%s2333_s16 + $0x30] sm:$0xf]  ;;  %v1068_v29 = vld [vmem:[#allocation2 + $0x8] sm:$0xff] }
  0x8e   : > { %1023 = vmatpush.bf16.msrb.mxu2 %v1778_v39  ;;  %992 = vmatmul.bf16.vlgmr.msra.gmra.mxu3 %v552_v43  ;;  %v1689_v39 = vor.u32 %v1796_v36, %v1688_v35  ;;  %v1793_v43 = vld [vmem:[%s2333_s16 + $0x34] sm:$0xf]  ;;  %v1681_v44 = vor.u32 %v1794_v42, %v1680_v41 }
  0x8f   : > { %1036 = vmatpush.bf16.msrb.mxu3 %v1786_v40  ;;  %v1693_v40 = vor.u32 %v1795_v37, %v1690_v38 }
  0x90   : > { %998 = vmatpush.bf16.msrb.mxu0 %v1761_v45  ;;  %v1682_v45 = vld [vmem:[%s2333_s16 + $0x38] sm:$0xf0] }
  0x91   : > { %1011 = vmatpush.bf16.msrb.mxu1 %v1769_v46  ;;  %v1685_v46 = vor.u32 %v1793_v43, %v1682_v45 }
  0x92   : > { %1024 = vmatpush.bf16.msrb.mxu2 %v1777_v47  ;;  %v1672_v47 = vld [vmem:[%s2333_s16 + $0x20] sm:$0xf] }
  0x93   : > { %1037 = vmatpush.bf16.msrb.mxu3 %v1785_v48  ;;  %v1792_v48 = vld [vmem:[%s2333_s16 + $0x24] sm:$0xf0] }
  0x94   : > { %999 = vmatpush.bf16.msrb.mxu0 %v1760_v49  ;;  %v1791_v49 = vld [vmem:[%s2333_s16 + $0x24] sm:$0xf] }
  0x95   : > { %1012 = vmatpush.bf16.msrb.mxu1 %v1768_v50 }
  0x96   : > { %1025 = vmatpush.bf16.msrb.mxu2 %v1776_v51  ;;  %v1673_v51 = vor.u32 %v1792_v48, %v1672_v47 }
  0x97   : > { %1038 = vmatpush.bf16.msrb.mxu3 %v1784_v52  ;;  %v1674_v52 = vld [vmem:[%s2333_s16 + $0x28] sm:$0xf0] }
  0x98   : > { %1000 = vmatpush.bf16.msrb.mxu0 %v1759_v53 }
  0x99   : > { %1013 = vmatpush.bf16.msrb.mxu1 %v1767_v54  ;;  %v1677_v54 = vor.u32 %v1791_v49, %v1674_v52 }
  0x9a   : > { %1026 = vmatpush.bf16.msrb.mxu2 %v1775_v55  ;;  %v1664_v55 = vld [vmem:[%s2333_s16 + $0x10] sm:$0xf] }
  0x9b   : > { %1039 = vmatpush.bf16.msrb.mxu3 %v1783_v56  ;;  %v1790_v56 = vld [vmem:[%s2333_s16 + $0x14] sm:$0xf0] }
  0x9c   : > { %1001 = vmatpush.bf16.msrb.mxu0 %v1758_v57  ;;  %v1789_v57 = vld [vmem:[%s2333_s16 + $0x14] sm:$0xf] }
  0x9d   : > { %1014 = vmatpush.bf16.msrb.mxu1 %v1766_v58  ;;  %v1665_v58 = vor.u32 %v1790_v56, %v1664_v55 }
  0x9e   : > { %1027 = vmatpush.bf16.msrb.mxu2 %v1774_v59  ;;  %v1666_v59 = vld [vmem:[%s2333_s16 + $0x18] sm:$0xf0] }
  0x9f   : > { %1040 = vmatpush.bf16.msrb.mxu3 %v1782_v60  ;;  %v1669_v60 = vor.u32 %v1789_v57, %v1666_v59 }
  0xa0   : > { %1002 = vmatpush.bf16.msrb.mxu0 %v1757_v61 }
  0xa1   : > { %1015 = vmatpush.bf16.msrb.mxu1 %v1765_v62 }
  0xa2   : > { %1028 = vmatpush.bf16.msrb.mxu2 %v1773_v63  ;;  %v1656_v63 = vld [vmem:[%s2333_s16] sm:$0xf] }
  0xa3   : > { %1041 = vmatpush.bf16.msrb.mxu3 %v1781_v0  ;;  %v1788_v0 = vld [vmem:[%s2333_s16 + $0x4] sm:$0xf0] }
  0xa4   : > { %1003 = vmatpush.bf16.msrb.mxu0 %v1756_v1  ;;  %v1787_v1 = vld [vmem:[%s2333_s16 + $0x4] sm:$0xf] }
  0xa5   : > { %1016 = vmatpush.bf16.msrb.mxu1 %v1764_v2 }
  0xa6   : > { %1029 = vmatpush.bf16.msrb.mxu2 %v1772_v3  ;;  %v1657_v3 = vor.u32 %v1788_v0, %v1656_v63 }
  0xa7   : > { %1042 = vmatpush.bf16.msrb.mxu3 %v1780_v4  ;;  %v1658_v4 = vld [vmem:[%s2333_s16 + $0x8] sm:$0xf0] }
  0xa8   : > { %1004 = vmatpush.bf16.msrb.mxu0 %v1755_v5 }
  0xa9   : > { %1017 = vmatpush.bf16.msrb.mxu1 %v1763_v6  ;;  %v1661_v6 = vor.u32 %v1787_v1, %v1658_v4 }
  0xaa   : > { %1030 = vmatpush.bf16.msrb.mxu2 %v1771_v7  ;;  %v1889_v7 = vld [vmem:[%s345_s21] ss:$0 sm:$0xff] }
  0xab   : > { %1043 = vmatpush.bf16.msrb.mxu3 %v1779_v10  ;;  %1005 = vmatmul.bf16.vlgmr.msrb.gmra.mxu0 %v553_v13 }
  0xac   : > { %1018 = vmatmul.bf16.vlgmr.msrb.gmra.mxu1 %v554_v14  ;;  %1149 = vmatpush.bf16.msra.mxu0 %v1713_v20 }
  0xad   : > { %1031 = vmatmul.bf16.vlgmr.msrb.gmra.mxu2 %v555_v15  ;;  %1162 = vmatpush.bf16.msra.mxu1 %v1717_v24 }
  0xae   : > { %1044 = vmatmul.bf16.vlgmr.msrb.gmra.mxu3 %v556_v16 }
  0xb0   : > { %1150 = vmatpush.bf16.msra.mxu0 %v1705_v27 }
  0xb1   : > { %1163 = vmatpush.bf16.msra.mxu1 %v1709_v28  ;;  %v1067_v28 = vld [vmem:[#allocation2] sm:$0xff] }
  0xb4   : > { %1151 = vmatpush.bf16.msra.mxu0 %v1697_v32 }
  0xb5   : > { %1164 = vmatpush.bf16.msra.mxu1 %v1701_v34 }
  0xb8   : > { %1152 = vmatpush.bf16.msra.mxu0 %v1689_v39 }
  0xb9   : > { %1165 = vmatpush.bf16.msra.mxu1 %v1693_v40 }
  0xbc   : > { %1153 = vmatpush.bf16.msra.mxu0 %v1681_v44 }
  0xbd   : > { %1166 = vmatpush.bf16.msra.mxu1 %v1685_v46 }
  0xc0   : > { %1154 = vmatpush.bf16.msra.mxu0 %v1673_v51 }
  0xc1   : > { %1167 = vmatpush.bf16.msra.mxu1 %v1677_v54 }
  0xc4   : > { %1155 = vmatpush.bf16.msra.mxu0 %v1665_v58 }
  0xc5   : > { %1168 = vmatpush.bf16.msra.mxu1 %v1669_v60 }
  0xc8   : > { %1156 = vmatpush.bf16.msra.mxu0 %v1657_v3 }
  0xc9   : > { %1169 = vmatpush.bf16.msra.mxu1 %v1661_v6 }
 0x108   : > { %v954_v50 = vpop.f32.mrf.mxu0 }
 0x109   : > { %v967_v53 = vpop.f32.mrf.mxu1  ;;  %v955_v10 = vadd.f32 %v1889_v7, %v954_v50 }
 0x10b   : > { %v968_v11 = vadd.f32 %v967_v53, %v955_v10 }
 0x110   : > { %v980_v61 = vpop.f32.mrf.mxu2  ;;  %v956_v2 = vpop.f32.mrf.mxu0 }
 0x111   : > { %v993_v62 = vpop.f32.mrf.mxu3  ;;  %v969_v5 = vpop.f32.mrf.mxu1  ;;  %v981_v12 = vadd.f32 %v980_v61, %v968_v11 }
 0x113   : > { %v994_v13 = vadd.f32 %v993_v62, %v981_v12 }
 0x118   : > { %v982_v8 = vpop.f32.mrf.mxu2 }
 0x119   : > { %v995_v9 = vpop.f32.mrf.mxu3 }
 0x128   : > { %v1006_v14 = vpop.f32.mrf.mxu0 }
 0x129   : > { %v1019_v15 = vpop.f32.mrf.mxu1  ;;  %v1007_v16 = vadd.f32 %v1006_v14, %v994_v13 }
 0x12b   : > { %v1020_v17 = vadd.f32 %v1019_v15, %v1007_v16 }
 0x130   : > { %v1032_v18 = vpop.f32.mrf.mxu2  ;;  %v1008_v21 = vpop.f32.mrf.mxu0 }
 0x131   : > { %v1045_v19 = vpop.f32.mrf.mxu3  ;;  %v1033_v20 = vadd.f32 %v1032_v18, %v1020_v17  ;;  %v1021_v22 = vpop.f32.mrf.mxu1 }
 0x133   : > { %v1046_v23 = vadd.f32 %v1045_v19, %v1033_v20 }
 0x135   : > { %v1049_v24 = vmax.f32 %v1046_v23, 0.0 }
 0x137   : > { %v1066_v25 = vpack.c.bf16 %v1049_v24, %v1049_v24 }
 0x138   : > { %v1034_v26 = vpop.f32.mrf.mxu2 }
 0x139   : > { %v1047_v27 = vpop.f32.mrf.mxu3  ;;  %1157 = vmatmul.bf16.vlgmr.msra.gmra.mxu0 %v1066_v25  ;;  %1170 = vmatmul.bf16.vlgmr.msra.gmra.mxu1 %v1066_v25 }
 0x1b6   : > { %v1158_v30 = vpop.f32.mrf.mxu0  ;;  %v1171_v31 = vpop.f32.mrf.mxu1 }
 0x1b7   : > { %v1175_v32 = vadd.f32 %v1158_v30, %v1067_v28  ;;  %v1176_v33 = vadd.f32 %v1171_v31, %v1068_v29 }
 0x1b9   : > { %1177 = vst [vmem:[#allocation2] sm:$0xff] %v1175_v32 }
 0x1ba   : > { %1178 = vst [vmem:[#allocation2 + $0x8] sm:$0xff] %v1176_v33  ;;  %1182 = sbr.rel (%p1718_p1) target bundleno = 610 (0x262), region = 80 }
 0x1be   : > { %v1160_v34 = vpop.f32.mrf.mxu0  ;;  %v1173_v35 = vpop.f32.mrf.mxu1 }
 0x1bf   : > { %v1210_v36 = vld [vmem:[#allocation10 + $0x78] sm:$0xff]  ;;  %v1209_v37 = vld [vmem:[#allocation10 + $0x70] sm:$0xff]  ;;  %v1208_v40 = vld [vmem:[#allocation10 + $0x68] sm:$0xff] }
 0x1c0   : > { %v1226_v38 = vld [vmem:[#allocation10 + $0xf8] sm:$0xff]  ;;  %1231 = vmatpush.msra.mxu0 %v1210_v36  ;;  %v1225_v39 = vld [vmem:[#allocation10 + $0xf0] sm:$0xff]  ;;  %v1224_v41 = vld [vmem:[#allocation10 + $0xe8] sm:$0xff] }
 0x1c1   : > { %1251 = vmatpush.msra.mxu1 %v1226_v38  ;;  %v1207_v42 = vld [vmem:[#allocation10 + $0x60] sm:$0xff]  ;;  %v1206_v44 = vld [vmem:[#allocation10 + $0x58] sm:$0xff]  ;;  %v1205_v46 = vld [vmem:[#allocation10 + $0x50] sm:$0xff] }
 0x1c2   : > { %1232 = vmatpush.msra.mxu0 %v1209_v37  ;;  %v1223_v43 = vld [vmem:[#allocation10 + $0xe0] sm:$0xff]  ;;  %v1222_v45 = vld [vmem:[#allocation10 + $0xd8] sm:$0xff]  ;;  %v1221_v47 = vld [vmem:[#allocation10 + $0xd0] sm:$0xff] }
 0x1c3   : > { %1252 = vmatpush.msra.mxu1 %v1225_v39  ;;  %v1204_v48 = vld [vmem:[#allocation10 + $0x48] sm:$0xff]  ;;  %v1203_v50 = vld [vmem:[#allocation10 + $0x40] sm:$0xff]  ;;  %v1202_v52 = vld [vmem:[#allocation10 + $0x38] sm:$0xff] }
 0x1c4   : > { %1233 = vmatpush.msra.mxu0 %v1208_v40  ;;  %v1220_v49 = vld [vmem:[#allocation10 + $0xc8] sm:$0xff]  ;;  %v1219_v51 = vld [vmem:[#allocation10 + $0xc0] sm:$0xff]  ;;  %v1218_v53 = vld [vmem:[#allocation10 + $0xb8] sm:$0xff] }
 0x1c5   : > { %1253 = vmatpush.msra.mxu1 %v1224_v41  ;;  %v1201_v54 = vld [vmem:[#allocation10 + $0x30] sm:$0xff]  ;;  %v1185_v56 = vld [vmem:[#allocation8] sm:$0x3]  ;;  %v1200_v57 = vld [vmem:[#allocation10 + $0x28] sm:$0xff] }
 0x1c6   : > { %1234 = vmatpush.msra.mxu0 %v1207_v42  ;;  %v1217_v55 = vld [vmem:[#allocation10 + $0xb0] sm:$0xff]  ;;  %v1216_v58 = vld [vmem:[#allocation10 + $0xa8] sm:$0xff]  ;;  %v1199_v59 = vld [vmem:[#allocation10 + $0x20] sm:$0xff]  ;;  %v1187_v61 = vperm.slane %v1185_v56, 0  ;;  %v1188_v62 = vperm.slane %v1185_v56, 1 }
 0x1c7   : > { %1254 = vmatpush.msra.mxu1 %v1223_v43  ;;  %v1215_v60 = vld [vmem:[#allocation10 + $0xa0] sm:$0xff]  ;;  %v1183_v63 = vld [vmem:[#allocation2] sm:$0xff]  ;;  %v1184_v0 = vld [vmem:[#allocation2 + $0x8] sm:$0xff] }
 0x1c8   : > { %1235 = vmatpush.msra.mxu0 %v1206_v44  ;;  %v1198_v1 = vld [vmem:[#allocation10 + $0x18] sm:$0xff]  ;;  %v1197_v3 = vld [vmem:[#allocation10 + $0x10] sm:$0xff]  ;;  %v1191_v5 = vadd.f32 %v1187_v61, %v1183_v63  ;;  %v1192_v6 = vadd.f32 %v1188_v62, %v1184_v0  ;;  %v1196_v7 = vld [vmem:[#allocation10 + $0x8] sm:$0xff] }
 0x1c9   : > { %1255 = vmatpush.msra.mxu1 %v1222_v45  ;;  %v1214_v2 = vld [vmem:[#allocation10 + $0x98] sm:$0xff]  ;;  %v1213_v4 = vld [vmem:[#allocation10 + $0x90] sm:$0xff]  ;;  %v1212_v8 = vld [vmem:[#allocation10 + $0x88] sm:$0xff] }
 0x1ca   : > { %1236 = vmatpush.msra.mxu0 %v1205_v46  ;;  %v1195_v9 = vld [vmem:[#allocation10] sm:$0xff]  ;;  %v1193_v10 = vmax.f32 %v1191_v5, 0.0  ;;  %v1194_v12 = vmax.f32 %v1192_v6, 0.0 }
 0x1cb   : > { %1256 = vmatpush.msra.mxu1 %v1221_v47  ;;  %v1211_v11 = vld [vmem:[#allocation10 + $0x80] sm:$0xff] }
 0x1cc   : > { %1237 = vmatpush.msra.mxu0 %v1204_v48  ;;  %v1890_v13 = vld [vmem:[#allocation11] ss:$0 sm:$0xff] }
 0x1cd   : > { %1257 = vmatpush.msra.mxu1 %v1220_v49 }
 0x1ce   : > { %1238 = vmatpush.msra.mxu0 %v1203_v50 }
 0x1cf   : > { %1258 = vmatpush.msra.mxu1 %v1219_v51 }
 0x1d0   : > { %1239 = vmatpush.msra.mxu0 %v1202_v52 }
 0x1d1   : > { %1259 = vmatpush.msra.mxu1 %v1218_v53 }
 0x1d2   : > { %1240 = vmatpush.msra.mxu0 %v1201_v54 }
 0x1d3   : > { %1260 = vmatpush.msra.mxu1 %v1217_v55 }
 0x1d4   : > { %1241 = vmatpush.msra.mxu0 %v1200_v57 }
 0x1d5   : > { %1261 = vmatpush.msra.mxu1 %v1216_v58 }
 0x1d6   : > { %1242 = vmatpush.msra.mxu0 %v1199_v59 }
 0x1d7   : > { %1262 = vmatpush.msra.mxu1 %v1215_v60 }
 0x1d8   : > { %1243 = vmatpush.msra.mxu0 %v1198_v1 }
 0x1d9   : > { %1263 = vmatpush.msra.mxu1 %v1214_v2 }
 0x1da   : > { %1244 = vmatpush.msra.mxu0 %v1197_v3 }
 0x1db   : > { %1264 = vmatpush.msra.mxu1 %v1213_v4 }
 0x1dc   : > { %1245 = vmatpush.msra.mxu0 %v1196_v7 }
 0x1dd   : > { %1265 = vmatpush.msra.mxu1 %v1212_v8 }
 0x1de   : > { %1246 = vmatpush.msra.mxu0 %v1195_v9 }
 0x1df   : > { %1266 = vmatpush.msra.mxu1 %v1211_v11  ;;  %1247 = vmatmul.f32.vlgmr.msra.gmra.mxu0 %v1193_v10 }
 0x1e0   : > { %1267 = vmatmul.f32.vlgmr.msra.gmra.mxu1 %v1194_v12 }
 0x25c   : > { %v1248_v14 = vpop.f32.mrf.mxu0 }
 0x25d   : > { %v1268_v15 = vpop.f32.mrf.mxu1  ;;  %v1249_v16 = vadd.f32 %v1890_v13, %v1248_v14 }
 0x25f   : > { %v1269_v17 = vadd.f32 %v1268_v15, %v1249_v16 }
 0x261   : > { %1271 = vst [vmem:[%s2491_s7] sm:$0xff] %v1269_v17 }
 0x262 PF: > { %s2509_s23 = sld [smem:[#allocation17_spill]]  ;;  %p22_p4 = scmp.ge.s32.totalorder %s2216_s14, 6  }
 0x263   : > { %s2510_s24 = smov %s2109_s25  ;;  %s2511_s25 = smov %s2113_s26 }
 0x264   : > { %s2513_s27 = smov %s2216_s14  ;;  %24 = sbr.rel (!%p22_p4) target bundleno = 12 (0xc), region = 128 }
 0x268   : > { %s2512_s26 = smov %s2509_s23 }
 0x269   :  { %1283 = vsyncpa [#allocation4], 1 }
 0x26a   :  { %1285 = vsyncpa [#allocation4 + $0x1], 1 }
 0x26b   :  { %1286 = vsyncpa [#allocation6], 1 }
 0x26c   :  { %1288 = vsyncpa [#allocation6 + $0x1], 1 }
 0x26d   :  { %1289 = vsyncpa [#allocation9], 1 }
 0x26e   :  { %1290 = vsyncpa [#allocation12], 1 }

// kernel: _lambda_.8
= control target key start
LH: loop header
LB: loop body
LE: loop exit
PB: predicated region body
PF: predicated region fallthrough
CT: control target
= control target key end

     0   :  { %14 = vsyncpa [#allocation4], 0  ;;  %s2466_s0 = inlined_call_operand.vmem [shape: f32[2,32,8], index: 0, kind: input, shape index: {}]   ;;  %s2467_s1 = inlined_call_operand.vmem [shape: f32[2,8,64], index: 1, kind: input, shape index: {}]   ;;  %s2468_s2 = inlined_call_operand.hbm [shape: f32[1,64], index: 2, kind: input, shape index: {}]   ;;  %s2469_s3 = inlined_call_operand.hbm [shape: f32[64,64], index: 3, kind: input, shape index: {}]   ;;  %s2470_s4 = inlined_call_operand.hbm [shape: f32[1,64], index: 4, kind: input, shape index: {}]   ;;  %s2471_s5 = inlined_call_operand.hbm [shape: f32[64,128], index: 5, kind: input, shape index: {}]   ;;  %s2472_s6 = inlined_call_operand.hbm [shape: f32[1,128], index: 6, kind: input, shape index: {}]   ;;  %s2473_s7 = inlined_call_operand.hbm [shape: bf16[128,1024], index: 7, kind: input, shape index: {}]   ;;  %s2474_s8 = inlined_call_operand.hbm [shape: f32[1,1024], index: 8, kind: input, shape index: {}]   ;;  %s2475_s9 = inlined_call_operand.vmem [shape: f32[2,1,1024], index: 9, kind: output, shape index: {}]  }
   0x1   :  { %15 = vsyncpa [#allocation6], 0 }
   0x2   :  { %16 = vsyncpa [#allocation9], 0 }
   0x3   :  { %17 = vsyncpa [#allocation12], 0  ;;  %s2312_s30 = smov 0   ;;  %s2314_s10 = smov 0  }
   0x4   :  { %s2316_s11 = smov 0  }
   0x5 LB: > { %s290_s14 = sshll.u32 %s2469_s3, 4  ;;  %s1541_s15 = sadd.s32 4294967295, %s2249_s11   ;;  %s2249_s11 = sphi %s2316_s11, %s23_s11   ;;  %s2245_s10 = sphi %s2314_s10, %s2480_s10   ;;  %s2241_s30 = sphi %s2312_s30, %s2479_s30   ;;  %s291_s14 = int_to_ptr.hbm [resolvable:$true] %s290_s14 }
   0x6   : > { %p1543_p0 = scmp.ge.s32.totalorder %s2249_s11, 1  ;;  %p267_p1 = scmp.lt.s32.totalorder %s2249_s11, 3 }
   0x7   : > { %p2333_p2 = scmp.eq.s32.totalorder %s1541_s15, 0  ;;  %s2251_s18 = smov [#allocation5]  }
   0x8   : > { %p2337_p3 = pnand %p1543_p0, %p267_p1  ;;  %s292_s19 = sshll.u32 %s2251_s18, 4  ;;  %s293_s19 = int_to_ptr.vmem [resolvable:$true] %s292_s19 }
   0x9   : > { %s316_s22 = sshll.u32 %s2471_s5, 4  ;;  %s2252_s24 = smov [#allocation8]   ;;  %s317_s22 = int_to_ptr.hbm [resolvable:$true] %s316_s22 }
   0xa   : > { %p1927_p4 = pneg %p2337_p3  ;;  %s318_s25 = sshll.u32 %s2252_s24, 4  ;;  %s319_s25 = int_to_ptr.vmem [resolvable:$true] %s318_s25 }
   0xb   : > { %s342_s28 = sshll.u32 %s2473_s7, 4  ;;  %s2253_s29 = smov 128   ;;  %s343_s28 = int_to_ptr.hbm [resolvable:$true] %s342_s28 }
   0xc   : > { %p2348_p5 = pnand %p2333_p2, %p1927_p4  ;;  %s2254_s12 = smov 8  }
   0xd   : > { %s2255_s13 = smov [#allocation11]   ;;  %s2256_s18 = smov 512  }
   0xe   : > { %1933 = dma.hbm_to_vmem [thread:$0]  (!%p2348_p5), %s291_s14, 1024, %s293_s19, [#allocation6], %s2253_s29, %s2253_s29, %s2254_s12  }
   0xf   : > { %1939 = dma.hbm_to_vmem [thread:$0]  (!%p2348_p5), %s317_s22, 1024, %s319_s25, [#allocation9], %s2253_s29, %s2253_s29, %s2254_s12  }
  0x10   : > { %s344_s15 = sshll.u32 %s2255_s13, 4  ;;  %s2257_s20 = smov 32   ;;  %s345_s15 = int_to_ptr.vmem [resolvable:$true] %s344_s15 }
  0x11   : > { %1945 = dma.hbm_to_vmem [thread:$0]  (!%p2348_p5), %s343_s28, 8192, %s345_s15, [#allocation12], %s2256_s18, %s2256_s18, %s2257_s20  }
  0x12   : > { %s35_s21 = sadd.s32 1, %s2245_s10  ;;  %s279_s27 = sshll.u32 %s2468_s2, 4  ;;  %s280_s27 = int_to_ptr.hbm [resolvable:$true] %s279_s27 }
  0x13   : > { %p37_p6 = scmp.ge.s32.totalorder %s35_s21, 2  ;;  %s305_s22 = sshll.u32 %s2470_s4, 4  ;;  %s306_s22 = int_to_ptr.hbm [resolvable:$true] %s305_s22 }
  0x14   : > { %s2258_s25 = smov [#allocation3]   ;;  %s2259_s28 = smov [#allocation7]  }
  0x15   : > { %s2482_s21 = smov (%p37_p6, %s35_s21), 0  ;;  %s281_s29 = sshll.u32 %s2258_s25, 4  ;;  %s282_s29 = int_to_ptr.vmem [resolvable:$true] %s281_s29 }
  0x16   : > { %1930 = dma.hbm_to_vmem [thread:$0]  (!%p2348_p5), %s280_s27, 16, %s282_s29, [#allocation4]  }
  0x17   : > { %s307_s12 = sshll.u32 %s2259_s28, 4  ;;  %s331_s18 = sshll.u32 %s2472_s6, 4  ;;  %s308_s12 = int_to_ptr.vmem [resolvable:$true] %s307_s12  ;;  %s332_s18 = int_to_ptr.hbm [resolvable:$true] %s331_s18 }
  0x18   : > { %1936 = dma.hbm_to_vmem [thread:$0]  (!%p2348_p5), %s306_s22, 16, %s308_s12, [#allocation6]  }
  0x19   : > { %s357_s26 = sshll.u32 %s2474_s8, 4  ;;  %s2260_s14 = smov [#allocation10]   ;;  %s358_s26 = int_to_ptr.hbm [resolvable:$true] %s357_s26 }
  0x1a   : > { %s333_s19 = sshll.u32 %s2260_s14, 4  ;;  %s2261_s27 = smov [#allocation13]   ;;  %s334_s19 = int_to_ptr.vmem [resolvable:$true] %s333_s19 }
  0x1b   : > { %1942 = dma.hbm_to_vmem [thread:$0]  (!%p2348_p5), %s332_s18, 16, %s334_s19, [#allocation9]  }
  0x1c   : > { %s359_s25 = sshll.u32 %s2261_s27, 4  ;;  %392 = sbr.rel (%p2337_p3) target bundleno = 666 (0x29a), region = 56  ;;  %s360_s25 = int_to_ptr.vmem [resolvable:$true] %s359_s25 }
  0x1d   : > { %1948 = dma.hbm_to_vmem [thread:$0]  (!%p2348_p5), %s358_s26, 128, %s360_s25, [#allocation12]  }
  0x21   : > { %2224 = dma.done.wait (%p2333_p2), [#allocation4], 16  }
  0x22   : > { %2226 = vsyncadd (%p2333_p2), [#allocation4], 4294967280 }
  0x23   : > { %2228 = dma.done.wait (%p2333_p2), [#allocation6], 1040  }
  0x24   : > { %2230 = vsyncadd (%p2333_p2), [#allocation6], 4294966256 }
  0x25   : > { %2232 = dma.done.wait (%p2333_p2), [#allocation9], 1040  }
  0x26   : > { %2234 = vsyncadd (%p2333_p2), [#allocation9], 4294966256 }
  0x27   : > { %2236 = dma.done.wait (%p2333_p2), [#allocation12], 8320  }
  0x28   : > { %2238 = vsyncadd (%p2333_p2), [#allocation12], 4294958976  ;;  %p467_p7 = scmp.lt.s32.totalorder %s2241_s30, 1  ;;  %vm505_vm0 = vcmask 64512   ;;  %v558_v2 = vld [vmem:[#allocation5 + $0x38] sm:$0xff]  ;;  %v557_v3 = vld [vmem:[#allocation5 + $0x30] sm:$0xff] }
  0x29   : > { %584 = vmatpush.msra.mxu1 %v558_v2  ;;  %v556_v4 = vld [vmem:[#allocation5 + $0x28] sm:$0xff]  ;;  %v555_v5 = vld [vmem:[#allocation5 + $0x20] sm:$0xff]  ;;  %v554_v7 = vld [vmem:[#allocation5 + $0x18] sm:$0xff]  ;;  %vm563_vm1 = vcmask 523264   ;;  %vm1376_vm2 = vcmask 1040384   ;;  %vm1378_vm3 = vcmask 1042434  }
  0x2a   : > { %s2484_s30 = smov (!%p467_p7, %s2241_s30), 1  ;;  %v553_v10 = vld [vmem:[#allocation5 + $0x10] sm:$0xff]  ;;  %v552_v11 = vld [vmem:[#allocation5 + $0x8] sm:$0xff]  ;;  %v551_v12 = vld [vmem:[#allocation5] sm:$0xff]  ;;  %vm1380_vm4 = vcmask 1041408   ;;  %vm1382_vm5 = vcmask 1044484  }
  0x2b   : > { %s1834_s17 = sshll.u32 %s2484_s30, 5  ;;  %s1562_s23 = sshll.u32 %s2484_s30, 3  ;;  %585 = vmatpush.msra.mxu1 %v557_v3  ;;  %v1998_v13 = vld [vmem:[#allocation3] ss:$0 sm:$0xff]  ;;  %v615_v15 = vld [vmem:[#allocation8 + $0x30] sm:$0xff]  ;;  %v614_v16 = vld [vmem:[#allocation8 + $0x28] sm:$0xff] }
  0x2c   : > { %s479_s28 = scalar_lea.vmem %s2467_s1, %s1562_s23  ;;  %s474_s16 = scalar_lea.vmem %s2466_s0, %s1834_s17  ;;  %v616_v14 = vld [vmem:[#allocation8 + $0x38] sm:$0xff]  ;;  %v613_v19 = vld [vmem:[#allocation8 + $0x20] sm:$0xff]  ;;  %v611_v31 = vld [vmem:[#allocation8 + $0x10] sm:$0xff]  ;;  %vm1384_vm6 = vcmask 1046534   ;;  %vm1386_vm7 = vcmask 1045508   ;;  %vm1388_vm8 = vcmask 1043456  }
  0x2d   : > { %v500_v0 = vld [vmem:[%s479_s28] sm:$0xff]  ;;  %586 = vmatpush.msra.mxu1 %v556_v4  ;;  %v497_v6 = vld [vmem:[%s474_s16 + $0x8] sm:$0xff]  ;;  %v498_v8 = vld [vmem:[%s474_s16 + $0x10] sm:$0xff]  ;;  %641 = vmatpush.msra.mxu2 %v616_v14  ;;  %s483_s20 = scalar_lea.vmem %s2475_s9, %s1562_s23 }
  0x2e   : > { %v496_v1 = vld [vmem:[%s474_s16] sm:$0xff]  ;;  %533 = vmatpush.msra.mxu0 %v500_v0  ;;  %v499_v9 = vld [vmem:[%s474_s16 + $0x18] sm:$0xff]  ;;  %v610_v32 = vld [vmem:[#allocation8 + $0x8] sm:$0xff] }
  0x2f   : > { %1564 = vmatmul.msk.f32.vlgmr.msra.gmra.mxu0 %vm505_vm0, %v496_v1  ;;  %587 = vmatpush.msra.mxu1 %v555_v5  ;;  %v612_v21 = vld [vmem:[#allocation8 + $0x18] sm:$0xff]  ;;  %v609_v33 = vld [vmem:[#allocation8] sm:$0xff]  ;;  %v1892_v35 = vld [vmem:[#allocation11 + $0x1cc] sm:$0xf] }
  0x30   : > { %642 = vmatpush.msra.mxu2 %v615_v15  ;;  %v2424_v34 = vld [vmem:[#allocation7] ss:$0 sm:$0xff]  ;;  %v1812_v36 = vld [vmem:[#allocation11 + $0x1e8] sm:$0xf0]  ;;  %v1802_v37 = vld [vmem:[#allocation11 + $0x1c0] sm:$0xf] }
  0x31   : > { %588 = vmatpush.msra.mxu1 %v554_v7  ;;  %v1815_v38 = vor.u32 %v1892_v35, %v1812_v36  ;;  %v1895_v39 = vld [vmem:[#allocation11 + $0x1dc] sm:$0xf0]  ;;  %v1891_v40 = vld [vmem:[#allocation11 + $0x1c4] sm:$0xf]  ;;  %v1810_v44 = vld [vmem:[#allocation11 + $0x1c8] sm:$0xf] }
  0x32   : > { %643 = vmatpush.msra.mxu2 %v614_v16  ;;  %v1804_v41 = vld [vmem:[#allocation11 + $0x1e0] sm:$0xf0]  ;;  %v1803_v42 = vor.u32 %v1895_v39, %v1802_v37  ;;  %v1896_v45 = vld [vmem:[#allocation11 + $0x1e4] sm:$0xf0]  ;;  %v1884_v46 = vld [vmem:[#allocation11 + $0x18c] sm:$0xf] }
  0x33   : > { %589 = vmatpush.msra.mxu1 %v553_v10  ;;  %v1807_v43 = vor.u32 %v1891_v40, %v1804_v41  ;;  %v1811_v48 = vor.u32 %v1896_v45, %v1810_v44  ;;  %v1780_v49 = vld [vmem:[#allocation11 + $0x1a8] sm:$0xf0]  ;;  %v1770_v50 = vld [vmem:[#allocation11 + $0x180] sm:$0xf]  ;;  %v1883_v55 = vld [vmem:[#allocation11 + $0x184] sm:$0xf] }
  0x34   : > { %644 = vmatpush.msra.mxu2 %v613_v19  ;;  %v1887_v51 = vld [vmem:[#allocation11 + $0x19c] sm:$0xf0]  ;;  %1070 = vmatpush.bf16.msra.mxu3 %v1803_v42  ;;  %v1783_v53 = vor.u32 %v1884_v46, %v1780_v49  ;;  %v1772_v56 = vld [vmem:[#allocation11 + $0x1a0] sm:$0xf0]  ;;  %v1778_v57 = vld [vmem:[#allocation11 + $0x188] sm:$0xf] }
  0x35   : > { %590 = vmatpush.msra.mxu1 %v552_v11  ;;  %1089 = vmatpush.bf16.msrb.mxu0 %v1807_v43  ;;  %v1771_v54 = vor.u32 %v1887_v51, %v1770_v50  ;;  %v1775_v58 = vor.u32 %v1883_v55, %v1772_v56  ;;  %v1888_v59 = vld [vmem:[#allocation11 + $0x1a4] sm:$0xf0]  ;;  %v1876_v60 = vld [vmem:[#allocation11 + $0x14c] sm:$0xf]  ;;  %v1738_v0 = vld [vmem:[#allocation11 + $0x140] sm:$0xf] }
  0x36   : > { %645 = vmatpush.msra.mxu2 %v612_v21  ;;  %v1748_v61 = vld [vmem:[#allocation11 + $0x168] sm:$0xf0]  ;;  %v1779_v63 = vor.u32 %v1888_v59, %v1778_v57  ;;  %v1879_v1 = vld [vmem:[#allocation11 + $0x15c] sm:$0xf0]  ;;  %v1875_v3 = vld [vmem:[#allocation11 + $0x144] sm:$0xf] }
  0x37   : > { %1565 = vmatmul.msk.f32.gmra.mxu0 %vm505_vm0, %v497_v6  ;;  %591 = vmatpush.msra.mxu1 %v551_v12  ;;  %v1751_v2 = vor.u32 %v1876_v60, %v1748_v61  ;;  %v1740_v4 = vld [vmem:[#allocation11 + $0x160] sm:$0xf0]  ;;  %v1746_v5 = vld [vmem:[#allocation11 + $0x148] sm:$0xf]  ;;  %v1739_v6 = vor.u32 %v1879_v1, %v1738_v0  ;;  %v1706_v12 = vld [vmem:[#allocation11 + $0x100] sm:$0xf] }
  0x38   : > { %646 = vmatpush.msra.mxu2 %v611_v31  ;;  %1071 = vmatpush.bf16.msra.mxu3 %v1771_v54  ;;  %v1880_v7 = vld [vmem:[#allocation11 + $0x164] sm:$0xf0]  ;;  %v1743_v10 = vor.u32 %v1875_v3, %v1740_v4  ;;  %v1867_v14 = vld [vmem:[#allocation11 + $0x104] sm:$0xf]  ;;  %v1674_v35 = vld [vmem:[#allocation11 + $0xc0] sm:$0xf] }
  0x39   : > { %1108 = vmatpush.bf16.msrb.mxu1 %v1811_v48  ;;  %1090 = vmatpush.bf16.msrb.mxu0 %v1775_v58  ;;  %v1747_v11 = vor.u32 %v1880_v7, %v1746_v5  ;;  %v1708_v15 = vld [vmem:[#allocation11 + $0x120] sm:$0xf0]  ;;  %v1714_v16 = vld [vmem:[#allocation11 + $0x108] sm:$0xf]  ;;  %v1863_v36 = vld [vmem:[#allocation11 + $0xdc] sm:$0xf0] }
  0x3a   : > { %647 = vmatpush.msra.mxu2 %v610_v32  ;;  %v1859_v37 = vld [vmem:[#allocation11 + $0xc4] sm:$0xf]  ;;  %v1682_v40 = vld [vmem:[#allocation11 + $0xc8] sm:$0xf]  ;;  %v1852_v44 = vld [vmem:[#allocation11 + $0x8c] sm:$0xf] }
  0x3b   : > { %v1676_v39 = vld [vmem:[#allocation11 + $0xe0] sm:$0xf0]  ;;  %v1864_v41 = vld [vmem:[#allocation11 + $0xe4] sm:$0xf0]  ;;  %v1652_v45 = vld [vmem:[#allocation11 + $0xa8] sm:$0xf0] }
  0x3c   : > { %648 = vmatpush.msra.mxu2 %v609_v33  ;;  %1072 = vmatpush.bf16.msra.mxu3 %v1739_v6  ;;  %v1679_v42 = vor.u32 %v1859_v37, %v1676_v39  ;;  %v1683_v43 = vor.u32 %v1864_v41, %v1682_v40  ;;  %v1642_v46 = vld [vmem:[#allocation11 + $0x80] sm:$0xf]  ;;  %v1851_v48 = vld [vmem:[#allocation11 + $0x84] sm:$0xf]  ;;  %v1844_v54 = vld [vmem:[#allocation11 + $0x4c] sm:$0xf] }
  0x3d   : > { %1109 = vmatpush.bf16.msrb.mxu1 %v1779_v63  ;;  %1091 = vmatpush.bf16.msrb.mxu0 %v1743_v10  ;;  %v1644_v49 = vld [vmem:[#allocation11 + $0xa0] sm:$0xf0]  ;;  %v1620_v56 = vld [vmem:[#allocation11 + $0x68] sm:$0xf0]  ;;  %v1610_v58 = vld [vmem:[#allocation11 + $0x40] sm:$0xf] }
  0x3e   : > { %1127 = vmatpush.bf16.msrb.mxu2 %v1815_v38  ;;  %v1675_v38 = vor.u32 %v1863_v36, %v1674_v35  ;;  %v1647_v51 = vor.u32 %v1851_v48, %v1644_v49  ;;  %v1623_v57 = vor.u32 %v1844_v54, %v1620_v56  ;;  %v1847_v59 = vld [vmem:[#allocation11 + $0x5c] sm:$0xf0]  ;;  %v1843_v60 = vld [vmem:[#allocation11 + $0x44] sm:$0xf]  ;;  %v1618_v63 = vld [vmem:[#allocation11 + $0x48] sm:$0xf] }
  0x3f   : > { %1566 = vmatmul.msk.f32.gmra.mxu0 %vm505_vm0, %v498_v8  ;;  %v1868_v8 = vld [vmem:[#allocation11 + $0x10c] sm:$0xf]  ;;  %v1611_v61 = vor.u32 %v1847_v59, %v1610_v58  ;;  %v1848_v0 = vld [vmem:[#allocation11 + $0x64] sm:$0xf0]  ;;  %v1578_v5 = vld [vmem:[#allocation11] sm:$0xf] }
  0x40   : > { %v1836_v3 = vld [vmem:[#allocation11 + $0xc] sm:$0xf]  ;;  %v1839_v7 = vld [vmem:[#allocation11 + $0x1c] sm:$0xf0]  ;;  %v1794_v37 = vld [vmem:[#allocation11 + $0x198] sm:$0xf] }
  0x41   : > { %1110 = vmatpush.bf16.msrb.mxu1 %v1747_v11  ;;  %v1588_v4 = vld [vmem:[#allocation11 + $0x28] sm:$0xf0]  ;;  %v1579_v10 = vor.u32 %v1839_v7, %v1578_v5  ;;  %v1754_v39 = vld [vmem:[#allocation11 + $0x150] sm:$0xf]  ;;  %v1882_v49 = vld [vmem:[#allocation11 + $0x174] sm:$0xf0] }
  0x42   : > { %1128 = vmatpush.bf16.msrb.mxu2 %v1783_v53  ;;  %v1856_v53 = vld [vmem:[#allocation11 + $0xa4] sm:$0xf0]  ;;  %v1591_v6 = vor.u32 %v1836_v3, %v1588_v4  ;;  %v1881_v41 = vld [vmem:[#allocation11 + $0x16c] sm:$0xf0]  ;;  %v1869_v56 = vld [vmem:[#allocation11 + $0x114] sm:$0xf] }
  0x43   : > { %v1700_v3 = vld [vmem:[#allocation11 + $0xf8] sm:$0xf0]  ;;  %v1861_v4 = vld [vmem:[#allocation11 + $0xd4] sm:$0xf] }
  0x44   : > { %v1692_v5 = vld [vmem:[#allocation11 + $0xf0] sm:$0xf0] }
  0x46   : > { %1129 = vmatpush.bf16.msrb.mxu2 %v1751_v2  ;;  %v1619_v2 = vor.u32 %v1848_v0, %v1618_v63  ;;  %v1690_v63 = vld [vmem:[#allocation11 + $0xd0] sm:$0xf] }
  0x47   : > { %1567 = vmatmul.msk.f32.gmra.mxu0 %vm505_vm0, %v499_v9  ;;  %v1716_v9 = vld [vmem:[#allocation11 + $0x128] sm:$0xf0]  ;;  %v1865_v0 = vld [vmem:[#allocation11 + $0xec] sm:$0xf0] }
  0x48   : > { %v1719_v19 = vor.u32 %v1868_v8, %v1716_v9  ;;  %v1835_v8 = vld [vmem:[#allocation11 + $0x4] sm:$0xf] }
  0x49   : > { %v1580_v9 = vld [vmem:[#allocation11 + $0x20] sm:$0xf0] }
  0x4a   : > { %1130 = vmatpush.bf16.msrb.mxu2 %v1719_v19  ;;  %v1583_v11 = vor.u32 %v1835_v8, %v1580_v9  ;;  %v1828_v19 = vld [vmem:[#allocation11 + $0x1f8] sm:$0xf0]  ;;  %v1695_v8 = vor.u32 %v1861_v4, %v1692_v5  ;;  %v1698_v9 = vld [vmem:[#allocation11 + $0xd8] sm:$0xf] }
  0xac   : > { %v535_v17 = vpop.f32.mrf.mxu0 }
  0xad   : > { %v536_v18 = vadd.f32 %v1998_v13, %v535_v17  ;;  %v1872_v17 = vld [vmem:[#allocation11 + $0x124] sm:$0xf0] }
  0xaf   : > { %v547_v20 = vmax.f32 %v536_v18, 0.0 }
  0xb1   : > { %1568 = vmatmul.msk.f32.vlgmr.msra.gmra.mxu1 %vm563_vm1, %v547_v20 }
  0xb4   : > { %v538_v22 = vpop.f32.mrf.mxu0 }
  0xb5   : > { %v539_v23 = vadd.f32 %v1998_v13, %v538_v22  ;;  %v1860_v22 = vld [vmem:[#allocation11 + $0xcc] sm:$0xf] }
  0xb7   : > { %v548_v24 = vmax.f32 %v539_v23, 0.0  ;;  %v1684_v23 = vld [vmem:[#allocation11 + $0xe8] sm:$0xf0] }
  0xb9   : > { %1569 = vmatmul.msk.f32.gmra.mxu1 %vm563_vm1, %v548_v24  ;;  %v1711_v24 = vor.u32 %v1867_v14, %v1708_v15  ;;  %v1818_v15 = vld [vmem:[#allocation11 + $0x1d0] sm:$0xf] }
  0xbb   : > { %1092 = vmatpush.bf16.msrb.mxu0 %v1711_v24  ;;  %v1826_v24 = vld [vmem:[#allocation11 + $0x1d8] sm:$0xf] }
  0xbc   : > { %v541_v25 = vpop.f32.mrf.mxu0 }
  0xbd   : > { %v542_v26 = vadd.f32 %v1998_v13, %v541_v25  ;;  %v1715_v25 = vor.u32 %v1872_v17, %v1714_v16  ;;  %v1897_v16 = vld [vmem:[#allocation11 + $0x1ec] sm:$0xf0]  ;;  %v1894_v17 = vld [vmem:[#allocation11 + $0x1dc] sm:$0xf] }
  0xbf   : > { %v549_v27 = vmax.f32 %v542_v26, 0.0  ;;  %1111 = vmatpush.bf16.msrb.mxu1 %v1715_v25  ;;  %1093 = vmatpush.bf16.msrb.mxu0 %v1679_v42  ;;  %v1898_v25 = vld [vmem:[#allocation11 + $0x1f4] sm:$0xf0]  ;;  %v1878_v42 = vld [vmem:[#allocation11 + $0x15c] sm:$0xf] }
  0xc1   : > { %1570 = vmatmul.msk.f32.gmra.mxu1 %vm563_vm1, %v549_v27  ;;  %v1687_v27 = vor.u32 %v1860_v22, %v1684_v23  ;;  %v1831_v22 = vor.u32 %v1894_v17, %v1828_v19  ;;  %v1660_v19 = vld [vmem:[#allocation11 + $0xb0] sm:$0xf0] }
  0xc3   : > { %1131 = vmatpush.bf16.msrb.mxu2 %v1687_v27  ;;  %1112 = vmatpush.bf16.msrb.mxu1 %v1683_v43  ;;  %v1786_v27 = vld [vmem:[#allocation11 + $0x190] sm:$0xf]  ;;  %v1764_v43 = vld [vmem:[#allocation11 + $0x178] sm:$0xf0] }
  0xc4   : > { %v544_v28 = vpop.f32.mrf.mxu0  ;;  %1094 = vmatpush.bf16.msrb.mxu0 %v1647_v51  ;;  %v1722_v51 = vld [vmem:[#allocation11 + $0x110] sm:$0xf] }
  0xc5   : > { %v545_v29 = vadd.f32 %v1998_v13, %v544_v28  ;;  %v1871_v13 = vld [vmem:[#allocation11 + $0x11c] sm:$0xf0] }
  0xc6   : > { %v1707_v21 = vor.u32 %v1871_v13, %v1706_v12  ;;  %v1586_v12 = vld [vmem:[#allocation11 + $0x8] sm:$0xf] }
  0xc7   : > { %v550_v30 = vmax.f32 %v545_v29, 0.0  ;;  %v1840_v13 = vld [vmem:[#allocation11 + $0x24] sm:$0xf0] }
  0xc8   : > { %1073 = vmatpush.bf16.msra.mxu3 %v1707_v21  ;;  %v1587_v14 = vor.u32 %v1840_v13, %v1586_v12  ;;  %v1820_v21 = vld [vmem:[#allocation11 + $0x1f0] sm:$0xf0]  ;;  %v1857_v13 = vld [vmem:[#allocation11 + $0xac] sm:$0xf0] }
  0xc9   : > { %1571 = vmatmul.msk.f32.gmra.mxu1 %vm563_vm1, %v550_v30 }
  0xcc   : > { %1074 = vmatpush.bf16.msra.mxu3 %v1675_v38  ;;  %v1890_v38 = vld [vmem:[#allocation11 + $0x1b4] sm:$0xf0] }
  0xcd   : > { %v1795_v40 = vor.u32 %v1890_v38, %v1794_v37  ;;  %v1594_v37 = vld [vmem:[#allocation11 + $0x10] sm:$0xf] }
  0xce   : > { %v1841_v38 = vld [vmem:[#allocation11 + $0x2c] sm:$0xf0] }
 0x12e   : > { %v593_v47 = vpop.f32.mrf.mxu1 }
 0x12f   : > { %v594_v52 = vadd.f32 %v2424_v34, %v593_v47  ;;  %v1655_v47 = vor.u32 %v1852_v44, %v1652_v45  ;;  %v1755_v44 = vor.u32 %v1881_v41, %v1754_v39  ;;  %v1767_v45 = vor.u32 %v1878_v42, %v1764_v43  ;;  %v1838_v41 = vld [vmem:[#allocation11 + $0x1c] sm:$0xf]  ;;  %v1837_v43 = vld [vmem:[#allocation11 + $0x14] sm:$0xf] }
 0x130   : > { %v1604_v42 = vld [vmem:[#allocation11 + $0x38] sm:$0xf0] }
 0x131   : > { %v605_v62 = vmax.f32 %v594_v52, 0.0  ;;  %v1650_v52 = vld [vmem:[#allocation11 + $0x88] sm:$0xf]  ;;  %1132 = vmatpush.bf16.msrb.mxu2 %v1655_v47  ;;  %v1756_v47 = vld [vmem:[#allocation11 + $0x170] sm:$0xf0] }
 0x132   : > { %v1651_v55 = vor.u32 %v1856_v53, %v1650_v52  ;;  %v1873_v52 = vld [vmem:[#allocation11 + $0x12c] sm:$0xf0]  ;;  %v1870_v53 = vld [vmem:[#allocation11 + $0x11c] sm:$0xf] }
 0x133   : > { %1572 = vmatmul.msk.f32.vlgmr.msra.gmra.mxu2 %vm563_vm1, %v605_v62  ;;  %v1612_v62 = vld [vmem:[#allocation11 + $0x60] sm:$0xf0]  ;;  %v1723_v54 = vor.u32 %v1873_v52, %v1722_v51 }
 0x134   : > { %1113 = vmatpush.bf16.msrb.mxu1 %v1651_v55  ;;  %v1615_v1 = vor.u32 %v1843_v60, %v1612_v62  ;;  %v1732_v55 = vld [vmem:[#allocation11 + $0x138] sm:$0xf0]  ;;  %v1730_v60 = vld [vmem:[#allocation11 + $0x118] sm:$0xf] }
 0x135   : > { %1133 = vmatpush.bf16.msrb.mxu2 %v1623_v57  ;;  %v1724_v57 = vld [vmem:[#allocation11 + $0x130] sm:$0xf0]  ;;  %v1735_v58 = vor.u32 %v1870_v53, %v1732_v55 }
 0x136   : > { %v596_v18 = vpop.f32.mrf.mxu1  ;;  %1095 = vmatpush.bf16.msrb.mxu0 %v1615_v1  ;;  %v1727_v59 = vor.u32 %v1869_v56, %v1724_v57  ;;  %v1862_v1 = vld [vmem:[#allocation11 + $0xdc] sm:$0xf] }
 0x137   : > { %v597_v20 = vadd.f32 %v2424_v34, %v596_v18  ;;  %v1819_v18 = vor.u32 %v1897_v16, %v1818_v15  ;;  %v1703_v7 = vor.u32 %v1862_v1, %v1700_v3  ;;  %v1668_v15 = vld [vmem:[#allocation11 + $0xb8] sm:$0xf0] }
 0x138   : > { %1114 = vmatpush.bf16.msrb.mxu1 %v1619_v2  ;;  %v1691_v2 = vor.u32 %v1865_v0, %v1690_v63 }
 0x139   : > { %v606_v26 = vmax.f32 %v597_v20, 0.0  ;;  %1134 = vmatpush.bf16.msrb.mxu2 %v1591_v6  ;;  %v1893_v20 = vld [vmem:[#allocation11 + $0x1d4] sm:$0xf] }
 0x13a   : > { %1096 = vmatpush.bf16.msrb.mxu0 %v1583_v11  ;;  %v1823_v23 = vor.u32 %v1893_v20, %v1820_v21  ;;  %v1658_v11 = vld [vmem:[#allocation11 + $0x90] sm:$0xf]  ;;  %v1666_v20 = vld [vmem:[#allocation11 + $0x98] sm:$0xf]  ;;  %v2000_v21 = vld [vmem:[#allocation10] ss:$0 sm:$0xff] }
 0x13b   : > { %1573 = vmatmul.msk.f32.gmra.mxu2 %vm563_vm1, %v606_v26  ;;  %v1827_v26 = vor.u32 %v1898_v25, %v1826_v24  ;;  %v1659_v16 = vor.u32 %v1857_v13, %v1658_v11  ;;  %v1626_v24 = vld [vmem:[#allocation11 + $0x50] sm:$0xf] }
 0x13c   : > { %1115 = vmatpush.bf16.msrb.mxu1 %v1587_v14  ;;  %v1854_v14 = vld [vmem:[#allocation11 + $0x9c] sm:$0xf] }
 0x13d   : > { %1203 = vmatpush.bf16.msra.mxu2 %v1831_v22  ;;  %v1671_v17 = vor.u32 %v1854_v14, %v1668_v15  ;;  %v2434_v15 = vld [vmem:[#allocation13] sm:$0xff] }
 0x13e   : > { %v599_v28 = vpop.f32.mrf.mxu1  ;;  %1165 = vmatpush.bf16.msra.mxu0 %v1823_v23  ;;  %v1858_v23 = vld [vmem:[#allocation11 + $0xb4] sm:$0xf0] }
 0x13f   : > { %v600_v29 = vadd.f32 %v2424_v34, %v599_v28  ;;  %v1889_v28 = vld [vmem:[#allocation11 + $0x1ac] sm:$0xf0]  ;;  %v1667_v25 = vor.u32 %v1858_v23, %v1666_v20 }
 0x140   : > { %1184 = vmatpush.bf16.msra.mxu1 %v1827_v26  ;;  %v1849_v26 = vld [vmem:[#allocation11 + $0x6c] sm:$0xf0] }
 0x141   : > { %v607_v30 = vmax.f32 %v600_v29, 0.0  ;;  %v1886_v29 = vld [vmem:[#allocation11 + $0x19c] sm:$0xf] }
 0x143   : > { %1574 = vmatmul.msk.f32.gmra.mxu2 %vm563_vm1, %v607_v30  ;;  %v1787_v30 = vor.u32 %v1889_v28, %v1786_v27  ;;  %v1846_v27 = vld [vmem:[#allocation11 + $0x5c] sm:$0xf] }
 0x144   : > { %1185 = vmatpush.bf16.msra.mxu1 %v1795_v40  ;;  %v1636_v28 = vld [vmem:[#allocation11 + $0x78] sm:$0xf0] }
 0x146   : > { %v602_v31 = vpop.f32.mrf.mxu1 }
 0x147   : > { %v603_v32 = vadd.f32 %v2424_v34, %v602_v31  ;;  %v1855_v34 = vld [vmem:[#allocation11 + $0x9c] sm:$0xf0]  ;;  %v1796_v31 = vld [vmem:[#allocation11 + $0x1b8] sm:$0xf0] }
 0x148   : > { %v1643_v50 = vor.u32 %v1855_v34, %v1642_v46  ;;  %v1799_v35 = vor.u32 %v1886_v29, %v1796_v31  ;;  %v1877_v46 = vld [vmem:[#allocation11 + $0x154] sm:$0xf]  ;;  %v1762_v34 = vld [vmem:[#allocation11 + $0x158] sm:$0xf]  ;;  %v1627_v29 = vor.u32 %v1849_v26, %v1626_v24 }
 0x149   : > { %v608_v33 = vmax.f32 %v603_v32, 0.0  ;;  %v1885_v32 = vld [vmem:[#allocation11 + $0x194] sm:$0xf]  ;;  %v1759_v48 = vor.u32 %v1877_v46, %v1756_v47  ;;  %v1595_v47 = vor.u32 %v1841_v38, %v1594_v37 }
 0x14a   : > { %1075 = vmatpush.bf16.msra.mxu3 %v1643_v50  ;;  %1204 = vmatpush.bf16.msra.mxu2 %v1799_v35  ;;  %v1763_v50 = vor.u32 %v1882_v49, %v1762_v34  ;;  %v1628_v31 = vld [vmem:[#allocation11 + $0x70] sm:$0xf0]  ;;  %v1607_v34 = vor.u32 %v1838_v41, %v1604_v42  ;;  %v1602_v49 = vld [vmem:[#allocation11 + $0x18] sm:$0xf] }
 0x14b   : > { %1575 = vmatmul.msk.f32.gmra.mxu2 %vm563_vm1, %v608_v33  ;;  %v1788_v33 = vld [vmem:[#allocation11 + $0x1b0] sm:$0xf0] }
 0x14c   : > { %v1791_v36 = vor.u32 %v1885_v32, %v1788_v33  ;;  %1186 = vmatpush.bf16.msra.mxu1 %v1763_v50  ;;  %v1634_v32 = vld [vmem:[#allocation11 + $0x58] sm:$0xf]  ;;  %v1639_v33 = vor.u32 %v1846_v27, %v1636_v28 }
 0x14d   : > { %v1842_v50 = vld [vmem:[#allocation11 + $0x34] sm:$0xf0] }
 0x14e   : > { %1076 = vmatpush.bf16.msra.mxu3 %v1611_v61  ;;  %1166 = vmatpush.bf16.msra.mxu0 %v1791_v36  ;;  %v1874_v61 = vld [vmem:[#allocation11 + $0x134] sm:$0xf0] }
 0x14f   : > { %1205 = vmatpush.bf16.msra.mxu2 %v1767_v45  ;;  %v1731_v62 = vor.u32 %v1874_v61, %v1730_v60  ;;  %v1850_v36 = vld [vmem:[#allocation11 + $0x74] sm:$0xf0]  ;;  %v1596_v45 = vld [vmem:[#allocation11 + $0x30] sm:$0xf0] }
 0x150   : > { %v1635_v40 = vor.u32 %v1850_v36, %v1634_v32  ;;  %v734_v32 = vperm.slane %v2434_v15, 0 }
 0x151   : > { %1187 = vmatpush.bf16.msra.mxu1 %v1731_v62 }
 0x152   : > { %1077 = vmatpush.bf16.msra.mxu3 %v1579_v10  ;;  %1167 = vmatpush.bf16.msra.mxu0 %v1759_v48  ;;  %v1866_v10 = vld [vmem:[#allocation11 + $0xf4] sm:$0xf0]  ;;  %v1599_v48 = vor.u32 %v1837_v43, %v1596_v45 }
 0x153   : > { %1206 = vmatpush.bf16.msra.mxu2 %v1735_v58  ;;  %v1699_v12 = vor.u32 %v1866_v10, %v1698_v9 }
 0x155   : > { %1188 = vmatpush.bf16.msra.mxu1 %v1699_v12 }
 0x156   : > { %1146 = vmatpush.bf16.msrb.mxu3 %v1819_v18  ;;  %1168 = vmatpush.bf16.msra.mxu0 %v1727_v59  ;;  %v1853_v18 = vld [vmem:[#allocation11 + $0x94] sm:$0xf] }
 0x157   : > { %1207 = vmatpush.bf16.msra.mxu2 %v1703_v7  ;;  %v1663_v22 = vor.u32 %v1853_v18, %v1660_v19  ;;  %v735_v18 = vperm.slane %v2434_v15, 1  ;;  %v736_v19 = vperm.slane %v2434_v15, 2 }
 0x159   : > { %1189 = vmatpush.bf16.msra.mxu1 %v1667_v25 }
 0x15a   : > { %1147 = vmatpush.bf16.msrb.mxu3 %v1787_v30  ;;  %1169 = vmatpush.bf16.msra.mxu0 %v1695_v8  ;;  %v1845_v30 = vld [vmem:[#allocation11 + $0x54] sm:$0xf] }
 0x15b   : > { %1208 = vmatpush.bf16.msra.mxu2 %v1671_v17  ;;  %v1631_v35 = vor.u32 %v1845_v30, %v1628_v31  ;;  %v737_v17 = vperm.slane %v2434_v15, 3 }
 0x15d   : > { %1190 = vmatpush.bf16.msra.mxu1 %v1635_v40 }
 0x15e   : > { %1148 = vmatpush.bf16.msrb.mxu3 %v1755_v44  ;;  %1170 = vmatpush.bf16.msra.mxu0 %v1663_v22 }
 0x15f   : > { %1209 = vmatpush.bf16.msra.mxu2 %v1639_v33 }
 0x162   : > { %1149 = vmatpush.bf16.msrb.mxu3 %v1723_v54  ;;  %1171 = vmatpush.bf16.msra.mxu0 %v1631_v35  ;;  %v1603_v54 = vor.u32 %v1842_v50, %v1602_v49 }
 0x163   : > { %1210 = vmatpush.bf16.msra.mxu2 %v1607_v34 }
 0x164   : > { %1191 = vmatpush.bf16.msra.mxu1 %v1603_v54 }
 0x166   : > { %1150 = vmatpush.bf16.msrb.mxu3 %v1691_v2  ;;  %1172 = vmatpush.bf16.msra.mxu0 %v1599_v48 }
 0x16a   : > { %1151 = vmatpush.bf16.msrb.mxu3 %v1659_v16 }
 0x16e   : > { %1152 = vmatpush.bf16.msrb.mxu3 %v1627_v29 }
 0x172   : > { %1153 = vmatpush.bf16.msrb.mxu3 %v1595_v47 }
 0x1b6   : > { %v650_v6 = vpop.f32.mrf.mxu2 }
 0x1b7   : > { %v651_v39 = vadd.f32 %v2000_v21, %v650_v6 }
 0x1b9   : > { %v662_v51 = vmax.f32 %v651_v39, 0.0 }
 0x1be   : > { %v653_v44 = vpop.f32.mrf.mxu2 }
 0x1bf   : > { %v654_v46 = vadd.f32 %v2000_v21, %v653_v44 }
 0x1c1   : > { %v663_v52 = vmax.f32 %v654_v46, 0.0 }
 0x1c3   : > { %v730_v53 = vpack.c.bf16 %v663_v52, %v662_v51 }
 0x1c5   : > { %1078 = vmatmul.bf16.vlgmr.msra.gmra.mxu3 %v730_v53  ;;  %1097 = vmatmul.bf16.vlgmr.msrb.gmra.mxu0 %v730_v53 }
 0x1c6   : > { %1116 = vmatmul.bf16.vlgmr.msrb.gmra.mxu1 %v730_v53  ;;  %1135 = vmatmul.bf16.vlgmr.msrb.gmra.mxu2 %v730_v53  ;;  %v656_v55 = vpop.f32.mrf.mxu2 }
 0x1c7   : > { %v657_v56 = vadd.f32 %v2000_v21, %v656_v55 }
 0x1c9   : > { %v664_v59 = vmax.f32 %v657_v56, 0.0 }
 0x1ce   : > { %v659_v57 = vpop.f32.mrf.mxu2 }
 0x1cf   : > { %v660_v58 = vadd.f32 %v2000_v21, %v659_v57 }
 0x1d1   : > { %v665_v60 = vmax.f32 %v660_v58, 0.0 }
 0x1d3   : > { %v731_v61 = vpack.c.bf16 %v665_v60, %v664_v59  ;;  %v739_v59 = vperm.slane %v2434_v15, 5 }
 0x1d5   : > { %1083 = vmatmul.bf16.gmra.mxu3 %v731_v61  ;;  %1102 = vmatmul.bf16.gmra.mxu0 %v731_v61 }
 0x1d6   : > { %1121 = vmatmul.bf16.gmra.mxu1 %v731_v61  ;;  %1140 = vmatmul.bf16.gmra.mxu2 %v731_v61 }
 0x1e5   : > { %1154 = vmatmul.bf16.vlgmr.msrb.gmra.mxu3 %v730_v53  ;;  %1173 = vmatmul.bf16.vlgmr.msra.gmra.mxu0 %v730_v53 }
 0x1e6   : > { %1192 = vmatmul.bf16.vlgmr.msra.gmra.mxu1 %v730_v53  ;;  %1211 = vmatmul.bf16.vlgmr.msra.gmra.mxu2 %v730_v53 }
 0x1f5   : > { %1159 = vmatmul.bf16.gmra.mxu3 %v731_v61  ;;  %1178 = vmatmul.bf16.gmra.mxu0 %v731_v61 }
 0x1f6   : > { %1197 = vmatmul.bf16.gmra.mxu1 %v731_v61  ;;  %1216 = vmatmul.bf16.gmra.mxu2 %v731_v61 }
 0x242   : > { %v1098_v62 = vpop.f32.mrf.mxu0 }
 0x243   : > { %v1117_v63 = vpop.f32.mrf.mxu1  ;;  %v1099_v27 = vadd.f32 %v1098_v62, %v735_v18 }
 0x244   : > { %v1118_v28 = vadd.f32 %v1117_v63, %v736_v19  ;;  %v740_v63 = vperm.slane %v2434_v15, 6 }
 0x245   : > { %v1223_v44 = vmax.f32 %v1099_v27, 0.0 }
 0x246   : > { %v1224_v45 = vmax.f32 %v1118_v28, 0.0 }
 0x248   : > { %v1079_v0 = vpop.f32.mrf.mxu3 }
 0x249   : > { %v1136_v1 = vpop.f32.mrf.mxu2  ;;  %v1080_v34 = vadd.f32 %v1079_v0, %v734_v32 }
 0x24a   : > { %v1100_v2 = vpop.f32.mrf.mxu0  ;;  %v1137_v24 = vadd.f32 %v1136_v1, %v737_v17 }
 0x24b   : > { %v1119_v3 = vpop.f32.mrf.mxu1  ;;  %v1101_v21 = vadd.f32 %v1100_v2, %v735_v18  ;;  %v1222_v0 = vmax.f32 %v1080_v34, 0.0 }
 0x24c   : > { %v1120_v22 = vadd.f32 %v1119_v3, %v736_v19  ;;  %v1225_v41 = vmax.f32 %v1137_v24, 0.0 }
 0x24d   : > { %v1231_v37 = vmax.f32 %v1101_v21, 0.0 }
 0x24e   : > { %v1232_v38 = vmax.f32 %v1120_v22, 0.0 }
 0x24f   : > { %v1257_v51 = vmax.f32 %v1223_v44, %v1231_v37 }
 0x250   : > { %v1081_v4 = vpop.f32.mrf.mxu3  ;;  %v1260_v52 = vmax.f32 %v1224_v45, %v1232_v38 }
 0x251   : > { %v1138_v5 = vpop.f32.mrf.mxu2  ;;  %v1082_v42 = vadd.f32 %v1081_v4, %v734_v32 }
 0x252   : > { %v1103_v6 = vpop.f32.mrf.mxu0  ;;  %v1139_v20 = vadd.f32 %v1138_v5, %v737_v17 }
 0x253   : > { %v1122_v7 = vpop.f32.mrf.mxu1  ;;  %v1104_v29 = vadd.f32 %v1103_v6, %v735_v18  ;;  %v1230_v56 = vmax.f32 %v1082_v42, 0.0 }
 0x254   : > { %v1123_v30 = vadd.f32 %v1122_v7, %v736_v19  ;;  %v1233_v33 = vmax.f32 %v1139_v20, 0.0 }
 0x255   : > { %v1239_v46 = vmax.f32 %v1104_v29, 0.0 }
 0x256   : > { %v1240_v47 = vmax.f32 %v1123_v30, 0.0  ;;  %v1263_v48 = vmax.f32 %v1225_v41, %v1233_v33 }
 0x257   : > { %v1258_v61 = vmax.f32 %v1257_v51, %v1239_v46 }
 0x258   : > { %v1084_v8 = vpop.f32.mrf.mxu3  ;;  %v1261_v62 = vmax.f32 %v1260_v52, %v1240_v47 }
 0x259   : > { %v1141_v9 = vpop.f32.mrf.mxu2  ;;  %v1085_v49 = vadd.f32 %v1084_v8, %v734_v32 }
 0x25a   : > { %v1105_v10 = vpop.f32.mrf.mxu0  ;;  %v1142_v25 = vadd.f32 %v1141_v9, %v737_v17  ;;  %v1254_v9 = vmax.f32 %v1222_v0, %v1230_v56 }
 0x25b   : > { %v1124_v11 = vpop.f32.mrf.mxu1  ;;  %v1106_v39 = vadd.f32 %v1105_v10, %v735_v18  ;;  %v1238_v2 = vmax.f32 %v1085_v49, 0.0 }
 0x25c   : > { %v1125_v40 = vadd.f32 %v1124_v11, %v736_v19  ;;  %v1241_v43 = vmax.f32 %v1142_v25, 0.0  ;;  %v741_v25 = vperm.slane %v2434_v15, 7 }
 0x25d   : > { %v1247_v53 = vmax.f32 %v1106_v39, 0.0  ;;  %v1255_v19 = vmax.f32 %v1254_v9, %v1238_v2 }
 0x25e   : > { %v1248_v54 = vmax.f32 %v1125_v40, 0.0  ;;  %v1264_v57 = vmax.f32 %v1263_v48, %v1241_v43 }
 0x25f   : > { %v1259_v6 = vmax.f32 %v1258_v61, %v1247_v53 }
 0x260   : > { %v1086_v12 = vpop.f32.mrf.mxu3  ;;  %v1262_v7 = vmax.f32 %v1261_v62, %v1248_v54 }
 0x261   : > { %v1143_v13 = vpop.f32.mrf.mxu2  ;;  %v1087_v58 = vadd.f32 %v1086_v12, %v734_v32  ;;  %v1319_v22 = vrot.slane %v1259_v6, 4 }
 0x262   : > { %v1174_v14 = vpop.f32.mrf.mxu0  ;;  %v1144_v35 = vadd.f32 %v1143_v13, %v737_v17  ;;  %v738_v17 = vperm.slane %v2434_v15, 4  ;;  %v1325_v24 = vrot.slane %v1262_v7, 4 }
 0x263   : > { %v1193_v16 = vpop.f32.mrf.mxu1  ;;  %v1246_v10 = vmax.f32 %v1087_v58, 0.0  ;;  %v1175_v11 = vadd.f32 %v1174_v14, %v739_v59  ;;  %v1320_v52 = vmax.f32 %v1259_v6, %v1319_v22 }
 0x264   : > { %v1249_v50 = vmax.f32 %v1144_v35, 0.0  ;;  %v1194_v13 = vadd.f32 %v1193_v16, %v740_v63  ;;  %v1326_v46 = vmax.f32 %v1262_v7, %v1325_v24 }
 0x265   : > { %v1256_v29 = vmax.f32 %v1255_v19, %v1246_v10  ;;  %v1227_v30 = vmax.f32 %v1175_v11, 0.0 }
 0x266   : > { %v1265_v3 = vmax.f32 %v1264_v57, %v1249_v50  ;;  %v1228_v14 = vmax.f32 %v1194_v13, 0.0 }
 0x267   : > { %v1313_v49 = vrot.slane %v1256_v29, 4 }
 0x268   : > { %v2439_v23 = vpop.f32.mrf.mxu3  ;;  %v1331_v20 = vrot.slane %v1265_v3, 4 }
 0x269   : > { %v2441_v26 = vpop.f32.mrf.mxu2  ;;  %v1156_v16 = vadd.f32 %v2439_v23, %v738_v17  ;;  %v1314_v0 = vmax.f32 %v1256_v29, %v1313_v49 }
 0x26a   : > { %v1176_v31 = vpop.f32.mrf.mxu0  ;;  %v1332_v38 = vmax.f32 %v1265_v3, %v1331_v20  ;;  %v1213_v15 = vadd.f32 %v2441_v26, %v741_v25 }
 0x26b   : > { %v1195_v36 = vpop.f32.mrf.mxu1  ;;  %v1177_v4 = vadd.f32 %v1176_v31, %v739_v59  ;;  %v1226_v53 = vmax.f32 %v1156_v16, 0.0  ;;  %v1315_v20 = vrot.slane %v1314_v0, 2 }
 0x26c   : > { %v1196_v8 = vadd.f32 %v1195_v36, %v740_v63  ;;  %v1333_v56 = vrot.slane %v1332_v38, 2  ;;  %v1229_v57 = vmax.f32 %v1213_v15, 0.0 }
 0x26d   : > { %v1235_v21 = vmax.f32 %v1177_v4, 0.0 }
 0x26e   : > { %v1236_v27 = vmax.f32 %v1196_v8, 0.0  ;;  %v1334_v9 = vmax.f32 %v1332_v38, %v1333_v56 }
 0x26f   : > { %v1269_v39 = vmax.f32 %v1227_v30, %v1235_v21 }
 0x270   : > { %v1157_v55 = vpop.f32.mrf.mxu3  ;;  %v1272_v43 = vmax.f32 %v1228_v14, %v1236_v27 }
 0x271   : > { %v1214_v60 = vpop.f32.mrf.mxu2  ;;  %v1158_v31 = vadd.f32 %v1157_v55, %v738_v17 }
 0x272   : > { %v1179_v1 = vpop.f32.mrf.mxu0  ;;  %v1215_v35 = vadd.f32 %v1214_v60, %v741_v25  ;;  %v1327_v60 = vrot.slane %v1326_v46, 2 }
 0x273   : > { %v1198_v5 = vpop.f32.mrf.mxu1  ;;  %v1180_v12 = vadd.f32 %v1179_v1, %v739_v59  ;;  %v1234_v47 = vmax.f32 %v1158_v31, 0.0 }
 0x274   : > { %v1199_v18 = vadd.f32 %v1198_v5, %v740_v63  ;;  %v1237_v50 = vmax.f32 %v1215_v35, 0.0  ;;  %v1321_v5 = vrot.slane %v1320_v52, 2  ;;  %v1328_v19 = vmax.f32 %v1326_v46, %v1327_v60 }
 0x275   : > { %v1243_v32 = vmax.f32 %v1180_v12, 0.0  ;;  %v1266_v61 = vmax.f32 %v1226_v53, %v1234_v47 }
 0x276   : > { %v1244_v36 = vmax.f32 %v1199_v18, 0.0  ;;  %v1275_v2 = vmax.f32 %v1229_v57, %v1237_v50  ;;  %v1329_v31 = vrot.slane %v1328_v19, 1 }
 0x277   : > { %v1270_v34 = vmax.f32 %v1269_v39, %v1243_v32  ;;  %v1316_v32 = vmax.f32 %v1314_v0, %v1315_v20 }
 0x278   : > { %v1160_v28 = vpop.f32.mrf.mxu3  ;;  %v1273_v23 = vmax.f32 %v1272_v43, %v1244_v36 }
 0x279   : > { %v1217_v33 = vpop.f32.mrf.mxu2  ;;  %v1161_v40 = vadd.f32 %v1160_v28, %v738_v17  ;;  %v1335_v28 = vrot.slane %v1334_v9, 1 }
 0x27a   : > { %v1181_v37 = vpop.f32.mrf.mxu0  ;;  %v1218_v44 = vadd.f32 %v1217_v33, %v741_v25 }
 0x27b   : > { %v1182_v41 = vadd.f32 %v1181_v37, %v739_v59  ;;  %v1200_v42 = vpop.f32.mrf.mxu1  ;;  %v1242_v54 = vmax.f32 %v1161_v40, 0.0  ;;  %v1336_v36 = vmax.f32 %v1334_v9, %v1335_v28  ;;  %v1330_v40 = vmax.f32 %v1328_v19, %v1329_v31 }
 0x27c   : > { %v1201_v45 = vadd.f32 %v1200_v42, %v740_v63  ;;  %v1245_v58 = vmax.f32 %v1218_v44, 0.0 }
 0x27d   : > { %v1251_v48 = vmax.f32 %v1182_v41, 0.0  ;;  %v1267_v7 = vmax.f32 %v1266_v61, %v1242_v54  ;;  %v1317_v41 = vrot.slane %v1316_v32, 1 }
 0x27e   : > { %v1252_v51 = vmax.f32 %v1201_v45, 0.0  ;;  %v1276_v10 = vmax.f32 %v1275_v2, %v1245_v58  ;;  %v1371_v45 = vrot.slane %v1336_v36, 5 }
 0x27f   : > { %v1271_v55 = vmax.f32 %v1270_v34, %v1251_v48  ;;  %v1370_v48 = vrot.slane %v1330_v40, 6  ;;  %v1318_v49 = vmax.f32 %v1316_v32, %v1317_v41 }
 0x280   : > { %v1274_v59 = vmax.f32 %v1273_v23, %v1252_v51  ;;  %v1162_v26 = vpop.f32.mrf.mxu3 }
 0x281   : > { %v1343_v62 = vrot.slane %v1271_v55, 4  ;;  %v1163_v63 = vadd.f32 %v1162_v26, %v738_v17  ;;  %v1219_v1 = vpop.f32.mrf.mxu2  ;;  %v1322_v17 = vmax.f32 %v1320_v52, %v1321_v5  ;;  %v1379_v53 = vsel %vm1378_vm3, %v1370_v48, %v1371_v45 }
 0x282   : > { %v1349_v3 = vrot.slane %v1274_v59, 4  ;;  %v1220_v4 = vadd.f32 %v1219_v1, %v741_v25 }
 0x283   : > { %v1344_v6 = vmax.f32 %v1271_v55, %v1343_v62  ;;  %v1250_v8 = vmax.f32 %v1163_v63, 0.0  ;;  %v1323_v14 = vrot.slane %v1322_v17, 1 }
 0x284   : > { %v1350_v11 = vmax.f32 %v1274_v59, %v1349_v3  ;;  %v1253_v12 = vmax.f32 %v1220_v4, 0.0 }
 0x285   : > { %v1345_v13 = vrot.slane %v1344_v6, 2  ;;  %v1268_v18 = vmax.f32 %v1267_v7, %v1250_v8  ;;  %v1324_v15 = vmax.f32 %v1322_v17, %v1323_v14 }
 0x286   : > { %v1351_v21 = vrot.slane %v1350_v11, 2  ;;  %v1277_v22 = vmax.f32 %v1276_v10, %v1253_v12 }
 0x287   : > { %v1346_v24 = vmax.f32 %v1344_v6, %v1345_v13  ;;  %v1337_v27 = vrot.slane %v1268_v18, 4  ;;  %v1369_v23 = vrot.slane %v1324_v15, 7 }
 0x288   : > { %v1352_v29 = vmax.f32 %v1350_v11, %v1351_v21  ;;  %v1355_v25 = vrot.slane %v1277_v22, 4 }
 0x289   : > { %v1338_v30 = vmax.f32 %v1268_v18, %v1337_v27  ;;  %v1347_v16 = vrot.slane %v1346_v24, 1  ;;  %v1377_v57 = vsel %vm1376_vm2, %v1318_v49, %v1369_v23 }
 0x28a   : > { %v1356_v33 = vmax.f32 %v1277_v22, %v1355_v25  ;;  %v1353_v37 = vrot.slane %v1352_v29, 1  ;;  %v1381_v59 = vsel %vm1380_vm4, %v1377_v57, %v1379_v53 }
 0x28b   : > { %v1339_v35 = vrot.slane %v1338_v30, 2  ;;  %v1348_v43 = vmax.f32 %v1346_v24, %v1347_v16 }
 0x28c   : > { %v1357_v38 = vrot.slane %v1356_v33, 2  ;;  %v1354_v46 = vmax.f32 %v1352_v29, %v1353_v37 }
 0x28d   : > { %v1340_v39 = vmax.f32 %v1338_v30, %v1339_v35  ;;  %v1373_v51 = vrot.slane %v1348_v43, 3 }
 0x28e   : > { %v1358_v42 = vmax.f32 %v1356_v33, %v1357_v38  ;;  %v1374_v54 = vrot.slane %v1354_v46, 2 }
 0x28f   : > { %v1341_v44 = vrot.slane %v1340_v39, 1 }
 0x290   : > { %v1359_v47 = vrot.slane %v1358_v42, 1 }
 0x291   : > { %v1342_v34 = vmax.f32 %v1340_v39, %v1341_v44 }
 0x292   : > { %v1360_v50 = vmax.f32 %v1358_v42, %v1359_v47 }
 0x293   : > { %v1372_v52 = vrot.slane %v1342_v34, 4 }
 0x294   : > { %v1375_v55 = vrot.slane %v1360_v50, 1 }
 0x295   : > { %v1383_v56 = vsel %vm1382_vm5, %v1372_v52, %v1373_v51 }
 0x296   : > { %v1385_v58 = vsel %vm1384_vm6, %v1374_v54, %v1375_v55 }
 0x297   : > { %v1387_v26 = vsel %vm1386_vm7, %v1383_v56, %v1385_v58 }
 0x298   : > { %v1389_v60 = vsel %vm1388_vm8, %v1381_v59, %v1387_v26 }
 0x299   : > { %1391 = vst [vmem:[%s483_s20] sm:$0xff] %v1389_v60 }
 0x29a PF: > { %s23_s11 = sadd.s32 1, %s2249_s11   ;;  %s2479_s30 = smov %s2245_s10 }
 0x29b   : > { %p20_p8 = scmp.ge.s32.totalorder %s23_s11, 4   ;;  %s2480_s10 = smov %s2482_s21 }
 0x29d   :  { %22 = sbr.rel (!%p20_p8) target bundleno = 5 (0x5), region = 126 }
 0x2a2   :  { %1411 = vsyncpa [#allocation4], 1 }
 0x2a3   :  { %1413 = vsyncpa [#allocation4 + $0x1], 1 }
 0x2a4   :  { %1414 = vsyncpa [#allocation6], 1 }
 0x2a5   :  { %1415 = vsyncpa [#allocation9], 1 }
 0x2a6   :  { %1416 = vsyncpa [#allocation12], 1 }

// kernel: _lambda_.10
= control target key start
LH: loop header
LB: loop body
LE: loop exit
PB: predicated region body
PF: predicated region fallthrough
CT: control target
= control target key end

     0   :  { %12 = vsyncpa [#allocation4], 0  ;;  %s2100_s0 = inlined_call_operand.vmem [shape: f32[2,32,8], index: 0, kind: input, shape index: {}]   ;;  %s2101_s1 = inlined_call_operand.vmem [shape: f32[2,8,64], index: 1, kind: input, shape index: {}]   ;;  %s2102_s2 = inlined_call_operand.hbm [shape: f32[1,64], index: 2, kind: input, shape index: {}]   ;;  %s2103_s3 = inlined_call_operand.vmem [shape: f32[2,64,128], index: 3, kind: input, shape index: {}]   ;;  %s2104_s4 = inlined_call_operand.hbm [shape: f32[1,128], index: 4, kind: input, shape index: {}]   ;;  %s2105_s5 = inlined_call_operand.hbm [shape: bf16[128,1024], index: 5, kind: input, shape index: {}]   ;;  %s2106_s6 = inlined_call_operand.hbm [shape: f32[1,1024], index: 6, kind: input, shape index: {}]   ;;  %s2107_s7 = inlined_call_operand.vmem [shape: f32[2,1,1024], index: 7, kind: output, shape index: {}]  }
   0x1   :  { %13 = vsyncpa [#allocation6], 0 }
   0x2   :  { %14 = vsyncpa [#allocation9], 0  ;;  %s1977_s24 = smov 0   ;;  %s1979_s25 = smov 0  }
   0x3   :  { %s1981_s26 = smov 0  }
   0x4 LB: > { %s251_s29 = sshll.u32 %s2104_s4, 4  ;;  %s1355_s30 = sadd.s32 4294967295, %s1929_s26   ;;  %s1929_s26 = sphi %s1981_s26, %s20_s26   ;;  %s1925_s25 = sphi %s1979_s25, %s2112_s25   ;;  %s1921_s24 = sphi %s1977_s24, %s2111_s24   ;;  %s252_s29 = int_to_ptr.hbm [resolvable:$true] %s251_s29 }
   0x5   : > { %p1357_p0 = scmp.ge.s32.totalorder %s1929_s26, 1  ;;  %p227_p1 = scmp.lt.s32.totalorder %s1929_s26, 3 }
   0x6   : > { %p1998_p2 = scmp.eq.s32.totalorder %s1355_s30, 0  ;;  %s1931_s10 = smov [#allocation5]  }
   0x7   : > { %p2002_p3 = pnand %p1357_p0, %p227_p1  ;;  %s253_s11 = sshll.u32 %s1931_s10, 4  ;;  %s254_s11 = int_to_ptr.vmem [resolvable:$true] %s253_s11 }
   0x8   : > { %s32_s13 = sadd.s32 1, %s1925_s25  ;;  %s239_s16 = sshll.u32 %s2102_s2, 4  ;;  %s240_s16 = int_to_ptr.hbm [resolvable:$true] %s239_s16 }
   0x9   : > { %p1722_p4 = pneg %p2002_p3  ;;  %p34_p6 = scmp.ge.s32.totalorder %s32_s13, 2 }
   0xa   : > { %s262_s19 = sshll.u32 %s2105_s5, 4  ;;  %s1932_s20 = smov [#allocation3]   ;;  %s263_s19 = int_to_ptr.hbm [resolvable:$true] %s262_s19 }
   0xb   : > { %p2010_p5 = pnand %p1998_p2, %p1722_p4  ;;  %s2114_s13 = smov (%p34_p6, %s32_s13), 0 }
   0xc   : > { %s241_s21 = sshll.u32 %s1932_s20, 4  ;;  %s1933_s22 = smov [#allocation7]   ;;  %s242_s21 = int_to_ptr.vmem [resolvable:$true] %s241_s21 }
   0xd   : > { %1728 = dma.hbm_to_vmem [thread:$0]  (!%p2010_p5), %s252_s29, 16, %s254_s11, [#allocation6]  }
   0xe   : > { %1725 = dma.hbm_to_vmem [thread:$0]  (!%p2010_p5), %s240_s16, 16, %s242_s21, [#allocation4]  }
   0xf   : > { %s264_s23 = sshll.u32 %s1933_s22, 4  ;;  %s1934_s27 = smov 512   ;;  %s265_s23 = int_to_ptr.vmem [resolvable:$true] %s264_s23 }
  0x10   : > { %s1935_s28 = smov 32   ;;  %s277_s10 = sshll.u32 %s2106_s6, 4  ;;  %s278_s10 = int_to_ptr.hbm [resolvable:$true] %s277_s10 }
  0x11   : > { %1731 = dma.hbm_to_vmem [thread:$0]  (!%p2010_p5), %s263_s19, 8192, %s265_s23, [#allocation6], %s1934_s27, %s1934_s27, %s1935_s28  }
  0x12   : > { %s1936_s11 = smov [#allocation8]   ;;  %320 = sbr.rel (%p2002_p3) target bundleno = 516 (0x204), region = 48 }
  0x13   : > { %s279_s14 = sshll.u32 %s1936_s11, 4  ;;  %s280_s14 = int_to_ptr.vmem [resolvable:$true] %s279_s14 }
  0x14   : > { %1734 = dma.hbm_to_vmem [thread:$0]  (!%p2010_p5), %s278_s10, 128, %s280_s14, [#allocation9]  }
  0x17   : > { %1908 = dma.done.wait (%p1998_p2), [#allocation4], 16  }
  0x18   : > { %1910 = vsyncadd (%p1998_p2), [#allocation4], 4294967280 }
  0x19   : > { %1912 = dma.done.wait (%p1998_p2), [#allocation6], 8208  }
  0x1a   : > { %1914 = vsyncadd (%p1998_p2), [#allocation6], 4294959088 }
  0x1b   : > { %1916 = dma.done.wait (%p1998_p2), [#allocation9], 128  }
  0x1c   : > { %1918 = vsyncadd (%p1998_p2), [#allocation9], 4294967168  ;;  %p381_p7 = scmp.lt.s32.totalorder %s1921_s24, 1  ;;  %vm424_vm0 = vcmask 64512   ;;  %v2070_v13 = vld [vmem:[#allocation3] ss:$0 sm:$0xff] }
  0x1d   : > { %vm482_vm1 = vcmask 523264   ;;  %v1608_v14 = vld [vmem:[#allocation7 + $0x1c0] sm:$0xf]  ;;  %v1698_v16 = vld [vmem:[#allocation7 + $0x1c4] sm:$0xf]  ;;  %vm1206_vm2 = vcmask 1040384  }
  0x1e   : > { %s2116_s24 = smov (!%p381_p7, %s1921_s24), 1  ;;  %v1702_v15 = vld [vmem:[#allocation7 + $0x1dc] sm:$0xf0]  ;;  %v1610_v18 = vld [vmem:[#allocation7 + $0x1e0] sm:$0xf0]  ;;  %vm1208_vm3 = vcmask 1042434  }
  0x1f   : > { %s1370_s9 = sshll.u32 %s2116_s24, 3  ;;  %s1641_s12 = sshll.u32 %s2116_s24, 6  ;;  %v1609_v17 = vor.u32 %v1702_v15, %v1608_v14  ;;  %v1616_v19 = vld [vmem:[#allocation7 + $0x1c8] sm:$0xf]  ;;  %v1613_v21 = vor.u32 %v1698_v16, %v1610_v18  ;;  %v1699_v23 = vld [vmem:[#allocation7 + $0x1cc] sm:$0xf] }
  0x20   : > { %s393_s17 = scalar_lea.vmem %s2101_s1, %s1370_s9  ;;  %s398_s8 = scalar_lea.vmem %s2103_s3, %s1641_s12  ;;  %v1703_v20 = vld [vmem:[#allocation7 + $0x1e4] sm:$0xf0]  ;;  %v1618_v24 = vld [vmem:[#allocation7 + $0x1e8] sm:$0xf0]  ;;  %v1576_v25 = vld [vmem:[#allocation7 + $0x180] sm:$0xf] }
  0x21   : > { %s1640_s20 = sshll.u32 %s2116_s24, 5  ;;  %v419_v0 = vld [vmem:[%s393_s17] sm:$0xff]  ;;  %v477_v1 = vld [vmem:[%s398_s8 + $0x38] sm:$0xff]  ;;  %v476_v2 = vld [vmem:[%s398_s8 + $0x30] sm:$0xff]  ;;  %v1617_v22 = vor.u32 %v1703_v20, %v1616_v19  ;;  %932 = vmatpush.bf16.msra.mxu2 %v1609_v17  ;;  %v1621_v27 = vor.u32 %v1699_v23, %v1618_v24  ;;  %951 = vmatpush.bf16.msra.mxu3 %v1613_v21  ;;  %vm1210_vm4 = vcmask 1041408   ;;  %vm1214_vm5 = vcmask 1046534   ;;  %s402_s29 = scalar_lea.vmem %s2107_s7, %s1370_s9 }
  0x22   : > { %s388_s23 = scalar_lea.vmem %s2100_s0, %s1640_s20  ;;  %452 = vmatpush.msra.mxu0 %v419_v0  ;;  %503 = vmatpush.msra.mxu1 %v477_v1  ;;  %v475_v4 = vld [vmem:[%s398_s8 + $0x28] sm:$0xff]  ;;  %v474_v5 = vld [vmem:[%s398_s8 + $0x20] sm:$0xff]  ;;  %v473_v6 = vld [vmem:[%s398_s8 + $0x18] sm:$0xff]  ;;  %vm1212_vm6 = vcmask 1044484   ;;  %vm1216_vm7 = vcmask 1045508   ;;  %vm1218_vm8 = vcmask 1043456  }
  0x23   : > { %v415_v3 = vld [vmem:[%s388_s23] sm:$0xff]  ;;  %v416_v7 = vld [vmem:[%s388_s23 + $0x8] sm:$0xff]  ;;  %v417_v8 = vld [vmem:[%s388_s23 + $0x10] sm:$0xff] }
  0x24   : > { %1374 = vmatmul.msk.f32.vlgmr.msra.gmra.mxu0 %vm424_vm0, %v415_v3  ;;  %504 = vmatpush.msra.mxu1 %v476_v2  ;;  %v418_v9 = vld [vmem:[%s388_s23 + $0x18] sm:$0xff]  ;;  %v472_v10 = vld [vmem:[%s398_s8 + $0x10] sm:$0xff]  ;;  %v471_v11 = vld [vmem:[%s398_s8 + $0x8] sm:$0xff] }
  0x25   : > { %v470_v12 = vld [vmem:[%s398_s8] sm:$0xff]  ;;  %v1690_v29 = vld [vmem:[#allocation7 + $0x184] sm:$0xf]  ;;  %970 = vmatpush.bf16.msrb.mxu0 %v1617_v22  ;;  %v1584_v34 = vld [vmem:[#allocation7 + $0x188] sm:$0xf] }
  0x26   : > { %505 = vmatpush.msra.mxu1 %v475_v4  ;;  %v1694_v28 = vld [vmem:[#allocation7 + $0x19c] sm:$0xf0]  ;;  %v1578_v30 = vld [vmem:[#allocation7 + $0x1a0] sm:$0xf0]  ;;  %v1695_v35 = vld [vmem:[#allocation7 + $0x1a4] sm:$0xf0] }
  0x27   : > { %v1577_v32 = vor.u32 %v1694_v28, %v1576_v25  ;;  %v1581_v33 = vor.u32 %v1690_v29, %v1578_v30  ;;  %v1691_v36 = vld [vmem:[#allocation7 + $0x18c] sm:$0xf]  ;;  %v1585_v37 = vor.u32 %v1695_v35, %v1584_v34  ;;  %v1544_v39 = vld [vmem:[#allocation7 + $0x140] sm:$0xf]  ;;  %v1682_v43 = vld [vmem:[#allocation7 + $0x144] sm:$0xf] }
  0x28   : > { %506 = vmatpush.msra.mxu1 %v474_v5  ;;  %v1586_v38 = vld [vmem:[#allocation7 + $0x1a8] sm:$0xf0]  ;;  %v1686_v40 = vld [vmem:[#allocation7 + $0x15c] sm:$0xf0]  ;;  %v1546_v44 = vld [vmem:[#allocation7 + $0x160] sm:$0xf0] }
  0x29   : > { %v1589_v42 = vor.u32 %v1691_v36, %v1586_v38  ;;  %933 = vmatpush.bf16.msra.mxu2 %v1577_v32  ;;  %v1545_v45 = vor.u32 %v1686_v40, %v1544_v39  ;;  %v1552_v46 = vld [vmem:[#allocation7 + $0x148] sm:$0xf]  ;;  %v1683_v48 = vld [vmem:[#allocation7 + $0x14c] sm:$0xf]  ;;  %952 = vmatpush.bf16.msra.mxu3 %v1581_v33  ;;  %v1549_v49 = vor.u32 %v1682_v43, %v1546_v44  ;;  %v1512_v51 = vld [vmem:[#allocation7 + $0x100] sm:$0xf] }
  0x2a   : > { %507 = vmatpush.msra.mxu1 %v473_v6  ;;  %v1687_v47 = vld [vmem:[#allocation7 + $0x164] sm:$0xf0]  ;;  %v1554_v50 = vld [vmem:[#allocation7 + $0x168] sm:$0xf0]  ;;  %v1678_v52 = vld [vmem:[#allocation7 + $0x11c] sm:$0xf0]  ;;  %971 = vmatpush.bf16.msrb.mxu0 %v1585_v37 }
  0x2b   : > { %v1553_v53 = vor.u32 %v1687_v47, %v1552_v46  ;;  %v1557_v54 = vor.u32 %v1683_v48, %v1554_v50  ;;  %v1674_v55 = vld [vmem:[#allocation7 + $0x104] sm:$0xf]  ;;  %v1520_v57 = vld [vmem:[#allocation7 + $0x108] sm:$0xf]  ;;  %v1675_v59 = vld [vmem:[#allocation7 + $0x10c] sm:$0xf]  ;;  %v1513_v62 = vor.u32 %v1678_v52, %v1512_v51 }
  0x2c   : > { %1375 = vmatmul.msk.f32.gmra.mxu0 %vm424_vm0, %v416_v7  ;;  %508 = vmatpush.msra.mxu1 %v472_v10  ;;  %v1514_v56 = vld [vmem:[#allocation7 + $0x120] sm:$0xf0]  ;;  %v1679_v58 = vld [vmem:[#allocation7 + $0x124] sm:$0xf0]  ;;  %v1522_v60 = vld [vmem:[#allocation7 + $0x128] sm:$0xf0] }
  0x2d   : > { %934 = vmatpush.bf16.msra.mxu2 %v1545_v45  ;;  %953 = vmatpush.bf16.msra.mxu3 %v1549_v49  ;;  %v1517_v0 = vor.u32 %v1674_v55, %v1514_v56  ;;  %v1521_v1 = vor.u32 %v1679_v58, %v1520_v57  ;;  %v1525_v2 = vor.u32 %v1675_v59, %v1522_v60  ;;  %v1480_v10 = vld [vmem:[#allocation7 + $0xc0] sm:$0xf]  ;;  %v1482_v15 = vld [vmem:[#allocation7 + $0xe0] sm:$0xf0]  ;;  %v1488_v16 = vld [vmem:[#allocation7 + $0xc8] sm:$0xf] }
  0x2e   : > { %509 = vmatpush.msra.mxu1 %v471_v11  ;;  %972 = vmatpush.bf16.msrb.mxu0 %v1553_v53  ;;  %v1670_v11 = vld [vmem:[#allocation7 + $0xdc] sm:$0xf0]  ;;  %v1671_v17 = vld [vmem:[#allocation7 + $0xe4] sm:$0xf0]  ;;  %v1667_v20 = vld [vmem:[#allocation7 + $0xcc] sm:$0xf] }
  0x2f   : > { %v1481_v14 = vor.u32 %v1670_v11, %v1480_v10  ;;  %v1489_v19 = vor.u32 %v1671_v17, %v1488_v16  ;;  %v1490_v21 = vld [vmem:[#allocation7 + $0xe8] sm:$0xf0]  ;;  %v1448_v23 = vld [vmem:[#allocation7 + $0x80] sm:$0xf]  ;;  %v1658_v24 = vld [vmem:[#allocation7 + $0x84] sm:$0xf] }
  0x30   : > { %510 = vmatpush.msra.mxu1 %v470_v12  ;;  %v1666_v12 = vld [vmem:[#allocation7 + $0xc4] sm:$0xf]  ;;  %v1493_v22 = vor.u32 %v1667_v20, %v1490_v21  ;;  %v1663_v28 = vld [vmem:[#allocation7 + $0xa4] sm:$0xf0]  ;;  %v1458_v32 = vld [vmem:[#allocation7 + $0xa8] sm:$0xf0] }
  0x31   : > { %935 = vmatpush.bf16.msra.mxu2 %v1513_v62  ;;  %954 = vmatpush.bf16.msra.mxu3 %v1517_v0  ;;  %v1485_v18 = vor.u32 %v1666_v12, %v1482_v15  ;;  %v1416_v34 = vld [vmem:[#allocation7 + $0x40] sm:$0xf]  ;;  %v1650_v36 = vld [vmem:[#allocation7 + $0x44] sm:$0xf]  ;;  %v1424_v39 = vld [vmem:[#allocation7 + $0x48] sm:$0xf] }
  0x32   : > { %989 = vmatpush.bf16.msrb.mxu1 %v1621_v27  ;;  %973 = vmatpush.bf16.msrb.mxu0 %v1521_v1  ;;  %v1456_v27 = vld [vmem:[#allocation7 + $0x88] sm:$0xf]  ;;  %v1654_v35 = vld [vmem:[#allocation7 + $0x5c] sm:$0xf0]  ;;  %v1418_v38 = vld [vmem:[#allocation7 + $0x60] sm:$0xf0] }
  0x33   : > { %v1457_v30 = vor.u32 %v1663_v28, %v1456_v27  ;;  %v1417_v37 = vor.u32 %v1654_v35, %v1416_v34  ;;  %v1655_v40 = vld [vmem:[#allocation7 + $0x64] sm:$0xf0]  ;;  %v1651_v43 = vld [vmem:[#allocation7 + $0x4c] sm:$0xf]  ;;  %v1384_v46 = vld [vmem:[#allocation7] sm:$0xf] }
  0x34   : > { %1376 = vmatmul.msk.f32.gmra.mxu0 %vm424_vm0, %v417_v8  ;;  %v1426_v44 = vld [vmem:[#allocation7 + $0x68] sm:$0xf0]  ;;  %v1646_v47 = vld [vmem:[#allocation7 + $0x1c] sm:$0xf0]  ;;  %v1642_v48 = vld [vmem:[#allocation7 + $0x4] sm:$0xf] }
  0x35   : > { %936 = vmatpush.bf16.msra.mxu2 %v1481_v14  ;;  %955 = vmatpush.bf16.msra.mxu3 %v1485_v18  ;;  %v1429_v45 = vor.u32 %v1651_v43, %v1426_v44  ;;  %v1385_v49 = vor.u32 %v1646_v47, %v1384_v46  ;;  %v1386_v50 = vld [vmem:[#allocation7 + $0x20] sm:$0xf0]  ;;  %v1392_v51 = vld [vmem:[#allocation7 + $0x8] sm:$0xf]  ;;  %v1643_v55 = vld [vmem:[#allocation7 + $0xc] sm:$0xf] }
  0x36   : > { %990 = vmatpush.bf16.msrb.mxu1 %v1589_v42  ;;  %974 = vmatpush.bf16.msrb.mxu0 %v1489_v19  ;;  %v1425_v42 = vor.u32 %v1655_v40, %v1424_v39  ;;  %v1647_v52 = vld [vmem:[#allocation7 + $0x24] sm:$0xf0]  ;;  %v1389_v53 = vor.u32 %v1642_v48, %v1386_v50  ;;  %v1394_v56 = vld [vmem:[#allocation7 + $0x28] sm:$0xf0]  ;;  %v1624_v58 = vld [vmem:[#allocation7 + $0x1d0] sm:$0xf] }
  0x37   : > { %v1397_v57 = vor.u32 %v1643_v55, %v1394_v56  ;;  %v1704_v59 = vld [vmem:[#allocation7 + $0x1ec] sm:$0xf0]  ;;  %v1700_v60 = vld [vmem:[#allocation7 + $0x1d4] sm:$0xf]  ;;  %v1705_v0 = vld [vmem:[#allocation7 + $0x1f4] sm:$0xf0] }
  0x38   : > { %v1626_v62 = vld [vmem:[#allocation7 + $0x1f0] sm:$0xf0]  ;;  %v1600_v11 = vld [vmem:[#allocation7 + $0x198] sm:$0xf]  ;;  %v1693_v16 = vld [vmem:[#allocation7 + $0x19c] sm:$0xf] }
  0x39   : > { %v1629_v1 = vor.u32 %v1700_v60, %v1626_v62  ;;  %v1594_v10 = vld [vmem:[#allocation7 + $0x1b0] sm:$0xf0]  ;;  %v1697_v12 = vld [vmem:[#allocation7 + $0x1b4] sm:$0xf0]  ;;  %v1602_v17 = vld [vmem:[#allocation7 + $0x1b8] sm:$0xf0] }
  0x3a   : > { %991 = vmatpush.bf16.msrb.mxu1 %v1557_v54  ;;  %975 = vmatpush.bf16.msrb.mxu0 %v1457_v30  ;;  %v1393_v54 = vor.u32 %v1647_v52, %v1392_v51  ;;  %v1601_v15 = vor.u32 %v1697_v12, %v1600_v11  ;;  %v1560_v18 = vld [vmem:[#allocation7 + $0x150] sm:$0xf]  ;;  %v1605_v19 = vor.u32 %v1693_v16, %v1602_v17  ;;  %v1684_v21 = vld [vmem:[#allocation7 + $0x154] sm:$0xf]  ;;  %v1570_v28 = vld [vmem:[#allocation7 + $0x178] sm:$0xf0] }
  0x3b   : > { %v1688_v20 = vld [vmem:[#allocation7 + $0x16c] sm:$0xf0]  ;;  %v1530_v34 = vld [vmem:[#allocation7 + $0x130] sm:$0xf0]  ;;  %v1536_v35 = vld [vmem:[#allocation7 + $0x118] sm:$0xf] }
  0x3c   : > { %1377 = vmatmul.msk.f32.gmra.mxu0 %vm424_vm0, %v418_v9  ;;  %v1528_v30 = vld [vmem:[#allocation7 + $0x110] sm:$0xf]  ;;  %v1677_v39 = vld [vmem:[#allocation7 + $0x11c] sm:$0xf]  ;;  %v1668_v44 = vld [vmem:[#allocation7 + $0xd4] sm:$0xf] }
  0x3d   : > { %v1538_v40 = vld [vmem:[#allocation7 + $0x138] sm:$0xf0]  ;;  %v1672_v43 = vld [vmem:[#allocation7 + $0xec] sm:$0xf0]  ;;  %v1498_v46 = vld [vmem:[#allocation7 + $0xf0] sm:$0xf0] }
  0x3e   : > { %992 = vmatpush.bf16.msrb.mxu1 %v1525_v2  ;;  %976 = vmatpush.bf16.msrb.mxu0 %v1425_v42  ;;  %v1496_v42 = vld [vmem:[#allocation7 + $0xd0] sm:$0xf]  ;;  %v1504_v47 = vld [vmem:[#allocation7 + $0xd8] sm:$0xf]  ;;  %v1501_v50 = vor.u32 %v1668_v44, %v1498_v46  ;;  %v1669_v52 = vld [vmem:[#allocation7 + $0xdc] sm:$0xf] }
  0x3f   : > { %v1673_v48 = vld [vmem:[#allocation7 + $0xf4] sm:$0xf0]  ;;  %v1664_v56 = vld [vmem:[#allocation7 + $0xac] sm:$0xf0]  ;;  %v1653_v11 = vld [vmem:[#allocation7 + $0x5c] sm:$0xf] }
  0x40   : > { %v1505_v51 = vor.u32 %v1673_v48, %v1504_v47  ;;  %v1665_v62 = vld [vmem:[#allocation7 + $0xb4] sm:$0xf0]  ;;  %v1400_v16 = vld [vmem:[#allocation7 + $0x10] sm:$0xf] }
  0x41   : > { %v1648_v17 = vld [vmem:[#allocation7 + $0x2c] sm:$0xf0] }
  0x42   : > { %993 = vmatpush.bf16.msrb.mxu1 %v1493_v22  ;;  %977 = vmatpush.bf16.msrb.mxu0 %v1393_v54  ;;  %v1562_v22 = vld [vmem:[#allocation7 + $0x170] sm:$0xf0]  ;;  %v1464_v54 = vld [vmem:[#allocation7 + $0x90] sm:$0xf] }
  0xa1   : > { %v454_v26 = vpop.f32.mrf.mxu0 }
  0xa2   : > { %v455_v31 = vadd.f32 %v2070_v13, %v454_v26  ;;  %v1450_v26 = vld [vmem:[#allocation7 + $0xa0] sm:$0xf0] }
  0xa3   : > { %v1453_v29 = vor.u32 %v1658_v24, %v1450_v26  ;;  %v1568_v24 = vld [vmem:[#allocation7 + $0x158] sm:$0xf]  ;;  %v1685_v26 = vld [vmem:[#allocation7 + $0x15c] sm:$0xf] }
  0xa4   : > { %v466_v41 = vmax.f32 %v455_v31, 0.0  ;;  %v1659_v31 = vld [vmem:[#allocation7 + $0x8c] sm:$0xf] }
  0xa5   : > { %v1461_v33 = vor.u32 %v1659_v31, %v1458_v32  ;;  %956 = vmatpush.bf16.msra.mxu3 %v1453_v29  ;;  %v1573_v29 = vor.u32 %v1685_v26, %v1570_v28  ;;  %v1680_v31 = vld [vmem:[#allocation7 + $0x12c] sm:$0xf0]  ;;  %v1676_v32 = vld [vmem:[#allocation7 + $0x114] sm:$0xf]  ;;  %v1645_v28 = vld [vmem:[#allocation7 + $0x1c] sm:$0xf] }
  0xa6   : > { %1378 = vmatmul.msk.f32.vlgmr.msra.gmra.mxu1 %vm482_vm1, %v466_v41  ;;  %v1421_v41 = vor.u32 %v1650_v36, %v1418_v38  ;;  %v1681_v36 = vld [vmem:[#allocation7 + $0x134] sm:$0xf0] }
  0xa7   : > { %994 = vmatpush.bf16.msrb.mxu1 %v1461_v33  ;;  %v1529_v33 = vor.u32 %v1680_v31, %v1528_v30  ;;  %v1537_v38 = vor.u32 %v1681_v36, %v1536_v35 }
  0xa9   : > { %v457_v61 = vpop.f32.mrf.mxu0  ;;  %957 = vmatpush.bf16.msra.mxu3 %v1421_v41  ;;  %v1541_v41 = vor.u32 %v1677_v39, %v1538_v40 }
  0xaa   : > { %v458_v63 = vadd.f32 %v2070_v13, %v457_v61  ;;  %v1625_v61 = vor.u32 %v1704_v59, %v1624_v58  ;;  %v1466_v58 = vld [vmem:[#allocation7 + $0xb0] sm:$0xf0]  ;;  %v1465_v59 = vor.u32 %v1664_v56, %v1464_v54 }
  0xab   : > { %995 = vmatpush.bf16.msrb.mxu1 %v1429_v45  ;;  %v1497_v45 = vor.u32 %v1672_v43, %v1496_v42 }
  0xac   : > { %v467_v3 = vmax.f32 %v458_v63, 0.0  ;;  %v1632_v63 = vld [vmem:[#allocation7 + $0x1d8] sm:$0xf] }
  0xad   : > { %958 = vmatpush.bf16.msra.mxu3 %v1389_v53  ;;  %v1633_v2 = vor.u32 %v1705_v0, %v1632_v63  ;;  %v1506_v53 = vld [vmem:[#allocation7 + $0xf8] sm:$0xf0] }
  0xae   : > { %1379 = vmatmul.msk.f32.gmra.mxu1 %vm482_vm1, %v467_v3  ;;  %v1701_v3 = vld [vmem:[#allocation7 + $0x1dc] sm:$0xf]  ;;  %v1509_v55 = vor.u32 %v1669_v52, %v1506_v53 }
  0xaf   : > { %996 = vmatpush.bf16.msrb.mxu1 %v1397_v57  ;;  %1046 = vmatpush.bf16.msra.mxu0 %v1633_v2  ;;  %v1660_v57 = vld [vmem:[#allocation7 + $0x94] sm:$0xf]  ;;  %v1661_v63 = vld [vmem:[#allocation7 + $0x9c] sm:$0xf] }
  0xb0   : > { %v1469_v60 = vor.u32 %v1660_v57, %v1466_v58  ;;  %v1774_v0 = vld [vmem:[#allocation5] ss:$0 sm:$0xff]  ;;  %v594_v57 = vld [vmem:[#allocation8] sm:$0xff] }
  0xb1   : > { %v460_v4 = vpop.f32.mrf.mxu0  ;;  %1027 = vmatpush.bf16.msrb.mxu3 %v1629_v1  ;;  %v1474_v2 = vld [vmem:[#allocation7 + $0xb8] sm:$0xf0] }
  0xb2   : > { %v461_v5 = vadd.f32 %v2070_v13, %v460_v4  ;;  %v1634_v4 = vld [vmem:[#allocation7 + $0x1f8] sm:$0xf0] }
  0xb3   : > { %1047 = vmatpush.bf16.msra.mxu0 %v1601_v15  ;;  %v1442_v15 = vld [vmem:[#allocation7 + $0x78] sm:$0xf0] }
  0xb4   : > { %v468_v6 = vmax.f32 %v461_v5, 0.0  ;;  %v1637_v5 = vor.u32 %v1701_v3, %v1634_v4  ;;  %v1432_v3 = vld [vmem:[#allocation7 + $0x50] sm:$0xf]  ;;  %v1477_v4 = vor.u32 %v1661_v63, %v1474_v2 }
  0xb6   : > { %1380 = vmatmul.msk.f32.gmra.mxu1 %vm482_vm1, %v468_v6  ;;  %v1592_v6 = vld [vmem:[#allocation7 + $0x190] sm:$0xf] }
  0xb7   : > { %1065 = vmatpush.bf16.msra.mxu1 %v1637_v5  ;;  %v1656_v5 = vld [vmem:[#allocation7 + $0x6c] sm:$0xf0] }
  0xb9   : > { %v463_v7 = vpop.f32.mrf.mxu0 }
  0xba   : > { %v464_v8 = vadd.f32 %v2070_v13, %v463_v7  ;;  %v1662_v13 = vld [vmem:[#allocation7 + $0x9c] sm:$0xf0]  ;;  %v1696_v7 = vld [vmem:[#allocation7 + $0x1ac] sm:$0xf0] }
  0xbb   : > { %v1449_v25 = vor.u32 %v1662_v13, %v1448_v23  ;;  %v1561_v23 = vor.u32 %v1688_v20, %v1560_v18  ;;  %v1565_v13 = vor.u32 %v1684_v21, %v1562_v22  ;;  %1066 = vmatpush.bf16.msra.mxu1 %v1605_v19  ;;  %v1445_v19 = vor.u32 %v1653_v11, %v1442_v15  ;;  %v1644_v20 = vld [vmem:[#allocation7 + $0x14] sm:$0xf]  ;;  %v1408_v22 = vld [vmem:[#allocation7 + $0x18] sm:$0xf] }
  0xbc   : > { %v469_v9 = vmax.f32 %v464_v8, 0.0  ;;  %v1692_v8 = vld [vmem:[#allocation7 + $0x194] sm:$0xf] }
  0xbd   : > { %937 = vmatpush.bf16.msra.mxu2 %v1449_v25  ;;  %v1597_v14 = vor.u32 %v1692_v8, %v1594_v10  ;;  %v1689_v25 = vld [vmem:[#allocation7 + $0x174] sm:$0xf0]  ;;  %v1433_v8 = vor.u32 %v1656_v5, %v1432_v3  ;;  %v1402_v21 = vld [vmem:[#allocation7 + $0x30] sm:$0xf0] }
  0xbe   : > { %1381 = vmatmul.msk.f32.gmra.mxu1 %vm482_vm1, %v469_v9  ;;  %v1593_v9 = vor.u32 %v1696_v7, %v1592_v6  ;;  %v1569_v27 = vor.u32 %v1689_v25, %v1568_v24  ;;  %v1652_v6 = vld [vmem:[#allocation7 + $0x54] sm:$0xf]  ;;  %v1657_v10 = vld [vmem:[#allocation7 + $0x74] sm:$0xf0]  ;;  %v1401_v25 = vor.u32 %v1648_v17, %v1400_v16  ;;  %v1405_v26 = vor.u32 %v1644_v20, %v1402_v21 }
  0xbf   : > { %1028 = vmatpush.bf16.msrb.mxu3 %v1597_v14  ;;  %1067 = vmatpush.bf16.msra.mxu1 %v1573_v29  ;;  %v1434_v7 = vld [vmem:[#allocation7 + $0x70] sm:$0xf0]  ;;  %v1410_v29 = vld [vmem:[#allocation7 + $0x38] sm:$0xf0]  ;;  %v596_v16 = vperm.slane %v594_v57, 0 }
  0xc0   : > { %1048 = vmatpush.bf16.msra.mxu0 %v1569_v27  ;;  %v1437_v12 = vor.u32 %v1652_v6, %v1434_v7 }
  0xc1   : > { %938 = vmatpush.bf16.msra.mxu2 %v1417_v37  ;;  %v1533_v37 = vor.u32 %v1676_v32, %v1530_v34 }
  0xc3   : > { %1029 = vmatpush.bf16.msrb.mxu3 %v1565_v13  ;;  %1068 = vmatpush.bf16.msra.mxu1 %v1541_v41  ;;  %v1649_v13 = vld [vmem:[#allocation7 + $0x34] sm:$0xf0] }
  0xc4   : > { %1049 = vmatpush.bf16.msra.mxu0 %v1537_v38  ;;  %v1409_v27 = vor.u32 %v1649_v13, %v1408_v22 }
  0xc5   : > { %939 = vmatpush.bf16.msra.mxu2 %v1385_v49 }
  0xc7   : > { %1030 = vmatpush.bf16.msrb.mxu3 %v1533_v37  ;;  %1069 = vmatpush.bf16.msra.mxu1 %v1509_v55 }
  0xc8   : > { %1050 = vmatpush.bf16.msra.mxu0 %v1505_v51 }
  0xc9   : > { %1008 = vmatpush.bf16.msrb.mxu2 %v1625_v61  ;;  %v1472_v61 = vld [vmem:[#allocation7 + $0x98] sm:$0xf] }
  0xca   : > { %v1473_v1 = vor.u32 %v1665_v62, %v1472_v61  ;;  %v597_v61 = vperm.slane %v594_v57, 1 }
  0xcb   : > { %1031 = vmatpush.bf16.msrb.mxu3 %v1501_v50  ;;  %1070 = vmatpush.bf16.msra.mxu1 %v1477_v4 }
  0xcc   : > { %1051 = vmatpush.bf16.msra.mxu0 %v1473_v1 }
  0xcd   : > { %1009 = vmatpush.bf16.msrb.mxu2 %v1593_v9  ;;  %v1440_v9 = vld [vmem:[#allocation7 + $0x58] sm:$0xf] }
  0xce   : > { %v1441_v14 = vor.u32 %v1657_v10, %v1440_v9 }
  0xcf   : > { %1032 = vmatpush.bf16.msrb.mxu3 %v1469_v60  ;;  %1071 = vmatpush.bf16.msra.mxu1 %v1445_v19  ;;  %v598_v60 = vperm.slane %v594_v57, 2 }
  0xd0   : > { %1052 = vmatpush.bf16.msra.mxu0 %v1441_v14 }
  0xd1   : > { %1010 = vmatpush.bf16.msrb.mxu2 %v1561_v23 }
  0xd3   : > { %1033 = vmatpush.bf16.msrb.mxu3 %v1437_v12 }
  0xd4   : > { %1053 = vmatpush.bf16.msra.mxu0 %v1409_v27 }
  0xd5   : > { %1011 = vmatpush.bf16.msrb.mxu2 %v1529_v33  ;;  %v1413_v33 = vor.u32 %v1645_v28, %v1410_v29 }
  0xd7   : > { %1034 = vmatpush.bf16.msrb.mxu3 %v1405_v26  ;;  %1072 = vmatpush.bf16.msra.mxu1 %v1413_v33 }
  0xd9   : > { %1012 = vmatpush.bf16.msrb.mxu2 %v1497_v45 }
  0xdd   : > { %1013 = vmatpush.bf16.msrb.mxu2 %v1465_v59 }
  0xe1   : > { %1014 = vmatpush.bf16.msrb.mxu2 %v1433_v8 }
  0xe5   : > { %1015 = vmatpush.bf16.msrb.mxu2 %v1401_v25 }
 0x123   : > { %v512_v49 = vpop.f32.mrf.mxu1 }
 0x124   : > { %v513_v18 = vadd.f32 %v1774_v0, %v512_v49 }
 0x126   : > { %v524_v30 = vmax.f32 %v513_v18, 0.0 }
 0x12b   : > { %v515_v23 = vpop.f32.mrf.mxu1 }
 0x12c   : > { %v516_v24 = vadd.f32 %v1774_v0, %v515_v23 }
 0x12e   : > { %v525_v31 = vmax.f32 %v516_v24, 0.0 }
 0x130   : > { %v592_v32 = vpack.c.bf16 %v525_v31, %v524_v30 }
 0x132   : > { %940 = vmatmul.bf16.vlgmr.msra.gmra.mxu2 %v592_v32  ;;  %959 = vmatmul.bf16.vlgmr.msra.gmra.mxu3 %v592_v32 }
 0x133   : > { %978 = vmatmul.bf16.vlgmr.msrb.gmra.mxu0 %v592_v32  ;;  %997 = vmatmul.bf16.vlgmr.msrb.gmra.mxu1 %v592_v32  ;;  %v518_v34 = vpop.f32.mrf.mxu1 }
 0x134   : > { %v519_v35 = vadd.f32 %v1774_v0, %v518_v34 }
 0x136   : > { %v526_v38 = vmax.f32 %v519_v35, 0.0 }
 0x13b   : > { %v521_v36 = vpop.f32.mrf.mxu1 }
 0x13c   : > { %v522_v37 = vadd.f32 %v1774_v0, %v521_v36  ;;  %v599_v0 = vperm.slane %v594_v57, 3 }
 0x13e   : > { %v527_v39 = vmax.f32 %v522_v37, 0.0  ;;  %v602_v37 = vperm.slane %v594_v57, 6 }
 0x140   : > { %v593_v40 = vpack.c.bf16 %v527_v39, %v526_v38  ;;  %v603_v38 = vperm.slane %v594_v57, 7 }
 0x142   : > { %945 = vmatmul.bf16.gmra.mxu2 %v593_v40  ;;  %964 = vmatmul.bf16.gmra.mxu3 %v593_v40 }
 0x143   : > { %983 = vmatmul.bf16.gmra.mxu0 %v593_v40  ;;  %1002 = vmatmul.bf16.gmra.mxu1 %v593_v40 }
 0x152   : > { %1016 = vmatmul.bf16.vlgmr.msrb.gmra.mxu2 %v592_v32  ;;  %1035 = vmatmul.bf16.vlgmr.msrb.gmra.mxu3 %v592_v32 }
 0x153   : > { %1054 = vmatmul.bf16.vlgmr.msra.gmra.mxu0 %v592_v32  ;;  %1073 = vmatmul.bf16.vlgmr.msra.gmra.mxu1 %v592_v32 }
 0x162   : > { %1021 = vmatmul.bf16.gmra.mxu2 %v593_v40  ;;  %1040 = vmatmul.bf16.gmra.mxu3 %v593_v40 }
 0x163   : > { %1059 = vmatmul.bf16.gmra.mxu0 %v593_v40  ;;  %1078 = vmatmul.bf16.gmra.mxu1 %v593_v40 }
 0x1b0   : > { %v979_v41 = vpop.f32.mrf.mxu0  ;;  %v998_v42 = vpop.f32.mrf.mxu1 }
 0x1b1   : > { %v980_v3 = vadd.f32 %v979_v41, %v598_v60  ;;  %v999_v15 = vadd.f32 %v998_v42, %v599_v0 }
 0x1b5   : > { %v941_v43 = vpop.f32.mrf.mxu2  ;;  %v960_v44 = vpop.f32.mrf.mxu3 }
 0x1b6   : > { %v961_v4 = vadd.f32 %v960_v44, %v597_v61  ;;  %v942_v24 = vadd.f32 %v941_v43, %v596_v16 }
 0x1b8   : > { %v981_v45 = vpop.f32.mrf.mxu0  ;;  %v1000_v46 = vpop.f32.mrf.mxu1 }
 0x1b9   : > { %v982_v62 = vadd.f32 %v981_v45, %v598_v60  ;;  %v1001_v7 = vadd.f32 %v1000_v46, %v599_v0 }
 0x1bb   : > { %v1090_v8 = vmax.f32 %v980_v3, %v982_v62  ;;  %v1093_v20 = vmax.f32 %v999_v15, %v1001_v7 }
 0x1bd   : > { %v943_v47 = vpop.f32.mrf.mxu2  ;;  %v962_v48 = vpop.f32.mrf.mxu3 }
 0x1be   : > { %v963_v63 = vadd.f32 %v962_v48, %v597_v61  ;;  %v944_v21 = vadd.f32 %v943_v47, %v596_v16 }
 0x1c0   : > { %v984_v49 = vpop.f32.mrf.mxu0  ;;  %v1003_v50 = vpop.f32.mrf.mxu1  ;;  %v1087_v9 = vmax.f32 %v961_v4, %v963_v63  ;;  %v1084_v29 = vmax.f32 %v942_v24, %v944_v21 }
 0x1c1   : > { %v985_v5 = vadd.f32 %v984_v49, %v598_v60  ;;  %v1004_v17 = vadd.f32 %v1003_v50, %v599_v0 }
 0x1c3   : > { %v1091_v18 = vmax.f32 %v1090_v8, %v985_v5  ;;  %v1094_v25 = vmax.f32 %v1093_v20, %v1004_v17 }
 0x1c5   : > { %v946_v51 = vpop.f32.mrf.mxu2  ;;  %v965_v52 = vpop.f32.mrf.mxu3 }
 0x1c6   : > { %v966_v6 = vadd.f32 %v965_v52, %v597_v61  ;;  %v947_v26 = vadd.f32 %v946_v51, %v596_v16  ;;  %v600_v51 = vperm.slane %v594_v57, 4  ;;  %v601_v52 = vperm.slane %v594_v57, 5 }
 0x1c8   : > { %v986_v53 = vpop.f32.mrf.mxu0  ;;  %v1005_v54 = vpop.f32.mrf.mxu1  ;;  %v1088_v19 = vmax.f32 %v1087_v9, %v966_v6  ;;  %v1085_v36 = vmax.f32 %v1084_v29, %v947_v26 }
 0x1c9   : > { %v987_v10 = vadd.f32 %v986_v53, %v598_v60  ;;  %v1006_v22 = vadd.f32 %v1005_v54, %v599_v0 }
 0x1cb   : > { %v1092_v23 = vmax.f32 %v1091_v18, %v987_v10  ;;  %v1095_v30 = vmax.f32 %v1094_v25, %v1006_v22 }
 0x1cd   : > { %v948_v55 = vpop.f32.mrf.mxu2  ;;  %v967_v56 = vpop.f32.mrf.mxu3  ;;  %v1155_v32 = vrot.slane %v1092_v23, 4  ;;  %v1161_v39 = vrot.slane %v1095_v30, 4 }
 0x1ce   : > { %v968_v11 = vadd.f32 %v967_v56, %v597_v61  ;;  %v949_v31 = vadd.f32 %v948_v55, %v596_v16 }
 0x1cf   : > { %v1156_v44 = vmax.f32 %v1092_v23, %v1155_v32  ;;  %v1162_v53 = vmax.f32 %v1095_v30, %v1161_v39 }
 0x1d0   : > { %v1055_v58 = vpop.f32.mrf.mxu0  ;;  %v1074_v59 = vpop.f32.mrf.mxu1  ;;  %v1089_v13 = vmax.f32 %v1088_v19, %v968_v11  ;;  %v1086_v40 = vmax.f32 %v1085_v36, %v949_v31 }
 0x1d1   : > { %v1056_v45 = vadd.f32 %v1055_v58, %v602_v37  ;;  %v1075_v46 = vadd.f32 %v1074_v59, %v603_v38  ;;  %v1157_v60 = vrot.slane %v1156_v44, 2  ;;  %v1163_v9 = vrot.slane %v1162_v53, 2 }
 0x1d2   : > { %v1149_v33 = vrot.slane %v1089_v13, 4  ;;  %v1143_v54 = vrot.slane %v1086_v40, 4 }
 0x1d3   : > { %v1158_v16 = vmax.f32 %v1156_v44, %v1157_v60  ;;  %v1164_v24 = vmax.f32 %v1162_v53, %v1163_v9 }
 0x1d4   : > { %v1150_v43 = vmax.f32 %v1089_v13, %v1149_v33  ;;  %v1144_v10 = vmax.f32 %v1086_v40, %v1143_v54 }
 0x1d5   : > { %v2080_v1 = vpop.f32.mrf.mxu2  ;;  %v2082_v2 = vpop.f32.mrf.mxu3  ;;  %v1159_v31 = vrot.slane %v1158_v16, 1 }
 0x1d6   : > { %v1151_v61 = vrot.slane %v1150_v43, 2  ;;  %v1018_v6 = vadd.f32 %v2080_v1, %v600_v51  ;;  %v1037_v7 = vadd.f32 %v2082_v2, %v601_v52  ;;  %v1145_v2 = vrot.slane %v1144_v10, 2 }
 0x1d8   : > { %v1057_v12 = vpop.f32.mrf.mxu0  ;;  %v1076_v14 = vpop.f32.mrf.mxu1  ;;  %v1152_v17 = vmax.f32 %v1150_v43, %v1151_v61  ;;  %v1146_v36 = vmax.f32 %v1144_v10, %v1145_v2 }
 0x1d9   : > { %v1058_v41 = vadd.f32 %v1057_v12, %v602_v37  ;;  %v1077_v42 = vadd.f32 %v1076_v14, %v603_v38 }
 0x1da   : > { %v1153_v32 = vrot.slane %v1152_v17, 1 }
 0x1db   : > { %v1102_v55 = vmax.f32 %v1056_v45, %v1058_v41  ;;  %v1105_v56 = vmax.f32 %v1075_v46, %v1077_v42  ;;  %v1160_v46 = vmax.f32 %v1158_v16, %v1159_v31 }
 0x1dc   : > { %v1154_v44 = vmax.f32 %v1152_v17, %v1153_v32 }
 0x1dd   : > { %v1019_v27 = vpop.f32.mrf.mxu2  ;;  %v1038_v28 = vpop.f32.mrf.mxu3 }
 0x1de   : > { %v1020_v62 = vadd.f32 %v1019_v27, %v600_v51  ;;  %v1039_v63 = vadd.f32 %v1038_v28, %v601_v52  ;;  %v1199_v53 = vrot.slane %v1154_v44, 7 }
 0x1e0   : > { %v1060_v34 = vpop.f32.mrf.mxu0  ;;  %v1079_v35 = vpop.f32.mrf.mxu1  ;;  %v1096_v14 = vmax.f32 %v1018_v6, %v1020_v62  ;;  %v1099_v15 = vmax.f32 %v1037_v7, %v1039_v63 }
 0x1e1   : > { %v1061_v47 = vadd.f32 %v1060_v34, %v602_v37  ;;  %v1080_v48 = vadd.f32 %v1079_v35, %v603_v38  ;;  %v1165_v35 = vrot.slane %v1164_v24, 1 }
 0x1e3   : > { %v1103_v4 = vmax.f32 %v1102_v55, %v1061_v47  ;;  %v1106_v5 = vmax.f32 %v1105_v56, %v1080_v48  ;;  %v1166_v47 = vmax.f32 %v1164_v24, %v1165_v35  ;;  %v1147_v48 = vrot.slane %v1146_v36, 1 }
 0x1e4   : > { %v1200_v56 = vrot.slane %v1160_v46, 6 }
 0x1e5   : > { %v1022_v49 = vpop.f32.mrf.mxu2  ;;  %v1041_v50 = vpop.f32.mrf.mxu3  ;;  %v1201_v60 = vrot.slane %v1166_v47, 5  ;;  %v1148_v61 = vmax.f32 %v1146_v36, %v1147_v48 }
 0x1e6   : > { %v1023_v8 = vadd.f32 %v1022_v49, %v600_v51  ;;  %v1042_v57 = vadd.f32 %v1041_v50, %v601_v52 }
 0x1e8   : > { %v1062_v0 = vpop.f32.mrf.mxu0  ;;  %v1081_v3 = vpop.f32.mrf.mxu1  ;;  %v1097_v22 = vmax.f32 %v1096_v14, %v1023_v8  ;;  %v1100_v23 = vmax.f32 %v1099_v15, %v1042_v57 }
 0x1e9   : > { %v1063_v58 = vadd.f32 %v1062_v0, %v602_v37  ;;  %v1082_v59 = vadd.f32 %v1081_v3, %v603_v38 }
 0x1eb   : > { %v1104_v11 = vmax.f32 %v1103_v4, %v1063_v58  ;;  %v1107_v12 = vmax.f32 %v1106_v5, %v1082_v59  ;;  %v1207_v4 = vsel %vm1206_vm2, %v1148_v61, %v1199_v53  ;;  %v1209_v59 = vsel %vm1208_vm3, %v1200_v56, %v1201_v60 }
 0x1ec   : > { %v1211_v8 = vsel %vm1210_vm4, %v1207_v4, %v1209_v59 }
 0x1ed   : > { %v1179_v18 = vrot.slane %v1104_v11, 4  ;;  %v1185_v19 = vrot.slane %v1107_v12, 4  ;;  %v1024_v20 = vpop.f32.mrf.mxu2  ;;  %v1043_v21 = vpop.f32.mrf.mxu3 }
 0x1ee   : > { %v1025_v13 = vadd.f32 %v1024_v20, %v600_v51  ;;  %v1044_v1 = vadd.f32 %v1043_v21, %v601_v52 }
 0x1ef   : > { %v1180_v25 = vmax.f32 %v1104_v11, %v1179_v18  ;;  %v1186_v26 = vmax.f32 %v1107_v12, %v1185_v19 }
 0x1f0   : > { %v1098_v27 = vmax.f32 %v1097_v22, %v1025_v13  ;;  %v1101_v28 = vmax.f32 %v1100_v23, %v1044_v1 }
 0x1f1   : > { %v1181_v29 = vrot.slane %v1180_v25, 2  ;;  %v1187_v30 = vrot.slane %v1186_v26, 2 }
 0x1f2   : > { %v1167_v33 = vrot.slane %v1098_v27, 4  ;;  %v1173_v34 = vrot.slane %v1101_v28, 4 }
 0x1f3   : > { %v1182_v37 = vmax.f32 %v1180_v25, %v1181_v29  ;;  %v1188_v38 = vmax.f32 %v1186_v26, %v1187_v30 }
 0x1f4   : > { %v1168_v39 = vmax.f32 %v1098_v27, %v1167_v33  ;;  %v1174_v40 = vmax.f32 %v1101_v28, %v1173_v34 }
 0x1f5   : > { %v1183_v41 = vrot.slane %v1182_v37, 1  ;;  %v1189_v42 = vrot.slane %v1188_v38, 1 }
 0x1f6   : > { %v1169_v43 = vrot.slane %v1168_v39, 2  ;;  %v1175_v45 = vrot.slane %v1174_v40, 2 }
 0x1f7   : > { %v1184_v49 = vmax.f32 %v1182_v37, %v1183_v41  ;;  %v1190_v50 = vmax.f32 %v1188_v38, %v1189_v42 }
 0x1f8   : > { %v1170_v51 = vmax.f32 %v1168_v39, %v1169_v43  ;;  %v1176_v52 = vmax.f32 %v1174_v40, %v1175_v45 }
 0x1f9   : > { %v1204_v62 = vrot.slane %v1184_v49, 2  ;;  %v1205_v63 = vrot.slane %v1190_v50, 1 }
 0x1fa   : > { %v1171_v54 = vrot.slane %v1170_v51, 1  ;;  %v1177_v55 = vrot.slane %v1176_v52, 1 }
 0x1fb   : > { %v1215_v6 = vsel %vm1214_vm5, %v1204_v62, %v1205_v63 }
 0x1fc   : > { %v1172_v0 = vmax.f32 %v1170_v51, %v1171_v54  ;;  %v1178_v3 = vmax.f32 %v1176_v52, %v1177_v55 }
 0x1fe   : > { %v1202_v5 = vrot.slane %v1172_v0, 4  ;;  %v1203_v58 = vrot.slane %v1178_v3, 3 }
 0x200   : > { %v1213_v7 = vsel %vm1212_vm6, %v1202_v5, %v1203_v58 }
 0x201   : > { %v1217_v57 = vsel %vm1216_vm7, %v1213_v7, %v1215_v6 }
 0x202   : > { %v1219_v9 = vsel %vm1218_vm8, %v1211_v8, %v1217_v57 }
 0x203   : > { %1221 = vst [vmem:[%s402_s29] sm:$0xff] %v1219_v9 }
 0x204 PF: > { %s20_s26 = sadd.s32 1, %s1929_s26   ;;  %s2111_s24 = smov %s1925_s25 }
 0x205   : > { %p17_p8 = scmp.ge.s32.totalorder %s20_s26, 4   ;;  %s2112_s25 = smov %s2114_s13 }
 0x207   :  { %19 = sbr.rel (!%p17_p8) target bundleno = 4 (0x4), region = 109 }
 0x20c   :  { %1241 = vsyncpa [#allocation4], 1 }
 0x20d   :  { %1243 = vsyncpa [#allocation4 + $0x1], 1 }
 0x20e   :  { %1244 = vsyncpa [#allocation6], 1 }
 0x20f   :  { %1245 = vsyncpa [#allocation9], 1 }

// kernel: _lambda_.9
= control target key start
LH: loop header
LB: loop body
LE: loop exit
PB: predicated region body
PF: predicated region fallthrough
CT: control target
= control target key end

     0   :  { %s5003_s0 = inlined_call_operand.vmem [shape: f32[8,1024], index: 0, kind: input, shape index: {}]   ;;  %s5004_s1 = inlined_call_operand.hbm [shape: bf16[1024,512], index: 1, kind: input, shape index: {}]   ;;  %s5005_s2 = inlined_call_operand.hbm [shape: f32[1,512], index: 2, kind: input, shape index: {}]   ;;  %s5006_s3 = inlined_call_operand.hbm [shape: bf16[512,256], index: 3, kind: input, shape index: {}]   ;;  %s5007_s4 = inlined_call_operand.hbm [shape: f32[1,256], index: 4, kind: input, shape index: {}]   ;;  %s5008_s5 = inlined_call_operand.hbm [shape: f32[256,4096], index: 5, kind: input, shape index: {}]   ;;  %s5009_s6 = inlined_call_operand.hbm [shape: f32[1,4096], index: 6, kind: input, shape index: {}]   ;;  %s5010_s7 = inlined_call_operand.vmem [shape: f32[8,4096], index: 7, kind: output, shape index: {}]  }
   0x1   :  { %5011 = sst [smem:[#allocation18_spill]] %s5005_s2 }
   0x2   :  { %5012 = sst [smem:[#allocation19_spill]] %s5007_s4 }
   0x3   :  { %5013 = sst [smem:[#allocation20_spill]] %s5008_s5 }
   0x4   :  { %5014 = sst [smem:[#allocation21_spill]] %s5009_s6 }
   0x5   :  { %12 = vsyncpa [#allocation4], 0 }
   0x6   :  { %14 = vsyncpa [#allocation4 + $0x1], 0 }
   0x7   :  { %15 = vsyncpa [#allocation6], 0 }
   0x8   :  { %17 = vsyncpa [#allocation6 + $0x1], 0 }
   0x9   :  { %18 = vsyncpa [#allocation9], 0 }
   0xa   :  { %19 = vsyncpa [#allocation12], 0  ;;  %s4500_s24 = smov 0   ;;  %s4502_s25 = smov 0  }
   0xb   :  { %s4504_s26 = smov 0   ;;  %s4506_s27 = smov 0  }
   0xc LB: > { %s4519_s28 = sadd.s32 4294967295, %s4448_s27   ;;  %p66_p0 = scmp.ne.s32.totalorder %s4440_s25, %s4436_s24  ;;  %s4448_s27 = sphi %s4506_s27, %s5030_s27   ;;  %s4444_s26 = sphi %s4504_s26, %s5029_s26   ;;  %s4440_s25 = sphi %s4502_s25, %s5028_s25   ;;  %s4436_s24 = sphi %s4500_s24, %s5027_s24  }
   0xd   : > { %p67_p1 = scmp.eq.s32.totalorder %s4519_s28, 0  ;;  %p3711_p2 = scmp.ge.s32.totalorder %s4448_s27, 1 }
   0xe   : > { %p213_p3 = scmp.lt.s32.totalorder %s4448_s27, 5  ;;  %p3712_p4 = scmp.ne.s32.totalorder %s4519_s28, 0 }
   0xf   : > { %p4528_p5 = por %p67_p1, %p66_p0  ;;  %s5016_s4 = sld [smem:[#allocation19_spill]] }
  0x10   : > { %p4535_p6 = pnand %p3711_p2, %p213_p3  ;;  %s4450_s11 = smov [#allocation8]  }
  0x11   : > { %s230_s12 = sshll.u32 %s4450_s11, 4  ;;  %s4548_s14 = sadd.s32 1, %s4448_s27   ;;  %s231_s12 = int_to_ptr.vmem [resolvable:$true] %s230_s12 }
  0x12   : > { %p4152_p7 = pneg %p4535_p6  ;;  %s53_s15 = sadd.s32 1, %s4444_s26 }
  0x13   : > { %s50_s16 = ssub.s32 %s4448_s27, %s4548_s14  ;;  %p60_p10 = scmp.ne.s32.totalorder %s4444_s26, %s4440_s25 }
  0x14   : > { %p4543_p8 = pnand %p4152_p7, %p67_p1  ;;  %p51_p9 = scmp.eq.s32.totalorder %s50_s16, 0 }
  0x15   : > { %s228_s9 = sshll.u32 %s5016_s4, 4  ;;  %p61_p11 = scmp.eq.s32.totalorder %s4448_s27, 0  ;;  %s229_s9 = int_to_ptr.hbm [resolvable:$true] %s228_s9 }
  0x16   : > { %4155 = dma.hbm_to_vmem [thread:$0]  (!%p4543_p8), %s229_s9, 32, %s231_s12, [#allocation9]  }
  0x17   : > { %p4175_p12 = scmp.lt.s32.totalorder %s4448_s27, 4  ;;  %p62_p13 = por %p61_p11, %p60_p10 }
  0x18   : > { %s4560_s17 = scalar_select %p51_p9, %s4444_s26, %s53_s15  }
  0x19   : > { %s4563_s18 = sand.u32 1, %s4444_s26   ;;  %s288_s20 = sand.u32 1, %s4448_s27  }
  0x1a   : > { %5019 = sst [smem:[#allocation17_spill]] %s4560_s17  ;;  %p4567_p0 = pnand %p4175_p12, %p62_p13 }
  0x1b   : > { %s5021_s2 = sld [smem:[#allocation18_spill]]  ;;  %s291_s8 = scalar_lea.vmem [#allocation5], %s4563_s18 }
  0x1c   : > { %s298_s9 = sshll.u32 %s291_s8, 4  ;;  %s4577_s12 = scalar_lea.sflag [#allocation6], %s288_s20  ;;  %s299_s9 = int_to_ptr.vmem [resolvable:$true] %s298_s9 }
  0x1d   : > { %p4256_p3 = pneg %p4567_p0 }
  0x21   : > { %s294_s24 = scalar_lea.hbm %s5021_s2, %s4448_s27 }
  0x22   : > { %s296_s30 = sshll.u32 %s294_s24, 4  ;;  %s4259_s24 = scalar_lea.hbm %s5021_s2, 4  ;;  %s297_s30 = int_to_ptr.hbm [resolvable:$true] %s296_s30 }
  0x23   : > { %s4252_s15 = sshra.s32 %s297_s30, 4  ;;  %s4253_s15 = int_to_ptr.hbm [resolvable:$true] %s4252_s15 }
  0x24   : > { %s4254_s16 = scalar_lea.hbm %s4253_s15, 1  ;;  %p4260_p10 = scmp.lt.s32.totalorder %s4253_s15, %s5021_s2 }
  0x25   : > { %p4255_p2 = scmp.ne.s32.totalorder %s4253_s15, %s4254_s16  ;;  %p4261_p11 = scmp.lt.s32.totalorder %s4259_s24, %s4254_s16 }
  0x27   : > { %p4257_p7 = pnand %p4256_p3, %p4255_p2  ;;  %p4262_p12 = por %p4261_p11, %p4260_p10 }
  0x29   : > { %p4258_p9 = pneg %p4257_p7 }
  0x2b   : > { %p4263_p13 = pnand %p4262_p12, %p4258_p9 }
  0x2d   : > { %4266 = shalt.err (!%p4263_p13)
}
  0x2e   : > { %4168 = dma.hbm_to_vmem [thread:$0]  (!%p4567_p0), %s297_s30, 16, %s299_s9, %s4577_s12  }
  0x2f   : > { %s5022_s5 = sld [smem:[#allocation20_spill]]  ;;  %s4451_s23 = smov [#allocation10]  }
  0x30   : > { %s241_s19 = sshll.u32 %s4451_s23, 4  ;;  %s5023_s6 = sld [smem:[#allocation21_spill]]  ;;  %s242_s19 = int_to_ptr.vmem [resolvable:$true] %s241_s19 }
  0x31   : > { %s4452_s8 = smov 4096   ;;  %s4453_s2 = smov 256  }
  0x32   : > { %s4454_s30 = smov [#allocation11]   ;;  %s3717_s11 = sshll.u32 %s4448_s27, 2 }
  0x33   : > { %s256_s9 = sshll.u32 %s4454_s30, 4  ;;  %s5024_s20 = sshll.u32 %s4563_s18, 9  ;;  %s257_s9 = int_to_ptr.vmem [resolvable:$true] %s256_s9 }
  0x34   : > { %s271_s23 = scalar_lea.vmem [#allocation3], %s5024_s20  ;;  %s275_s16 = scalar_lea.hbm %s5004_s1, %s3717_s11 }
  0x35   : > { %s239_s22 = sshll.u32 %s5022_s5, 4  ;;  %s278_s4 = sshll.u32 %s271_s23, 4  ;;  %s240_s22 = int_to_ptr.hbm [resolvable:$true] %s239_s22  ;;  %s279_s4 = int_to_ptr.vmem [resolvable:$true] %s278_s4 }
  0x36   : > { %s254_s24 = sshll.u32 %s5023_s6, 4  ;;  %s276_s6 = sshll.u32 %s275_s16, 4  ;;  %s255_s24 = int_to_ptr.hbm [resolvable:$true] %s254_s24  ;;  %s277_s6 = int_to_ptr.hbm [resolvable:$true] %s276_s6 }
  0x37   : > { %4158 = dma.hbm_to_vmem [thread:$0]  (!%p4543_p8), %s240_s22, 131072, %s242_s19, [#allocation9], %s4452_s8, %s4452_s8, %s4453_s2  }
  0x38   : > { %4161 = dma.hbm_to_vmem [thread:$0]  (!%p4543_p8), %s255_s24, 512, %s257_s9, [#allocation12]  }
  0x39   : > { %s268_s17 = scalar_lea.sflag [#allocation4], %s4563_s18  ;;  %s4342_s22 = sshra.s32 %s277_s6, 4  ;;  %s4343_s22 = int_to_ptr.hbm [resolvable:$true] %s4342_s22 }
  0x3a   : > { %s4344_s19 = scalar_lea.hbm %s4343_s22, 512  ;;  %s4349_s8 = scalar_lea.hbm %s5004_s1, 2048 }
  0x3b   : > { %p4345_p2 = scmp.ne.s32.totalorder %s4343_s22, %s4344_s19  ;;  %p4350_p9 = scmp.lt.s32.totalorder %s4343_s22, %s5004_s1 }
  0x3c   : > { %p4351_p10 = scmp.lt.s32.totalorder %s4349_s8, %s4344_s19 }
  0x3d   : > { %p4347_p7 = pnand %p4345_p2, %p4256_p3 }
  0x3e   : > { %p4352_p11 = por %p4351_p10, %p4350_p9 }
  0x3f   : > { %p4348_p8 = pneg %p4347_p7 }
  0x41   : > { %p4353_p12 = pnand %p4352_p11, %p4348_p8 }
  0x43   : > { %4356 = shalt.err (!%p4353_p12)
}
  0x44   : > { %s4455_s5 = smov 64   ;;  %s4456_s11 = smov 4  }
  0x45   : > { %4165 = dma.hbm_to_vmem [thread:$0]  (!%p4567_p0), %s277_s6, 8192, %s279_s4, %s268_s17, %s4453_s2, %s4455_s5, %s4456_s11  }
  0x46   : > { %s4053_s20 = sshll.u32 %s4448_s27, 7  ;;  %s5025_s13 = sshll.u32 %s4563_s18, 7 }
  0x47   : > { %s315_s16 = scalar_lea.hbm %s5006_s3, %s4053_s20  ;;  %s309_s22 = scalar_lea.vmem [#allocation7], %s5025_s13 }
  0x48   : > { %s318_s19 = sshll.u32 %s309_s22, 4  ;;  %s316_s24 = sshll.u32 %s315_s16, 4  ;;  %s319_s19 = int_to_ptr.vmem [resolvable:$true] %s318_s19  ;;  %s317_s24 = int_to_ptr.hbm [resolvable:$true] %s316_s24 }
  0x49   : > { %s4372_s8 = sshra.s32 %s317_s24, 4  ;;  %s4379_s6 = scalar_lea.hbm %s5006_s3, 512  ;;  %s4373_s8 = int_to_ptr.hbm [resolvable:$true] %s4372_s8 }
  0x4a   : > { %s4374_s30 = scalar_lea.hbm %s4373_s8, 128  ;;  %p4380_p8 = scmp.lt.s32.totalorder %s4373_s8, %s5006_s3 }
  0x4b   : > { %p4375_p13 = scmp.ne.s32.totalorder %s4373_s8, %s4374_s30  ;;  %p4381_p9 = scmp.lt.s32.totalorder %s4379_s6, %s4374_s30 }
  0x4d   : > { %p4377_p2 = pnand %p4375_p13, %p4256_p3  ;;  %p4382_p10 = por %p4381_p9, %p4380_p8 }
  0x4f   : > { %p4378_p7 = pneg %p4377_p2 }
  0x51   : > { %p4383_p11 = pnand %p4382_p10, %p4378_p7 }
  0x53   : > { %4386 = shalt.err (!%p4383_p11)
}
  0x54   : > { %s4457_s18 = smov 128   ;;  %s4458_s9 = smov 8  }
  0x55   : > { %4171 = dma.hbm_to_vmem [thread:$0]  (!%p4567_p0), %s317_s24, 2048, %s319_s19, %s4577_s12, %s4457_s18, %s4457_s18, %s4458_s9  }
  0x56   : > { %330 = sbr.rel (%p4535_p6) target bundleno = 1126 (0x466), region = 48  ;;  %s4644_s5 = sand.u32 (!%p4535_p6), 1, %s4440_s25  }
  0x57   : > { %s3723_s11 = sshll.u32 (!%p4535_p6), %s4644_s5, 9  ;;  %s333_s20 = scalar_lea.sflag (!%p4535_p6), [#allocation4], %s4644_s5 }
  0x58   : > { %s4648_s23 = scalar_lea.vmem (!%p4535_p6), [#allocation3], %s3723_s11 }
  0x5b   : > { %4419 = dma.done.wait (%p4528_p5), %s333_s20, 8192  }
  0x5c   : > { %4421 = vsyncadd (%p4528_p5), %s333_s20, 4294959104  ;;  %s342_s10 = sand.u32 1, %s4519_s28   ;;  %s345_s12 = scalar_lea.vmem [#allocation5], %s4644_s5 }
  0x5d   : > { %s343_s21 = scalar_lea.sflag [#allocation6], %s342_s10 }
  0x5e   : > { %4423 = dma.done.wait (%p4528_p5), %s343_s21, 2064  }
  0x5f   : > { %4425 = vsyncadd (%p4528_p5), %s343_s21, 4294965232  ;;  %s3724_s15 = sshll.u32 %s4644_s5, 7 }
  0x60   : > { %s4661_s16 = scalar_lea.vmem [#allocation7], %s3724_s15 }
  0x61   : > { %4427 = dma.done.wait (%p67_p1), [#allocation9], 131104  }
  0x62   : > { %4429 = vsyncadd (%p67_p1), [#allocation9], 4294836192 }
  0x63   : > { %4431 = dma.done.wait (%p67_p1), [#allocation12], 512  }
  0x64   : > { %4433 = vsyncadd (%p67_p1), [#allocation12], 4294966784  ;;  %410 = sbr.rel (%p3712_p4) target bundleno = 108 (0x6c), region = 76 }
  0x69   : > { %v4459_v0 = vmov 0.0  }
  0x6a   : > { %411 = vst [vmem:[#allocation2] sm:$0xff] %v4459_v0 }
  0x6b   : > { %412 = vst [vmem:[#allocation2 + $0x8] sm:$0xff] %v4459_v0 }
  0x6c PF: > { %v4061_v1 = vld [vmem:[%s4648_s23 + $0x38] sm:$0xff]  ;;  %v4060_v5 = vld [vmem:[%s4648_s23 + $0x30] sm:$0xff]  ;;  %v4059_v9 = vld [vmem:[%s4648_s23 + $0x28] sm:$0xff]  ;;  %p4049_p1 = scmp.ne.s32.totalorder %s4519_s28, 3 }
  0x6d   : > { %v4069_v2 = vld [vmem:[%s4648_s23 + $0x78] sm:$0xff]  ;;  %945 = vmatpush.bf16.msra.mxu0 %v4061_v1  ;;  %v4068_v6 = vld [vmem:[%s4648_s23 + $0x70] sm:$0xff]  ;;  %v4067_v10 = vld [vmem:[%s4648_s23 + $0x68] sm:$0xff] }
  0x6e   : > { %v4077_v3 = vld [vmem:[%s4648_s23 + $0xb8] sm:$0xff]  ;;  %958 = vmatpush.bf16.msra.mxu1 %v4069_v2  ;;  %v4076_v7 = vld [vmem:[%s4648_s23 + $0xb0] sm:$0xff]  ;;  %v4075_v11 = vld [vmem:[%s4648_s23 + $0xa8] sm:$0xff] }
  0x6f   : > { %v4085_v4 = vld [vmem:[%s4648_s23 + $0xf8] sm:$0xff]  ;;  %971 = vmatpush.bf16.msra.mxu2 %v4077_v3  ;;  %v4084_v8 = vld [vmem:[%s4648_s23 + $0xf0] sm:$0xff]  ;;  %v4083_v12 = vld [vmem:[%s4648_s23 + $0xe8] sm:$0xff] }
  0x70   : > { %984 = vmatpush.bf16.msra.mxu3 %v4085_v4  ;;  %v4058_v13 = vld [vmem:[%s4648_s23 + $0x20] sm:$0xff]  ;;  %v4057_v17 = vld [vmem:[%s4648_s23 + $0x18] sm:$0xff]  ;;  %v4056_v21 = vld [vmem:[%s4648_s23 + $0x10] sm:$0xff] }
  0x71   : > { %946 = vmatpush.bf16.msra.mxu0 %v4060_v5  ;;  %v4066_v14 = vld [vmem:[%s4648_s23 + $0x60] sm:$0xff]  ;;  %v4065_v18 = vld [vmem:[%s4648_s23 + $0x58] sm:$0xff]  ;;  %v4064_v22 = vld [vmem:[%s4648_s23 + $0x50] sm:$0xff] }
  0x72   : > { %959 = vmatpush.bf16.msra.mxu1 %v4068_v6  ;;  %v4074_v15 = vld [vmem:[%s4648_s23 + $0xa0] sm:$0xff]  ;;  %v4073_v19 = vld [vmem:[%s4648_s23 + $0x98] sm:$0xff]  ;;  %v4072_v23 = vld [vmem:[%s4648_s23 + $0x90] sm:$0xff] }
  0x73   : > { %972 = vmatpush.bf16.msra.mxu2 %v4076_v7  ;;  %v4082_v16 = vld [vmem:[%s4648_s23 + $0xe0] sm:$0xff]  ;;  %v4081_v20 = vld [vmem:[%s4648_s23 + $0xd8] sm:$0xff]  ;;  %v4080_v24 = vld [vmem:[%s4648_s23 + $0xd0] sm:$0xff] }
  0x74   : > { %985 = vmatpush.bf16.msra.mxu3 %v4084_v8  ;;  %v4055_v25 = vld [vmem:[%s4648_s23 + $0x8] sm:$0xff]  ;;  %v4054_v29 = vld [vmem:[%s4648_s23] sm:$0xff]  ;;  %v4093_v33 = vld [vmem:[%s4648_s23 + $0x138] sm:$0xff] }
  0x75   : > { %947 = vmatpush.bf16.msra.mxu0 %v4059_v9  ;;  %v4063_v26 = vld [vmem:[%s4648_s23 + $0x48] sm:$0xff]  ;;  %v4062_v30 = vld [vmem:[%s4648_s23 + $0x40] sm:$0xff]  ;;  %v413_v35 = vld [vmem:[%s5003_s0] sm:$0xff] }
  0x76   : > { %960 = vmatpush.bf16.msra.mxu1 %v4067_v10  ;;  %v4071_v27 = vld [vmem:[%s4648_s23 + $0x88] sm:$0xff]  ;;  %v4070_v31 = vld [vmem:[%s4648_s23 + $0x80] sm:$0xff]  ;;  %v4101_v36 = vld [vmem:[%s4648_s23 + $0x178] sm:$0xff]  ;;  %v549_v42 = vpack.c.bf16 %v413_v35, %v413_v35 }
  0x77   : > { %973 = vmatpush.bf16.msra.mxu2 %v4075_v11  ;;  %v4079_v28 = vld [vmem:[%s4648_s23 + $0xc8] sm:$0xff]  ;;  %v4078_v32 = vld [vmem:[%s4648_s23 + $0xc0] sm:$0xff]  ;;  %v414_v38 = vld [vmem:[%s5003_s0 + $0x8] sm:$0xff] }
  0x78   : > { %986 = vmatpush.bf16.msra.mxu3 %v4083_v12  ;;  %v415_v34 = vld [vmem:[%s5003_s0 + $0x10] sm:$0xff]  ;;  %v416_v37 = vld [vmem:[%s5003_s0 + $0x18] sm:$0xff]  ;;  %v4109_v39 = vld [vmem:[%s4648_s23 + $0x1b8] sm:$0xff]  ;;  %v550_v44 = vpack.c.bf16 %v414_v38, %v414_v38 }
  0x79   : > { %948 = vmatpush.bf16.msra.mxu0 %v4058_v13  ;;  %v4117_v40 = vld [vmem:[%s4648_s23 + $0x1f8] sm:$0xff]  ;;  %v551_v41 = vpack.c.bf16 %v415_v34, %v415_v34  ;;  %v552_v43 = vpack.c.bf16 %v416_v37, %v416_v37  ;;  %v4092_v45 = vld [vmem:[%s4648_s23 + $0x130] sm:$0xff]  ;;  %v4091_v49 = vld [vmem:[%s4648_s23 + $0x128] sm:$0xff] }
  0x7a   : > { %961 = vmatpush.bf16.msra.mxu1 %v4066_v14  ;;  %v4100_v46 = vld [vmem:[%s4648_s23 + $0x170] sm:$0xff]  ;;  %v4099_v50 = vld [vmem:[%s4648_s23 + $0x168] sm:$0xff]  ;;  %v4090_v53 = vld [vmem:[%s4648_s23 + $0x120] sm:$0xff] }
  0x7b   : > { %974 = vmatpush.bf16.msra.mxu2 %v4074_v15  ;;  %v4108_v47 = vld [vmem:[%s4648_s23 + $0x1b0] sm:$0xff]  ;;  %v4107_v51 = vld [vmem:[%s4648_s23 + $0x1a8] sm:$0xff]  ;;  %v4098_v54 = vld [vmem:[%s4648_s23 + $0x160] sm:$0xff] }
  0x7c   : > { %987 = vmatpush.bf16.msra.mxu3 %v4082_v16  ;;  %v4116_v48 = vld [vmem:[%s4648_s23 + $0x1f0] sm:$0xff]  ;;  %v4115_v52 = vld [vmem:[%s4648_s23 + $0x1e8] sm:$0xff]  ;;  %v4106_v55 = vld [vmem:[%s4648_s23 + $0x1a0] sm:$0xff] }
  0x7d   : > { %949 = vmatpush.bf16.msra.mxu0 %v4057_v17  ;;  %v4114_v56 = vld [vmem:[%s4648_s23 + $0x1e0] sm:$0xff]  ;;  %v4089_v57 = vld [vmem:[%s4648_s23 + $0x118] sm:$0xff]  ;;  %v4088_v61 = vld [vmem:[%s4648_s23 + $0x110] sm:$0xff] }
  0x7e   : > { %962 = vmatpush.bf16.msra.mxu1 %v4065_v18  ;;  %v4097_v58 = vld [vmem:[%s4648_s23 + $0x158] sm:$0xff]  ;;  %v4096_v62 = vld [vmem:[%s4648_s23 + $0x150] sm:$0xff]  ;;  %v4087_v1 = vld [vmem:[%s4648_s23 + $0x108] sm:$0xff] }
  0x7f   : > { %975 = vmatpush.bf16.msra.mxu2 %v4073_v19  ;;  %v4105_v59 = vld [vmem:[%s4648_s23 + $0x198] sm:$0xff]  ;;  %v4104_v63 = vld [vmem:[%s4648_s23 + $0x190] sm:$0xff]  ;;  %v4095_v2 = vld [vmem:[%s4648_s23 + $0x148] sm:$0xff] }
  0x80   : > { %988 = vmatpush.bf16.msra.mxu3 %v4081_v20  ;;  %v4113_v60 = vld [vmem:[%s4648_s23 + $0x1d8] sm:$0xff]  ;;  %v4112_v0 = vld [vmem:[%s4648_s23 + $0x1d0] sm:$0xff]  ;;  %v4103_v3 = vld [vmem:[%s4648_s23 + $0x188] sm:$0xff] }
  0x81   : > { %950 = vmatpush.bf16.msra.mxu0 %v4056_v21  ;;  %v4111_v4 = vld [vmem:[%s4648_s23 + $0x1c8] sm:$0xff]  ;;  %v4086_v5 = vld [vmem:[%s4648_s23 + $0x100] sm:$0xff]  ;;  %v417_v8 = vld [vmem:[%s5003_s0 + $0x20] sm:$0xff] }
  0x82   : > { %963 = vmatpush.bf16.msra.mxu1 %v4064_v22  ;;  %v4094_v6 = vld [vmem:[%s4648_s23 + $0x140] sm:$0xff]  ;;  %v418_v9 = vld [vmem:[%s5003_s0 + $0x28] sm:$0xff]  ;;  %v420_v12 = vld [vmem:[%s5003_s0 + $0x38] sm:$0xff]  ;;  %v553_v13 = vpack.c.bf16 %v417_v8, %v417_v8 }
  0x83   : > { %976 = vmatpush.bf16.msra.mxu2 %v4072_v23  ;;  %v4102_v7 = vld [vmem:[%s4648_s23 + $0x180] sm:$0xff]  ;;  %v554_v14 = vpack.c.bf16 %v418_v9, %v418_v9  ;;  %v556_v16 = vpack.c.bf16 %v420_v12, %v420_v12  ;;  %v4043_v17 = vld [vmem:[%s4661_s16 + $0x70] sm:$0xf]  ;;  %v4133_v18 = vld [vmem:[%s4661_s16 + $0x74] sm:$0xf0] }
  0x84   : > { %989 = vmatpush.bf16.msra.mxu3 %v4080_v24  ;;  %v4110_v10 = vld [vmem:[%s4648_s23 + $0x1c0] sm:$0xff]  ;;  %v4132_v19 = vld [vmem:[%s4661_s16 + $0x74] sm:$0xf]  ;;  %v4044_v20 = vor.u32 %v4133_v18, %v4043_v17  ;;  %v4131_v23 = vld [vmem:[%s4661_s16 + $0x64] sm:$0xf0] }
  0x85   : > { %951 = vmatpush.bf16.msra.mxu0 %v4055_v25  ;;  %v419_v11 = vld [vmem:[%s5003_s0 + $0x30] sm:$0xff]  ;;  %v4021_v38 = vld [vmem:[%s4661_s16 + $0x48] sm:$0xf0] }
  0x86   : > { %964 = vmatpush.bf16.msra.mxu1 %v4063_v26  ;;  %v555_v15 = vpack.c.bf16 %v419_v11, %v419_v11  ;;  %v4045_v21 = vld [vmem:[%s4661_s16 + $0x78] sm:$0xf0]  ;;  %v4035_v22 = vld [vmem:[%s4661_s16 + $0x60] sm:$0xf]  ;;  %v4130_v25 = vld [vmem:[%s4661_s16 + $0x64] sm:$0xf] }
  0x87   : > { %977 = vmatpush.bf16.msra.mxu2 %v4071_v27  ;;  %v4048_v24 = vor.u32 %v4132_v19, %v4045_v21  ;;  %v4037_v26 = vld [vmem:[%s4661_s16 + $0x68] sm:$0xf0]  ;;  %v4036_v27 = vor.u32 %v4131_v23, %v4035_v22  ;;  %v4019_v35 = vld [vmem:[%s4661_s16 + $0x40] sm:$0xf]  ;;  %v4126_v37 = vld [vmem:[%s4661_s16 + $0x44] sm:$0xf] }
  0x88   : > { %990 = vmatpush.bf16.msra.mxu3 %v4079_v28  ;;  %v4040_v28 = vor.u32 %v4130_v25, %v4037_v26 }
  0x89   : > { %952 = vmatpush.bf16.msra.mxu0 %v4054_v29  ;;  %v4027_v29 = vld [vmem:[%s4661_s16 + $0x50] sm:$0xf] }
  0x8a   : > { %965 = vmatpush.bf16.msra.mxu1 %v4062_v30  ;;  %v4129_v30 = vld [vmem:[%s4661_s16 + $0x54] sm:$0xf0] }
  0x8b   : > { %978 = vmatpush.bf16.msra.mxu2 %v4070_v31  ;;  %v4128_v31 = vld [vmem:[%s4661_s16 + $0x54] sm:$0xf] }
  0x8c   : > { %991 = vmatpush.bf16.msra.mxu3 %v4078_v32  ;;  %953 = vmatmul.bf16.vlgmr.msra.gmra.mxu0 %v549_v42  ;;  %v4028_v32 = vor.u32 %v4129_v30, %v4027_v29  ;;  %v4125_v42 = vld [vmem:[%s4661_s16 + $0x34] sm:$0xf0] }
  0x8d   : > { %997 = vmatpush.bf16.msrb.mxu0 %v4093_v33  ;;  %966 = vmatmul.bf16.vlgmr.msra.gmra.mxu1 %v550_v44  ;;  %v4029_v33 = vld [vmem:[%s4661_s16 + $0x58] sm:$0xf0] }
  0x8e   : > { %1010 = vmatpush.bf16.msrb.mxu1 %v4101_v36  ;;  %979 = vmatmul.bf16.vlgmr.msra.gmra.mxu2 %v551_v41  ;;  %v4032_v34 = vor.u32 %v4128_v31, %v4029_v33  ;;  %v4127_v36 = vld [vmem:[%s4661_s16 + $0x44] sm:$0xf0]  ;;  %v4011_v41 = vld [vmem:[%s4661_s16 + $0x30] sm:$0xf]  ;;  %v1068_v29 = vld [vmem:[#allocation2 + $0x8] sm:$0xff] }
  0x8f   : > { %1023 = vmatpush.bf16.msrb.mxu2 %v4109_v39  ;;  %992 = vmatmul.bf16.vlgmr.msra.gmra.mxu3 %v552_v43  ;;  %v4020_v39 = vor.u32 %v4127_v36, %v4019_v35  ;;  %v4124_v43 = vld [vmem:[%s4661_s16 + $0x34] sm:$0xf]  ;;  %v4012_v44 = vor.u32 %v4125_v42, %v4011_v41 }
  0x90   : > { %1036 = vmatpush.bf16.msrb.mxu3 %v4117_v40  ;;  %v4024_v40 = vor.u32 %v4126_v37, %v4021_v38 }
  0x91   : > { %998 = vmatpush.bf16.msrb.mxu0 %v4092_v45  ;;  %v4013_v45 = vld [vmem:[%s4661_s16 + $0x38] sm:$0xf0] }
  0x92   : > { %1011 = vmatpush.bf16.msrb.mxu1 %v4100_v46  ;;  %v4016_v46 = vor.u32 %v4124_v43, %v4013_v45 }
  0x93   : > { %1024 = vmatpush.bf16.msrb.mxu2 %v4108_v47  ;;  %v4003_v47 = vld [vmem:[%s4661_s16 + $0x20] sm:$0xf] }
  0x94   : > { %1037 = vmatpush.bf16.msrb.mxu3 %v4116_v48  ;;  %v4123_v48 = vld [vmem:[%s4661_s16 + $0x24] sm:$0xf0] }
  0x95   : > { %999 = vmatpush.bf16.msrb.mxu0 %v4091_v49  ;;  %v4122_v49 = vld [vmem:[%s4661_s16 + $0x24] sm:$0xf] }
  0x96   : > { %1012 = vmatpush.bf16.msrb.mxu1 %v4099_v50 }
  0x97   : > { %1025 = vmatpush.bf16.msrb.mxu2 %v4107_v51  ;;  %v4004_v51 = vor.u32 %v4123_v48, %v4003_v47 }
  0x98   : > { %1038 = vmatpush.bf16.msrb.mxu3 %v4115_v52  ;;  %v4005_v52 = vld [vmem:[%s4661_s16 + $0x28] sm:$0xf0] }
  0x99   : > { %1000 = vmatpush.bf16.msrb.mxu0 %v4090_v53 }
  0x9a   : > { %1013 = vmatpush.bf16.msrb.mxu1 %v4098_v54  ;;  %v4008_v54 = vor.u32 %v4122_v49, %v4005_v52 }
  0x9b   : > { %1026 = vmatpush.bf16.msrb.mxu2 %v4106_v55  ;;  %v3995_v55 = vld [vmem:[%s4661_s16 + $0x10] sm:$0xf] }
  0x9c   : > { %1039 = vmatpush.bf16.msrb.mxu3 %v4114_v56  ;;  %v4121_v56 = vld [vmem:[%s4661_s16 + $0x14] sm:$0xf0] }
  0x9d   : > { %1001 = vmatpush.bf16.msrb.mxu0 %v4089_v57  ;;  %v4120_v57 = vld [vmem:[%s4661_s16 + $0x14] sm:$0xf] }
  0x9e   : > { %1014 = vmatpush.bf16.msrb.mxu1 %v4097_v58  ;;  %v3996_v58 = vor.u32 %v4121_v56, %v3995_v55 }
  0x9f   : > { %1027 = vmatpush.bf16.msrb.mxu2 %v4105_v59  ;;  %v3997_v59 = vld [vmem:[%s4661_s16 + $0x18] sm:$0xf0] }
  0xa0   : > { %1040 = vmatpush.bf16.msrb.mxu3 %v4113_v60  ;;  %v4000_v60 = vor.u32 %v4120_v57, %v3997_v59 }
  0xa1   : > { %1002 = vmatpush.bf16.msrb.mxu0 %v4088_v61 }
  0xa2   : > { %1015 = vmatpush.bf16.msrb.mxu1 %v4096_v62 }
  0xa3   : > { %1028 = vmatpush.bf16.msrb.mxu2 %v4104_v63  ;;  %v3987_v63 = vld [vmem:[%s4661_s16] sm:$0xf] }
  0xa4   : > { %1041 = vmatpush.bf16.msrb.mxu3 %v4112_v0  ;;  %v4119_v0 = vld [vmem:[%s4661_s16 + $0x4] sm:$0xf0] }
  0xa5   : > { %1003 = vmatpush.bf16.msrb.mxu0 %v4087_v1  ;;  %v4118_v1 = vld [vmem:[%s4661_s16 + $0x4] sm:$0xf] }
  0xa6   : > { %1016 = vmatpush.bf16.msrb.mxu1 %v4095_v2 }
  0xa7   : > { %1029 = vmatpush.bf16.msrb.mxu2 %v4103_v3  ;;  %v3988_v3 = vor.u32 %v4119_v0, %v3987_v63 }
  0xa8   : > { %1042 = vmatpush.bf16.msrb.mxu3 %v4111_v4  ;;  %v3989_v4 = vld [vmem:[%s4661_s16 + $0x8] sm:$0xf0] }
  0xa9   : > { %1004 = vmatpush.bf16.msrb.mxu0 %v4086_v5 }
  0xaa   : > { %1017 = vmatpush.bf16.msrb.mxu1 %v4094_v6  ;;  %v3992_v6 = vor.u32 %v4118_v1, %v3989_v4 }
  0xab   : > { %1030 = vmatpush.bf16.msrb.mxu2 %v4102_v7  ;;  %v4221_v7 = vld [vmem:[%s345_s12] ss:$0 sm:$0xff] }
  0xac   : > { %1043 = vmatpush.bf16.msrb.mxu3 %v4110_v10  ;;  %1005 = vmatmul.bf16.vlgmr.msrb.gmra.mxu0 %v553_v13 }
  0xad   : > { %1018 = vmatmul.bf16.vlgmr.msrb.gmra.mxu1 %v554_v14  ;;  %1149 = vmatpush.bf16.msra.mxu0 %v4044_v20 }
  0xae   : > { %1031 = vmatmul.bf16.vlgmr.msrb.gmra.mxu2 %v555_v15  ;;  %1162 = vmatpush.bf16.msra.mxu1 %v4048_v24 }
  0xaf   : > { %1044 = vmatmul.bf16.vlgmr.msrb.gmra.mxu3 %v556_v16 }
  0xb1   : > { %1150 = vmatpush.bf16.msra.mxu0 %v4036_v27 }
  0xb2   : > { %1163 = vmatpush.bf16.msra.mxu1 %v4040_v28  ;;  %v1067_v28 = vld [vmem:[#allocation2] sm:$0xff] }
  0xb5   : > { %1151 = vmatpush.bf16.msra.mxu0 %v4028_v32 }
  0xb6   : > { %1164 = vmatpush.bf16.msra.mxu1 %v4032_v34 }
  0xb9   : > { %1152 = vmatpush.bf16.msra.mxu0 %v4020_v39 }
  0xba   : > { %1165 = vmatpush.bf16.msra.mxu1 %v4024_v40 }
  0xbd   : > { %1153 = vmatpush.bf16.msra.mxu0 %v4012_v44 }
  0xbe   : > { %1166 = vmatpush.bf16.msra.mxu1 %v4016_v46 }
  0xc1   : > { %1154 = vmatpush.bf16.msra.mxu0 %v4004_v51 }
  0xc2   : > { %1167 = vmatpush.bf16.msra.mxu1 %v4008_v54 }
  0xc5   : > { %1155 = vmatpush.bf16.msra.mxu0 %v3996_v58 }
  0xc6   : > { %1168 = vmatpush.bf16.msra.mxu1 %v4000_v60 }
  0xc9   : > { %1156 = vmatpush.bf16.msra.mxu0 %v3988_v3 }
  0xca   : > { %1169 = vmatpush.bf16.msra.mxu1 %v3992_v6 }
 0x109   : > { %v954_v50 = vpop.f32.mrf.mxu0 }
 0x10a   : > { %v967_v53 = vpop.f32.mrf.mxu1  ;;  %v955_v10 = vadd.f32 %v4221_v7, %v954_v50 }
 0x10c   : > { %v968_v11 = vadd.f32 %v967_v53, %v955_v10 }
 0x111   : > { %v980_v61 = vpop.f32.mrf.mxu2  ;;  %v956_v2 = vpop.f32.mrf.mxu0 }
 0x112   : > { %v993_v62 = vpop.f32.mrf.mxu3  ;;  %v969_v5 = vpop.f32.mrf.mxu1  ;;  %v981_v12 = vadd.f32 %v980_v61, %v968_v11 }
 0x114   : > { %v994_v13 = vadd.f32 %v993_v62, %v981_v12 }
 0x119   : > { %v982_v8 = vpop.f32.mrf.mxu2 }
 0x11a   : > { %v995_v9 = vpop.f32.mrf.mxu3 }
 0x129   : > { %v1006_v14 = vpop.f32.mrf.mxu0 }
 0x12a   : > { %v1019_v15 = vpop.f32.mrf.mxu1  ;;  %v1007_v16 = vadd.f32 %v1006_v14, %v994_v13 }
 0x12c   : > { %v1020_v17 = vadd.f32 %v1019_v15, %v1007_v16 }
 0x131   : > { %v1032_v18 = vpop.f32.mrf.mxu2  ;;  %v1008_v21 = vpop.f32.mrf.mxu0 }
 0x132   : > { %v1045_v19 = vpop.f32.mrf.mxu3  ;;  %v1033_v20 = vadd.f32 %v1032_v18, %v1020_v17  ;;  %v1021_v22 = vpop.f32.mrf.mxu1 }
 0x134   : > { %v1046_v23 = vadd.f32 %v1045_v19, %v1033_v20 }
 0x136   : > { %v1049_v24 = vmax.f32 %v1046_v23, 0.0 }
 0x138   : > { %v1066_v25 = vpack.c.bf16 %v1049_v24, %v1049_v24 }
 0x139   : > { %v1034_v26 = vpop.f32.mrf.mxu2 }
 0x13a   : > { %v1047_v27 = vpop.f32.mrf.mxu3  ;;  %1157 = vmatmul.bf16.vlgmr.msra.gmra.mxu0 %v1066_v25  ;;  %1170 = vmatmul.bf16.vlgmr.msra.gmra.mxu1 %v1066_v25 }
 0x1b7   : > { %v1158_v30 = vpop.f32.mrf.mxu0  ;;  %v1171_v31 = vpop.f32.mrf.mxu1 }
 0x1b8   : > { %v1175_v32 = vadd.f32 %v1158_v30, %v1067_v28  ;;  %v1176_v33 = vadd.f32 %v1171_v31, %v1068_v29 }
 0x1ba   : > { %1177 = vst [vmem:[#allocation2] sm:$0xff] %v1175_v32 }
 0x1bb   : > { %1178 = vst [vmem:[#allocation2 + $0x8] sm:$0xff] %v1176_v33  ;;  %1182 = sbr.rel (%p4049_p1) target bundleno = 1126 (0x466), region = 80 }
 0x1bf   : > { %v1160_v34 = vpop.f32.mrf.mxu0  ;;  %v1173_v35 = vpop.f32.mrf.mxu1 }
 0x1c0   : > { %v1676_v36 = vld [vmem:[#allocation10 + $0xf08] sm:$0xff]  ;;  %v1675_v40 = vld [vmem:[#allocation10 + $0xf00] sm:$0xff]  ;;  %v1678_v33 = vld [vmem:[#allocation10 + $0xf18] sm:$0xff] }
 0x1c1   : > { %v1644_v37 = vld [vmem:[#allocation10 + $0xe08] sm:$0xff]  ;;  %2331 = vmatpush.msra.mxu2 %v1676_v36  ;;  %2291 = vmatpush.msra.mxu0 %v1675_v40  ;;  %v1643_v43 = vld [vmem:[#allocation10 + $0xe00] sm:$0xff]  ;;  %v2190_v34 = vld [vmem:[#allocation10 + $0x1f18] sm:$0xff] }
 0x1c2   : > { %v2188_v38 = vld [vmem:[#allocation10 + $0x1f08] sm:$0xff]  ;;  %v2187_v45 = vld [vmem:[#allocation10 + $0x1f00] sm:$0xff] }
 0x1c3   : > { %2351 = vmatpush.msra.mxu3 %v2188_v38  ;;  %v2156_v39 = vld [vmem:[#allocation10 + $0x1e08] sm:$0xff]  ;;  %2332 = vmatpush.msra.mxu2 %v1644_v37  ;;  %v1611_v47 = vld [vmem:[#allocation10 + $0xd00] sm:$0xff]  ;;  %v1646_v37 = vld [vmem:[#allocation10 + $0xe18] sm:$0xff] }
 0x1c4   : > { %v1612_v41 = vld [vmem:[#allocation10 + $0xd08] sm:$0xff]  ;;  %2292 = vmatpush.msra.mxu0 %v1643_v43  ;;  %2311 = vmatpush.msra.mxu1 %v2187_v45  ;;  %v2155_v48 = vld [vmem:[#allocation10 + $0x1e00] sm:$0xff]  ;;  %v2158_v38 = vld [vmem:[#allocation10 + $0x1e18] sm:$0xff] }
 0x1c5   : > { %v2124_v42 = vld [vmem:[#allocation10 + $0x1d08] sm:$0xff]  ;;  %2352 = vmatpush.msra.mxu3 %v2156_v39  ;;  %2333 = vmatpush.msra.mxu2 %v1612_v41  ;;  %v1579_v49 = vld [vmem:[#allocation10 + $0xc00] sm:$0xff]  ;;  %v1677_v39 = vld [vmem:[#allocation10 + $0xf10] sm:$0xff] }
 0x1c6   : > { %v1580_v44 = vld [vmem:[#allocation10 + $0xc08] sm:$0xff]  ;;  %v2123_v50 = vld [vmem:[#allocation10 + $0x1d00] sm:$0xff]  ;;  %2293 = vmatpush.msra.mxu0 %v1611_v47  ;;  %2312 = vmatpush.msra.mxu1 %v2155_v48  ;;  %v1614_v41 = vld [vmem:[#allocation10 + $0xd18] sm:$0xff] }
 0x1c7   : > { %v2092_v46 = vld [vmem:[#allocation10 + $0x1c08] sm:$0xff]  ;;  %2353 = vmatpush.msra.mxu3 %v2124_v42  ;;  %2334 = vmatpush.msra.mxu2 %v1580_v44  ;;  %v1547_v53 = vld [vmem:[#allocation10 + $0xb00] sm:$0xff]  ;;  %v2126_v42 = vld [vmem:[#allocation10 + $0x1d18] sm:$0xff] }
 0x1c8   : > { %v1548_v51 = vld [vmem:[#allocation10 + $0xb08] sm:$0xff]  ;;  %v2091_v54 = vld [vmem:[#allocation10 + $0x1c00] sm:$0xff]  ;;  %2294 = vmatpush.msra.mxu0 %v1579_v49  ;;  %2313 = vmatpush.msra.mxu1 %v2123_v50  ;;  %v1645_v43 = vld [vmem:[#allocation10 + $0xe10] sm:$0xff] }
 0x1c9   : > { %v2060_v52 = vld [vmem:[#allocation10 + $0x1b08] sm:$0xff]  ;;  %2354 = vmatpush.msra.mxu3 %v2092_v46  ;;  %2335 = vmatpush.msra.mxu2 %v1548_v51  ;;  %v1515_v57 = vld [vmem:[#allocation10 + $0xa00] sm:$0xff]  ;;  %v2189_v44 = vld [vmem:[#allocation10 + $0x1f10] sm:$0xff] }
 0x1ca   : > { %v1516_v55 = vld [vmem:[#allocation10 + $0xa08] sm:$0xff]  ;;  %v2059_v58 = vld [vmem:[#allocation10 + $0x1b00] sm:$0xff]  ;;  %2295 = vmatpush.msra.mxu0 %v1547_v53  ;;  %2314 = vmatpush.msra.mxu1 %v2091_v54  ;;  %v1582_v45 = vld [vmem:[#allocation10 + $0xc18] sm:$0xff] }
 0x1cb   : > { %v2028_v56 = vld [vmem:[#allocation10 + $0x1a08] sm:$0xff]  ;;  %2355 = vmatpush.msra.mxu3 %v2060_v52  ;;  %2336 = vmatpush.msra.mxu2 %v1516_v55  ;;  %v1483_v61 = vld [vmem:[#allocation10 + $0x900] sm:$0xff]  ;;  %v2094_v46 = vld [vmem:[#allocation10 + $0x1c18] sm:$0xff] }
 0x1cc   : > { %v1484_v59 = vld [vmem:[#allocation10 + $0x908] sm:$0xff]  ;;  %v2027_v62 = vld [vmem:[#allocation10 + $0x1a00] sm:$0xff]  ;;  %2296 = vmatpush.msra.mxu0 %v1515_v57  ;;  %2315 = vmatpush.msra.mxu1 %v2059_v58  ;;  %v1613_v47 = vld [vmem:[#allocation10 + $0xd10] sm:$0xff] }
 0x1cd   : > { %v1996_v60 = vld [vmem:[#allocation10 + $0x1908] sm:$0xff]  ;;  %2356 = vmatpush.msra.mxu3 %v2028_v56  ;;  %2337 = vmatpush.msra.mxu2 %v1484_v59  ;;  %v1451_v1 = vld [vmem:[#allocation10 + $0x800] sm:$0xff]  ;;  %v2157_v48 = vld [vmem:[#allocation10 + $0x1e10] sm:$0xff] }
 0x1ce   : > { %v1452_v63 = vld [vmem:[#allocation10 + $0x808] sm:$0xff]  ;;  %v1995_v2 = vld [vmem:[#allocation10 + $0x1900] sm:$0xff]  ;;  %2297 = vmatpush.msra.mxu0 %v1483_v61  ;;  %2316 = vmatpush.msra.mxu1 %v2027_v62  ;;  %v1550_v49 = vld [vmem:[#allocation10 + $0xb18] sm:$0xff] }
 0x1cf   : > { %v1964_v0 = vld [vmem:[#allocation10 + $0x1808] sm:$0xff]  ;;  %2357 = vmatpush.msra.mxu3 %v1996_v60  ;;  %2338 = vmatpush.msra.mxu2 %v1452_v63  ;;  %v1419_v5 = vld [vmem:[#allocation10 + $0x700] sm:$0xff]  ;;  %v2062_v50 = vld [vmem:[#allocation10 + $0x1b18] sm:$0xff] }
 0x1d0   : > { %v1420_v3 = vld [vmem:[#allocation10 + $0x708] sm:$0xff]  ;;  %v1963_v6 = vld [vmem:[#allocation10 + $0x1800] sm:$0xff]  ;;  %2298 = vmatpush.msra.mxu0 %v1451_v1  ;;  %2317 = vmatpush.msra.mxu1 %v1995_v2  ;;  %v1581_v51 = vld [vmem:[#allocation10 + $0xc10] sm:$0xff] }
 0x1d1   : > { %v1932_v4 = vld [vmem:[#allocation10 + $0x1708] sm:$0xff]  ;;  %2358 = vmatpush.msra.mxu3 %v1964_v0  ;;  %2339 = vmatpush.msra.mxu2 %v1420_v3  ;;  %v1387_v9 = vld [vmem:[#allocation10 + $0x600] sm:$0xff]  ;;  %v2125_v52 = vld [vmem:[#allocation10 + $0x1d10] sm:$0xff] }
 0x1d2   : > { %v1388_v7 = vld [vmem:[#allocation10 + $0x608] sm:$0xff]  ;;  %v1931_v10 = vld [vmem:[#allocation10 + $0x1700] sm:$0xff]  ;;  %2299 = vmatpush.msra.mxu0 %v1419_v5  ;;  %2318 = vmatpush.msra.mxu1 %v1963_v6  ;;  %v1518_v53 = vld [vmem:[#allocation10 + $0xa18] sm:$0xff] }
 0x1d3   : > { %v1900_v8 = vld [vmem:[#allocation10 + $0x1608] sm:$0xff]  ;;  %2359 = vmatpush.msra.mxu3 %v1932_v4  ;;  %2340 = vmatpush.msra.mxu2 %v1388_v7  ;;  %v1355_v13 = vld [vmem:[#allocation10 + $0x500] sm:$0xff]  ;;  %v2030_v54 = vld [vmem:[#allocation10 + $0x1a18] sm:$0xff] }
 0x1d4   : > { %v1356_v11 = vld [vmem:[#allocation10 + $0x508] sm:$0xff]  ;;  %v1899_v14 = vld [vmem:[#allocation10 + $0x1600] sm:$0xff]  ;;  %2300 = vmatpush.msra.mxu0 %v1387_v9  ;;  %2319 = vmatpush.msra.mxu1 %v1931_v10  ;;  %v1549_v55 = vld [vmem:[#allocation10 + $0xb10] sm:$0xff] }
 0x1d5   : > { %v1868_v12 = vld [vmem:[#allocation10 + $0x1508] sm:$0xff]  ;;  %2360 = vmatpush.msra.mxu3 %v1900_v8  ;;  %2341 = vmatpush.msra.mxu2 %v1356_v11  ;;  %v1323_v17 = vld [vmem:[#allocation10 + $0x400] sm:$0xff]  ;;  %v2093_v56 = vld [vmem:[#allocation10 + $0x1c10] sm:$0xff] }
 0x1d6   : > { %v1324_v15 = vld [vmem:[#allocation10 + $0x408] sm:$0xff]  ;;  %v1867_v18 = vld [vmem:[#allocation10 + $0x1500] sm:$0xff]  ;;  %2301 = vmatpush.msra.mxu0 %v1355_v13  ;;  %2320 = vmatpush.msra.mxu1 %v1899_v14  ;;  %v1486_v57 = vld [vmem:[#allocation10 + $0x918] sm:$0xff] }
 0x1d7   : > { %v1836_v16 = vld [vmem:[#allocation10 + $0x1408] sm:$0xff]  ;;  %2361 = vmatpush.msra.mxu3 %v1868_v12  ;;  %2342 = vmatpush.msra.mxu2 %v1324_v15  ;;  %v1291_v21 = vld [vmem:[#allocation10 + $0x300] sm:$0xff]  ;;  %v1998_v58 = vld [vmem:[#allocation10 + $0x1918] sm:$0xff] }
 0x1d8   : > { %v1292_v19 = vld [vmem:[#allocation10 + $0x308] sm:$0xff]  ;;  %v1835_v22 = vld [vmem:[#allocation10 + $0x1400] sm:$0xff]  ;;  %2302 = vmatpush.msra.mxu0 %v1323_v17  ;;  %2321 = vmatpush.msra.mxu1 %v1867_v18  ;;  %v1517_v59 = vld [vmem:[#allocation10 + $0xa10] sm:$0xff] }
 0x1d9   : > { %v1804_v20 = vld [vmem:[#allocation10 + $0x1308] sm:$0xff]  ;;  %2362 = vmatpush.msra.mxu3 %v1836_v16  ;;  %2343 = vmatpush.msra.mxu2 %v1292_v19  ;;  %v1259_v25 = vld [vmem:[#allocation10 + $0x200] sm:$0xff]  ;;  %v2061_v60 = vld [vmem:[#allocation10 + $0x1b10] sm:$0xff] }
 0x1da   : > { %v1260_v23 = vld [vmem:[#allocation10 + $0x208] sm:$0xff]  ;;  %v1803_v26 = vld [vmem:[#allocation10 + $0x1300] sm:$0xff]  ;;  %2303 = vmatpush.msra.mxu0 %v1291_v21  ;;  %2322 = vmatpush.msra.mxu1 %v1835_v22  ;;  %v1454_v61 = vld [vmem:[#allocation10 + $0x818] sm:$0xff] }
 0x1db   : > { %v1772_v24 = vld [vmem:[#allocation10 + $0x1208] sm:$0xff]  ;;  %2363 = vmatpush.msra.mxu3 %v1804_v20  ;;  %2344 = vmatpush.msra.mxu2 %v1260_v23  ;;  %v1227_v29 = vld [vmem:[#allocation10 + $0x100] sm:$0xff]  ;;  %v1966_v62 = vld [vmem:[#allocation10 + $0x1818] sm:$0xff] }
 0x1dc   : > { %v1228_v27 = vld [vmem:[#allocation10 + $0x108] sm:$0xff]  ;;  %v1771_v30 = vld [vmem:[#allocation10 + $0x1200] sm:$0xff]  ;;  %2304 = vmatpush.msra.mxu0 %v1259_v25  ;;  %2323 = vmatpush.msra.mxu1 %v1803_v26  ;;  %v1485_v63 = vld [vmem:[#allocation10 + $0x910] sm:$0xff] }
 0x1dd   : > { %v1740_v28 = vld [vmem:[#allocation10 + $0x1108] sm:$0xff]  ;;  %2364 = vmatpush.msra.mxu3 %v1772_v24  ;;  %2345 = vmatpush.msra.mxu2 %v1228_v27  ;;  %v1195_v35 = vld [vmem:[#allocation10] sm:$0xff]  ;;  %v2029_v0 = vld [vmem:[#allocation10 + $0x1a10] sm:$0xff] }
 0x1de   : > { %v1196_v31 = vld [vmem:[#allocation10 + $0x8] sm:$0xff]  ;;  %2305 = vmatpush.msra.mxu0 %v1227_v29  ;;  %2324 = vmatpush.msra.mxu1 %v1771_v30  ;;  %v1739_v36 = vld [vmem:[#allocation10 + $0x1100] sm:$0xff]  ;;  %v1422_v1 = vld [vmem:[#allocation10 + $0x718] sm:$0xff] }
 0x1df   : > { %v1708_v32 = vld [vmem:[#allocation10 + $0x1008] sm:$0xff]  ;;  %2365 = vmatpush.msra.mxu3 %v1740_v28  ;;  %2346 = vmatpush.msra.mxu2 %v1196_v31  ;;  %v1707_v40 = vld [vmem:[#allocation10 + $0x1000] sm:$0xff]  ;;  %v1934_v2 = vld [vmem:[#allocation10 + $0x1718] sm:$0xff] }
 0x1e0   : > { %2306 = vmatpush.msra.mxu0 %v1195_v35  ;;  %2325 = vmatpush.msra.mxu1 %v1739_v36  ;;  %v1453_v3 = vld [vmem:[#allocation10 + $0x810] sm:$0xff]  ;;  %v1185_v5 = vld [vmem:[#allocation8] sm:$0x3] }
 0x1e1   : > { %2366 = vmatpush.msra.mxu3 %v1708_v32  ;;  %2411 = vmatpush.msrb.mxu2 %v1678_v33  ;;  %v1997_v4 = vld [vmem:[#allocation10 + $0x1910] sm:$0xff]  ;;  %v1390_v6 = vld [vmem:[#allocation10 + $0x618] sm:$0xff]  ;;  %v1187_v12 = vperm.slane %v1185_v5, 0  ;;  %v1188_v20 = vperm.slane %v1185_v5, 1  ;;  %v1519_v5 = vld [vmem:[#allocation10 + $0xa20] sm:$0xff] }
 0x1e2   : > { %2371 = vmatpush.msrb.mxu0 %v1677_v39  ;;  %2326 = vmatpush.msra.mxu1 %v1707_v40  ;;  %v1902_v7 = vld [vmem:[#allocation10 + $0x1618] sm:$0xff]  ;;  %v1421_v8 = vld [vmem:[#allocation10 + $0x710] sm:$0xff] }
 0x1e3   : > { %2431 = vmatpush.msrb.mxu3 %v2190_v34  ;;  %2412 = vmatpush.msrb.mxu2 %v1646_v37  ;;  %v1965_v9 = vld [vmem:[#allocation10 + $0x1810] sm:$0xff]  ;;  %v1358_v10 = vld [vmem:[#allocation10 + $0x518] sm:$0xff] }
 0x1e4   : > { %2372 = vmatpush.msrb.mxu0 %v1645_v43  ;;  %2391 = vmatpush.msrb.mxu1 %v2189_v44  ;;  %v1870_v11 = vld [vmem:[#allocation10 + $0x1518] sm:$0xff]  ;;  %v1389_v13 = vld [vmem:[#allocation10 + $0x610] sm:$0xff]  ;;  %v2192_v43 = vld [vmem:[#allocation10 + $0x1f28] sm:$0xff] }
 0x1e5   : > { %2432 = vmatpush.msrb.mxu3 %v2158_v38  ;;  %2413 = vmatpush.msrb.mxu2 %v1614_v41  ;;  %v1933_v14 = vld [vmem:[#allocation10 + $0x1710] sm:$0xff]  ;;  %v1326_v16 = vld [vmem:[#allocation10 + $0x418] sm:$0xff]  ;;  %v1680_v38 = vld [vmem:[#allocation10 + $0xf28] sm:$0xff] }
 0x1e6   : > { %2373 = vmatpush.msrb.mxu0 %v1613_v47  ;;  %2392 = vmatpush.msrb.mxu1 %v2157_v48  ;;  %v1183_v15 = vld [vmem:[#allocation2] sm:$0xff]  ;;  %v1838_v17 = vld [vmem:[#allocation10 + $0x1418] sm:$0xff] }
 0x1e7   : > { %2433 = vmatpush.msrb.mxu3 %v2126_v42  ;;  %2414 = vmatpush.msrb.mxu2 %v1582_v45  ;;  %v1357_v18 = vld [vmem:[#allocation10 + $0x510] sm:$0xff]  ;;  %v1294_v21 = vld [vmem:[#allocation10 + $0x318] sm:$0xff]  ;;  %v1191_v23 = vadd.f32 %v1187_v12, %v1183_v15  ;;  %v1648_v42 = vld [vmem:[#allocation10 + $0xe28] sm:$0xff] }
 0x1e8   : > { %2374 = vmatpush.msrb.mxu0 %v1581_v51  ;;  %2393 = vmatpush.msrb.mxu1 %v2125_v52  ;;  %v1901_v19 = vld [vmem:[#allocation10 + $0x1610] sm:$0xff]  ;;  %v1806_v22 = vld [vmem:[#allocation10 + $0x1318] sm:$0xff]  ;;  %v2160_v47 = vld [vmem:[#allocation10 + $0x1e28] sm:$0xff] }
 0x1e9   : > { %2434 = vmatpush.msrb.mxu3 %v2094_v46  ;;  %2415 = vmatpush.msrb.mxu2 %v1550_v49  ;;  %v1184_v24 = vld [vmem:[#allocation2 + $0x8] sm:$0xff]  ;;  %v4796_v34 = vmax.f32 %v1191_v23, 0.0  ;;  %v1616_v46 = vld [vmem:[#allocation10 + $0xd28] sm:$0xff]  ;;  %v1679_v49 = vld [vmem:[#allocation10 + $0xf20] sm:$0xff] }
 0x1ea   : > { %2375 = vmatpush.msrb.mxu0 %v1549_v55  ;;  %2394 = vmatpush.msrb.mxu1 %v2093_v56  ;;  %v1325_v25 = vld [vmem:[#allocation10 + $0x410] sm:$0xff]  ;;  %v1262_v27 = vld [vmem:[#allocation10 + $0x218] sm:$0xff]  ;;  %v1192_v31 = vadd.f32 %v1188_v20, %v1184_v24  ;;  %v2128_v51 = vld [vmem:[#allocation10 + $0x1d28] sm:$0xff] }
 0x1eb   : > { %2435 = vmatpush.msrb.mxu3 %v2062_v50  ;;  %2416 = vmatpush.msrb.mxu2 %v1518_v53  ;;  %v1869_v26 = vld [vmem:[#allocation10 + $0x1510] sm:$0xff]  ;;  %v1774_v28 = vld [vmem:[#allocation10 + $0x1218] sm:$0xff]  ;;  %v1584_v50 = vld [vmem:[#allocation10 + $0xc28] sm:$0xff] }
 0x1ec   : > { %2376 = vmatpush.msrb.mxu0 %v1517_v59  ;;  %2395 = vmatpush.msrb.mxu1 %v2061_v60  ;;  %v1293_v29 = vld [vmem:[#allocation10 + $0x310] sm:$0xff]  ;;  %v1230_v32 = vld [vmem:[#allocation10 + $0x118] sm:$0xff]  ;;  %v4798_v40 = vmax.f32 %v1192_v31, 0.0  ;;  %v1647_v53 = vld [vmem:[#allocation10 + $0xe20] sm:$0xff] }
 0x1ed   : > { %2436 = vmatpush.msrb.mxu3 %v2030_v54  ;;  %2417 = vmatpush.msrb.mxu2 %v1486_v57  ;;  %v1837_v30 = vld [vmem:[#allocation10 + $0x1410] sm:$0xff]  ;;  %v1742_v33 = vld [vmem:[#allocation10 + $0x1118] sm:$0xff]  ;;  %v2191_v54 = vld [vmem:[#allocation10 + $0x1f20] sm:$0xff] }
 0x1ee   : > { %2377 = vmatpush.msrb.mxu0 %v1485_v63  ;;  %2396 = vmatpush.msrb.mxu1 %v2029_v0  ;;  %v1261_v35 = vld [vmem:[#allocation10 + $0x210] sm:$0xff]  ;;  %v1198_v36 = vld [vmem:[#allocation10 + $0x18] sm:$0xff]  ;;  %v1552_v55 = vld [vmem:[#allocation10 + $0xb28] sm:$0xff] }
 0x1ef   : > { %2437 = vmatpush.msrb.mxu3 %v1998_v58  ;;  %2418 = vmatpush.msrb.mxu2 %v1454_v61  ;;  %v1805_v37 = vld [vmem:[#allocation10 + $0x1310] sm:$0xff]  ;;  %v1710_v39 = vld [vmem:[#allocation10 + $0x1018] sm:$0xff]  ;;  %v2096_v56 = vld [vmem:[#allocation10 + $0x1c28] sm:$0xff] }
 0x1f0   : > { %2378 = vmatpush.msrb.mxu0 %v1453_v3  ;;  %2397 = vmatpush.msrb.mxu1 %v1997_v4  ;;  %v1229_v41 = vld [vmem:[#allocation10 + $0x110] sm:$0xff]  ;;  %v1615_v57 = vld [vmem:[#allocation10 + $0xd20] sm:$0xff]  ;;  %v1520_v59 = vld [vmem:[#allocation10 + $0xa28] sm:$0xff] }
 0x1f1   : > { %2438 = vmatpush.msrb.mxu3 %v1966_v62  ;;  %2419 = vmatpush.msrb.mxu2 %v1422_v1  ;;  %v1773_v44 = vld [vmem:[#allocation10 + $0x1210] sm:$0xff]  ;;  %v2159_v58 = vld [vmem:[#allocation10 + $0x1e20] sm:$0xff]  ;;  %v2064_v60 = vld [vmem:[#allocation10 + $0x1b28] sm:$0xff] }
 0x1f2   : > { %2379 = vmatpush.msrb.mxu0 %v1421_v8  ;;  %2398 = vmatpush.msrb.mxu1 %v1965_v9  ;;  %v1197_v45 = vld [vmem:[#allocation10 + $0x10] sm:$0xff]  ;;  %v1583_v61 = vld [vmem:[#allocation10 + $0xc20] sm:$0xff]  ;;  %v1488_v63 = vld [vmem:[#allocation10 + $0x928] sm:$0xff] }
 0x1f3   : > { %2439 = vmatpush.msrb.mxu3 %v1934_v2  ;;  %2420 = vmatpush.msrb.mxu2 %v1390_v6  ;;  %v1741_v48 = vld [vmem:[#allocation10 + $0x1110] sm:$0xff]  ;;  %v2127_v62 = vld [vmem:[#allocation10 + $0x1d20] sm:$0xff]  ;;  %v2032_v0 = vld [vmem:[#allocation10 + $0x1a28] sm:$0xff] }
 0x1f4   : > { %2380 = vmatpush.msrb.mxu0 %v1389_v13  ;;  %2399 = vmatpush.msrb.mxu1 %v1933_v14  ;;  %v1709_v52 = vld [vmem:[#allocation10 + $0x1010] sm:$0xff]  ;;  %v1551_v1 = vld [vmem:[#allocation10 + $0xb20] sm:$0xff]  ;;  %v1456_v3 = vld [vmem:[#allocation10 + $0x828] sm:$0xff] }
 0x1f5   : > { %2440 = vmatpush.msrb.mxu3 %v1902_v7  ;;  %2421 = vmatpush.msrb.mxu2 %v1358_v10  ;;  %v2095_v2 = vld [vmem:[#allocation10 + $0x1c20] sm:$0xff]  ;;  %v2000_v4 = vld [vmem:[#allocation10 + $0x1928] sm:$0xff] }
 0x1f6   : > { %2381 = vmatpush.msrb.mxu0 %v1357_v18  ;;  %2400 = vmatpush.msrb.mxu1 %v1901_v19  ;;  %v2063_v6 = vld [vmem:[#allocation10 + $0x1b20] sm:$0xff]  ;;  %v1424_v7 = vld [vmem:[#allocation10 + $0x728] sm:$0xff] }
 0x1f7   : > { %2441 = vmatpush.msrb.mxu3 %v1870_v11  ;;  %2422 = vmatpush.msrb.mxu2 %v1326_v16  ;;  %v1968_v8 = vld [vmem:[#allocation10 + $0x1828] sm:$0xff]  ;;  %v1487_v9 = vld [vmem:[#allocation10 + $0x920] sm:$0xff] }
 0x1f8   : > { %2382 = vmatpush.msrb.mxu0 %v1325_v25  ;;  %2401 = vmatpush.msrb.mxu1 %v1869_v26  ;;  %v2031_v10 = vld [vmem:[#allocation10 + $0x1a20] sm:$0xff]  ;;  %v1392_v11 = vld [vmem:[#allocation10 + $0x628] sm:$0xff] }
 0x1f9   : > { %2442 = vmatpush.msrb.mxu3 %v1838_v17  ;;  %2423 = vmatpush.msrb.mxu2 %v1294_v21  ;;  %v1936_v12 = vld [vmem:[#allocation10 + $0x1728] sm:$0xff]  ;;  %v1455_v13 = vld [vmem:[#allocation10 + $0x820] sm:$0xff] }
 0x1fa   : > { %2383 = vmatpush.msrb.mxu0 %v1293_v29  ;;  %2402 = vmatpush.msrb.mxu1 %v1837_v30  ;;  %v1999_v14 = vld [vmem:[#allocation10 + $0x1920] sm:$0xff]  ;;  %v1360_v15 = vld [vmem:[#allocation10 + $0x528] sm:$0xff] }
 0x1fb   : > { %2443 = vmatpush.msrb.mxu3 %v1806_v22  ;;  %2424 = vmatpush.msrb.mxu2 %v1262_v27  ;;  %v1904_v16 = vld [vmem:[#allocation10 + $0x1628] sm:$0xff]  ;;  %v1423_v17 = vld [vmem:[#allocation10 + $0x720] sm:$0xff] }
 0x1fc   : > { %2347 = vmatmul.f32.vlgmr.msra.gmra.mxu2 %v4796_v34  ;;  %2384 = vmatpush.msrb.mxu0 %v1261_v35  ;;  %v1967_v18 = vld [vmem:[#allocation10 + $0x1820] sm:$0xff]  ;;  %v1328_v19 = vld [vmem:[#allocation10 + $0x428] sm:$0xff] }
 0x1fd   : > { %2444 = vmatpush.msrb.mxu3 %v1774_v28  ;;  %2425 = vmatpush.msrb.mxu2 %v1230_v32  ;;  %v1872_v20 = vld [vmem:[#allocation10 + $0x1528] sm:$0xff]  ;;  %v1391_v21 = vld [vmem:[#allocation10 + $0x620] sm:$0xff] }
 0x1fe   : > { %2403 = vmatpush.msrb.mxu1 %v1805_v37  ;;  %2367 = vmatmul.f32.vlgmr.msra.gmra.mxu3 %v4798_v40  ;;  %v1935_v22 = vld [vmem:[#allocation10 + $0x1720] sm:$0xff]  ;;  %v1296_v23 = vld [vmem:[#allocation10 + $0x328] sm:$0xff] }
 0x1ff   : > { %2445 = vmatpush.msrb.mxu3 %v1742_v33  ;;  %2426 = vmatpush.msrb.mxu2 %v1198_v36  ;;  %v1840_v24 = vld [vmem:[#allocation10 + $0x1428] sm:$0xff]  ;;  %v1359_v25 = vld [vmem:[#allocation10 + $0x520] sm:$0xff] }
 0x200   : > { %2385 = vmatpush.msrb.mxu0 %v1229_v41  ;;  %2404 = vmatpush.msrb.mxu1 %v1773_v44  ;;  %v1903_v26 = vld [vmem:[#allocation10 + $0x1620] sm:$0xff]  ;;  %v1264_v27 = vld [vmem:[#allocation10 + $0x228] sm:$0xff]  ;;  %v2194_v44 = vld [vmem:[#allocation10 + $0x1f38] sm:$0xff] }
 0x201   : > { %2491 = vmatpush.msra.mxu2 %v1680_v38  ;;  %2446 = vmatpush.msrb.mxu3 %v1710_v39  ;;  %v1808_v28 = vld [vmem:[#allocation10 + $0x1328] sm:$0xff]  ;;  %v1327_v29 = vld [vmem:[#allocation10 + $0x420] sm:$0xff]  ;;  %v1682_v38 = vld [vmem:[#allocation10 + $0xf38] sm:$0xff] }
 0x202   : > { %2386 = vmatpush.msrb.mxu0 %v1197_v45  ;;  %2405 = vmatpush.msrb.mxu1 %v1741_v48  ;;  %v1871_v30 = vld [vmem:[#allocation10 + $0x1520] sm:$0xff]  ;;  %v1232_v31 = vld [vmem:[#allocation10 + $0x128] sm:$0xff]  ;;  %v2162_v48 = vld [vmem:[#allocation10 + $0x1e38] sm:$0xff] }
 0x203   : > { %2492 = vmatpush.msra.mxu2 %v1648_v42  ;;  %2511 = vmatpush.msra.mxu3 %v2192_v43  ;;  %v1776_v32 = vld [vmem:[#allocation10 + $0x1228] sm:$0xff]  ;;  %v1295_v33 = vld [vmem:[#allocation10 + $0x320] sm:$0xff]  ;;  %v1650_v43 = vld [vmem:[#allocation10 + $0xe38] sm:$0xff] }
 0x204   : > { %2307 = vmatmul.f32.vlgmr.msra.gmra.mxu0 %v4796_v34  ;;  %2406 = vmatpush.msrb.mxu1 %v1709_v52  ;;  %v1839_v35 = vld [vmem:[#allocation10 + $0x1420] sm:$0xff]  ;;  %v1200_v36 = vld [vmem:[#allocation10 + $0x28] sm:$0xff]  ;;  %v1586_v52 = vld [vmem:[#allocation10 + $0xc38] sm:$0xff] }
 0x205   : > { %2493 = vmatpush.msra.mxu2 %v1616_v46  ;;  %2512 = vmatpush.msra.mxu3 %v2160_v47  ;;  %v1744_v37 = vld [vmem:[#allocation10 + $0x1128] sm:$0xff]  ;;  %v1263_v39 = vld [vmem:[#allocation10 + $0x220] sm:$0xff]  ;;  %v1618_v47 = vld [vmem:[#allocation10 + $0xd38] sm:$0xff] }
 0x206   : > { %2451 = vmatpush.msra.mxu0 %v1679_v49  ;;  %2327 = vmatmul.f32.vlgmr.msra.gmra.mxu1 %v4798_v40  ;;  %v1807_v41 = vld [vmem:[#allocation10 + $0x1320] sm:$0xff]  ;;  %v1712_v42 = vld [vmem:[#allocation10 + $0x1028] sm:$0xff] }
 0x207   : > { %2494 = vmatpush.msra.mxu2 %v1584_v50  ;;  %2513 = vmatpush.msra.mxu3 %v2128_v51  ;;  %v1231_v45 = vld [vmem:[#allocation10 + $0x120] sm:$0xff]  ;;  %v1681_v51 = vld [vmem:[#allocation10 + $0xf30] sm:$0xff] }
 0x208   : > { %2452 = vmatpush.msra.mxu0 %v1647_v53  ;;  %2471 = vmatpush.msra.mxu1 %v2191_v54  ;;  %v1775_v46 = vld [vmem:[#allocation10 + $0x1220] sm:$0xff]  ;;  %v2130_v53 = vld [vmem:[#allocation10 + $0x1d38] sm:$0xff] }
 0x209   : > { %2495 = vmatpush.msra.mxu2 %v1552_v55  ;;  %2514 = vmatpush.msra.mxu3 %v2096_v56  ;;  %v1199_v49 = vld [vmem:[#allocation10 + $0x20] sm:$0xff]  ;;  %v1649_v55 = vld [vmem:[#allocation10 + $0xe30] sm:$0xff] }
 0x20a   : > { %2453 = vmatpush.msra.mxu0 %v1615_v57  ;;  %2472 = vmatpush.msra.mxu1 %v2159_v58  ;;  %v1743_v50 = vld [vmem:[#allocation10 + $0x1120] sm:$0xff]  ;;  %v2193_v56 = vld [vmem:[#allocation10 + $0x1f30] sm:$0xff]  ;;  %v1554_v57 = vld [vmem:[#allocation10 + $0xb38] sm:$0xff] }
 0x20b   : > { %2496 = vmatpush.msra.mxu2 %v1520_v59  ;;  %2515 = vmatpush.msra.mxu3 %v2064_v60  ;;  %v1711_v54 = vld [vmem:[#allocation10 + $0x1020] sm:$0xff]  ;;  %v2098_v58 = vld [vmem:[#allocation10 + $0x1c38] sm:$0xff]  ;;  %v1617_v59 = vld [vmem:[#allocation10 + $0xd30] sm:$0xff] }
 0x20c   : > { %2454 = vmatpush.msra.mxu0 %v1583_v61  ;;  %2473 = vmatpush.msra.mxu1 %v2127_v62  ;;  %v2161_v60 = vld [vmem:[#allocation10 + $0x1e30] sm:$0xff]  ;;  %v1522_v61 = vld [vmem:[#allocation10 + $0xa38] sm:$0xff] }
 0x20d   : > { %2497 = vmatpush.msra.mxu2 %v1488_v63  ;;  %2516 = vmatpush.msra.mxu3 %v2032_v0  ;;  %v2066_v62 = vld [vmem:[#allocation10 + $0x1b38] sm:$0xff]  ;;  %v1585_v63 = vld [vmem:[#allocation10 + $0xc30] sm:$0xff] }
 0x20e   : > { %2455 = vmatpush.msra.mxu0 %v1551_v1  ;;  %2474 = vmatpush.msra.mxu1 %v2095_v2  ;;  %v2129_v0 = vld [vmem:[#allocation10 + $0x1d30] sm:$0xff]  ;;  %v1490_v1 = vld [vmem:[#allocation10 + $0x938] sm:$0xff] }
 0x20f   : > { %2498 = vmatpush.msra.mxu2 %v1456_v3  ;;  %2517 = vmatpush.msra.mxu3 %v2000_v4  ;;  %v2034_v2 = vld [vmem:[#allocation10 + $0x1a38] sm:$0xff]  ;;  %v1553_v3 = vld [vmem:[#allocation10 + $0xb30] sm:$0xff] }
 0x210   : > { %2456 = vmatpush.msra.mxu0 %v1519_v5  ;;  %2475 = vmatpush.msra.mxu1 %v2063_v6  ;;  %v2097_v4 = vld [vmem:[#allocation10 + $0x1c30] sm:$0xff]  ;;  %v1458_v5 = vld [vmem:[#allocation10 + $0x838] sm:$0xff] }
 0x211   : > { %2499 = vmatpush.msra.mxu2 %v1424_v7  ;;  %2518 = vmatpush.msra.mxu3 %v1968_v8  ;;  %v2002_v6 = vld [vmem:[#allocation10 + $0x1938] sm:$0xff]  ;;  %v1521_v7 = vld [vmem:[#allocation10 + $0xa30] sm:$0xff] }
 0x212   : > { %2457 = vmatpush.msra.mxu0 %v1487_v9  ;;  %2476 = vmatpush.msra.mxu1 %v2031_v10  ;;  %v2065_v8 = vld [vmem:[#allocation10 + $0x1b30] sm:$0xff]  ;;  %v1426_v9 = vld [vmem:[#allocation10 + $0x738] sm:$0xff] }
 0x213   : > { %2500 = vmatpush.msra.mxu2 %v1392_v11  ;;  %2519 = vmatpush.msra.mxu3 %v1936_v12  ;;  %v1970_v10 = vld [vmem:[#allocation10 + $0x1838] sm:$0xff]  ;;  %v1489_v11 = vld [vmem:[#allocation10 + $0x930] sm:$0xff] }
 0x214   : > { %2458 = vmatpush.msra.mxu0 %v1455_v13  ;;  %2477 = vmatpush.msra.mxu1 %v1999_v14  ;;  %v2033_v12 = vld [vmem:[#allocation10 + $0x1a30] sm:$0xff]  ;;  %v1394_v13 = vld [vmem:[#allocation10 + $0x638] sm:$0xff] }
 0x215   : > { %2501 = vmatpush.msra.mxu2 %v1360_v15  ;;  %2520 = vmatpush.msra.mxu3 %v1904_v16  ;;  %v1938_v14 = vld [vmem:[#allocation10 + $0x1738] sm:$0xff]  ;;  %v1457_v15 = vld [vmem:[#allocation10 + $0x830] sm:$0xff] }
 0x216   : > { %2459 = vmatpush.msra.mxu0 %v1423_v17  ;;  %2478 = vmatpush.msra.mxu1 %v1967_v18  ;;  %v2001_v16 = vld [vmem:[#allocation10 + $0x1930] sm:$0xff]  ;;  %v1362_v17 = vld [vmem:[#allocation10 + $0x538] sm:$0xff] }
 0x217   : > { %2502 = vmatpush.msra.mxu2 %v1328_v19  ;;  %2521 = vmatpush.msra.mxu3 %v1872_v20  ;;  %v1906_v18 = vld [vmem:[#allocation10 + $0x1638] sm:$0xff]  ;;  %v1425_v19 = vld [vmem:[#allocation10 + $0x730] sm:$0xff] }
 0x218   : > { %2460 = vmatpush.msra.mxu0 %v1391_v21  ;;  %2479 = vmatpush.msra.mxu1 %v1935_v22  ;;  %v1969_v20 = vld [vmem:[#allocation10 + $0x1830] sm:$0xff]  ;;  %v1330_v21 = vld [vmem:[#allocation10 + $0x438] sm:$0xff] }
 0x219   : > { %2503 = vmatpush.msra.mxu2 %v1296_v23  ;;  %2522 = vmatpush.msra.mxu3 %v1840_v24  ;;  %v1874_v22 = vld [vmem:[#allocation10 + $0x1538] sm:$0xff]  ;;  %v1393_v23 = vld [vmem:[#allocation10 + $0x630] sm:$0xff] }
 0x21a   : > { %2461 = vmatpush.msra.mxu0 %v1359_v25  ;;  %2480 = vmatpush.msra.mxu1 %v1903_v26  ;;  %v1937_v24 = vld [vmem:[#allocation10 + $0x1730] sm:$0xff]  ;;  %v1298_v25 = vld [vmem:[#allocation10 + $0x338] sm:$0xff] }
 0x21b   : > { %2504 = vmatpush.msra.mxu2 %v1264_v27  ;;  %2523 = vmatpush.msra.mxu3 %v1808_v28  ;;  %v1842_v26 = vld [vmem:[#allocation10 + $0x1438] sm:$0xff]  ;;  %v1361_v27 = vld [vmem:[#allocation10 + $0x530] sm:$0xff] }
 0x21c   : > { %2462 = vmatpush.msra.mxu0 %v1327_v29  ;;  %2481 = vmatpush.msra.mxu1 %v1871_v30  ;;  %v1905_v28 = vld [vmem:[#allocation10 + $0x1630] sm:$0xff]  ;;  %v1266_v29 = vld [vmem:[#allocation10 + $0x238] sm:$0xff] }
 0x21d   : > { %2505 = vmatpush.msra.mxu2 %v1232_v31  ;;  %2524 = vmatpush.msra.mxu3 %v1776_v32  ;;  %v1810_v30 = vld [vmem:[#allocation10 + $0x1338] sm:$0xff]  ;;  %v1329_v31 = vld [vmem:[#allocation10 + $0x430] sm:$0xff] }
 0x21e   : > { %2463 = vmatpush.msra.mxu0 %v1295_v33  ;;  %2482 = vmatpush.msra.mxu1 %v1839_v35  ;;  %v1873_v32 = vld [vmem:[#allocation10 + $0x1530] sm:$0xff]  ;;  %v1234_v33 = vld [vmem:[#allocation10 + $0x138] sm:$0xff] }
 0x21f   : > { %2506 = vmatpush.msra.mxu2 %v1200_v36  ;;  %2525 = vmatpush.msra.mxu3 %v1744_v37  ;;  %v1778_v35 = vld [vmem:[#allocation10 + $0x1238] sm:$0xff]  ;;  %v1297_v36 = vld [vmem:[#allocation10 + $0x330] sm:$0xff] }
 0x220   : > { %2427 = vmatmul.f32.vlgmr.msrb.gmra.mxu2 %v4796_v34  ;;  %2464 = vmatpush.msra.mxu0 %v1263_v39  ;;  %v1841_v37 = vld [vmem:[#allocation10 + $0x1430] sm:$0xff]  ;;  %v1746_v39 = vld [vmem:[#allocation10 + $0x1138] sm:$0xff] }
 0x221   : > { %2571 = vmatpush.msrb.mxu2 %v1682_v38  ;;  %2483 = vmatpush.msra.mxu1 %v1807_v41  ;;  %v1202_v38 = vld [vmem:[#allocation10 + $0x38] sm:$0xff]  ;;  %v1684_v41 = vld [vmem:[#allocation10 + $0xf48] sm:$0xff] }
 0x222   : > { %2526 = vmatpush.msra.mxu3 %v1712_v42  ;;  %2465 = vmatpush.msra.mxu0 %v1231_v45  ;;  %v1265_v42 = vld [vmem:[#allocation10 + $0x230] sm:$0xff]  ;;  %v1652_v45 = vld [vmem:[#allocation10 + $0xe48] sm:$0xff] }
 0x223   : > { %2447 = vmatmul.f32.vlgmr.msrb.gmra.mxu3 %v4798_v40  ;;  %2572 = vmatpush.msrb.mxu2 %v1650_v43  ;;  %v1809_v43 = vld [vmem:[#allocation10 + $0x1330] sm:$0xff] }
 0x224   : > { %2591 = vmatpush.msrb.mxu3 %v2194_v44  ;;  %2484 = vmatpush.msra.mxu1 %v1775_v46  ;;  %v1714_v44 = vld [vmem:[#allocation10 + $0x1038] sm:$0xff]  ;;  %v2196_v46 = vld [vmem:[#allocation10 + $0x1f48] sm:$0xff] }
 0x225   : > { %2573 = vmatpush.msrb.mxu2 %v1618_v47  ;;  %2466 = vmatpush.msra.mxu0 %v1199_v49  ;;  %v1233_v47 = vld [vmem:[#allocation10 + $0x130] sm:$0xff]  ;;  %v1620_v49 = vld [vmem:[#allocation10 + $0xd48] sm:$0xff] }
 0x226   : > { %2592 = vmatpush.msrb.mxu3 %v2162_v48  ;;  %2485 = vmatpush.msra.mxu1 %v1743_v50  ;;  %v1777_v48 = vld [vmem:[#allocation10 + $0x1230] sm:$0xff]  ;;  %v2164_v50 = vld [vmem:[#allocation10 + $0x1e48] sm:$0xff] }
 0x227   : > { %2387 = vmatmul.f32.vlgmr.msrb.gmra.mxu0 %v4796_v34  ;;  %2574 = vmatpush.msrb.mxu2 %v1586_v52  ;;  %v1745_v52 = vld [vmem:[#allocation10 + $0x1130] sm:$0xff] }
 0x228   : > { %2531 = vmatpush.msrb.mxu0 %v1681_v51  ;;  %2593 = vmatpush.msrb.mxu3 %v2130_v53  ;;  %v1201_v51 = vld [vmem:[#allocation10 + $0x30] sm:$0xff]  ;;  %v1683_v53 = vld [vmem:[#allocation10 + $0xf40] sm:$0xff] }
 0x229   : > { %2486 = vmatpush.msra.mxu1 %v1711_v54  ;;  %2575 = vmatpush.msrb.mxu2 %v1554_v57  ;;  %v1588_v54 = vld [vmem:[#allocation10 + $0xc48] sm:$0xff]  ;;  %v1651_v57 = vld [vmem:[#allocation10 + $0xe40] sm:$0xff] }
 0x22a   : > { %2407 = vmatmul.f32.vlgmr.msrb.gmra.mxu1 %v4798_v40  ;;  %2532 = vmatpush.msrb.mxu0 %v1649_v55  ;;  %v2132_v55 = vld [vmem:[#allocation10 + $0x1d48] sm:$0xff] }
 0x22b   : > { %2551 = vmatpush.msrb.mxu1 %v2193_v56  ;;  %2594 = vmatpush.msrb.mxu3 %v2098_v58  ;;  %v1713_v56 = vld [vmem:[#allocation10 + $0x1030] sm:$0xff]  ;;  %v2195_v58 = vld [vmem:[#allocation10 + $0x1f40] sm:$0xff] }
 0x22c   : > { %2533 = vmatpush.msrb.mxu0 %v1617_v59  ;;  %2576 = vmatpush.msrb.mxu2 %v1522_v61  ;;  %v1556_v59 = vld [vmem:[#allocation10 + $0xb48] sm:$0xff]  ;;  %v1619_v61 = vld [vmem:[#allocation10 + $0xd40] sm:$0xff] }
 0x22d   : > { %2552 = vmatpush.msrb.mxu1 %v2161_v60  ;;  %2595 = vmatpush.msrb.mxu3 %v2066_v62  ;;  %v2100_v60 = vld [vmem:[#allocation10 + $0x1c48] sm:$0xff]  ;;  %v2163_v62 = vld [vmem:[#allocation10 + $0x1e40] sm:$0xff] }
 0x22e   : > { %2534 = vmatpush.msrb.mxu0 %v1585_v63  ;;  %2577 = vmatpush.msrb.mxu2 %v1490_v1  ;;  %v1524_v63 = vld [vmem:[#allocation10 + $0xa48] sm:$0xff]  ;;  %v1587_v1 = vld [vmem:[#allocation10 + $0xc40] sm:$0xff] }
 0x22f   : > { %2553 = vmatpush.msrb.mxu1 %v2129_v0  ;;  %2596 = vmatpush.msrb.mxu3 %v2034_v2  ;;  %v2068_v0 = vld [vmem:[#allocation10 + $0x1b48] sm:$0xff]  ;;  %v2131_v2 = vld [vmem:[#allocation10 + $0x1d40] sm:$0xff] }
 0x230   : > { %2535 = vmatpush.msrb.mxu0 %v1553_v3  ;;  %2578 = vmatpush.msrb.mxu2 %v1458_v5  ;;  %v1492_v3 = vld [vmem:[#allocation10 + $0x948] sm:$0xff]  ;;  %v1555_v5 = vld [vmem:[#allocation10 + $0xb40] sm:$0xff] }
 0x231   : > { %2554 = vmatpush.msrb.mxu1 %v2097_v4  ;;  %2597 = vmatpush.msrb.mxu3 %v2002_v6  ;;  %v2036_v4 = vld [vmem:[#allocation10 + $0x1a48] sm:$0xff]  ;;  %v2099_v6 = vld [vmem:[#allocation10 + $0x1c40] sm:$0xff] }
 0x232   : > { %2536 = vmatpush.msrb.mxu0 %v1521_v7  ;;  %2579 = vmatpush.msrb.mxu2 %v1426_v9  ;;  %v1460_v7 = vld [vmem:[#allocation10 + $0x848] sm:$0xff]  ;;  %v1523_v9 = vld [vmem:[#allocation10 + $0xa40] sm:$0xff] }
 0x233   : > { %2555 = vmatpush.msrb.mxu1 %v2065_v8  ;;  %2598 = vmatpush.msrb.mxu3 %v1970_v10  ;;  %v2004_v8 = vld [vmem:[#allocation10 + $0x1948] sm:$0xff]  ;;  %v2067_v10 = vld [vmem:[#allocation10 + $0x1b40] sm:$0xff] }
 0x234   : > { %2537 = vmatpush.msrb.mxu0 %v1489_v11  ;;  %2580 = vmatpush.msrb.mxu2 %v1394_v13  ;;  %v1428_v11 = vld [vmem:[#allocation10 + $0x748] sm:$0xff]  ;;  %v1491_v13 = vld [vmem:[#allocation10 + $0x940] sm:$0xff] }
 0x235   : > { %2556 = vmatpush.msrb.mxu1 %v2033_v12  ;;  %2599 = vmatpush.msrb.mxu3 %v1938_v14  ;;  %v1972_v12 = vld [vmem:[#allocation10 + $0x1848] sm:$0xff]  ;;  %v2035_v14 = vld [vmem:[#allocation10 + $0x1a40] sm:$0xff] }
 0x236   : > { %2538 = vmatpush.msrb.mxu0 %v1457_v15  ;;  %2581 = vmatpush.msrb.mxu2 %v1362_v17  ;;  %v1396_v15 = vld [vmem:[#allocation10 + $0x648] sm:$0xff]  ;;  %v1459_v17 = vld [vmem:[#allocation10 + $0x840] sm:$0xff] }
 0x237   : > { %2557 = vmatpush.msrb.mxu1 %v2001_v16  ;;  %2600 = vmatpush.msrb.mxu3 %v1906_v18  ;;  %v1940_v16 = vld [vmem:[#allocation10 + $0x1748] sm:$0xff]  ;;  %v2003_v18 = vld [vmem:[#allocation10 + $0x1940] sm:$0xff] }
 0x238   : > { %2539 = vmatpush.msrb.mxu0 %v1425_v19  ;;  %2582 = vmatpush.msrb.mxu2 %v1330_v21  ;;  %v1364_v19 = vld [vmem:[#allocation10 + $0x548] sm:$0xff]  ;;  %v1427_v21 = vld [vmem:[#allocation10 + $0x740] sm:$0xff] }
 0x239   : > { %2558 = vmatpush.msrb.mxu1 %v1969_v20  ;;  %2601 = vmatpush.msrb.mxu3 %v1874_v22  ;;  %v1908_v20 = vld [vmem:[#allocation10 + $0x1648] sm:$0xff]  ;;  %v1971_v22 = vld [vmem:[#allocation10 + $0x1840] sm:$0xff] }
 0x23a   : > { %2540 = vmatpush.msrb.mxu0 %v1393_v23  ;;  %2583 = vmatpush.msrb.mxu2 %v1298_v25  ;;  %v1332_v23 = vld [vmem:[#allocation10 + $0x448] sm:$0xff]  ;;  %v1395_v25 = vld [vmem:[#allocation10 + $0x640] sm:$0xff] }
 0x23b   : > { %2559 = vmatpush.msrb.mxu1 %v1937_v24  ;;  %2602 = vmatpush.msrb.mxu3 %v1842_v26  ;;  %v1876_v24 = vld [vmem:[#allocation10 + $0x1548] sm:$0xff]  ;;  %v1939_v26 = vld [vmem:[#allocation10 + $0x1740] sm:$0xff] }
 0x23c   : > { %2541 = vmatpush.msrb.mxu0 %v1361_v27  ;;  %2584 = vmatpush.msrb.mxu2 %v1266_v29  ;;  %v1300_v27 = vld [vmem:[#allocation10 + $0x348] sm:$0xff]  ;;  %v1363_v29 = vld [vmem:[#allocation10 + $0x540] sm:$0xff] }
 0x23d   : > { %2560 = vmatpush.msrb.mxu1 %v1905_v28  ;;  %2603 = vmatpush.msrb.mxu3 %v1810_v30  ;;  %v1844_v28 = vld [vmem:[#allocation10 + $0x1448] sm:$0xff]  ;;  %v1907_v30 = vld [vmem:[#allocation10 + $0x1640] sm:$0xff] }
 0x23e   : > { %2542 = vmatpush.msrb.mxu0 %v1329_v31  ;;  %2585 = vmatpush.msrb.mxu2 %v1234_v33  ;;  %v1268_v31 = vld [vmem:[#allocation10 + $0x248] sm:$0xff]  ;;  %v1331_v33 = vld [vmem:[#allocation10 + $0x440] sm:$0xff] }
 0x23f   : > { %2561 = vmatpush.msrb.mxu1 %v1873_v32  ;;  %2604 = vmatpush.msrb.mxu3 %v1778_v35  ;;  %v1812_v32 = vld [vmem:[#allocation10 + $0x1348] sm:$0xff]  ;;  %v1875_v35 = vld [vmem:[#allocation10 + $0x1540] sm:$0xff] }
 0x240   : > { %2543 = vmatpush.msrb.mxu0 %v1297_v36  ;;  %2586 = vmatpush.msrb.mxu2 %v1202_v38  ;;  %v1236_v36 = vld [vmem:[#allocation10 + $0x148] sm:$0xff]  ;;  %v1299_v38 = vld [vmem:[#allocation10 + $0x340] sm:$0xff] }
 0x241   : > { %2562 = vmatpush.msrb.mxu1 %v1841_v37  ;;  %2605 = vmatpush.msrb.mxu3 %v1746_v39  ;;  %v1780_v37 = vld [vmem:[#allocation10 + $0x1248] sm:$0xff]  ;;  %v1843_v39 = vld [vmem:[#allocation10 + $0x1440] sm:$0xff] }
 0x242   : > { %2507 = vmatmul.f32.vlgmr.msra.gmra.mxu2 %v4796_v34  ;;  %2544 = vmatpush.msrb.mxu0 %v1265_v42  ;;  %v1748_v42 = vld [vmem:[#allocation10 + $0x1148] sm:$0xff] }
 0x243   : > { %2651 = vmatpush.msra.mxu2 %v1684_v41  ;;  %2563 = vmatpush.msrb.mxu1 %v1809_v43  ;;  %v1204_v41 = vld [vmem:[#allocation10 + $0x48] sm:$0xff]  ;;  %v1686_v43 = vld [vmem:[#allocation10 + $0xf58] sm:$0xff] }
 0x244   : > { %2606 = vmatpush.msrb.mxu3 %v1714_v44  ;;  %2545 = vmatpush.msrb.mxu0 %v1233_v47  ;;  %v1267_v44 = vld [vmem:[#allocation10 + $0x240] sm:$0xff]  ;;  %v1654_v47 = vld [vmem:[#allocation10 + $0xe58] sm:$0xff] }
 0x245   : > { %2527 = vmatmul.f32.vlgmr.msra.gmra.mxu3 %v4798_v40  ;;  %2652 = vmatpush.msra.mxu2 %v1652_v45  ;;  %v1811_v45 = vld [vmem:[#allocation10 + $0x1340] sm:$0xff] }
 0x246   : > { %2671 = vmatpush.msra.mxu3 %v2196_v46  ;;  %2564 = vmatpush.msrb.mxu1 %v1777_v48  ;;  %v1716_v46 = vld [vmem:[#allocation10 + $0x1048] sm:$0xff]  ;;  %v2198_v48 = vld [vmem:[#allocation10 + $0x1f58] sm:$0xff] }
 0x247   : > { %2653 = vmatpush.msra.mxu2 %v1620_v49  ;;  %2546 = vmatpush.msrb.mxu0 %v1201_v51  ;;  %v1235_v49 = vld [vmem:[#allocation10 + $0x140] sm:$0xff]  ;;  %v1622_v51 = vld [vmem:[#allocation10 + $0xd58] sm:$0xff] }
 0x248   : > { %2672 = vmatpush.msra.mxu3 %v2164_v50  ;;  %2565 = vmatpush.msrb.mxu1 %v1745_v52  ;;  %v1779_v50 = vld [vmem:[#allocation10 + $0x1240] sm:$0xff]  ;;  %v2166_v52 = vld [vmem:[#allocation10 + $0x1e58] sm:$0xff] }
 0x249   : > { %2467 = vmatmul.f32.vlgmr.msra.gmra.mxu0 %v4796_v34  ;;  %2654 = vmatpush.msra.mxu2 %v1588_v54  ;;  %v1747_v54 = vld [vmem:[#allocation10 + $0x1140] sm:$0xff] }
 0x24a   : > { %2611 = vmatpush.msra.mxu0 %v1683_v53  ;;  %2673 = vmatpush.msra.mxu3 %v2132_v55  ;;  %v1203_v53 = vld [vmem:[#allocation10 + $0x40] sm:$0xff]  ;;  %v1685_v55 = vld [vmem:[#allocation10 + $0xf50] sm:$0xff] }
 0x24b   : > { %2566 = vmatpush.msrb.mxu1 %v1713_v56  ;;  %2655 = vmatpush.msra.mxu2 %v1556_v59  ;;  %v1590_v56 = vld [vmem:[#allocation10 + $0xc58] sm:$0xff]  ;;  %v1653_v59 = vld [vmem:[#allocation10 + $0xe50] sm:$0xff] }
 0x24c   : > { %2487 = vmatmul.f32.vlgmr.msra.gmra.mxu1 %v4798_v40  ;;  %2612 = vmatpush.msra.mxu0 %v1651_v57  ;;  %v2134_v57 = vld [vmem:[#allocation10 + $0x1d58] sm:$0xff] }
 0x24d   : > { %2631 = vmatpush.msra.mxu1 %v2195_v58  ;;  %2674 = vmatpush.msra.mxu3 %v2100_v60  ;;  %v1715_v58 = vld [vmem:[#allocation10 + $0x1040] sm:$0xff]  ;;  %v2197_v60 = vld [vmem:[#allocation10 + $0x1f50] sm:$0xff] }
 0x24e   : > { %2613 = vmatpush.msra.mxu0 %v1619_v61  ;;  %2656 = vmatpush.msra.mxu2 %v1524_v63  ;;  %v1558_v61 = vld [vmem:[#allocation10 + $0xb58] sm:$0xff]  ;;  %v1621_v63 = vld [vmem:[#allocation10 + $0xd50] sm:$0xff] }
 0x24f   : > { %2632 = vmatpush.msra.mxu1 %v2163_v62  ;;  %2675 = vmatpush.msra.mxu3 %v2068_v0  ;;  %v2102_v62 = vld [vmem:[#allocation10 + $0x1c58] sm:$0xff]  ;;  %v2165_v0 = vld [vmem:[#allocation10 + $0x1e50] sm:$0xff] }
 0x250   : > { %2614 = vmatpush.msra.mxu0 %v1587_v1  ;;  %2657 = vmatpush.msra.mxu2 %v1492_v3  ;;  %v1526_v1 = vld [vmem:[#allocation10 + $0xa58] sm:$0xff]  ;;  %v1589_v3 = vld [vmem:[#allocation10 + $0xc50] sm:$0xff] }
 0x251   : > { %2633 = vmatpush.msra.mxu1 %v2131_v2  ;;  %2676 = vmatpush.msra.mxu3 %v2036_v4  ;;  %v2070_v2 = vld [vmem:[#allocation10 + $0x1b58] sm:$0xff]  ;;  %v2133_v4 = vld [vmem:[#allocation10 + $0x1d50] sm:$0xff] }
 0x252   : > { %2615 = vmatpush.msra.mxu0 %v1555_v5  ;;  %2658 = vmatpush.msra.mxu2 %v1460_v7  ;;  %v1494_v5 = vld [vmem:[#allocation10 + $0x958] sm:$0xff]  ;;  %v1557_v7 = vld [vmem:[#allocation10 + $0xb50] sm:$0xff] }
 0x253   : > { %2634 = vmatpush.msra.mxu1 %v2099_v6  ;;  %2677 = vmatpush.msra.mxu3 %v2004_v8  ;;  %v2038_v6 = vld [vmem:[#allocation10 + $0x1a58] sm:$0xff]  ;;  %v2101_v8 = vld [vmem:[#allocation10 + $0x1c50] sm:$0xff] }
 0x254   : > { %2616 = vmatpush.msra.mxu0 %v1523_v9  ;;  %2659 = vmatpush.msra.mxu2 %v1428_v11  ;;  %v1462_v9 = vld [vmem:[#allocation10 + $0x858] sm:$0xff]  ;;  %v1525_v11 = vld [vmem:[#allocation10 + $0xa50] sm:$0xff] }
 0x255   : > { %2635 = vmatpush.msra.mxu1 %v2067_v10  ;;  %2678 = vmatpush.msra.mxu3 %v1972_v12  ;;  %v2006_v10 = vld [vmem:[#allocation10 + $0x1958] sm:$0xff]  ;;  %v2069_v12 = vld [vmem:[#allocation10 + $0x1b50] sm:$0xff] }
 0x256   : > { %2617 = vmatpush.msra.mxu0 %v1491_v13  ;;  %2660 = vmatpush.msra.mxu2 %v1396_v15  ;;  %v1430_v13 = vld [vmem:[#allocation10 + $0x758] sm:$0xff]  ;;  %v1493_v15 = vld [vmem:[#allocation10 + $0x950] sm:$0xff] }
 0x257   : > { %2636 = vmatpush.msra.mxu1 %v2035_v14  ;;  %2679 = vmatpush.msra.mxu3 %v1940_v16  ;;  %v1974_v14 = vld [vmem:[#allocation10 + $0x1858] sm:$0xff]  ;;  %v2037_v16 = vld [vmem:[#allocation10 + $0x1a50] sm:$0xff] }
 0x258   : > { %2618 = vmatpush.msra.mxu0 %v1459_v17  ;;  %2661 = vmatpush.msra.mxu2 %v1364_v19  ;;  %v1398_v17 = vld [vmem:[#allocation10 + $0x658] sm:$0xff]  ;;  %v1461_v19 = vld [vmem:[#allocation10 + $0x850] sm:$0xff] }
 0x259   : > { %2637 = vmatpush.msra.mxu1 %v2003_v18  ;;  %2680 = vmatpush.msra.mxu3 %v1908_v20  ;;  %v1942_v18 = vld [vmem:[#allocation10 + $0x1758] sm:$0xff]  ;;  %v2005_v20 = vld [vmem:[#allocation10 + $0x1950] sm:$0xff] }
 0x25a   : > { %2619 = vmatpush.msra.mxu0 %v1427_v21  ;;  %2662 = vmatpush.msra.mxu2 %v1332_v23  ;;  %v1366_v21 = vld [vmem:[#allocation10 + $0x558] sm:$0xff]  ;;  %v1429_v23 = vld [vmem:[#allocation10 + $0x750] sm:$0xff] }
 0x25b   : > { %2638 = vmatpush.msra.mxu1 %v1971_v22  ;;  %2681 = vmatpush.msra.mxu3 %v1876_v24  ;;  %v1910_v22 = vld [vmem:[#allocation10 + $0x1658] sm:$0xff]  ;;  %v1973_v24 = vld [vmem:[#allocation10 + $0x1850] sm:$0xff] }
 0x25c   : > { %2620 = vmatpush.msra.mxu0 %v1395_v25  ;;  %2663 = vmatpush.msra.mxu2 %v1300_v27  ;;  %v1334_v25 = vld [vmem:[#allocation10 + $0x458] sm:$0xff]  ;;  %v1397_v27 = vld [vmem:[#allocation10 + $0x650] sm:$0xff] }
 0x25d   : > { %2639 = vmatpush.msra.mxu1 %v1939_v26  ;;  %2682 = vmatpush.msra.mxu3 %v1844_v28  ;;  %v1878_v26 = vld [vmem:[#allocation10 + $0x1558] sm:$0xff]  ;;  %v4816_v28 = vld [vmem:[#allocation11] sm:$0xff] }
 0x25e   : > { %2621 = vmatpush.msra.mxu0 %v1363_v29  ;;  %2664 = vmatpush.msra.mxu2 %v1268_v31  ;;  %v1941_v29 = vld [vmem:[#allocation10 + $0x1750] sm:$0xff]  ;;  %v1846_v31 = vld [vmem:[#allocation10 + $0x1458] sm:$0xff] }
 0x25f   : > { %2640 = vmatpush.msra.mxu1 %v1907_v30  ;;  %2683 = vmatpush.msra.mxu3 %v1812_v32  ;;  %v1302_v30 = vld [vmem:[#allocation10 + $0x358] sm:$0xff]  ;;  %v1365_v32 = vld [vmem:[#allocation10 + $0x550] sm:$0xff] }
 0x260   : > { %2622 = vmatpush.msra.mxu0 %v1331_v33  ;;  %2665 = vmatpush.msra.mxu2 %v1236_v36  ;;  %v1909_v33 = vld [vmem:[#allocation10 + $0x1650] sm:$0xff]  ;;  %v2228_v36 = vperm.slane %v4816_v28, 1 }
 0x261   : > { %2641 = vmatpush.msra.mxu1 %v1875_v35  ;;  %2684 = vmatpush.msra.mxu3 %v1780_v37  ;;  %v1270_v35 = vld [vmem:[#allocation10 + $0x258] sm:$0xff] }
 0x262   : > { %2623 = vmatpush.msra.mxu0 %v1299_v38  ;;  %2666 = vmatpush.msra.mxu2 %v1204_v41  ;;  %v1814_v37 = vld [vmem:[#allocation10 + $0x1358] sm:$0xff]  ;;  %v1333_v38 = vld [vmem:[#allocation10 + $0x450] sm:$0xff] }
 0x263   : > { %2642 = vmatpush.msra.mxu1 %v1843_v39  ;;  %2685 = vmatpush.msra.mxu3 %v1748_v42  ;;  %v2227_v39 = vperm.slane %v4816_v28, 0  ;;  %v1877_v41 = vld [vmem:[#allocation10 + $0x1550] sm:$0xff]  ;;  %v1238_v42 = vld [vmem:[#allocation10 + $0x158] sm:$0xff] }
 0x264   : > { %2587 = vmatmul.f32.vlgmr.msrb.gmra.mxu2 %v4796_v34  ;;  %2624 = vmatpush.msra.mxu0 %v1267_v44  ;;  %v1301_v44 = vld [vmem:[#allocation10 + $0x350] sm:$0xff] }
 0x265   : > { %2731 = vmatpush.msrb.mxu2 %v1686_v43  ;;  %2643 = vmatpush.msra.mxu1 %v1811_v45  ;;  %v1782_v43 = vld [vmem:[#allocation10 + $0x1258] sm:$0xff] }
 0x266   : > { %2686 = vmatpush.msra.mxu3 %v1716_v46  ;;  %2625 = vmatpush.msra.mxu0 %v1235_v49  ;;  %v1845_v46 = vld [vmem:[#allocation10 + $0x1450] sm:$0xff] }
 0x267   : > { %2607 = vmatmul.f32.vlgmr.msrb.gmra.mxu3 %v4798_v40  ;;  %2732 = vmatpush.msrb.mxu2 %v1654_v47  ;;  %v1206_v47 = vld [vmem:[#allocation10 + $0x58] sm:$0xff] }
 0x268   : > { %2751 = vmatpush.msrb.mxu3 %v2198_v48  ;;  %2644 = vmatpush.msra.mxu1 %v1779_v50  ;;  %v1750_v50 = vld [vmem:[#allocation10 + $0x1158] sm:$0xff] }
 0x269   : > { %2733 = vmatpush.msrb.mxu2 %v1622_v51  ;;  %2626 = vmatpush.msra.mxu0 %v1203_v53  ;;  %v1269_v53 = vld [vmem:[#allocation10 + $0x250] sm:$0xff] }
 0x26a   : > { %2752 = vmatpush.msrb.mxu3 %v2166_v52  ;;  %2645 = vmatpush.msra.mxu1 %v1747_v54  ;;  %v1688_v52 = vld [vmem:[#allocation10 + $0xf68] sm:$0xff] }
 0x26b   : > { %2547 = vmatmul.f32.vlgmr.msrb.gmra.mxu0 %v4796_v34  ;;  %2734 = vmatpush.msrb.mxu2 %v1590_v56  ;;  %v1718_v56 = vld [vmem:[#allocation10 + $0x1058] sm:$0xff] }
 0x26c   : > { %2691 = vmatpush.msrb.mxu0 %v1685_v55  ;;  %2753 = vmatpush.msrb.mxu3 %v2134_v57  ;;  %v1813_v55 = vld [vmem:[#allocation10 + $0x1350] sm:$0xff] }
 0x26d   : > { %2646 = vmatpush.msra.mxu1 %v1715_v58  ;;  %2735 = vmatpush.msrb.mxu2 %v1558_v61  ;;  %v2200_v61 = vld [vmem:[#allocation10 + $0x1f68] sm:$0xff] }
 0x26e   : > { %2567 = vmatmul.f32.vlgmr.msrb.gmra.mxu1 %v4798_v40  ;;  %2692 = vmatpush.msrb.mxu0 %v1653_v59  ;;  %v1656_v59 = vld [vmem:[#allocation10 + $0xe68] sm:$0xff] }
 0x26f   : > { %2711 = vmatpush.msrb.mxu1 %v2197_v60  ;;  %2754 = vmatpush.msrb.mxu3 %v2102_v62  ;;  %v1237_v62 = vld [vmem:[#allocation10 + $0x150] sm:$0xff] }
 0x270   : > { %2693 = vmatpush.msrb.mxu0 %v1621_v63  ;;  %2736 = vmatpush.msrb.mxu2 %v1526_v1  ;;  %v1781_v63 = vld [vmem:[#allocation10 + $0x1250] sm:$0xff]  ;;  %v2168_v1 = vld [vmem:[#allocation10 + $0x1e68] sm:$0xff] }
 0x271   : > { %2712 = vmatpush.msrb.mxu1 %v2165_v0  ;;  %2755 = vmatpush.msrb.mxu3 %v2070_v2  ;;  %v1624_v0 = vld [vmem:[#allocation10 + $0xd68] sm:$0xff]  ;;  %v1205_v2 = vld [vmem:[#allocation10 + $0x50] sm:$0xff] }
 0x272   : > { %2694 = vmatpush.msrb.mxu0 %v1589_v3  ;;  %2737 = vmatpush.msrb.mxu2 %v1494_v5  ;;  %v1749_v3 = vld [vmem:[#allocation10 + $0x1150] sm:$0xff]  ;;  %v1592_v5 = vld [vmem:[#allocation10 + $0xc68] sm:$0xff] }
 0x273   : > { %2713 = vmatpush.msrb.mxu1 %v2133_v4  ;;  %2756 = vmatpush.msrb.mxu3 %v2038_v6  ;;  %v1687_v4 = vld [vmem:[#allocation10 + $0xf60] sm:$0xff]  ;;  %v2136_v6 = vld [vmem:[#allocation10 + $0x1d68] sm:$0xff] }
 0x274   : > { %2695 = vmatpush.msrb.mxu0 %v1557_v7  ;;  %2738 = vmatpush.msrb.mxu2 %v1462_v9  ;;  %v1717_v7 = vld [vmem:[#allocation10 + $0x1050] sm:$0xff]  ;;  %v2199_v9 = vld [vmem:[#allocation10 + $0x1f60] sm:$0xff] }
 0x275   : > { %2714 = vmatpush.msrb.mxu1 %v2101_v8  ;;  %2757 = vmatpush.msrb.mxu3 %v2006_v10  ;;  %v1655_v8 = vld [vmem:[#allocation10 + $0xe60] sm:$0xff]  ;;  %v1560_v10 = vld [vmem:[#allocation10 + $0xb68] sm:$0xff] }
 0x276   : > { %2696 = vmatpush.msrb.mxu0 %v1525_v11  ;;  %2739 = vmatpush.msrb.mxu2 %v1430_v13  ;;  %v2104_v11 = vld [vmem:[#allocation10 + $0x1c68] sm:$0xff]  ;;  %v2167_v13 = vld [vmem:[#allocation10 + $0x1e60] sm:$0xff] }
 0x277   : > { %2715 = vmatpush.msrb.mxu1 %v2069_v12  ;;  %2758 = vmatpush.msrb.mxu3 %v1974_v14  ;;  %v1623_v12 = vld [vmem:[#allocation10 + $0xd60] sm:$0xff]  ;;  %v1528_v14 = vld [vmem:[#allocation10 + $0xa68] sm:$0xff] }
 0x278   : > { %2697 = vmatpush.msrb.mxu0 %v1493_v15  ;;  %2740 = vmatpush.msrb.mxu2 %v1398_v17  ;;  %v2072_v15 = vld [vmem:[#allocation10 + $0x1b68] sm:$0xff]  ;;  %v2135_v17 = vld [vmem:[#allocation10 + $0x1d60] sm:$0xff] }
 0x279   : > { %2716 = vmatpush.msrb.mxu1 %v2037_v16  ;;  %2759 = vmatpush.msrb.mxu3 %v1942_v18  ;;  %v1591_v16 = vld [vmem:[#allocation10 + $0xc60] sm:$0xff]  ;;  %v1496_v18 = vld [vmem:[#allocation10 + $0x968] sm:$0xff] }
 0x27a   : > { %2698 = vmatpush.msrb.mxu0 %v1461_v19  ;;  %2741 = vmatpush.msrb.mxu2 %v1366_v21  ;;  %v2040_v19 = vld [vmem:[#allocation10 + $0x1a68] sm:$0xff]  ;;  %v2103_v21 = vld [vmem:[#allocation10 + $0x1c60] sm:$0xff] }
 0x27b   : > { %2717 = vmatpush.msrb.mxu1 %v2005_v20  ;;  %2760 = vmatpush.msrb.mxu3 %v1910_v22  ;;  %v1559_v20 = vld [vmem:[#allocation10 + $0xb60] sm:$0xff]  ;;  %v1464_v22 = vld [vmem:[#allocation10 + $0x868] sm:$0xff] }
 0x27c   : > { %2699 = vmatpush.msrb.mxu0 %v1429_v23  ;;  %2742 = vmatpush.msrb.mxu2 %v1334_v25  ;;  %v2008_v23 = vld [vmem:[#allocation10 + $0x1968] sm:$0xff]  ;;  %v2071_v25 = vld [vmem:[#allocation10 + $0x1b60] sm:$0xff] }
 0x27d   : > { %2718 = vmatpush.msrb.mxu1 %v1973_v24  ;;  %2761 = vmatpush.msrb.mxu3 %v1878_v26  ;;  %v1527_v24 = vld [vmem:[#allocation10 + $0xa60] sm:$0xff]  ;;  %v1432_v26 = vld [vmem:[#allocation10 + $0x768] sm:$0xff] }
 0x27e   : > { %2700 = vmatpush.msrb.mxu0 %v1397_v27  ;;  %2743 = vmatpush.msrb.mxu2 %v1302_v30  ;;  %v1976_v27 = vld [vmem:[#allocation10 + $0x1868] sm:$0xff]  ;;  %v2039_v30 = vld [vmem:[#allocation10 + $0x1a60] sm:$0xff] }
 0x27f   : > { %2719 = vmatpush.msrb.mxu1 %v1941_v29  ;;  %2762 = vmatpush.msrb.mxu3 %v1846_v31  ;;  %v2348_v45 = vpop.f32.mrf.mxu2  ;;  %v1495_v29 = vld [vmem:[#allocation10 + $0x960] sm:$0xff]  ;;  %v1400_v31 = vld [vmem:[#allocation10 + $0x668] sm:$0xff] }
 0x280   : > { %2701 = vmatpush.msrb.mxu0 %v1365_v32  ;;  %2744 = vmatpush.msrb.mxu2 %v1270_v35  ;;  %v2349_v49 = vadd.f32 %v2348_v45, %v2228_v36  ;;  %v1944_v32 = vld [vmem:[#allocation10 + $0x1768] sm:$0xff]  ;;  %v2007_v35 = vld [vmem:[#allocation10 + $0x1960] sm:$0xff] }
 0x281   : > { %2720 = vmatpush.msrb.mxu1 %v1909_v33  ;;  %2763 = vmatpush.msrb.mxu3 %v1814_v37  ;;  %v2308_v48 = vpop.f32.mrf.mxu0  ;;  %v2368_v54 = vpop.f32.mrf.mxu3  ;;  %v1463_v33 = vld [vmem:[#allocation10 + $0x860] sm:$0xff]  ;;  %v1368_v36 = vld [vmem:[#allocation10 + $0x568] sm:$0xff] }
 0x282   : > { %2702 = vmatpush.msrb.mxu0 %v1333_v38  ;;  %2745 = vmatpush.msrb.mxu2 %v1238_v42  ;;  %v2309_v51 = vadd.f32 %v2308_v48, %v2227_v39  ;;  %v2369_v58 = vadd.f32 %v2368_v54, %v2349_v49  ;;  %v1912_v37 = vld [vmem:[#allocation10 + $0x1668] sm:$0xff]  ;;  %v1431_v38 = vld [vmem:[#allocation10 + $0x760] sm:$0xff] }
 0x283   : > { %2721 = vmatpush.msrb.mxu1 %v1877_v41  ;;  %2764 = vmatpush.msrb.mxu3 %v1782_v43  ;;  %v2328_v57 = vpop.f32.mrf.mxu1  ;;  %v1975_v39 = vld [vmem:[#allocation10 + $0x1860] sm:$0xff]  ;;  %v1336_v41 = vld [vmem:[#allocation10 + $0x468] sm:$0xff] }
 0x284   : > { %2703 = vmatpush.msrb.mxu0 %v1301_v44  ;;  %2746 = vmatpush.msrb.mxu2 %v1206_v47  ;;  %v2329_v60 = vadd.f32 %v2328_v57, %v2309_v51  ;;  %3572 = vst [vmem:[%s5010_s7 + $0x8] sm:$0xff] %v2369_v58  ;;  %v1880_v42 = vld [vmem:[#allocation10 + $0x1568] sm:$0xff]  ;;  %v1399_v43 = vld [vmem:[#allocation10 + $0x660] sm:$0xff] }
 0x285   : > { %2722 = vmatpush.msrb.mxu1 %v1845_v46  ;;  %2765 = vmatpush.msrb.mxu3 %v1750_v50  ;;  %v1943_v44 = vld [vmem:[#allocation10 + $0x1760] sm:$0xff]  ;;  %v1304_v45 = vld [vmem:[#allocation10 + $0x368] sm:$0xff]  ;;  %v2230_v50 = vperm.slane %v4816_v28, 3 }
 0x286   : > { %2667 = vmatmul.f32.vlgmr.msra.gmra.mxu2 %v4796_v34  ;;  %2704 = vmatpush.msrb.mxu0 %v1269_v53  ;;  %3571 = vst [vmem:[%s5010_s7] sm:$0xff] %v2329_v60  ;;  %v1848_v46 = vld [vmem:[#allocation10 + $0x1468] sm:$0xff]  ;;  %v1367_v47 = vld [vmem:[#allocation10 + $0x560] sm:$0xff]  ;;  %v2229_v53 = vperm.slane %v4816_v28, 2 }
 0x287   : > { %2811 = vmatpush.msra.mxu2 %v1688_v52  ;;  %2723 = vmatpush.msrb.mxu1 %v1813_v55  ;;  %v1911_v48 = vld [vmem:[#allocation10 + $0x1660] sm:$0xff]  ;;  %v1272_v49 = vld [vmem:[#allocation10 + $0x268] sm:$0xff] }
 0x288   : > { %2766 = vmatpush.msrb.mxu3 %v1718_v56  ;;  %2705 = vmatpush.msrb.mxu0 %v1237_v62  ;;  %v1816_v51 = vld [vmem:[#allocation10 + $0x1368] sm:$0xff]  ;;  %v1335_v52 = vld [vmem:[#allocation10 + $0x460] sm:$0xff] }
 0x289   : > { %2687 = vmatmul.f32.vlgmr.msra.gmra.mxu3 %v4798_v40  ;;  %2812 = vmatpush.msra.mxu2 %v1656_v59  ;;  %v1879_v54 = vld [vmem:[#allocation10 + $0x1560] sm:$0xff]  ;;  %v1240_v55 = vld [vmem:[#allocation10 + $0x168] sm:$0xff] }
 0x28a   : > { %2831 = vmatpush.msra.mxu3 %v2200_v61  ;;  %2724 = vmatpush.msrb.mxu1 %v1781_v63  ;;  %v1784_v56 = vld [vmem:[#allocation10 + $0x1268] sm:$0xff]  ;;  %v1303_v57 = vld [vmem:[#allocation10 + $0x360] sm:$0xff] }
 0x28b   : > { %2813 = vmatpush.msra.mxu2 %v1624_v0  ;;  %2706 = vmatpush.msrb.mxu0 %v1205_v2  ;;  %v1847_v59 = vld [vmem:[#allocation10 + $0x1460] sm:$0xff]  ;;  %v1208_v60 = vld [vmem:[#allocation10 + $0x68] sm:$0xff] }
 0x28c   : > { %2832 = vmatpush.msra.mxu3 %v2168_v1  ;;  %2725 = vmatpush.msrb.mxu1 %v1749_v3  ;;  %v1752_v63 = vld [vmem:[#allocation10 + $0x1168] sm:$0xff]  ;;  %v1690_v1 = vld [vmem:[#allocation10 + $0xf78] sm:$0xff]  ;;  %v1271_v2 = vld [vmem:[#allocation10 + $0x260] sm:$0xff] }
 0x28d   : > { %2627 = vmatmul.f32.vlgmr.msra.gmra.mxu0 %v4796_v34  ;;  %2814 = vmatpush.msra.mxu2 %v1592_v5  ;;  %v1720_v5 = vld [vmem:[#allocation10 + $0x1068] sm:$0xff] }
 0x28e   : > { %2771 = vmatpush.msra.mxu0 %v1687_v4  ;;  %2833 = vmatpush.msra.mxu3 %v2136_v6  ;;  %v1815_v4 = vld [vmem:[#allocation10 + $0x1360] sm:$0xff] }
 0x28f   : > { %2726 = vmatpush.msrb.mxu1 %v1717_v7  ;;  %2815 = vmatpush.msra.mxu2 %v1560_v10  ;;  %v2202_v10 = vld [vmem:[#allocation10 + $0x1f78] sm:$0xff] }
 0x290   : > { %2647 = vmatmul.f32.vlgmr.msra.gmra.mxu1 %v4798_v40  ;;  %2772 = vmatpush.msra.mxu0 %v1655_v8  ;;  %v1658_v8 = vld [vmem:[#allocation10 + $0xe78] sm:$0xff] }
 0x291   : > { %2791 = vmatpush.msra.mxu1 %v2199_v9  ;;  %2834 = vmatpush.msra.mxu3 %v2104_v11  ;;  %v1239_v11 = vld [vmem:[#allocation10 + $0x160] sm:$0xff] }
 0x292   : > { %2773 = vmatpush.msra.mxu0 %v1623_v12  ;;  %2816 = vmatpush.msra.mxu2 %v1528_v14  ;;  %v1783_v12 = vld [vmem:[#allocation10 + $0x1260] sm:$0xff]  ;;  %v2170_v14 = vld [vmem:[#allocation10 + $0x1e78] sm:$0xff] }
 0x293   : > { %2792 = vmatpush.msra.mxu1 %v2167_v13  ;;  %2835 = vmatpush.msra.mxu3 %v2072_v15  ;;  %v1626_v13 = vld [vmem:[#allocation10 + $0xd78] sm:$0xff]  ;;  %v1207_v15 = vld [vmem:[#allocation10 + $0x60] sm:$0xff] }
 0x294   : > { %2774 = vmatpush.msra.mxu0 %v1591_v16  ;;  %2817 = vmatpush.msra.mxu2 %v1496_v18  ;;  %v1751_v16 = vld [vmem:[#allocation10 + $0x1160] sm:$0xff]  ;;  %v1594_v18 = vld [vmem:[#allocation10 + $0xc78] sm:$0xff] }
 0x295   : > { %2793 = vmatpush.msra.mxu1 %v2135_v17  ;;  %2836 = vmatpush.msra.mxu3 %v2040_v19  ;;  %v1689_v17 = vld [vmem:[#allocation10 + $0xf70] sm:$0xff]  ;;  %v2138_v19 = vld [vmem:[#allocation10 + $0x1d78] sm:$0xff] }
 0x296   : > { %2775 = vmatpush.msra.mxu0 %v1559_v20  ;;  %2818 = vmatpush.msra.mxu2 %v1464_v22  ;;  %v1719_v20 = vld [vmem:[#allocation10 + $0x1060] sm:$0xff]  ;;  %v2201_v22 = vld [vmem:[#allocation10 + $0x1f70] sm:$0xff] }
 0x297   : > { %2794 = vmatpush.msra.mxu1 %v2103_v21  ;;  %2837 = vmatpush.msra.mxu3 %v2008_v23  ;;  %v1657_v21 = vld [vmem:[#allocation10 + $0xe70] sm:$0xff]  ;;  %v1562_v23 = vld [vmem:[#allocation10 + $0xb78] sm:$0xff] }
 0x298   : > { %2776 = vmatpush.msra.mxu0 %v1527_v24  ;;  %2819 = vmatpush.msra.mxu2 %v1432_v26  ;;  %v2106_v24 = vld [vmem:[#allocation10 + $0x1c78] sm:$0xff]  ;;  %v2169_v26 = vld [vmem:[#allocation10 + $0x1e70] sm:$0xff] }
 0x299   : > { %2795 = vmatpush.msra.mxu1 %v2071_v25  ;;  %2838 = vmatpush.msra.mxu3 %v1976_v27  ;;  %v1625_v25 = vld [vmem:[#allocation10 + $0xd70] sm:$0xff]  ;;  %v1530_v27 = vld [vmem:[#allocation10 + $0xa78] sm:$0xff] }
 0x29a   : > { %2777 = vmatpush.msra.mxu0 %v1495_v29  ;;  %2820 = vmatpush.msra.mxu2 %v1400_v31  ;;  %v2074_v29 = vld [vmem:[#allocation10 + $0x1b78] sm:$0xff]  ;;  %v2137_v31 = vld [vmem:[#allocation10 + $0x1d70] sm:$0xff] }
 0x29b   : > { %2796 = vmatpush.msra.mxu1 %v2039_v30  ;;  %2839 = vmatpush.msra.mxu3 %v1944_v32  ;;  %v1593_v30 = vld [vmem:[#allocation10 + $0xc70] sm:$0xff]  ;;  %v1498_v32 = vld [vmem:[#allocation10 + $0x978] sm:$0xff] }
 0x29c   : > { %2778 = vmatpush.msra.mxu0 %v1463_v33  ;;  %2821 = vmatpush.msra.mxu2 %v1368_v36  ;;  %v2042_v33 = vld [vmem:[#allocation10 + $0x1a78] sm:$0xff]  ;;  %v2105_v36 = vld [vmem:[#allocation10 + $0x1c70] sm:$0xff] }
 0x29d   : > { %2797 = vmatpush.msra.mxu1 %v2007_v35  ;;  %2840 = vmatpush.msra.mxu3 %v1912_v37  ;;  %v1561_v35 = vld [vmem:[#allocation10 + $0xb70] sm:$0xff]  ;;  %v1466_v37 = vld [vmem:[#allocation10 + $0x878] sm:$0xff] }
 0x29e   : > { %2779 = vmatpush.msra.mxu0 %v1431_v38  ;;  %2822 = vmatpush.msra.mxu2 %v1336_v41  ;;  %v2010_v38 = vld [vmem:[#allocation10 + $0x1978] sm:$0xff]  ;;  %v2073_v41 = vld [vmem:[#allocation10 + $0x1b70] sm:$0xff] }
 0x29f   : > { %2798 = vmatpush.msra.mxu1 %v1975_v39  ;;  %2841 = vmatpush.msra.mxu3 %v1880_v42  ;;  %v1529_v39 = vld [vmem:[#allocation10 + $0xa70] sm:$0xff]  ;;  %v1434_v42 = vld [vmem:[#allocation10 + $0x778] sm:$0xff] }
 0x2a0   : > { %2780 = vmatpush.msra.mxu0 %v1399_v43  ;;  %2823 = vmatpush.msra.mxu2 %v1304_v45  ;;  %v1978_v43 = vld [vmem:[#allocation10 + $0x1878] sm:$0xff]  ;;  %v2041_v45 = vld [vmem:[#allocation10 + $0x1a70] sm:$0xff] }
 0x2a1   : > { %2799 = vmatpush.msra.mxu1 %v1943_v44  ;;  %2842 = vmatpush.msra.mxu3 %v1848_v46  ;;  %v1497_v44 = vld [vmem:[#allocation10 + $0x970] sm:$0xff]  ;;  %v1402_v46 = vld [vmem:[#allocation10 + $0x678] sm:$0xff] }
 0x2a2   : > { %2781 = vmatpush.msra.mxu0 %v1367_v47  ;;  %2824 = vmatpush.msra.mxu2 %v1272_v49  ;;  %v1946_v47 = vld [vmem:[#allocation10 + $0x1778] sm:$0xff]  ;;  %v2009_v49 = vld [vmem:[#allocation10 + $0x1970] sm:$0xff] }
 0x2a3   : > { %2800 = vmatpush.msra.mxu1 %v1911_v48  ;;  %v2428_v58 = vpop.f32.mrf.mxu2  ;;  %2843 = vmatpush.msra.mxu3 %v1816_v51  ;;  %v1465_v48 = vld [vmem:[#allocation10 + $0x870] sm:$0xff]  ;;  %v1914_v51 = vld [vmem:[#allocation10 + $0x1678] sm:$0xff] }
 0x2a4   : > { %2782 = vmatpush.msra.mxu0 %v1335_v52  ;;  %v2388_v61 = vpop.f32.mrf.mxu0  ;;  %v2429_v62 = vadd.f32 %v2428_v58, %v2230_v50  ;;  %2825 = vmatpush.msra.mxu2 %v1240_v55  ;;  %v1370_v50 = vld [vmem:[#allocation10 + $0x578] sm:$0xff]  ;;  %v1433_v52 = vld [vmem:[#allocation10 + $0x770] sm:$0xff] }
 0x2a5   : > { %2801 = vmatpush.msra.mxu1 %v1879_v54  ;;  %v2389_v0 = vadd.f32 %v2388_v61, %v2229_v53  ;;  %2844 = vmatpush.msra.mxu3 %v1784_v56  ;;  %v1977_v53 = vld [vmem:[#allocation10 + $0x1870] sm:$0xff]  ;;  %v1338_v54 = vld [vmem:[#allocation10 + $0x478] sm:$0xff] }
 0x2a6   : > { %2783 = vmatpush.msra.mxu0 %v1303_v57  ;;  %v2448_v3 = vpop.f32.mrf.mxu3  ;;  %2826 = vmatpush.msra.mxu2 %v1208_v60  ;;  %v1882_v55 = vld [vmem:[#allocation10 + $0x1578] sm:$0xff]  ;;  %v1401_v56 = vld [vmem:[#allocation10 + $0x670] sm:$0xff] }
 0x2a7   : > { %2802 = vmatpush.msra.mxu1 %v1847_v59  ;;  %v2408_v6 = vpop.f32.mrf.mxu1  ;;  %v2449_v7 = vadd.f32 %v2448_v3, %v2429_v62  ;;  %2845 = vmatpush.msra.mxu3 %v1752_v63  ;;  %v1945_v57 = vld [vmem:[#allocation10 + $0x1770] sm:$0xff]  ;;  %v1306_v58 = vld [vmem:[#allocation10 + $0x378] sm:$0xff]  ;;  %v2232_v63 = vperm.slane %v4816_v28, 5 }
 0x2a8   : > { %2747 = vmatmul.f32.vlgmr.msrb.gmra.mxu2 %v4796_v34  ;;  %v2409_v9 = vadd.f32 %v2408_v6, %v2389_v0  ;;  %2784 = vmatpush.msra.mxu0 %v1271_v2  ;;  %v1850_v59 = vld [vmem:[#allocation10 + $0x1478] sm:$0xff]  ;;  %v1369_v60 = vld [vmem:[#allocation10 + $0x570] sm:$0xff]  ;;  %v2231_v2 = vperm.slane %v4816_v28, 4 }
 0x2a9   : > { %2891 = vmatpush.msrb.mxu2 %v1690_v1  ;;  %3574 = vst [vmem:[%s5010_s7 + $0x18] sm:$0xff] %v2449_v7  ;;  %2803 = vmatpush.msra.mxu1 %v1815_v4  ;;  %v1913_v61 = vld [vmem:[#allocation10 + $0x1670] sm:$0xff]  ;;  %v1274_v62 = vld [vmem:[#allocation10 + $0x278] sm:$0xff] }
 0x2aa   : > { %2846 = vmatpush.msra.mxu3 %v1720_v5  ;;  %3573 = vst [vmem:[%s5010_s7 + $0x10] sm:$0xff] %v2409_v9  ;;  %2785 = vmatpush.msra.mxu0 %v1239_v11  ;;  %v1818_v0 = vld [vmem:[#allocation10 + $0x1378] sm:$0xff]  ;;  %v1337_v1 = vld [vmem:[#allocation10 + $0x470] sm:$0xff] }
 0x2ab   : > { %2767 = vmatmul.f32.vlgmr.msrb.gmra.mxu3 %v4798_v40  ;;  %2892 = vmatpush.msrb.mxu2 %v1658_v8  ;;  %v1881_v3 = vld [vmem:[#allocation10 + $0x1570] sm:$0xff]  ;;  %v1242_v4 = vld [vmem:[#allocation10 + $0x178] sm:$0xff] }
 0x2ac   : > { %2911 = vmatpush.msrb.mxu3 %v2202_v10  ;;  %2804 = vmatpush.msra.mxu1 %v1783_v12  ;;  %v1786_v5 = vld [vmem:[#allocation10 + $0x1278] sm:$0xff]  ;;  %v1305_v6 = vld [vmem:[#allocation10 + $0x370] sm:$0xff] }
 0x2ad   : > { %2893 = vmatpush.msrb.mxu2 %v1626_v13  ;;  %2786 = vmatpush.msra.mxu0 %v1207_v15  ;;  %v1849_v8 = vld [vmem:[#allocation10 + $0x1470] sm:$0xff]  ;;  %v1210_v9 = vld [vmem:[#allocation10 + $0x78] sm:$0xff] }
 0x2ae   : > { %2912 = vmatpush.msrb.mxu3 %v2170_v14  ;;  %2805 = vmatpush.msra.mxu1 %v1751_v16  ;;  %v1754_v12 = vld [vmem:[#allocation10 + $0x1178] sm:$0xff]  ;;  %v1692_v14 = vld [vmem:[#allocation10 + $0xf88] sm:$0xff]  ;;  %v1273_v15 = vld [vmem:[#allocation10 + $0x270] sm:$0xff] }
 0x2af   : > { %2707 = vmatmul.f32.vlgmr.msrb.gmra.mxu0 %v4796_v34  ;;  %2894 = vmatpush.msrb.mxu2 %v1594_v18  ;;  %v1722_v18 = vld [vmem:[#allocation10 + $0x1078] sm:$0xff] }
 0x2b0   : > { %2851 = vmatpush.msrb.mxu0 %v1689_v17  ;;  %2913 = vmatpush.msrb.mxu3 %v2138_v19  ;;  %v1817_v17 = vld [vmem:[#allocation10 + $0x1370] sm:$0xff] }
 0x2b1   : > { %2806 = vmatpush.msra.mxu1 %v1719_v20  ;;  %2895 = vmatpush.msrb.mxu2 %v1562_v23  ;;  %v2204_v23 = vld [vmem:[#allocation10 + $0x1f88] sm:$0xff] }
 0x2b2   : > { %2727 = vmatmul.f32.vlgmr.msrb.gmra.mxu1 %v4798_v40  ;;  %2852 = vmatpush.msrb.mxu0 %v1657_v21  ;;  %v1660_v21 = vld [vmem:[#allocation10 + $0xe88] sm:$0xff] }
 0x2b3   : > { %2871 = vmatpush.msrb.mxu1 %v2201_v22  ;;  %2914 = vmatpush.msrb.mxu3 %v2106_v24  ;;  %v1241_v24 = vld [vmem:[#allocation10 + $0x170] sm:$0xff] }
 0x2b4   : > { %2853 = vmatpush.msrb.mxu0 %v1625_v25  ;;  %2896 = vmatpush.msrb.mxu2 %v1530_v27  ;;  %v1785_v25 = vld [vmem:[#allocation10 + $0x1270] sm:$0xff]  ;;  %v2172_v27 = vld [vmem:[#allocation10 + $0x1e88] sm:$0xff] }
 0x2b5   : > { %2872 = vmatpush.msrb.mxu1 %v2169_v26  ;;  %2915 = vmatpush.msrb.mxu3 %v2074_v29  ;;  %v1628_v26 = vld [vmem:[#allocation10 + $0xd88] sm:$0xff]  ;;  %v1209_v29 = vld [vmem:[#allocation10 + $0x70] sm:$0xff] }
 0x2b6   : > { %2854 = vmatpush.msrb.mxu0 %v1593_v30  ;;  %2897 = vmatpush.msrb.mxu2 %v1498_v32  ;;  %v1753_v30 = vld [vmem:[#allocation10 + $0x1170] sm:$0xff]  ;;  %v1596_v32 = vld [vmem:[#allocation10 + $0xc88] sm:$0xff] }
 0x2b7   : > { %2873 = vmatpush.msrb.mxu1 %v2137_v31  ;;  %2916 = vmatpush.msrb.mxu3 %v2042_v33  ;;  %v1691_v31 = vld [vmem:[#allocation10 + $0xf80] sm:$0xff]  ;;  %v2140_v33 = vld [vmem:[#allocation10 + $0x1d88] sm:$0xff] }
 0x2b8   : > { %2855 = vmatpush.msrb.mxu0 %v1561_v35  ;;  %2898 = vmatpush.msrb.mxu2 %v1466_v37  ;;  %v1721_v35 = vld [vmem:[#allocation10 + $0x1070] sm:$0xff]  ;;  %v2203_v37 = vld [vmem:[#allocation10 + $0x1f80] sm:$0xff] }
 0x2b9   : > { %2874 = vmatpush.msrb.mxu1 %v2105_v36  ;;  %2917 = vmatpush.msrb.mxu3 %v2010_v38  ;;  %v1659_v36 = vld [vmem:[#allocation10 + $0xe80] sm:$0xff]  ;;  %v1564_v38 = vld [vmem:[#allocation10 + $0xb88] sm:$0xff] }
 0x2ba   : > { %2856 = vmatpush.msrb.mxu0 %v1529_v39  ;;  %2899 = vmatpush.msrb.mxu2 %v1434_v42  ;;  %v2108_v39 = vld [vmem:[#allocation10 + $0x1c88] sm:$0xff]  ;;  %v2171_v42 = vld [vmem:[#allocation10 + $0x1e80] sm:$0xff] }
 0x2bb   : > { %2875 = vmatpush.msrb.mxu1 %v2073_v41  ;;  %2918 = vmatpush.msrb.mxu3 %v1978_v43  ;;  %v1627_v41 = vld [vmem:[#allocation10 + $0xd80] sm:$0xff]  ;;  %v1532_v43 = vld [vmem:[#allocation10 + $0xa88] sm:$0xff] }
 0x2bc   : > { %2857 = vmatpush.msrb.mxu0 %v1497_v44  ;;  %2900 = vmatpush.msrb.mxu2 %v1402_v46  ;;  %v2076_v44 = vld [vmem:[#allocation10 + $0x1b88] sm:$0xff]  ;;  %v2139_v46 = vld [vmem:[#allocation10 + $0x1d80] sm:$0xff] }
 0x2bd   : > { %2876 = vmatpush.msrb.mxu1 %v2041_v45  ;;  %2919 = vmatpush.msrb.mxu3 %v1946_v47  ;;  %v1595_v45 = vld [vmem:[#allocation10 + $0xc80] sm:$0xff]  ;;  %v1500_v47 = vld [vmem:[#allocation10 + $0x988] sm:$0xff] }
 0x2be   : > { %2858 = vmatpush.msrb.mxu0 %v1465_v48  ;;  %2901 = vmatpush.msrb.mxu2 %v1370_v50  ;;  %v2044_v48 = vld [vmem:[#allocation10 + $0x1a88] sm:$0xff]  ;;  %v2107_v50 = vld [vmem:[#allocation10 + $0x1c80] sm:$0xff] }
 0x2bf   : > { %2877 = vmatpush.msrb.mxu1 %v2009_v49  ;;  %2920 = vmatpush.msrb.mxu3 %v1914_v51  ;;  %v1563_v49 = vld [vmem:[#allocation10 + $0xb80] sm:$0xff]  ;;  %v1468_v51 = vld [vmem:[#allocation10 + $0x888] sm:$0xff] }
 0x2c0   : > { %2859 = vmatpush.msrb.mxu0 %v1433_v52  ;;  %2902 = vmatpush.msrb.mxu2 %v1338_v54  ;;  %v2012_v52 = vld [vmem:[#allocation10 + $0x1988] sm:$0xff]  ;;  %v2075_v54 = vld [vmem:[#allocation10 + $0x1b80] sm:$0xff] }
 0x2c1   : > { %2878 = vmatpush.msrb.mxu1 %v1977_v53  ;;  %2921 = vmatpush.msrb.mxu3 %v1882_v55  ;;  %v1531_v53 = vld [vmem:[#allocation10 + $0xa80] sm:$0xff]  ;;  %v1436_v55 = vld [vmem:[#allocation10 + $0x788] sm:$0xff] }
 0x2c2   : > { %2860 = vmatpush.msrb.mxu0 %v1401_v56  ;;  %2903 = vmatpush.msrb.mxu2 %v1306_v58  ;;  %v1980_v56 = vld [vmem:[#allocation10 + $0x1888] sm:$0xff]  ;;  %v2043_v58 = vld [vmem:[#allocation10 + $0x1a80] sm:$0xff] }
 0x2c3   : > { %2879 = vmatpush.msrb.mxu1 %v1945_v57  ;;  %2922 = vmatpush.msrb.mxu3 %v1850_v59  ;;  %v1499_v57 = vld [vmem:[#allocation10 + $0x980] sm:$0xff]  ;;  %v1404_v59 = vld [vmem:[#allocation10 + $0x688] sm:$0xff] }
 0x2c4   : > { %2861 = vmatpush.msrb.mxu0 %v1369_v60  ;;  %2904 = vmatpush.msrb.mxu2 %v1274_v62  ;;  %v1948_v60 = vld [vmem:[#allocation10 + $0x1788] sm:$0xff]  ;;  %v2011_v62 = vld [vmem:[#allocation10 + $0x1980] sm:$0xff] }
 0x2c5   : > { %2880 = vmatpush.msrb.mxu1 %v1913_v61  ;;  %v2508_v7 = vpop.f32.mrf.mxu2  ;;  %2923 = vmatpush.msrb.mxu3 %v1818_v0  ;;  %v1467_v61 = vld [vmem:[#allocation10 + $0x880] sm:$0xff]  ;;  %v1916_v0 = vld [vmem:[#allocation10 + $0x1688] sm:$0xff] }
 0x2c6   : > { %2862 = vmatpush.msrb.mxu0 %v1337_v1  ;;  %v2468_v10 = vpop.f32.mrf.mxu0  ;;  %v2509_v11 = vadd.f32 %v2508_v7, %v2232_v63  ;;  %2905 = vmatpush.msrb.mxu2 %v1242_v4  ;;  %v1372_v63 = vld [vmem:[#allocation10 + $0x588] sm:$0xff]  ;;  %v1435_v1 = vld [vmem:[#allocation10 + $0x780] sm:$0xff] }
 0x2c7   : > { %2881 = vmatpush.msrb.mxu1 %v1881_v3  ;;  %v2469_v13 = vadd.f32 %v2468_v10, %v2231_v2  ;;  %2924 = vmatpush.msrb.mxu3 %v1786_v5  ;;  %v1979_v2 = vld [vmem:[#allocation10 + $0x1880] sm:$0xff]  ;;  %v1340_v3 = vld [vmem:[#allocation10 + $0x488] sm:$0xff] }
 0x2c8   : > { %2863 = vmatpush.msrb.mxu0 %v1305_v6  ;;  %v2528_v16 = vpop.f32.mrf.mxu3  ;;  %2906 = vmatpush.msrb.mxu2 %v1210_v9  ;;  %v1884_v4 = vld [vmem:[#allocation10 + $0x1588] sm:$0xff]  ;;  %v1403_v5 = vld [vmem:[#allocation10 + $0x680] sm:$0xff] }
 0x2c9   : > { %2882 = vmatpush.msrb.mxu1 %v1849_v8  ;;  %v2488_v19 = vpop.f32.mrf.mxu1  ;;  %v2529_v20 = vadd.f32 %v2528_v16, %v2509_v11  ;;  %2925 = vmatpush.msrb.mxu3 %v1754_v12  ;;  %v1947_v6 = vld [vmem:[#allocation10 + $0x1780] sm:$0xff]  ;;  %v1308_v7 = vld [vmem:[#allocation10 + $0x388] sm:$0xff]  ;;  %v2234_v12 = vperm.slane %v4816_v28, 7 }
 0x2ca   : > { %2827 = vmatmul.f32.vlgmr.msra.gmra.mxu2 %v4796_v34  ;;  %v2489_v22 = vadd.f32 %v2488_v19, %v2469_v13  ;;  %2864 = vmatpush.msrb.mxu0 %v1273_v15  ;;  %v1852_v8 = vld [vmem:[#allocation10 + $0x1488] sm:$0xff]  ;;  %v1371_v9 = vld [vmem:[#allocation10 + $0x580] sm:$0xff]  ;;  %v2233_v15 = vperm.slane %v4816_v28, 6  ;;  %v1694_v28 = vld [vmem:[#allocation10 + $0xf98] sm:$0xff] }
 0x2cb   : > { %2971 = vmatpush.msra.mxu2 %v1692_v14  ;;  %3576 = vst [vmem:[%s5010_s7 + $0x28] sm:$0xff] %v2529_v20  ;;  %2883 = vmatpush.msrb.mxu1 %v1817_v17  ;;  %v1915_v10 = vld [vmem:[#allocation10 + $0x1680] sm:$0xff]  ;;  %v1276_v11 = vld [vmem:[#allocation10 + $0x288] sm:$0xff] }
 0x2cc   : > { %2926 = vmatpush.msrb.mxu3 %v1722_v18  ;;  %3575 = vst [vmem:[%s5010_s7 + $0x20] sm:$0xff] %v2489_v22  ;;  %2865 = vmatpush.msrb.mxu0 %v1241_v24  ;;  %v1820_v13 = vld [vmem:[#allocation10 + $0x1388] sm:$0xff]  ;;  %v1339_v14 = vld [vmem:[#allocation10 + $0x480] sm:$0xff] }
 0x2cd   : > { %2847 = vmatmul.f32.vlgmr.msra.gmra.mxu3 %v4798_v40  ;;  %2972 = vmatpush.msra.mxu2 %v1660_v21  ;;  %v1883_v16 = vld [vmem:[#allocation10 + $0x1580] sm:$0xff]  ;;  %v1244_v17 = vld [vmem:[#allocation10 + $0x188] sm:$0xff] }
 0x2ce   : > { %2991 = vmatpush.msra.mxu3 %v2204_v23  ;;  %2884 = vmatpush.msrb.mxu1 %v1785_v25  ;;  %v1788_v18 = vld [vmem:[#allocation10 + $0x1288] sm:$0xff]  ;;  %v1307_v19 = vld [vmem:[#allocation10 + $0x380] sm:$0xff] }
 0x2cf   : > { %2973 = vmatpush.msra.mxu2 %v1628_v26  ;;  %2866 = vmatpush.msrb.mxu0 %v1209_v29  ;;  %v1851_v21 = vld [vmem:[#allocation10 + $0x1480] sm:$0xff]  ;;  %v1212_v22 = vld [vmem:[#allocation10 + $0x88] sm:$0xff] }
 0x2d0   : > { %2992 = vmatpush.msra.mxu3 %v2172_v27  ;;  %2885 = vmatpush.msrb.mxu1 %v1753_v30  ;;  %v1756_v25 = vld [vmem:[#allocation10 + $0x1188] sm:$0xff]  ;;  %v1275_v27 = vld [vmem:[#allocation10 + $0x280] sm:$0xff] }
 0x2d1   : > { %2787 = vmatmul.f32.vlgmr.msra.gmra.mxu0 %v4796_v34  ;;  %2974 = vmatpush.msra.mxu2 %v1596_v32  ;;  %v1819_v30 = vld [vmem:[#allocation10 + $0x1380] sm:$0xff] }
 0x2d2   : > { %2931 = vmatpush.msra.mxu0 %v1691_v31  ;;  %2993 = vmatpush.msra.mxu3 %v2140_v33  ;;  %v1724_v31 = vld [vmem:[#allocation10 + $0x1088] sm:$0xff] }
 0x2d3   : > { %2886 = vmatpush.msrb.mxu1 %v1721_v35  ;;  %2975 = vmatpush.msra.mxu2 %v1564_v38  ;;  %v1662_v35 = vld [vmem:[#allocation10 + $0xe98] sm:$0xff]  ;;  %v1243_v38 = vld [vmem:[#allocation10 + $0x180] sm:$0xff] }
 0x2d4   : > { %2807 = vmatmul.f32.vlgmr.msra.gmra.mxu1 %v4798_v40  ;;  %2932 = vmatpush.msra.mxu0 %v1659_v36 }
 0x2d5   : > { %2951 = vmatpush.msra.mxu1 %v2203_v37  ;;  %2994 = vmatpush.msra.mxu3 %v2108_v39  ;;  %v2206_v37 = vld [vmem:[#allocation10 + $0x1f98] sm:$0xff]  ;;  %v1787_v39 = vld [vmem:[#allocation10 + $0x1280] sm:$0xff] }
 0x2d6   : > { %2933 = vmatpush.msra.mxu0 %v1627_v41  ;;  %2976 = vmatpush.msra.mxu2 %v1532_v43  ;;  %v1630_v41 = vld [vmem:[#allocation10 + $0xd98] sm:$0xff]  ;;  %v1211_v43 = vld [vmem:[#allocation10 + $0x80] sm:$0xff] }
 0x2d7   : > { %2952 = vmatpush.msra.mxu1 %v2171_v42  ;;  %2995 = vmatpush.msra.mxu3 %v2076_v44  ;;  %v2174_v42 = vld [vmem:[#allocation10 + $0x1e98] sm:$0xff]  ;;  %v1755_v44 = vld [vmem:[#allocation10 + $0x1180] sm:$0xff] }
 0x2d8   : > { %2934 = vmatpush.msra.mxu0 %v1595_v45  ;;  %2977 = vmatpush.msra.mxu2 %v1500_v47  ;;  %v1693_v45 = vld [vmem:[#allocation10 + $0xf90] sm:$0xff]  ;;  %v2142_v47 = vld [vmem:[#allocation10 + $0x1d98] sm:$0xff] }
 0x2d9   : > { %2953 = vmatpush.msra.mxu1 %v2139_v46  ;;  %2996 = vmatpush.msra.mxu3 %v2044_v48  ;;  %v1598_v46 = vld [vmem:[#allocation10 + $0xc98] sm:$0xff]  ;;  %v1723_v48 = vld [vmem:[#allocation10 + $0x1080] sm:$0xff] }
 0x2da   : > { %2935 = vmatpush.msra.mxu0 %v1563_v49  ;;  %2978 = vmatpush.msra.mxu2 %v1468_v51  ;;  %v1661_v49 = vld [vmem:[#allocation10 + $0xe90] sm:$0xff]  ;;  %v1566_v51 = vld [vmem:[#allocation10 + $0xb98] sm:$0xff] }
 0x2db   : > { %2954 = vmatpush.msra.mxu1 %v2107_v50  ;;  %2997 = vmatpush.msra.mxu3 %v2012_v52  ;;  %v2205_v50 = vld [vmem:[#allocation10 + $0x1f90] sm:$0xff]  ;;  %v2110_v52 = vld [vmem:[#allocation10 + $0x1c98] sm:$0xff] }
 0x2dc   : > { %2936 = vmatpush.msra.mxu0 %v1531_v53  ;;  %2979 = vmatpush.msra.mxu2 %v1436_v55  ;;  %v1629_v53 = vld [vmem:[#allocation10 + $0xd90] sm:$0xff]  ;;  %v1534_v55 = vld [vmem:[#allocation10 + $0xa98] sm:$0xff] }
 0x2dd   : > { %2955 = vmatpush.msra.mxu1 %v2075_v54  ;;  %2998 = vmatpush.msra.mxu3 %v1980_v56  ;;  %v2173_v54 = vld [vmem:[#allocation10 + $0x1e90] sm:$0xff]  ;;  %v2078_v56 = vld [vmem:[#allocation10 + $0x1b98] sm:$0xff] }
 0x2de   : > { %2937 = vmatpush.msra.mxu0 %v1499_v57  ;;  %2980 = vmatpush.msra.mxu2 %v1404_v59  ;;  %v1597_v57 = vld [vmem:[#allocation10 + $0xc90] sm:$0xff]  ;;  %v1502_v59 = vld [vmem:[#allocation10 + $0x998] sm:$0xff] }
 0x2df   : > { %2956 = vmatpush.msra.mxu1 %v2043_v58  ;;  %2999 = vmatpush.msra.mxu3 %v1948_v60  ;;  %v2141_v58 = vld [vmem:[#allocation10 + $0x1d90] sm:$0xff]  ;;  %v2046_v60 = vld [vmem:[#allocation10 + $0x1a98] sm:$0xff] }
 0x2e0   : > { %2938 = vmatpush.msra.mxu0 %v1467_v61  ;;  %2981 = vmatpush.msra.mxu2 %v1372_v63  ;;  %v1565_v61 = vld [vmem:[#allocation10 + $0xb90] sm:$0xff]  ;;  %v1470_v63 = vld [vmem:[#allocation10 + $0x898] sm:$0xff] }
 0x2e1   : > { %2957 = vmatpush.msra.mxu1 %v2011_v62  ;;  %3000 = vmatpush.msra.mxu3 %v1916_v0  ;;  %v2109_v62 = vld [vmem:[#allocation10 + $0x1c90] sm:$0xff]  ;;  %v2014_v0 = vld [vmem:[#allocation10 + $0x1998] sm:$0xff] }
 0x2e2   : > { %2939 = vmatpush.msra.mxu0 %v1435_v1  ;;  %2982 = vmatpush.msra.mxu2 %v1340_v3  ;;  %v1533_v1 = vld [vmem:[#allocation10 + $0xa90] sm:$0xff]  ;;  %v1438_v3 = vld [vmem:[#allocation10 + $0x798] sm:$0xff] }
 0x2e3   : > { %2958 = vmatpush.msra.mxu1 %v1979_v2  ;;  %3001 = vmatpush.msra.mxu3 %v1884_v4  ;;  %v2077_v2 = vld [vmem:[#allocation10 + $0x1b90] sm:$0xff]  ;;  %v1982_v4 = vld [vmem:[#allocation10 + $0x1898] sm:$0xff] }
 0x2e4   : > { %2940 = vmatpush.msra.mxu0 %v1403_v5  ;;  %2983 = vmatpush.msra.mxu2 %v1308_v7  ;;  %v1501_v5 = vld [vmem:[#allocation10 + $0x990] sm:$0xff]  ;;  %v1406_v7 = vld [vmem:[#allocation10 + $0x698] sm:$0xff] }
 0x2e5   : > { %2959 = vmatpush.msra.mxu1 %v1947_v6  ;;  %3002 = vmatpush.msra.mxu3 %v1852_v8  ;;  %v2045_v6 = vld [vmem:[#allocation10 + $0x1a90] sm:$0xff]  ;;  %v1950_v8 = vld [vmem:[#allocation10 + $0x1798] sm:$0xff] }
 0x2e6   : > { %2941 = vmatpush.msra.mxu0 %v1371_v9  ;;  %2984 = vmatpush.msra.mxu2 %v1276_v11  ;;  %v1469_v9 = vld [vmem:[#allocation10 + $0x890] sm:$0xff]  ;;  %v1374_v11 = vld [vmem:[#allocation10 + $0x598] sm:$0xff] }
 0x2e7   : > { %2960 = vmatpush.msra.mxu1 %v1915_v10  ;;  %v2588_v20 = vpop.f32.mrf.mxu2  ;;  %3003 = vmatpush.msra.mxu3 %v1820_v13  ;;  %v2013_v10 = vld [vmem:[#allocation10 + $0x1990] sm:$0xff] }
 0x2e8   : > { %2942 = vmatpush.msra.mxu0 %v1339_v14  ;;  %v2548_v23 = vpop.f32.mrf.mxu0  ;;  %v2589_v24 = vadd.f32 %v2588_v20, %v2234_v12  ;;  %2985 = vmatpush.msra.mxu2 %v1244_v17  ;;  %v1918_v12 = vld [vmem:[#allocation10 + $0x1698] sm:$0xff]  ;;  %v1437_v13 = vld [vmem:[#allocation10 + $0x790] sm:$0xff] }
 0x2e9   : > { %2961 = vmatpush.msra.mxu1 %v1883_v16  ;;  %v2549_v26 = vadd.f32 %v2548_v23, %v2233_v15  ;;  %3004 = vmatpush.msra.mxu3 %v1788_v18  ;;  %v1981_v14 = vld [vmem:[#allocation10 + $0x1890] sm:$0xff]  ;;  %v1342_v15 = vld [vmem:[#allocation10 + $0x498] sm:$0xff]  ;;  %v4866_v18 = vld [vmem:[#allocation11 + $0x8] sm:$0xff] }
 0x2ea   : > { %2943 = vmatpush.msra.mxu0 %v1307_v19  ;;  %v2608_v29 = vpop.f32.mrf.mxu3  ;;  %2986 = vmatpush.msra.mxu2 %v1212_v22  ;;  %v1886_v16 = vld [vmem:[#allocation10 + $0x1598] sm:$0xff]  ;;  %v1405_v17 = vld [vmem:[#allocation10 + $0x690] sm:$0xff] }
 0x2eb   : > { %2962 = vmatpush.msra.mxu1 %v1851_v21  ;;  %v2568_v32 = vpop.f32.mrf.mxu1  ;;  %v2609_v33 = vadd.f32 %v2608_v29, %v2589_v24  ;;  %3005 = vmatpush.msra.mxu3 %v1756_v25  ;;  %v1949_v19 = vld [vmem:[#allocation10 + $0x1790] sm:$0xff]  ;;  %v1310_v20 = vld [vmem:[#allocation10 + $0x398] sm:$0xff]  ;;  %v2236_v25 = vperm.slane %v4866_v18, 1 }
 0x2ec   : > { %2907 = vmatmul.f32.vlgmr.msrb.gmra.mxu2 %v4796_v34  ;;  %v2569_v36 = vadd.f32 %v2568_v32, %v2549_v26  ;;  %2944 = vmatpush.msra.mxu0 %v1275_v27  ;;  %v1854_v21 = vld [vmem:[#allocation10 + $0x1498] sm:$0xff]  ;;  %v1373_v22 = vld [vmem:[#allocation10 + $0x590] sm:$0xff]  ;;  %v2235_v27 = vperm.slane %v4866_v18, 0 }
 0x2ed   : > { %3051 = vmatpush.msrb.mxu2 %v1694_v28  ;;  %3578 = vst [vmem:[%s5010_s7 + $0x38] sm:$0xff] %v2609_v33  ;;  %2963 = vmatpush.msra.mxu1 %v1819_v30  ;;  %v1917_v23 = vld [vmem:[#allocation10 + $0x1690] sm:$0xff]  ;;  %v1278_v24 = vld [vmem:[#allocation10 + $0x298] sm:$0xff] }
 0x2ee   : > { %3006 = vmatpush.msra.mxu3 %v1724_v31  ;;  %3577 = vst [vmem:[%s5010_s7 + $0x30] sm:$0xff] %v2569_v36  ;;  %2945 = vmatpush.msra.mxu0 %v1243_v38  ;;  %v1822_v26 = vld [vmem:[#allocation10 + $0x1398] sm:$0xff]  ;;  %v1341_v28 = vld [vmem:[#allocation10 + $0x490] sm:$0xff] }
 0x2ef   : > { %2927 = vmatmul.f32.vlgmr.msrb.gmra.mxu3 %v4798_v40  ;;  %3052 = vmatpush.msrb.mxu2 %v1662_v35  ;;  %v1885_v29 = vld [vmem:[#allocation10 + $0x1590] sm:$0xff]  ;;  %v1246_v30 = vld [vmem:[#allocation10 + $0x198] sm:$0xff] }
 0x2f0   : > { %3071 = vmatpush.msrb.mxu3 %v2206_v37  ;;  %2964 = vmatpush.msra.mxu1 %v1787_v39  ;;  %v1790_v31 = vld [vmem:[#allocation10 + $0x1298] sm:$0xff]  ;;  %v1309_v32 = vld [vmem:[#allocation10 + $0x390] sm:$0xff] }
 0x2f1   : > { %3053 = vmatpush.msrb.mxu2 %v1630_v41  ;;  %2946 = vmatpush.msra.mxu0 %v1211_v43  ;;  %v1853_v35 = vld [vmem:[#allocation10 + $0x1490] sm:$0xff]  ;;  %v1214_v36 = vld [vmem:[#allocation10 + $0x98] sm:$0xff] }
 0x2f2   : > { %3072 = vmatpush.msrb.mxu3 %v2174_v42  ;;  %2965 = vmatpush.msra.mxu1 %v1755_v44  ;;  %v1758_v39 = vld [vmem:[#allocation10 + $0x1198] sm:$0xff]  ;;  %v1696_v42 = vld [vmem:[#allocation10 + $0xfa8] sm:$0xff]  ;;  %v1277_v43 = vld [vmem:[#allocation10 + $0x290] sm:$0xff] }
 0x2f3   : > { %2867 = vmatmul.f32.vlgmr.msrb.gmra.mxu0 %v4796_v34  ;;  %3054 = vmatpush.msrb.mxu2 %v1598_v46  ;;  %v1726_v46 = vld [vmem:[#allocation10 + $0x1098] sm:$0xff] }
 0x2f4   : > { %3011 = vmatpush.msrb.mxu0 %v1693_v45  ;;  %3073 = vmatpush.msrb.mxu3 %v2142_v47  ;;  %v1821_v45 = vld [vmem:[#allocation10 + $0x1390] sm:$0xff] }
 0x2f5   : > { %2966 = vmatpush.msra.mxu1 %v1723_v48  ;;  %3055 = vmatpush.msrb.mxu2 %v1566_v51  ;;  %v2208_v51 = vld [vmem:[#allocation10 + $0x1fa8] sm:$0xff] }
 0x2f6   : > { %2887 = vmatmul.f32.vlgmr.msrb.gmra.mxu1 %v4798_v40  ;;  %3012 = vmatpush.msrb.mxu0 %v1661_v49  ;;  %v1664_v49 = vld [vmem:[#allocation10 + $0xea8] sm:$0xff] }
 0x2f7   : > { %3031 = vmatpush.msrb.mxu1 %v2205_v50  ;;  %3074 = vmatpush.msrb.mxu3 %v2110_v52  ;;  %v1245_v52 = vld [vmem:[#allocation10 + $0x190] sm:$0xff] }
 0x2f8   : > { %3013 = vmatpush.msrb.mxu0 %v1629_v53  ;;  %3056 = vmatpush.msrb.mxu2 %v1534_v55  ;;  %v1789_v53 = vld [vmem:[#allocation10 + $0x1290] sm:$0xff]  ;;  %v2176_v55 = vld [vmem:[#allocation10 + $0x1ea8] sm:$0xff] }
 0x2f9   : > { %3032 = vmatpush.msrb.mxu1 %v2173_v54  ;;  %3075 = vmatpush.msrb.mxu3 %v2078_v56  ;;  %v1632_v54 = vld [vmem:[#allocation10 + $0xda8] sm:$0xff]  ;;  %v1213_v56 = vld [vmem:[#allocation10 + $0x90] sm:$0xff] }
 0x2fa   : > { %3014 = vmatpush.msrb.mxu0 %v1597_v57  ;;  %3057 = vmatpush.msrb.mxu2 %v1502_v59  ;;  %v1757_v57 = vld [vmem:[#allocation10 + $0x1190] sm:$0xff]  ;;  %v1600_v59 = vld [vmem:[#allocation10 + $0xca8] sm:$0xff] }
 0x2fb   : > { %3033 = vmatpush.msrb.mxu1 %v2141_v58  ;;  %3076 = vmatpush.msrb.mxu3 %v2046_v60  ;;  %v1695_v58 = vld [vmem:[#allocation10 + $0xfa0] sm:$0xff]  ;;  %v2144_v60 = vld [vmem:[#allocation10 + $0x1da8] sm:$0xff] }
 0x2fc   : > { %3015 = vmatpush.msrb.mxu0 %v1565_v61  ;;  %3058 = vmatpush.msrb.mxu2 %v1470_v63  ;;  %v1725_v61 = vld [vmem:[#allocation10 + $0x1090] sm:$0xff]  ;;  %v2207_v63 = vld [vmem:[#allocation10 + $0x1fa0] sm:$0xff] }
 0x2fd   : > { %3034 = vmatpush.msrb.mxu1 %v2109_v62  ;;  %3077 = vmatpush.msrb.mxu3 %v2014_v0  ;;  %v1663_v62 = vld [vmem:[#allocation10 + $0xea0] sm:$0xff]  ;;  %v1568_v0 = vld [vmem:[#allocation10 + $0xba8] sm:$0xff] }
 0x2fe   : > { %3016 = vmatpush.msrb.mxu0 %v1533_v1  ;;  %3059 = vmatpush.msrb.mxu2 %v1438_v3  ;;  %v2112_v1 = vld [vmem:[#allocation10 + $0x1ca8] sm:$0xff]  ;;  %v2175_v3 = vld [vmem:[#allocation10 + $0x1ea0] sm:$0xff] }
 0x2ff   : > { %3035 = vmatpush.msrb.mxu1 %v2077_v2  ;;  %3078 = vmatpush.msrb.mxu3 %v1982_v4  ;;  %v1631_v2 = vld [vmem:[#allocation10 + $0xda0] sm:$0xff]  ;;  %v1536_v4 = vld [vmem:[#allocation10 + $0xaa8] sm:$0xff] }
 0x300   : > { %3017 = vmatpush.msrb.mxu0 %v1501_v5  ;;  %3060 = vmatpush.msrb.mxu2 %v1406_v7  ;;  %v2080_v5 = vld [vmem:[#allocation10 + $0x1ba8] sm:$0xff]  ;;  %v2143_v7 = vld [vmem:[#allocation10 + $0x1da0] sm:$0xff] }
 0x301   : > { %3036 = vmatpush.msrb.mxu1 %v2045_v6  ;;  %3079 = vmatpush.msrb.mxu3 %v1950_v8  ;;  %v1599_v6 = vld [vmem:[#allocation10 + $0xca0] sm:$0xff]  ;;  %v1504_v8 = vld [vmem:[#allocation10 + $0x9a8] sm:$0xff] }
 0x302   : > { %3018 = vmatpush.msrb.mxu0 %v1469_v9  ;;  %3061 = vmatpush.msrb.mxu2 %v1374_v11  ;;  %v2048_v9 = vld [vmem:[#allocation10 + $0x1aa8] sm:$0xff]  ;;  %v2111_v11 = vld [vmem:[#allocation10 + $0x1ca0] sm:$0xff] }
 0x303   : > { %3037 = vmatpush.msrb.mxu1 %v2013_v10  ;;  %3080 = vmatpush.msrb.mxu3 %v1918_v12  ;;  %v1567_v10 = vld [vmem:[#allocation10 + $0xba0] sm:$0xff]  ;;  %v1472_v12 = vld [vmem:[#allocation10 + $0x8a8] sm:$0xff] }
 0x304   : > { %3019 = vmatpush.msrb.mxu0 %v1437_v13  ;;  %3062 = vmatpush.msrb.mxu2 %v1342_v15  ;;  %v2016_v13 = vld [vmem:[#allocation10 + $0x19a8] sm:$0xff]  ;;  %v2079_v15 = vld [vmem:[#allocation10 + $0x1ba0] sm:$0xff] }
 0x305   : > { %3038 = vmatpush.msrb.mxu1 %v1981_v14  ;;  %3081 = vmatpush.msrb.mxu3 %v1886_v16  ;;  %v1535_v14 = vld [vmem:[#allocation10 + $0xaa0] sm:$0xff]  ;;  %v1440_v16 = vld [vmem:[#allocation10 + $0x7a8] sm:$0xff] }
 0x306   : > { %3020 = vmatpush.msrb.mxu0 %v1405_v17  ;;  %3063 = vmatpush.msrb.mxu2 %v1310_v20  ;;  %v1984_v17 = vld [vmem:[#allocation10 + $0x18a8] sm:$0xff]  ;;  %v2047_v20 = vld [vmem:[#allocation10 + $0x1aa0] sm:$0xff] }
 0x307   : > { %3039 = vmatpush.msrb.mxu1 %v1949_v19  ;;  %3082 = vmatpush.msrb.mxu3 %v1854_v21  ;;  %v1503_v19 = vld [vmem:[#allocation10 + $0x9a0] sm:$0xff]  ;;  %v1408_v21 = vld [vmem:[#allocation10 + $0x6a8] sm:$0xff] }
 0x308   : > { %3021 = vmatpush.msrb.mxu0 %v1373_v22  ;;  %3064 = vmatpush.msrb.mxu2 %v1278_v24  ;;  %v1952_v22 = vld [vmem:[#allocation10 + $0x17a8] sm:$0xff]  ;;  %v2015_v24 = vld [vmem:[#allocation10 + $0x19a0] sm:$0xff] }
 0x309   : > { %3040 = vmatpush.msrb.mxu1 %v1917_v23  ;;  %v2668_v33 = vpop.f32.mrf.mxu2  ;;  %3083 = vmatpush.msrb.mxu3 %v1822_v26  ;;  %v1471_v23 = vld [vmem:[#allocation10 + $0x8a0] sm:$0xff]  ;;  %v1920_v26 = vld [vmem:[#allocation10 + $0x16a8] sm:$0xff] }
 0x30a   : > { %3022 = vmatpush.msrb.mxu0 %v1341_v28  ;;  %v2628_v37 = vpop.f32.mrf.mxu0  ;;  %v2669_v38 = vadd.f32 %v2668_v33, %v2236_v25  ;;  %3065 = vmatpush.msrb.mxu2 %v1246_v30  ;;  %v1376_v25 = vld [vmem:[#allocation10 + $0x5a8] sm:$0xff]  ;;  %v1439_v28 = vld [vmem:[#allocation10 + $0x7a0] sm:$0xff] }
 0x30b   : > { %3041 = vmatpush.msrb.mxu1 %v1885_v29  ;;  %v2629_v41 = vadd.f32 %v2628_v37, %v2235_v27  ;;  %3084 = vmatpush.msrb.mxu3 %v1790_v31  ;;  %v1983_v27 = vld [vmem:[#allocation10 + $0x18a0] sm:$0xff]  ;;  %v1344_v29 = vld [vmem:[#allocation10 + $0x4a8] sm:$0xff] }
 0x30c   : > { %3023 = vmatpush.msrb.mxu0 %v1309_v32  ;;  %v2688_v44 = vpop.f32.mrf.mxu3  ;;  %3066 = vmatpush.msrb.mxu2 %v1214_v36  ;;  %v1888_v30 = vld [vmem:[#allocation10 + $0x15a8] sm:$0xff]  ;;  %v1407_v31 = vld [vmem:[#allocation10 + $0x6a0] sm:$0xff] }
 0x30d   : > { %3042 = vmatpush.msrb.mxu1 %v1853_v35  ;;  %v2648_v47 = vpop.f32.mrf.mxu1  ;;  %v2689_v48 = vadd.f32 %v2688_v44, %v2669_v38  ;;  %3085 = vmatpush.msrb.mxu3 %v1758_v39  ;;  %v1951_v32 = vld [vmem:[#allocation10 + $0x17a0] sm:$0xff]  ;;  %v1312_v33 = vld [vmem:[#allocation10 + $0x3a8] sm:$0xff]  ;;  %v2238_v39 = vperm.slane %v4866_v18, 3 }
 0x30e   : > { %2987 = vmatmul.f32.vlgmr.msra.gmra.mxu2 %v4796_v34  ;;  %v2649_v50 = vadd.f32 %v2648_v47, %v2629_v41  ;;  %3024 = vmatpush.msrb.mxu0 %v1277_v43  ;;  %v1856_v35 = vld [vmem:[#allocation10 + $0x14a8] sm:$0xff]  ;;  %v1375_v36 = vld [vmem:[#allocation10 + $0x5a0] sm:$0xff]  ;;  %v2237_v43 = vperm.slane %v4866_v18, 2 }
 0x30f   : > { %3131 = vmatpush.msra.mxu2 %v1696_v42  ;;  %3580 = vst [vmem:[%s5010_s7 + $0x48] sm:$0xff] %v2689_v48  ;;  %3043 = vmatpush.msrb.mxu1 %v1821_v45  ;;  %v1919_v37 = vld [vmem:[#allocation10 + $0x16a0] sm:$0xff]  ;;  %v1280_v38 = vld [vmem:[#allocation10 + $0x2a8] sm:$0xff] }
 0x310   : > { %3086 = vmatpush.msrb.mxu3 %v1726_v46  ;;  %3579 = vst [vmem:[%s5010_s7 + $0x40] sm:$0xff] %v2649_v50  ;;  %3025 = vmatpush.msrb.mxu0 %v1245_v52  ;;  %v1824_v41 = vld [vmem:[#allocation10 + $0x13a8] sm:$0xff]  ;;  %v1343_v42 = vld [vmem:[#allocation10 + $0x4a0] sm:$0xff] }
 0x311   : > { %3007 = vmatmul.f32.vlgmr.msra.gmra.mxu3 %v4798_v40  ;;  %3132 = vmatpush.msra.mxu2 %v1664_v49  ;;  %v1887_v44 = vld [vmem:[#allocation10 + $0x15a0] sm:$0xff]  ;;  %v1248_v45 = vld [vmem:[#allocation10 + $0x1a8] sm:$0xff] }
 0x312   : > { %3151 = vmatpush.msra.mxu3 %v2208_v51  ;;  %3044 = vmatpush.msrb.mxu1 %v1789_v53  ;;  %v1792_v46 = vld [vmem:[#allocation10 + $0x12a8] sm:$0xff]  ;;  %v1311_v47 = vld [vmem:[#allocation10 + $0x3a0] sm:$0xff] }
 0x313   : > { %3133 = vmatpush.msra.mxu2 %v1632_v54  ;;  %3026 = vmatpush.msrb.mxu0 %v1213_v56  ;;  %v1855_v49 = vld [vmem:[#allocation10 + $0x14a0] sm:$0xff]  ;;  %v1216_v50 = vld [vmem:[#allocation10 + $0xa8] sm:$0xff] }
 0x314   : > { %3152 = vmatpush.msra.mxu3 %v2176_v55  ;;  %3045 = vmatpush.msrb.mxu1 %v1757_v57  ;;  %v1760_v53 = vld [vmem:[#allocation10 + $0x11a8] sm:$0xff]  ;;  %v1698_v55 = vld [vmem:[#allocation10 + $0xfb8] sm:$0xff]  ;;  %v1279_v56 = vld [vmem:[#allocation10 + $0x2a0] sm:$0xff] }
 0x315   : > { %2947 = vmatmul.f32.vlgmr.msra.gmra.mxu0 %v4796_v34  ;;  %3134 = vmatpush.msra.mxu2 %v1600_v59  ;;  %v1728_v59 = vld [vmem:[#allocation10 + $0x10a8] sm:$0xff] }
 0x316   : > { %3091 = vmatpush.msra.mxu0 %v1695_v58  ;;  %3153 = vmatpush.msra.mxu3 %v2144_v60  ;;  %v1823_v58 = vld [vmem:[#allocation10 + $0x13a0] sm:$0xff] }
 0x317   : > { %3046 = vmatpush.msrb.mxu1 %v1725_v61  ;;  %3135 = vmatpush.msra.mxu2 %v1568_v0  ;;  %v2210_v0 = vld [vmem:[#allocation10 + $0x1fb8] sm:$0xff] }
 0x318   : > { %2967 = vmatmul.f32.vlgmr.msra.gmra.mxu1 %v4798_v40  ;;  %3092 = vmatpush.msra.mxu0 %v1663_v62  ;;  %v1666_v62 = vld [vmem:[#allocation10 + $0xeb8] sm:$0xff] }
 0x319   : > { %3111 = vmatpush.msra.mxu1 %v2207_v63  ;;  %3154 = vmatpush.msra.mxu3 %v2112_v1  ;;  %v1247_v1 = vld [vmem:[#allocation10 + $0x1a0] sm:$0xff] }
 0x31a   : > { %3093 = vmatpush.msra.mxu0 %v1631_v2  ;;  %3136 = vmatpush.msra.mxu2 %v1536_v4  ;;  %v1791_v2 = vld [vmem:[#allocation10 + $0x12a0] sm:$0xff]  ;;  %v2178_v4 = vld [vmem:[#allocation10 + $0x1eb8] sm:$0xff] }
 0x31b   : > { %3112 = vmatpush.msra.mxu1 %v2175_v3  ;;  %3155 = vmatpush.msra.mxu3 %v2080_v5  ;;  %v1634_v3 = vld [vmem:[#allocation10 + $0xdb8] sm:$0xff]  ;;  %v1215_v5 = vld [vmem:[#allocation10 + $0xa0] sm:$0xff] }
 0x31c   : > { %3094 = vmatpush.msra.mxu0 %v1599_v6  ;;  %3137 = vmatpush.msra.mxu2 %v1504_v8  ;;  %v1759_v6 = vld [vmem:[#allocation10 + $0x11a0] sm:$0xff]  ;;  %v1602_v8 = vld [vmem:[#allocation10 + $0xcb8] sm:$0xff] }
 0x31d   : > { %3113 = vmatpush.msra.mxu1 %v2143_v7  ;;  %3156 = vmatpush.msra.mxu3 %v2048_v9  ;;  %v1697_v7 = vld [vmem:[#allocation10 + $0xfb0] sm:$0xff]  ;;  %v2146_v9 = vld [vmem:[#allocation10 + $0x1db8] sm:$0xff] }
 0x31e   : > { %3095 = vmatpush.msra.mxu0 %v1567_v10  ;;  %3138 = vmatpush.msra.mxu2 %v1472_v12  ;;  %v1727_v10 = vld [vmem:[#allocation10 + $0x10a0] sm:$0xff]  ;;  %v2209_v12 = vld [vmem:[#allocation10 + $0x1fb0] sm:$0xff] }
 0x31f   : > { %3114 = vmatpush.msra.mxu1 %v2111_v11  ;;  %3157 = vmatpush.msra.mxu3 %v2016_v13  ;;  %v1665_v11 = vld [vmem:[#allocation10 + $0xeb0] sm:$0xff]  ;;  %v1570_v13 = vld [vmem:[#allocation10 + $0xbb8] sm:$0xff] }
 0x320   : > { %3096 = vmatpush.msra.mxu0 %v1535_v14  ;;  %3139 = vmatpush.msra.mxu2 %v1440_v16  ;;  %v2114_v14 = vld [vmem:[#allocation10 + $0x1cb8] sm:$0xff]  ;;  %v2177_v16 = vld [vmem:[#allocation10 + $0x1eb0] sm:$0xff] }
 0x321   : > { %3115 = vmatpush.msra.mxu1 %v2079_v15  ;;  %3158 = vmatpush.msra.mxu3 %v1984_v17  ;;  %v1633_v15 = vld [vmem:[#allocation10 + $0xdb0] sm:$0xff]  ;;  %v1538_v17 = vld [vmem:[#allocation10 + $0xab8] sm:$0xff] }
 0x322   : > { %3097 = vmatpush.msra.mxu0 %v1503_v19  ;;  %3140 = vmatpush.msra.mxu2 %v1408_v21  ;;  %v2082_v19 = vld [vmem:[#allocation10 + $0x1bb8] sm:$0xff]  ;;  %v2145_v21 = vld [vmem:[#allocation10 + $0x1db0] sm:$0xff] }
 0x323   : > { %3116 = vmatpush.msra.mxu1 %v2047_v20  ;;  %3159 = vmatpush.msra.mxu3 %v1952_v22  ;;  %v1601_v20 = vld [vmem:[#allocation10 + $0xcb0] sm:$0xff]  ;;  %v1506_v22 = vld [vmem:[#allocation10 + $0x9b8] sm:$0xff] }
 0x324   : > { %3098 = vmatpush.msra.mxu0 %v1471_v23  ;;  %3141 = vmatpush.msra.mxu2 %v1376_v25  ;;  %v2050_v23 = vld [vmem:[#allocation10 + $0x1ab8] sm:$0xff]  ;;  %v2113_v25 = vld [vmem:[#allocation10 + $0x1cb0] sm:$0xff] }
 0x325   : > { %3117 = vmatpush.msra.mxu1 %v2015_v24  ;;  %3160 = vmatpush.msra.mxu3 %v1920_v26  ;;  %v1569_v24 = vld [vmem:[#allocation10 + $0xbb0] sm:$0xff]  ;;  %v1474_v26 = vld [vmem:[#allocation10 + $0x8b8] sm:$0xff] }
 0x326   : > { %3099 = vmatpush.msra.mxu0 %v1439_v28  ;;  %3142 = vmatpush.msra.mxu2 %v1344_v29  ;;  %v2018_v28 = vld [vmem:[#allocation10 + $0x19b8] sm:$0xff]  ;;  %v2081_v29 = vld [vmem:[#allocation10 + $0x1bb0] sm:$0xff] }
 0x327   : > { %3118 = vmatpush.msra.mxu1 %v1983_v27  ;;  %3161 = vmatpush.msra.mxu3 %v1888_v30  ;;  %v1537_v27 = vld [vmem:[#allocation10 + $0xab0] sm:$0xff]  ;;  %v1442_v30 = vld [vmem:[#allocation10 + $0x7b8] sm:$0xff] }
 0x328   : > { %3100 = vmatpush.msra.mxu0 %v1407_v31  ;;  %3143 = vmatpush.msra.mxu2 %v1312_v33  ;;  %v1986_v31 = vld [vmem:[#allocation10 + $0x18b8] sm:$0xff]  ;;  %v2049_v33 = vld [vmem:[#allocation10 + $0x1ab0] sm:$0xff] }
 0x329   : > { %3119 = vmatpush.msra.mxu1 %v1951_v32  ;;  %3162 = vmatpush.msra.mxu3 %v1856_v35  ;;  %v1505_v32 = vld [vmem:[#allocation10 + $0x9b0] sm:$0xff]  ;;  %v1410_v35 = vld [vmem:[#allocation10 + $0x6b8] sm:$0xff] }
 0x32a   : > { %3101 = vmatpush.msra.mxu0 %v1375_v36  ;;  %3144 = vmatpush.msra.mxu2 %v1280_v38  ;;  %v1954_v36 = vld [vmem:[#allocation10 + $0x17b8] sm:$0xff]  ;;  %v2017_v38 = vld [vmem:[#allocation10 + $0x19b0] sm:$0xff] }
 0x32b   : > { %3120 = vmatpush.msra.mxu1 %v1919_v37  ;;  %v2748_v48 = vpop.f32.mrf.mxu2  ;;  %3163 = vmatpush.msra.mxu3 %v1824_v41  ;;  %v1473_v37 = vld [vmem:[#allocation10 + $0x8b0] sm:$0xff]  ;;  %v1922_v41 = vld [vmem:[#allocation10 + $0x16b8] sm:$0xff] }
 0x32c   : > { %3102 = vmatpush.msra.mxu0 %v1343_v42  ;;  %v2708_v51 = vpop.f32.mrf.mxu0  ;;  %v2749_v52 = vadd.f32 %v2748_v48, %v2238_v39  ;;  %3145 = vmatpush.msra.mxu2 %v1248_v45  ;;  %v1378_v39 = vld [vmem:[#allocation10 + $0x5b8] sm:$0xff]  ;;  %v1441_v42 = vld [vmem:[#allocation10 + $0x7b0] sm:$0xff] }
 0x32d   : > { %3121 = vmatpush.msra.mxu1 %v1887_v44  ;;  %v2709_v54 = vadd.f32 %v2708_v51, %v2237_v43  ;;  %3164 = vmatpush.msra.mxu3 %v1792_v46  ;;  %v1985_v43 = vld [vmem:[#allocation10 + $0x18b0] sm:$0xff]  ;;  %v1346_v44 = vld [vmem:[#allocation10 + $0x4b8] sm:$0xff] }
 0x32e   : > { %3103 = vmatpush.msra.mxu0 %v1311_v47  ;;  %v2768_v57 = vpop.f32.mrf.mxu3  ;;  %3146 = vmatpush.msra.mxu2 %v1216_v50  ;;  %v1890_v45 = vld [vmem:[#allocation10 + $0x15b8] sm:$0xff]  ;;  %v1409_v46 = vld [vmem:[#allocation10 + $0x6b0] sm:$0xff] }
 0x32f   : > { %3122 = vmatpush.msra.mxu1 %v1855_v49  ;;  %v2728_v60 = vpop.f32.mrf.mxu1  ;;  %v2769_v61 = vadd.f32 %v2768_v57, %v2749_v52  ;;  %3165 = vmatpush.msra.mxu3 %v1760_v53  ;;  %v1953_v47 = vld [vmem:[#allocation10 + $0x17b0] sm:$0xff]  ;;  %v1314_v48 = vld [vmem:[#allocation10 + $0x3b8] sm:$0xff]  ;;  %v2240_v53 = vperm.slane %v4866_v18, 5 }
 0x330   : > { %3067 = vmatmul.f32.vlgmr.msrb.gmra.mxu2 %v4796_v34  ;;  %v2729_v63 = vadd.f32 %v2728_v60, %v2709_v54  ;;  %3104 = vmatpush.msra.mxu0 %v1279_v56  ;;  %v1858_v49 = vld [vmem:[#allocation10 + $0x14b8] sm:$0xff]  ;;  %v1377_v50 = vld [vmem:[#allocation10 + $0x5b0] sm:$0xff]  ;;  %v2239_v56 = vperm.slane %v4866_v18, 4 }
 0x331   : > { %3211 = vmatpush.msrb.mxu2 %v1698_v55  ;;  %3582 = vst [vmem:[%s5010_s7 + $0x58] sm:$0xff] %v2769_v61  ;;  %3123 = vmatpush.msra.mxu1 %v1823_v58  ;;  %v1921_v51 = vld [vmem:[#allocation10 + $0x16b0] sm:$0xff]  ;;  %v1282_v52 = vld [vmem:[#allocation10 + $0x2b8] sm:$0xff] }
 0x332   : > { %3166 = vmatpush.msra.mxu3 %v1728_v59  ;;  %3581 = vst [vmem:[%s5010_s7 + $0x50] sm:$0xff] %v2729_v63  ;;  %3105 = vmatpush.msra.mxu0 %v1247_v1  ;;  %v1826_v54 = vld [vmem:[#allocation10 + $0x13b8] sm:$0xff]  ;;  %v1345_v55 = vld [vmem:[#allocation10 + $0x4b0] sm:$0xff] }
 0x333   : > { %3087 = vmatmul.f32.vlgmr.msrb.gmra.mxu3 %v4798_v40  ;;  %3212 = vmatpush.msrb.mxu2 %v1666_v62  ;;  %v1889_v57 = vld [vmem:[#allocation10 + $0x15b0] sm:$0xff]  ;;  %v1250_v58 = vld [vmem:[#allocation10 + $0x1b8] sm:$0xff] }
 0x334   : > { %3231 = vmatpush.msrb.mxu3 %v2210_v0  ;;  %3124 = vmatpush.msra.mxu1 %v1791_v2  ;;  %v1794_v59 = vld [vmem:[#allocation10 + $0x12b8] sm:$0xff]  ;;  %v1313_v60 = vld [vmem:[#allocation10 + $0x3b0] sm:$0xff] }
 0x335   : > { %3213 = vmatpush.msrb.mxu2 %v1634_v3  ;;  %3106 = vmatpush.msra.mxu0 %v1215_v5  ;;  %v1857_v62 = vld [vmem:[#allocation10 + $0x14b0] sm:$0xff]  ;;  %v1218_v63 = vld [vmem:[#allocation10 + $0xb8] sm:$0xff] }
 0x336   : > { %3232 = vmatpush.msrb.mxu3 %v2178_v4  ;;  %3125 = vmatpush.msra.mxu1 %v1759_v6  ;;  %v1762_v2 = vld [vmem:[#allocation10 + $0x11b8] sm:$0xff]  ;;  %v1700_v4 = vld [vmem:[#allocation10 + $0xfc8] sm:$0xff]  ;;  %v1281_v5 = vld [vmem:[#allocation10 + $0x2b0] sm:$0xff] }
 0x337   : > { %3027 = vmatmul.f32.vlgmr.msrb.gmra.mxu0 %v4796_v34  ;;  %3214 = vmatpush.msrb.mxu2 %v1602_v8  ;;  %v1730_v8 = vld [vmem:[#allocation10 + $0x10b8] sm:$0xff] }
 0x338   : > { %3171 = vmatpush.msrb.mxu0 %v1697_v7  ;;  %3233 = vmatpush.msrb.mxu3 %v2146_v9  ;;  %v1825_v7 = vld [vmem:[#allocation10 + $0x13b0] sm:$0xff] }
 0x339   : > { %3126 = vmatpush.msra.mxu1 %v1727_v10  ;;  %3215 = vmatpush.msrb.mxu2 %v1570_v13  ;;  %v2212_v13 = vld [vmem:[#allocation10 + $0x1fc8] sm:$0xff] }
 0x33a   : > { %3047 = vmatmul.f32.vlgmr.msrb.gmra.mxu1 %v4798_v40  ;;  %3172 = vmatpush.msrb.mxu0 %v1665_v11  ;;  %v1668_v11 = vld [vmem:[#allocation10 + $0xec8] sm:$0xff] }
 0x33b   : > { %3191 = vmatpush.msrb.mxu1 %v2209_v12  ;;  %3234 = vmatpush.msrb.mxu3 %v2114_v14  ;;  %v1249_v14 = vld [vmem:[#allocation10 + $0x1b0] sm:$0xff] }
 0x33c   : > { %3173 = vmatpush.msrb.mxu0 %v1633_v15  ;;  %3216 = vmatpush.msrb.mxu2 %v1538_v17  ;;  %v1793_v15 = vld [vmem:[#allocation10 + $0x12b0] sm:$0xff]  ;;  %v2180_v17 = vld [vmem:[#allocation10 + $0x1ec8] sm:$0xff] }
 0x33d   : > { %3192 = vmatpush.msrb.mxu1 %v2177_v16  ;;  %3235 = vmatpush.msrb.mxu3 %v2082_v19  ;;  %v1636_v16 = vld [vmem:[#allocation10 + $0xdc8] sm:$0xff]  ;;  %v1217_v19 = vld [vmem:[#allocation10 + $0xb0] sm:$0xff] }
 0x33e   : > { %3174 = vmatpush.msrb.mxu0 %v1601_v20  ;;  %3217 = vmatpush.msrb.mxu2 %v1506_v22  ;;  %v1761_v20 = vld [vmem:[#allocation10 + $0x11b0] sm:$0xff]  ;;  %v1604_v22 = vld [vmem:[#allocation10 + $0xcc8] sm:$0xff] }
 0x33f   : > { %3193 = vmatpush.msrb.mxu1 %v2145_v21  ;;  %3236 = vmatpush.msrb.mxu3 %v2050_v23  ;;  %v1699_v21 = vld [vmem:[#allocation10 + $0xfc0] sm:$0xff]  ;;  %v2148_v23 = vld [vmem:[#allocation10 + $0x1dc8] sm:$0xff] }
 0x340   : > { %3175 = vmatpush.msrb.mxu0 %v1569_v24  ;;  %3218 = vmatpush.msrb.mxu2 %v1474_v26  ;;  %v1729_v24 = vld [vmem:[#allocation10 + $0x10b0] sm:$0xff]  ;;  %v2211_v26 = vld [vmem:[#allocation10 + $0x1fc0] sm:$0xff] }
 0x341   : > { %3194 = vmatpush.msrb.mxu1 %v2113_v25  ;;  %3237 = vmatpush.msrb.mxu3 %v2018_v28  ;;  %v1667_v25 = vld [vmem:[#allocation10 + $0xec0] sm:$0xff]  ;;  %v1572_v28 = vld [vmem:[#allocation10 + $0xbc8] sm:$0xff] }
 0x342   : > { %3176 = vmatpush.msrb.mxu0 %v1537_v27  ;;  %3219 = vmatpush.msrb.mxu2 %v1442_v30  ;;  %v2116_v27 = vld [vmem:[#allocation10 + $0x1cc8] sm:$0xff]  ;;  %v2179_v30 = vld [vmem:[#allocation10 + $0x1ec0] sm:$0xff] }
 0x343   : > { %3195 = vmatpush.msrb.mxu1 %v2081_v29  ;;  %3238 = vmatpush.msrb.mxu3 %v1986_v31  ;;  %v1635_v29 = vld [vmem:[#allocation10 + $0xdc0] sm:$0xff]  ;;  %v1540_v31 = vld [vmem:[#allocation10 + $0xac8] sm:$0xff] }
 0x344   : > { %3177 = vmatpush.msrb.mxu0 %v1505_v32  ;;  %3220 = vmatpush.msrb.mxu2 %v1410_v35  ;;  %v2084_v32 = vld [vmem:[#allocation10 + $0x1bc8] sm:$0xff]  ;;  %v2147_v35 = vld [vmem:[#allocation10 + $0x1dc0] sm:$0xff] }
 0x345   : > { %3196 = vmatpush.msrb.mxu1 %v2049_v33  ;;  %3239 = vmatpush.msrb.mxu3 %v1954_v36  ;;  %v1603_v33 = vld [vmem:[#allocation10 + $0xcc0] sm:$0xff]  ;;  %v1508_v36 = vld [vmem:[#allocation10 + $0x9c8] sm:$0xff] }
 0x346   : > { %3178 = vmatpush.msrb.mxu0 %v1473_v37  ;;  %3221 = vmatpush.msrb.mxu2 %v1378_v39  ;;  %v2052_v37 = vld [vmem:[#allocation10 + $0x1ac8] sm:$0xff]  ;;  %v2115_v39 = vld [vmem:[#allocation10 + $0x1cc0] sm:$0xff] }
 0x347   : > { %3197 = vmatpush.msrb.mxu1 %v2017_v38  ;;  %3240 = vmatpush.msrb.mxu3 %v1922_v41  ;;  %v1571_v38 = vld [vmem:[#allocation10 + $0xbc0] sm:$0xff]  ;;  %v1476_v41 = vld [vmem:[#allocation10 + $0x8c8] sm:$0xff] }
 0x348   : > { %3179 = vmatpush.msrb.mxu0 %v1441_v42  ;;  %3222 = vmatpush.msrb.mxu2 %v1346_v44  ;;  %v2020_v42 = vld [vmem:[#allocation10 + $0x19c8] sm:$0xff]  ;;  %v2083_v44 = vld [vmem:[#allocation10 + $0x1bc0] sm:$0xff] }
 0x349   : > { %3198 = vmatpush.msrb.mxu1 %v1985_v43  ;;  %3241 = vmatpush.msrb.mxu3 %v1890_v45  ;;  %v1539_v43 = vld [vmem:[#allocation10 + $0xac0] sm:$0xff]  ;;  %v1444_v45 = vld [vmem:[#allocation10 + $0x7c8] sm:$0xff] }
 0x34a   : > { %3180 = vmatpush.msrb.mxu0 %v1409_v46  ;;  %3223 = vmatpush.msrb.mxu2 %v1314_v48  ;;  %v1988_v46 = vld [vmem:[#allocation10 + $0x18c8] sm:$0xff]  ;;  %v2051_v48 = vld [vmem:[#allocation10 + $0x1ac0] sm:$0xff] }
 0x34b   : > { %3199 = vmatpush.msrb.mxu1 %v1953_v47  ;;  %3242 = vmatpush.msrb.mxu3 %v1858_v49  ;;  %v1507_v47 = vld [vmem:[#allocation10 + $0x9c0] sm:$0xff]  ;;  %v1412_v49 = vld [vmem:[#allocation10 + $0x6c8] sm:$0xff] }
 0x34c   : > { %3181 = vmatpush.msrb.mxu0 %v1377_v50  ;;  %3224 = vmatpush.msrb.mxu2 %v1282_v52  ;;  %v1956_v50 = vld [vmem:[#allocation10 + $0x17c8] sm:$0xff]  ;;  %v2019_v52 = vld [vmem:[#allocation10 + $0x19c0] sm:$0xff] }
 0x34d   : > { %3200 = vmatpush.msrb.mxu1 %v1921_v51  ;;  %v2828_v61 = vpop.f32.mrf.mxu2  ;;  %3243 = vmatpush.msrb.mxu3 %v1826_v54  ;;  %v1475_v51 = vld [vmem:[#allocation10 + $0x8c0] sm:$0xff]  ;;  %v1924_v54 = vld [vmem:[#allocation10 + $0x16c8] sm:$0xff] }
 0x34e   : > { %3182 = vmatpush.msrb.mxu0 %v1345_v55  ;;  %v2788_v0 = vpop.f32.mrf.mxu0  ;;  %v2829_v1 = vadd.f32 %v2828_v61, %v2240_v53  ;;  %3225 = vmatpush.msrb.mxu2 %v1250_v58  ;;  %v1380_v53 = vld [vmem:[#allocation10 + $0x5c8] sm:$0xff]  ;;  %v1443_v55 = vld [vmem:[#allocation10 + $0x7c0] sm:$0xff] }
 0x34f   : > { %3201 = vmatpush.msrb.mxu1 %v1889_v57  ;;  %v2789_v3 = vadd.f32 %v2788_v0, %v2239_v56  ;;  %3244 = vmatpush.msrb.mxu3 %v1794_v59  ;;  %v1987_v56 = vld [vmem:[#allocation10 + $0x18c0] sm:$0xff]  ;;  %v1348_v57 = vld [vmem:[#allocation10 + $0x4c8] sm:$0xff] }
 0x350   : > { %3183 = vmatpush.msrb.mxu0 %v1313_v60  ;;  %v2848_v6 = vpop.f32.mrf.mxu3  ;;  %3226 = vmatpush.msrb.mxu2 %v1218_v63  ;;  %v1892_v58 = vld [vmem:[#allocation10 + $0x15c8] sm:$0xff]  ;;  %v1411_v59 = vld [vmem:[#allocation10 + $0x6c0] sm:$0xff] }
 0x351   : > { %3202 = vmatpush.msrb.mxu1 %v1857_v62  ;;  %v2808_v9 = vpop.f32.mrf.mxu1  ;;  %v2849_v10 = vadd.f32 %v2848_v6, %v2829_v1  ;;  %3245 = vmatpush.msrb.mxu3 %v1762_v2  ;;  %v1955_v60 = vld [vmem:[#allocation10 + $0x17c0] sm:$0xff]  ;;  %v1316_v61 = vld [vmem:[#allocation10 + $0x3c8] sm:$0xff]  ;;  %v2242_v2 = vperm.slane %v4866_v18, 7 }
 0x352   : > { %3147 = vmatmul.f32.vlgmr.msra.gmra.mxu2 %v4796_v34  ;;  %v2809_v12 = vadd.f32 %v2808_v9, %v2789_v3  ;;  %3184 = vmatpush.msrb.mxu0 %v1281_v5  ;;  %v1860_v62 = vld [vmem:[#allocation10 + $0x14c8] sm:$0xff]  ;;  %v1379_v63 = vld [vmem:[#allocation10 + $0x5c0] sm:$0xff]  ;;  %v2241_v5 = vperm.slane %v4866_v18, 6  ;;  %v1702_v18 = vld [vmem:[#allocation10 + $0xfd8] sm:$0xff] }
 0x353   : > { %3291 = vmatpush.msra.mxu2 %v1700_v4  ;;  %3584 = vst [vmem:[%s5010_s7 + $0x68] sm:$0xff] %v2849_v10  ;;  %3203 = vmatpush.msrb.mxu1 %v1825_v7  ;;  %v1923_v0 = vld [vmem:[#allocation10 + $0x16c0] sm:$0xff]  ;;  %v1284_v1 = vld [vmem:[#allocation10 + $0x2c8] sm:$0xff] }
 0x354   : > { %3246 = vmatpush.msrb.mxu3 %v1730_v8  ;;  %3583 = vst [vmem:[%s5010_s7 + $0x60] sm:$0xff] %v2809_v12  ;;  %3185 = vmatpush.msrb.mxu0 %v1249_v14  ;;  %v1828_v3 = vld [vmem:[#allocation10 + $0x13c8] sm:$0xff]  ;;  %v1347_v4 = vld [vmem:[#allocation10 + $0x4c0] sm:$0xff] }
 0x355   : > { %3167 = vmatmul.f32.vlgmr.msra.gmra.mxu3 %v4798_v40  ;;  %3292 = vmatpush.msra.mxu2 %v1668_v11  ;;  %v1891_v6 = vld [vmem:[#allocation10 + $0x15c0] sm:$0xff]  ;;  %v1252_v7 = vld [vmem:[#allocation10 + $0x1c8] sm:$0xff] }
 0x356   : > { %3311 = vmatpush.msra.mxu3 %v2212_v13  ;;  %3204 = vmatpush.msrb.mxu1 %v1793_v15  ;;  %v1796_v8 = vld [vmem:[#allocation10 + $0x12c8] sm:$0xff]  ;;  %v1315_v9 = vld [vmem:[#allocation10 + $0x3c0] sm:$0xff] }
 0x357   : > { %3293 = vmatpush.msra.mxu2 %v1636_v16  ;;  %3186 = vmatpush.msrb.mxu0 %v1217_v19  ;;  %v1859_v11 = vld [vmem:[#allocation10 + $0x14c0] sm:$0xff]  ;;  %v1220_v12 = vld [vmem:[#allocation10 + $0xc8] sm:$0xff] }
 0x358   : > { %3312 = vmatpush.msra.mxu3 %v2180_v17  ;;  %3205 = vmatpush.msrb.mxu1 %v1761_v20  ;;  %v1764_v15 = vld [vmem:[#allocation10 + $0x11c8] sm:$0xff]  ;;  %v1283_v17 = vld [vmem:[#allocation10 + $0x2c0] sm:$0xff] }
 0x359   : > { %3107 = vmatmul.f32.vlgmr.msra.gmra.mxu0 %v4796_v34  ;;  %3294 = vmatpush.msra.mxu2 %v1604_v22  ;;  %v1827_v20 = vld [vmem:[#allocation10 + $0x13c0] sm:$0xff] }
 0x35a   : > { %3251 = vmatpush.msra.mxu0 %v1699_v21  ;;  %3313 = vmatpush.msra.mxu3 %v2148_v23  ;;  %v1732_v21 = vld [vmem:[#allocation10 + $0x10c8] sm:$0xff] }
 0x35b   : > { %3206 = vmatpush.msrb.mxu1 %v1729_v24  ;;  %3295 = vmatpush.msra.mxu2 %v1572_v28  ;;  %v1670_v24 = vld [vmem:[#allocation10 + $0xed8] sm:$0xff]  ;;  %v1251_v28 = vld [vmem:[#allocation10 + $0x1c0] sm:$0xff] }
 0x35c   : > { %3127 = vmatmul.f32.vlgmr.msra.gmra.mxu1 %v4798_v40  ;;  %3252 = vmatpush.msra.mxu0 %v1667_v25 }
 0x35d   : > { %3271 = vmatpush.msra.mxu1 %v2211_v26  ;;  %3314 = vmatpush.msra.mxu3 %v2116_v27  ;;  %v2214_v26 = vld [vmem:[#allocation10 + $0x1fd8] sm:$0xff]  ;;  %v1795_v27 = vld [vmem:[#allocation10 + $0x12c0] sm:$0xff] }
 0x35e   : > { %3253 = vmatpush.msra.mxu0 %v1635_v29  ;;  %3296 = vmatpush.msra.mxu2 %v1540_v31  ;;  %v1638_v29 = vld [vmem:[#allocation10 + $0xdd8] sm:$0xff]  ;;  %v1219_v31 = vld [vmem:[#allocation10 + $0xc0] sm:$0xff] }
 0x35f   : > { %3272 = vmatpush.msra.mxu1 %v2179_v30  ;;  %3315 = vmatpush.msra.mxu3 %v2084_v32  ;;  %v2182_v30 = vld [vmem:[#allocation10 + $0x1ed8] sm:$0xff]  ;;  %v1763_v32 = vld [vmem:[#allocation10 + $0x11c0] sm:$0xff] }
 0x360   : > { %3254 = vmatpush.msra.mxu0 %v1603_v33  ;;  %3297 = vmatpush.msra.mxu2 %v1508_v36  ;;  %v1701_v33 = vld [vmem:[#allocation10 + $0xfd0] sm:$0xff]  ;;  %v2150_v36 = vld [vmem:[#allocation10 + $0x1dd8] sm:$0xff] }
 0x361   : > { %3273 = vmatpush.msra.mxu1 %v2147_v35  ;;  %3316 = vmatpush.msra.mxu3 %v2052_v37  ;;  %v1606_v35 = vld [vmem:[#allocation10 + $0xcd8] sm:$0xff]  ;;  %v1731_v37 = vld [vmem:[#allocation10 + $0x10c0] sm:$0xff] }
 0x362   : > { %3255 = vmatpush.msra.mxu0 %v1571_v38  ;;  %3298 = vmatpush.msra.mxu2 %v1476_v41  ;;  %v1669_v38 = vld [vmem:[#allocation10 + $0xed0] sm:$0xff]  ;;  %v1574_v41 = vld [vmem:[#allocation10 + $0xbd8] sm:$0xff] }
 0x363   : > { %3274 = vmatpush.msra.mxu1 %v2115_v39  ;;  %3317 = vmatpush.msra.mxu3 %v2020_v42  ;;  %v2213_v39 = vld [vmem:[#allocation10 + $0x1fd0] sm:$0xff]  ;;  %v2118_v42 = vld [vmem:[#allocation10 + $0x1cd8] sm:$0xff] }
 0x364   : > { %3256 = vmatpush.msra.mxu0 %v1539_v43  ;;  %3299 = vmatpush.msra.mxu2 %v1444_v45  ;;  %v1637_v43 = vld [vmem:[#allocation10 + $0xdd0] sm:$0xff]  ;;  %v1542_v45 = vld [vmem:[#allocation10 + $0xad8] sm:$0xff] }
 0x365   : > { %3275 = vmatpush.msra.mxu1 %v2083_v44  ;;  %3318 = vmatpush.msra.mxu3 %v1988_v46  ;;  %v2181_v44 = vld [vmem:[#allocation10 + $0x1ed0] sm:$0xff]  ;;  %v2086_v46 = vld [vmem:[#allocation10 + $0x1bd8] sm:$0xff] }
 0x366   : > { %3257 = vmatpush.msra.mxu0 %v1507_v47  ;;  %3300 = vmatpush.msra.mxu2 %v1412_v49  ;;  %v1605_v47 = vld [vmem:[#allocation10 + $0xcd0] sm:$0xff]  ;;  %v1510_v49 = vld [vmem:[#allocation10 + $0x9d8] sm:$0xff] }
 0x367   : > { %3276 = vmatpush.msra.mxu1 %v2051_v48  ;;  %3319 = vmatpush.msra.mxu3 %v1956_v50  ;;  %v2149_v48 = vld [vmem:[#allocation10 + $0x1dd0] sm:$0xff]  ;;  %v2054_v50 = vld [vmem:[#allocation10 + $0x1ad8] sm:$0xff] }
 0x368   : > { %3258 = vmatpush.msra.mxu0 %v1475_v51  ;;  %3301 = vmatpush.msra.mxu2 %v1380_v53  ;;  %v1573_v51 = vld [vmem:[#allocation10 + $0xbd0] sm:$0xff]  ;;  %v1478_v53 = vld [vmem:[#allocation10 + $0x8d8] sm:$0xff] }
 0x369   : > { %3277 = vmatpush.msra.mxu1 %v2019_v52  ;;  %3320 = vmatpush.msra.mxu3 %v1924_v54  ;;  %v2117_v52 = vld [vmem:[#allocation10 + $0x1cd0] sm:$0xff]  ;;  %v2022_v54 = vld [vmem:[#allocation10 + $0x19d8] sm:$0xff] }
 0x36a   : > { %3259 = vmatpush.msra.mxu0 %v1443_v55  ;;  %3302 = vmatpush.msra.mxu2 %v1348_v57  ;;  %v1541_v55 = vld [vmem:[#allocation10 + $0xad0] sm:$0xff]  ;;  %v1446_v57 = vld [vmem:[#allocation10 + $0x7d8] sm:$0xff] }
 0x36b   : > { %3278 = vmatpush.msra.mxu1 %v1987_v56  ;;  %3321 = vmatpush.msra.mxu3 %v1892_v58  ;;  %v2085_v56 = vld [vmem:[#allocation10 + $0x1bd0] sm:$0xff]  ;;  %v1990_v58 = vld [vmem:[#allocation10 + $0x18d8] sm:$0xff] }
 0x36c   : > { %3260 = vmatpush.msra.mxu0 %v1411_v59  ;;  %3303 = vmatpush.msra.mxu2 %v1316_v61  ;;  %v1509_v59 = vld [vmem:[#allocation10 + $0x9d0] sm:$0xff]  ;;  %v1414_v61 = vld [vmem:[#allocation10 + $0x6d8] sm:$0xff] }
 0x36d   : > { %3279 = vmatpush.msra.mxu1 %v1955_v60  ;;  %3322 = vmatpush.msra.mxu3 %v1860_v62  ;;  %v2053_v60 = vld [vmem:[#allocation10 + $0x1ad0] sm:$0xff]  ;;  %v1958_v62 = vld [vmem:[#allocation10 + $0x17d8] sm:$0xff] }
 0x36e   : > { %3261 = vmatpush.msra.mxu0 %v1379_v63  ;;  %3304 = vmatpush.msra.mxu2 %v1284_v1  ;;  %v1477_v63 = vld [vmem:[#allocation10 + $0x8d0] sm:$0xff]  ;;  %v1382_v1 = vld [vmem:[#allocation10 + $0x5d8] sm:$0xff] }
 0x36f   : > { %3280 = vmatpush.msra.mxu1 %v1923_v0  ;;  %v2908_v10 = vpop.f32.mrf.mxu2  ;;  %3323 = vmatpush.msra.mxu3 %v1828_v3  ;;  %v2021_v0 = vld [vmem:[#allocation10 + $0x19d0] sm:$0xff] }
 0x370   : > { %3262 = vmatpush.msra.mxu0 %v1347_v4  ;;  %v2868_v13 = vpop.f32.mrf.mxu0  ;;  %v2909_v14 = vadd.f32 %v2908_v10, %v2242_v2  ;;  %3305 = vmatpush.msra.mxu2 %v1252_v7  ;;  %v1926_v2 = vld [vmem:[#allocation10 + $0x16d8] sm:$0xff]  ;;  %v1445_v3 = vld [vmem:[#allocation10 + $0x7d0] sm:$0xff] }
 0x371   : > { %3281 = vmatpush.msra.mxu1 %v1891_v6  ;;  %v2869_v16 = vadd.f32 %v2868_v13, %v2241_v5  ;;  %3324 = vmatpush.msra.mxu3 %v1796_v8  ;;  %v1989_v4 = vld [vmem:[#allocation10 + $0x18d0] sm:$0xff]  ;;  %v1350_v5 = vld [vmem:[#allocation10 + $0x4d8] sm:$0xff] }
 0x372   : > { %3263 = vmatpush.msra.mxu0 %v1315_v9  ;;  %v2928_v19 = vpop.f32.mrf.mxu3  ;;  %3306 = vmatpush.msra.mxu2 %v1220_v12  ;;  %v1894_v6 = vld [vmem:[#allocation10 + $0x15d8] sm:$0xff]  ;;  %v1413_v7 = vld [vmem:[#allocation10 + $0x6d0] sm:$0xff] }
 0x373   : > { %3282 = vmatpush.msra.mxu1 %v1859_v11  ;;  %v2888_v22 = vpop.f32.mrf.mxu1  ;;  %v2929_v23 = vadd.f32 %v2928_v19, %v2909_v14  ;;  %3325 = vmatpush.msra.mxu3 %v1764_v15  ;;  %v4916_v8 = vld [vmem:[#allocation11 + $0x10] sm:$0xff]  ;;  %v1318_v10 = vld [vmem:[#allocation10 + $0x3d8] sm:$0xff] }
 0x374   : > { %3227 = vmatmul.f32.vlgmr.msrb.gmra.mxu2 %v4796_v34  ;;  %v2889_v25 = vadd.f32 %v2888_v22, %v2869_v16  ;;  %3264 = vmatpush.msra.mxu0 %v1283_v17  ;;  %v1957_v9 = vld [vmem:[#allocation10 + $0x17d0] sm:$0xff]  ;;  %v1862_v11 = vld [vmem:[#allocation10 + $0x14d8] sm:$0xff]  ;;  %v2244_v15 = vperm.slane %v4916_v8, 1  ;;  %v2243_v17 = vperm.slane %v4916_v8, 0 }
 0x375   : > { %3371 = vmatpush.msrb.mxu2 %v1702_v18  ;;  %3586 = vst [vmem:[%s5010_s7 + $0x78] sm:$0xff] %v2929_v23  ;;  %3283 = vmatpush.msra.mxu1 %v1827_v20  ;;  %v1381_v12 = vld [vmem:[#allocation10 + $0x5d0] sm:$0xff]  ;;  %v1286_v14 = vld [vmem:[#allocation10 + $0x2d8] sm:$0xff] }
 0x376   : > { %3326 = vmatpush.msra.mxu3 %v1732_v21  ;;  %3585 = vst [vmem:[%s5010_s7 + $0x70] sm:$0xff] %v2889_v25  ;;  %3265 = vmatpush.msra.mxu0 %v1251_v28  ;;  %v1925_v13 = vld [vmem:[#allocation10 + $0x16d0] sm:$0xff]  ;;  %v1830_v16 = vld [vmem:[#allocation10 + $0x13d8] sm:$0xff] }
 0x377   : > { %3247 = vmatmul.f32.vlgmr.msrb.gmra.mxu3 %v4798_v40  ;;  %3372 = vmatpush.msrb.mxu2 %v1670_v24  ;;  %v1349_v18 = vld [vmem:[#allocation10 + $0x4d0] sm:$0xff]  ;;  %v1254_v20 = vld [vmem:[#allocation10 + $0x1d8] sm:$0xff] }
 0x378   : > { %3391 = vmatpush.msrb.mxu3 %v2214_v26  ;;  %3284 = vmatpush.msra.mxu1 %v1795_v27  ;;  %v1893_v19 = vld [vmem:[#allocation10 + $0x15d0] sm:$0xff]  ;;  %v1798_v21 = vld [vmem:[#allocation10 + $0x12d8] sm:$0xff] }
 0x379   : > { %3373 = vmatpush.msrb.mxu2 %v1638_v29  ;;  %3266 = vmatpush.msra.mxu0 %v1219_v31  ;;  %v1317_v22 = vld [vmem:[#allocation10 + $0x3d0] sm:$0xff]  ;;  %v1222_v25 = vld [vmem:[#allocation10 + $0xd8] sm:$0xff] }
 0x37a   : > { %3392 = vmatpush.msrb.mxu3 %v2182_v30  ;;  %3285 = vmatpush.msra.mxu1 %v1763_v32  ;;  %v1861_v24 = vld [vmem:[#allocation10 + $0x14d0] sm:$0xff]  ;;  %v1766_v27 = vld [vmem:[#allocation10 + $0x11d8] sm:$0xff]  ;;  %v1704_v30 = vld [vmem:[#allocation10 + $0xfe8] sm:$0xff] }
 0x37b   : > { %3187 = vmatmul.f32.vlgmr.msrb.gmra.mxu0 %v4796_v34  ;;  %3374 = vmatpush.msrb.mxu2 %v1606_v35  ;;  %v1285_v31 = vld [vmem:[#allocation10 + $0x2d0] sm:$0xff]  ;;  %v1734_v35 = vld [vmem:[#allocation10 + $0x10d8] sm:$0xff] }
 0x37c   : > { %3331 = vmatpush.msrb.mxu0 %v1701_v33  ;;  %3393 = vmatpush.msrb.mxu3 %v2150_v36  ;;  %v1829_v33 = vld [vmem:[#allocation10 + $0x13d0] sm:$0xff] }
 0x37d   : > { %3286 = vmatpush.msra.mxu1 %v1731_v37  ;;  %3375 = vmatpush.msrb.mxu2 %v1574_v41  ;;  %v2216_v41 = vld [vmem:[#allocation10 + $0x1fe8] sm:$0xff] }
 0x37e   : > { %3207 = vmatmul.f32.vlgmr.msrb.gmra.mxu1 %v4798_v40  ;;  %3332 = vmatpush.msrb.mxu0 %v1669_v38  ;;  %v1672_v38 = vld [vmem:[#allocation10 + $0xee8] sm:$0xff] }
 0x37f   : > { %3351 = vmatpush.msrb.mxu1 %v2213_v39  ;;  %3394 = vmatpush.msrb.mxu3 %v2118_v42  ;;  %v1253_v42 = vld [vmem:[#allocation10 + $0x1d0] sm:$0xff] }
 0x380   : > { %3333 = vmatpush.msrb.mxu0 %v1637_v43  ;;  %3376 = vmatpush.msrb.mxu2 %v1542_v45  ;;  %v1797_v43 = vld [vmem:[#allocation10 + $0x12d0] sm:$0xff]  ;;  %v2184_v45 = vld [vmem:[#allocation10 + $0x1ee8] sm:$0xff] }
 0x381   : > { %3352 = vmatpush.msrb.mxu1 %v2181_v44  ;;  %3395 = vmatpush.msrb.mxu3 %v2086_v46  ;;  %v1640_v44 = vld [vmem:[#allocation10 + $0xde8] sm:$0xff]  ;;  %v1221_v46 = vld [vmem:[#allocation10 + $0xd0] sm:$0xff] }
 0x382   : > { %3334 = vmatpush.msrb.mxu0 %v1605_v47  ;;  %3377 = vmatpush.msrb.mxu2 %v1510_v49  ;;  %v1765_v47 = vld [vmem:[#allocation10 + $0x11d0] sm:$0xff]  ;;  %v1608_v49 = vld [vmem:[#allocation10 + $0xce8] sm:$0xff] }
 0x383   : > { %3353 = vmatpush.msrb.mxu1 %v2149_v48  ;;  %3396 = vmatpush.msrb.mxu3 %v2054_v50  ;;  %v1703_v48 = vld [vmem:[#allocation10 + $0xfe0] sm:$0xff]  ;;  %v2152_v50 = vld [vmem:[#allocation10 + $0x1de8] sm:$0xff] }
 0x384   : > { %3335 = vmatpush.msrb.mxu0 %v1573_v51  ;;  %3378 = vmatpush.msrb.mxu2 %v1478_v53  ;;  %v1733_v51 = vld [vmem:[#allocation10 + $0x10d0] sm:$0xff]  ;;  %v2215_v53 = vld [vmem:[#allocation10 + $0x1fe0] sm:$0xff] }
 0x385   : > { %3354 = vmatpush.msrb.mxu1 %v2117_v52  ;;  %3397 = vmatpush.msrb.mxu3 %v2022_v54  ;;  %v1671_v52 = vld [vmem:[#allocation10 + $0xee0] sm:$0xff]  ;;  %v1576_v54 = vld [vmem:[#allocation10 + $0xbe8] sm:$0xff] }
 0x386   : > { %3336 = vmatpush.msrb.mxu0 %v1541_v55  ;;  %3379 = vmatpush.msrb.mxu2 %v1446_v57  ;;  %v2120_v55 = vld [vmem:[#allocation10 + $0x1ce8] sm:$0xff]  ;;  %v2183_v57 = vld [vmem:[#allocation10 + $0x1ee0] sm:$0xff] }
 0x387   : > { %3355 = vmatpush.msrb.mxu1 %v2085_v56  ;;  %3398 = vmatpush.msrb.mxu3 %v1990_v58  ;;  %v1639_v56 = vld [vmem:[#allocation10 + $0xde0] sm:$0xff]  ;;  %v1544_v58 = vld [vmem:[#allocation10 + $0xae8] sm:$0xff] }
 0x388   : > { %3337 = vmatpush.msrb.mxu0 %v1509_v59  ;;  %3380 = vmatpush.msrb.mxu2 %v1414_v61  ;;  %v2088_v59 = vld [vmem:[#allocation10 + $0x1be8] sm:$0xff]  ;;  %v2151_v61 = vld [vmem:[#allocation10 + $0x1de0] sm:$0xff] }
 0x389   : > { %3356 = vmatpush.msrb.mxu1 %v2053_v60  ;;  %3399 = vmatpush.msrb.mxu3 %v1958_v62  ;;  %v1607_v60 = vld [vmem:[#allocation10 + $0xce0] sm:$0xff]  ;;  %v1512_v62 = vld [vmem:[#allocation10 + $0x9e8] sm:$0xff] }
 0x38a   : > { %3338 = vmatpush.msrb.mxu0 %v1477_v63  ;;  %3381 = vmatpush.msrb.mxu2 %v1382_v1  ;;  %v2056_v63 = vld [vmem:[#allocation10 + $0x1ae8] sm:$0xff]  ;;  %v2119_v1 = vld [vmem:[#allocation10 + $0x1ce0] sm:$0xff] }
 0x38b   : > { %3357 = vmatpush.msrb.mxu1 %v2021_v0  ;;  %3400 = vmatpush.msrb.mxu3 %v1926_v2  ;;  %v1575_v0 = vld [vmem:[#allocation10 + $0xbe0] sm:$0xff]  ;;  %v1480_v2 = vld [vmem:[#allocation10 + $0x8e8] sm:$0xff] }
 0x38c   : > { %3339 = vmatpush.msrb.mxu0 %v1445_v3  ;;  %3382 = vmatpush.msrb.mxu2 %v1350_v5  ;;  %v2024_v3 = vld [vmem:[#allocation10 + $0x19e8] sm:$0xff]  ;;  %v2087_v5 = vld [vmem:[#allocation10 + $0x1be0] sm:$0xff] }
 0x38d   : > { %3358 = vmatpush.msrb.mxu1 %v1989_v4  ;;  %3401 = vmatpush.msrb.mxu3 %v1894_v6  ;;  %v1543_v4 = vld [vmem:[#allocation10 + $0xae0] sm:$0xff]  ;;  %v1448_v6 = vld [vmem:[#allocation10 + $0x7e8] sm:$0xff] }
 0x38e   : > { %3340 = vmatpush.msrb.mxu0 %v1413_v7  ;;  %3383 = vmatpush.msrb.mxu2 %v1318_v10  ;;  %v1992_v7 = vld [vmem:[#allocation10 + $0x18e8] sm:$0xff]  ;;  %v2055_v10 = vld [vmem:[#allocation10 + $0x1ae0] sm:$0xff] }
 0x38f   : > { %3359 = vmatpush.msrb.mxu1 %v1957_v9  ;;  %3402 = vmatpush.msrb.mxu3 %v1862_v11  ;;  %v1511_v9 = vld [vmem:[#allocation10 + $0x9e0] sm:$0xff]  ;;  %v1416_v11 = vld [vmem:[#allocation10 + $0x6e8] sm:$0xff] }
 0x390   : > { %3341 = vmatpush.msrb.mxu0 %v1381_v12  ;;  %3384 = vmatpush.msrb.mxu2 %v1286_v14  ;;  %v1960_v12 = vld [vmem:[#allocation10 + $0x17e8] sm:$0xff]  ;;  %v2023_v14 = vld [vmem:[#allocation10 + $0x19e0] sm:$0xff] }
 0x391   : > { %3360 = vmatpush.msrb.mxu1 %v1925_v13  ;;  %v2988_v23 = vpop.f32.mrf.mxu2  ;;  %3403 = vmatpush.msrb.mxu3 %v1830_v16  ;;  %v1479_v13 = vld [vmem:[#allocation10 + $0x8e0] sm:$0xff]  ;;  %v1928_v16 = vld [vmem:[#allocation10 + $0x16e8] sm:$0xff] }
 0x392   : > { %3342 = vmatpush.msrb.mxu0 %v1349_v18  ;;  %v2948_v26 = vpop.f32.mrf.mxu0  ;;  %v2989_v28 = vadd.f32 %v2988_v23, %v2244_v15  ;;  %3385 = vmatpush.msrb.mxu2 %v1254_v20  ;;  %v1384_v15 = vld [vmem:[#allocation10 + $0x5e8] sm:$0xff]  ;;  %v1447_v18 = vld [vmem:[#allocation10 + $0x7e0] sm:$0xff] }
 0x393   : > { %3361 = vmatpush.msrb.mxu1 %v1893_v19  ;;  %v2949_v29 = vadd.f32 %v2948_v26, %v2243_v17  ;;  %3404 = vmatpush.msrb.mxu3 %v1798_v21  ;;  %v1991_v17 = vld [vmem:[#allocation10 + $0x18e0] sm:$0xff]  ;;  %v1352_v19 = vld [vmem:[#allocation10 + $0x4e8] sm:$0xff] }
 0x394   : > { %3343 = vmatpush.msrb.mxu0 %v1317_v22  ;;  %v3008_v32 = vpop.f32.mrf.mxu3  ;;  %3386 = vmatpush.msrb.mxu2 %v1222_v25  ;;  %v1896_v20 = vld [vmem:[#allocation10 + $0x15e8] sm:$0xff]  ;;  %v1415_v21 = vld [vmem:[#allocation10 + $0x6e0] sm:$0xff] }
 0x395   : > { %3362 = vmatpush.msrb.mxu1 %v1861_v24  ;;  %v2968_v36 = vpop.f32.mrf.mxu1  ;;  %v3009_v37 = vadd.f32 %v3008_v32, %v2989_v28  ;;  %3405 = vmatpush.msrb.mxu3 %v1766_v27  ;;  %v1959_v22 = vld [vmem:[#allocation10 + $0x17e0] sm:$0xff]  ;;  %v1320_v23 = vld [vmem:[#allocation10 + $0x3e8] sm:$0xff]  ;;  %v2246_v27 = vperm.slane %v4916_v8, 3 }
 0x396   : > { %3307 = vmatmul.f32.vlgmr.msra.gmra.mxu2 %v4796_v34  ;;  %v2969_v39 = vadd.f32 %v2968_v36, %v2949_v29  ;;  %3344 = vmatpush.msrb.mxu0 %v1285_v31  ;;  %v1864_v24 = vld [vmem:[#allocation10 + $0x14e8] sm:$0xff]  ;;  %v1383_v25 = vld [vmem:[#allocation10 + $0x5e0] sm:$0xff]  ;;  %v2245_v31 = vperm.slane %v4916_v8, 2 }
 0x397   : > { %3451 = vmatpush.msra.mxu2 %v1704_v30  ;;  %3588 = vst [vmem:[%s5010_s7 + $0x88] sm:$0xff] %v3009_v37  ;;  %3363 = vmatpush.msrb.mxu1 %v1829_v33  ;;  %v1927_v26 = vld [vmem:[#allocation10 + $0x16e0] sm:$0xff]  ;;  %v1288_v28 = vld [vmem:[#allocation10 + $0x2e8] sm:$0xff] }
 0x398   : > { %3406 = vmatpush.msrb.mxu3 %v1734_v35  ;;  %3587 = vst [vmem:[%s5010_s7 + $0x80] sm:$0xff] %v2969_v39  ;;  %3345 = vmatpush.msrb.mxu0 %v1253_v42  ;;  %v1832_v29 = vld [vmem:[#allocation10 + $0x13e8] sm:$0xff]  ;;  %v1351_v30 = vld [vmem:[#allocation10 + $0x4e0] sm:$0xff] }
 0x399   : > { %3327 = vmatmul.f32.vlgmr.msra.gmra.mxu3 %v4798_v40  ;;  %3452 = vmatpush.msra.mxu2 %v1672_v38  ;;  %v1895_v32 = vld [vmem:[#allocation10 + $0x15e0] sm:$0xff]  ;;  %v1256_v33 = vld [vmem:[#allocation10 + $0x1e8] sm:$0xff] }
 0x39a   : > { %3471 = vmatpush.msra.mxu3 %v2216_v41  ;;  %3364 = vmatpush.msrb.mxu1 %v1797_v43  ;;  %v1800_v35 = vld [vmem:[#allocation10 + $0x12e8] sm:$0xff]  ;;  %v1319_v36 = vld [vmem:[#allocation10 + $0x3e0] sm:$0xff] }
 0x39b   : > { %3453 = vmatpush.msra.mxu2 %v1640_v44  ;;  %3346 = vmatpush.msrb.mxu0 %v1221_v46  ;;  %v1863_v38 = vld [vmem:[#allocation10 + $0x14e0] sm:$0xff]  ;;  %v1224_v39 = vld [vmem:[#allocation10 + $0xe8] sm:$0xff] }
 0x39c   : > { %3472 = vmatpush.msra.mxu3 %v2184_v45  ;;  %3365 = vmatpush.msrb.mxu1 %v1765_v47  ;;  %v1768_v43 = vld [vmem:[#allocation10 + $0x11e8] sm:$0xff]  ;;  %v1706_v45 = vld [vmem:[#allocation10 + $0xff8] sm:$0xff]  ;;  %v1287_v46 = vld [vmem:[#allocation10 + $0x2e0] sm:$0xff] }
 0x39d   : > { %3267 = vmatmul.f32.vlgmr.msra.gmra.mxu0 %v4796_v34  ;;  %3454 = vmatpush.msra.mxu2 %v1608_v49  ;;  %v1736_v49 = vld [vmem:[#allocation10 + $0x10e8] sm:$0xff] }
 0x39e   : > { %3411 = vmatpush.msra.mxu0 %v1703_v48  ;;  %3473 = vmatpush.msra.mxu3 %v2152_v50  ;;  %v1831_v48 = vld [vmem:[#allocation10 + $0x13e0] sm:$0xff] }
 0x39f   : > { %3366 = vmatpush.msrb.mxu1 %v1733_v51  ;;  %3455 = vmatpush.msra.mxu2 %v1576_v54  ;;  %v2218_v54 = vld [vmem:[#allocation10 + $0x1ff8] sm:$0xff] }
 0x3a0   : > { %3287 = vmatmul.f32.vlgmr.msra.gmra.mxu1 %v4798_v40  ;;  %3412 = vmatpush.msra.mxu0 %v1671_v52  ;;  %v1674_v52 = vld [vmem:[#allocation10 + $0xef8] sm:$0xff] }
 0x3a1   : > { %3431 = vmatpush.msra.mxu1 %v2215_v53  ;;  %3474 = vmatpush.msra.mxu3 %v2120_v55  ;;  %v1255_v55 = vld [vmem:[#allocation10 + $0x1e0] sm:$0xff] }
 0x3a2   : > { %3413 = vmatpush.msra.mxu0 %v1639_v56  ;;  %3456 = vmatpush.msra.mxu2 %v1544_v58  ;;  %v1799_v56 = vld [vmem:[#allocation10 + $0x12e0] sm:$0xff]  ;;  %v2186_v58 = vld [vmem:[#allocation10 + $0x1ef8] sm:$0xff] }
 0x3a3   : > { %3432 = vmatpush.msra.mxu1 %v2183_v57  ;;  %3475 = vmatpush.msra.mxu3 %v2088_v59  ;;  %v1642_v57 = vld [vmem:[#allocation10 + $0xdf8] sm:$0xff]  ;;  %v1223_v59 = vld [vmem:[#allocation10 + $0xe0] sm:$0xff] }
 0x3a4   : > { %3414 = vmatpush.msra.mxu0 %v1607_v60  ;;  %3457 = vmatpush.msra.mxu2 %v1512_v62  ;;  %v1767_v60 = vld [vmem:[#allocation10 + $0x11e0] sm:$0xff]  ;;  %v1610_v62 = vld [vmem:[#allocation10 + $0xcf8] sm:$0xff] }
 0x3a5   : > { %3433 = vmatpush.msra.mxu1 %v2151_v61  ;;  %3476 = vmatpush.msra.mxu3 %v2056_v63  ;;  %v1705_v61 = vld [vmem:[#allocation10 + $0xff0] sm:$0xff]  ;;  %v2154_v63 = vld [vmem:[#allocation10 + $0x1df8] sm:$0xff] }
 0x3a6   : > { %3415 = vmatpush.msra.mxu0 %v1575_v0  ;;  %3458 = vmatpush.msra.mxu2 %v1480_v2  ;;  %v1735_v0 = vld [vmem:[#allocation10 + $0x10e0] sm:$0xff]  ;;  %v2217_v2 = vld [vmem:[#allocation10 + $0x1ff0] sm:$0xff] }
 0x3a7   : > { %3434 = vmatpush.msra.mxu1 %v2119_v1  ;;  %3477 = vmatpush.msra.mxu3 %v2024_v3  ;;  %v1673_v1 = vld [vmem:[#allocation10 + $0xef0] sm:$0xff]  ;;  %v1578_v3 = vld [vmem:[#allocation10 + $0xbf8] sm:$0xff] }
 0x3a8   : > { %3416 = vmatpush.msra.mxu0 %v1543_v4  ;;  %3459 = vmatpush.msra.mxu2 %v1448_v6  ;;  %v2122_v4 = vld [vmem:[#allocation10 + $0x1cf8] sm:$0xff]  ;;  %v2185_v6 = vld [vmem:[#allocation10 + $0x1ef0] sm:$0xff] }
 0x3a9   : > { %3435 = vmatpush.msra.mxu1 %v2087_v5  ;;  %3478 = vmatpush.msra.mxu3 %v1992_v7  ;;  %v1641_v5 = vld [vmem:[#allocation10 + $0xdf0] sm:$0xff]  ;;  %v1546_v7 = vld [vmem:[#allocation10 + $0xaf8] sm:$0xff] }
 0x3aa   : > { %3417 = vmatpush.msra.mxu0 %v1511_v9  ;;  %3460 = vmatpush.msra.mxu2 %v1416_v11  ;;  %v2090_v9 = vld [vmem:[#allocation10 + $0x1bf8] sm:$0xff]  ;;  %v2153_v11 = vld [vmem:[#allocation10 + $0x1df0] sm:$0xff] }
 0x3ab   : > { %3436 = vmatpush.msra.mxu1 %v2055_v10  ;;  %3479 = vmatpush.msra.mxu3 %v1960_v12  ;;  %v1609_v10 = vld [vmem:[#allocation10 + $0xcf0] sm:$0xff]  ;;  %v1514_v12 = vld [vmem:[#allocation10 + $0x9f8] sm:$0xff] }
 0x3ac   : > { %3418 = vmatpush.msra.mxu0 %v1479_v13  ;;  %3461 = vmatpush.msra.mxu2 %v1384_v15  ;;  %v2058_v13 = vld [vmem:[#allocation10 + $0x1af8] sm:$0xff]  ;;  %v2121_v15 = vld [vmem:[#allocation10 + $0x1cf0] sm:$0xff] }
 0x3ad   : > { %3437 = vmatpush.msra.mxu1 %v2023_v14  ;;  %3480 = vmatpush.msra.mxu3 %v1928_v16  ;;  %v1577_v14 = vld [vmem:[#allocation10 + $0xbf0] sm:$0xff]  ;;  %v1482_v16 = vld [vmem:[#allocation10 + $0x8f8] sm:$0xff] }
 0x3ae   : > { %3419 = vmatpush.msra.mxu0 %v1447_v18  ;;  %3462 = vmatpush.msra.mxu2 %v1352_v19  ;;  %v2026_v18 = vld [vmem:[#allocation10 + $0x19f8] sm:$0xff]  ;;  %v2089_v19 = vld [vmem:[#allocation10 + $0x1bf0] sm:$0xff] }
 0x3af   : > { %3438 = vmatpush.msra.mxu1 %v1991_v17  ;;  %3481 = vmatpush.msra.mxu3 %v1896_v20  ;;  %v1545_v17 = vld [vmem:[#allocation10 + $0xaf0] sm:$0xff]  ;;  %v1450_v20 = vld [vmem:[#allocation10 + $0x7f8] sm:$0xff] }
 0x3b0   : > { %3420 = vmatpush.msra.mxu0 %v1415_v21  ;;  %3463 = vmatpush.msra.mxu2 %v1320_v23  ;;  %v1994_v21 = vld [vmem:[#allocation10 + $0x18f8] sm:$0xff]  ;;  %v2057_v23 = vld [vmem:[#allocation10 + $0x1af0] sm:$0xff] }
 0x3b1   : > { %3439 = vmatpush.msra.mxu1 %v1959_v22  ;;  %3482 = vmatpush.msra.mxu3 %v1864_v24  ;;  %v1513_v22 = vld [vmem:[#allocation10 + $0x9f0] sm:$0xff]  ;;  %v1418_v24 = vld [vmem:[#allocation10 + $0x6f8] sm:$0xff] }
 0x3b2   : > { %3421 = vmatpush.msra.mxu0 %v1383_v25  ;;  %3464 = vmatpush.msra.mxu2 %v1288_v28  ;;  %v1962_v25 = vld [vmem:[#allocation10 + $0x17f8] sm:$0xff]  ;;  %v2025_v28 = vld [vmem:[#allocation10 + $0x19f0] sm:$0xff] }
 0x3b3   : > { %3440 = vmatpush.msra.mxu1 %v1927_v26  ;;  %v3068_v37 = vpop.f32.mrf.mxu2  ;;  %3483 = vmatpush.msra.mxu3 %v1832_v29  ;;  %v1481_v26 = vld [vmem:[#allocation10 + $0x8f0] sm:$0xff]  ;;  %v1930_v29 = vld [vmem:[#allocation10 + $0x16f8] sm:$0xff] }
 0x3b4   : > { %3422 = vmatpush.msra.mxu0 %v1351_v30  ;;  %v3028_v41 = vpop.f32.mrf.mxu0  ;;  %v3069_v42 = vadd.f32 %v3068_v37, %v2246_v27  ;;  %3465 = vmatpush.msra.mxu2 %v1256_v33  ;;  %v1386_v27 = vld [vmem:[#allocation10 + $0x5f8] sm:$0xff]  ;;  %v1449_v30 = vld [vmem:[#allocation10 + $0x7f0] sm:$0xff] }
 0x3b5   : > { %3441 = vmatpush.msra.mxu1 %v1895_v32  ;;  %v3029_v44 = vadd.f32 %v3028_v41, %v2245_v31  ;;  %3484 = vmatpush.msra.mxu3 %v1800_v35  ;;  %v1993_v31 = vld [vmem:[#allocation10 + $0x18f0] sm:$0xff]  ;;  %v1354_v32 = vld [vmem:[#allocation10 + $0x4f8] sm:$0xff]  ;;  %v2248_v41 = vperm.slane %v4916_v8, 5 }
 0x3b6   : > { %3423 = vmatpush.msra.mxu0 %v1319_v36  ;;  %v3088_v47 = vpop.f32.mrf.mxu3  ;;  %3466 = vmatpush.msra.mxu2 %v1224_v39  ;;  %v1898_v33 = vld [vmem:[#allocation10 + $0x15f8] sm:$0xff]  ;;  %v1417_v35 = vld [vmem:[#allocation10 + $0x6f0] sm:$0xff] }
 0x3b7   : > { %3442 = vmatpush.msra.mxu1 %v1863_v38  ;;  %v3048_v50 = vpop.f32.mrf.mxu1  ;;  %v3089_v51 = vadd.f32 %v3088_v47, %v3069_v42  ;;  %3485 = vmatpush.msra.mxu3 %v1768_v43  ;;  %v1961_v36 = vld [vmem:[#allocation10 + $0x17f0] sm:$0xff]  ;;  %v1322_v37 = vld [vmem:[#allocation10 + $0x3f8] sm:$0xff] }
 0x3b8   : > { %3387 = vmatmul.f32.vlgmr.msrb.gmra.mxu2 %v4796_v34  ;;  %v3049_v53 = vadd.f32 %v3048_v50, %v3029_v44  ;;  %3424 = vmatpush.msra.mxu0 %v1287_v46  ;;  %v1866_v38 = vld [vmem:[#allocation10 + $0x14f8] sm:$0xff]  ;;  %v1385_v39 = vld [vmem:[#allocation10 + $0x5f0] sm:$0xff]  ;;  %v2247_v44 = vperm.slane %v4916_v8, 4 }
 0x3b9   : > { %3531 = vmatpush.msrb.mxu2 %v1706_v45  ;;  %3590 = vst [vmem:[%s5010_s7 + $0x98] sm:$0xff] %v3089_v51  ;;  %3443 = vmatpush.msra.mxu1 %v1831_v48  ;;  %v1929_v42 = vld [vmem:[#allocation10 + $0x16f0] sm:$0xff]  ;;  %v1290_v43 = vld [vmem:[#allocation10 + $0x2f8] sm:$0xff] }
 0x3ba   : > { %3486 = vmatpush.msra.mxu3 %v1736_v49  ;;  %3589 = vst [vmem:[%s5010_s7 + $0x90] sm:$0xff] %v3049_v53  ;;  %3425 = vmatpush.msra.mxu0 %v1255_v55  ;;  %v1834_v45 = vld [vmem:[#allocation10 + $0x13f8] sm:$0xff]  ;;  %v1353_v46 = vld [vmem:[#allocation10 + $0x4f0] sm:$0xff] }
 0x3bb   : > { %3407 = vmatmul.f32.vlgmr.msrb.gmra.mxu3 %v4798_v40  ;;  %3532 = vmatpush.msrb.mxu2 %v1674_v52  ;;  %v1897_v47 = vld [vmem:[#allocation10 + $0x15f0] sm:$0xff]  ;;  %v1258_v48 = vld [vmem:[#allocation10 + $0x1f8] sm:$0xff] }
 0x3bc   : > { %3551 = vmatpush.msrb.mxu3 %v2218_v54  ;;  %3444 = vmatpush.msra.mxu1 %v1799_v56  ;;  %v1802_v50 = vld [vmem:[#allocation10 + $0x12f8] sm:$0xff]  ;;  %v1321_v53 = vld [vmem:[#allocation10 + $0x3f0] sm:$0xff] }
 0x3bd   : > { %3533 = vmatpush.msrb.mxu2 %v1642_v57  ;;  %3426 = vmatpush.msra.mxu0 %v1223_v59  ;;  %v1865_v54 = vld [vmem:[#allocation10 + $0x14f0] sm:$0xff]  ;;  %v1226_v56 = vld [vmem:[#allocation10 + $0xf8] sm:$0xff] }
 0x3be   : > { %3552 = vmatpush.msrb.mxu3 %v2186_v58  ;;  %3445 = vmatpush.msra.mxu1 %v1767_v60  ;;  %v1770_v57 = vld [vmem:[#allocation10 + $0x11f8] sm:$0xff] }
 0x3bf   : > { %3347 = vmatmul.f32.vlgmr.msrb.gmra.mxu0 %v4796_v34  ;;  %3534 = vmatpush.msrb.mxu2 %v1610_v62  ;;  %v1833_v62 = vld [vmem:[#allocation10 + $0x13f0] sm:$0xff] }
 0x3c0   : > { %3491 = vmatpush.msrb.mxu0 %v1705_v61  ;;  %3553 = vmatpush.msrb.mxu3 %v2154_v63  ;;  %v1289_v61 = vld [vmem:[#allocation10 + $0x2f0] sm:$0xff] }
 0x3c1   : > { %3446 = vmatpush.msra.mxu1 %v1735_v0  ;;  %3535 = vmatpush.msrb.mxu2 %v1578_v3  ;;  %v1738_v0 = vld [vmem:[#allocation10 + $0x10f8] sm:$0xff]  ;;  %v1225_v3 = vld [vmem:[#allocation10 + $0xf0] sm:$0xff] }
 0x3c2   : > { %3367 = vmatmul.f32.vlgmr.msrb.gmra.mxu1 %v4798_v40  ;;  %3492 = vmatpush.msrb.mxu0 %v1673_v1  ;;  %v1257_v1 = vld [vmem:[#allocation10 + $0x1f0] sm:$0xff] }
 0x3c3   : > { %3511 = vmatpush.msrb.mxu1 %v2217_v2  ;;  %3554 = vmatpush.msrb.mxu3 %v2122_v4  ;;  %v1801_v2 = vld [vmem:[#allocation10 + $0x12f0] sm:$0xff] }
 0x3c4   : > { %3493 = vmatpush.msrb.mxu0 %v1641_v5  ;;  %3536 = vmatpush.msrb.mxu2 %v1546_v7  ;;  %v1769_v4 = vld [vmem:[#allocation10 + $0x11f0] sm:$0xff]  ;;  %v2249_v7 = vperm.slane %v4916_v8, 6 }
 0x3c5   : > { %3512 = vmatpush.msrb.mxu1 %v2185_v6  ;;  %3555 = vmatpush.msrb.mxu3 %v2090_v9  ;;  %v1737_v5 = vld [vmem:[#allocation10 + $0x10f0] sm:$0xff]  ;;  %v2250_v6 = vperm.slane %v4916_v8, 7 }
 0x3c6   : > { %3494 = vmatpush.msrb.mxu0 %v1609_v10  ;;  %3537 = vmatpush.msrb.mxu2 %v1514_v12 }
 0x3c7   : > { %3513 = vmatpush.msrb.mxu1 %v2153_v11  ;;  %3556 = vmatpush.msrb.mxu3 %v2058_v13 }
 0x3c8   : > { %3495 = vmatpush.msrb.mxu0 %v1577_v14  ;;  %3538 = vmatpush.msrb.mxu2 %v1482_v16 }
 0x3c9   : > { %3514 = vmatpush.msrb.mxu1 %v2121_v15  ;;  %3557 = vmatpush.msrb.mxu3 %v2026_v18 }
 0x3ca   : > { %3496 = vmatpush.msrb.mxu0 %v1545_v17  ;;  %3539 = vmatpush.msrb.mxu2 %v1450_v20 }
 0x3cb   : > { %3515 = vmatpush.msrb.mxu1 %v2089_v19  ;;  %3558 = vmatpush.msrb.mxu3 %v1994_v21 }
 0x3cc   : > { %3497 = vmatpush.msrb.mxu0 %v1513_v22  ;;  %3540 = vmatpush.msrb.mxu2 %v1418_v24 }
 0x3cd   : > { %3516 = vmatpush.msrb.mxu1 %v2057_v23  ;;  %3559 = vmatpush.msrb.mxu3 %v1962_v25 }
 0x3ce   : > { %3498 = vmatpush.msrb.mxu0 %v1481_v26  ;;  %3541 = vmatpush.msrb.mxu2 %v1386_v27 }
 0x3cf   : > { %3517 = vmatpush.msrb.mxu1 %v2025_v28  ;;  %3560 = vmatpush.msrb.mxu3 %v1930_v29 }
 0x3d0   : > { %3499 = vmatpush.msrb.mxu0 %v1449_v30  ;;  %3542 = vmatpush.msrb.mxu2 %v1354_v32 }
 0x3d1   : > { %3518 = vmatpush.msrb.mxu1 %v1993_v31  ;;  %3561 = vmatpush.msrb.mxu3 %v1898_v33 }
 0x3d2   : > { %3467 = vmatmul.f32.vlgmr.msra.gmra.mxu2 %v4796_v34  ;;  %3500 = vmatpush.msrb.mxu0 %v1417_v35 }
 0x3d3   : > { %3519 = vmatpush.msrb.mxu1 %v1961_v36  ;;  %3543 = vmatpush.msrb.mxu2 %v1322_v37 }
 0x3d4   : > { %3562 = vmatpush.msrb.mxu3 %v1866_v38  ;;  %3501 = vmatpush.msrb.mxu0 %v1385_v39 }
 0x3d5   : > { %3487 = vmatmul.f32.vlgmr.msra.gmra.mxu3 %v4798_v40  ;;  %v3148_v49 = vpop.f32.mrf.mxu2  ;;  %3520 = vmatpush.msrb.mxu1 %v1929_v42 }
 0x3d6   : > { %3544 = vmatpush.msrb.mxu2 %v1290_v43  ;;  %v3108_v51 = vpop.f32.mrf.mxu0  ;;  %v3149_v52 = vadd.f32 %v3148_v49, %v2248_v41  ;;  %3563 = vmatpush.msrb.mxu3 %v1834_v45 }
 0x3d7   : > { %3502 = vmatpush.msrb.mxu0 %v1353_v46  ;;  %v3109_v55 = vadd.f32 %v3108_v51, %v2247_v44  ;;  %3521 = vmatpush.msrb.mxu1 %v1897_v47 }
 0x3d8   : > { %3545 = vmatpush.msrb.mxu2 %v1258_v48  ;;  %v3168_v58 = vpop.f32.mrf.mxu3  ;;  %3564 = vmatpush.msrb.mxu3 %v1802_v50 }
 0x3d9   : > { %3427 = vmatmul.f32.vlgmr.msra.gmra.mxu0 %v4796_v34  ;;  %v3128_v59 = vpop.f32.mrf.mxu1  ;;  %v3169_v60 = vadd.f32 %v3168_v58, %v3149_v52  ;;  %3522 = vmatpush.msrb.mxu1 %v1865_v54 }
 0x3da   : > { %3503 = vmatpush.msrb.mxu0 %v1321_v53  ;;  %v3129_v63 = vadd.f32 %v3128_v59, %v3109_v55  ;;  %3546 = vmatpush.msrb.mxu2 %v1226_v56 }
 0x3db   : > { %3565 = vmatpush.msrb.mxu3 %v1770_v57  ;;  %3592 = vst [vmem:[%s5010_s7 + $0xa8] sm:$0xff] %v3169_v60  ;;  %3447 = vmatmul.f32.vlgmr.msra.gmra.mxu1 %v4798_v40 }
 0x3dc   : > { %3547 = vmatmul.f32.vlgmr.msrb.gmra.mxu2 %v4796_v34  ;;  %3591 = vst [vmem:[%s5010_s7 + $0xa0] sm:$0xff] %v3129_v63  ;;  %3504 = vmatpush.msrb.mxu0 %v1289_v61 }
 0x3dd   : > { %3523 = vmatpush.msrb.mxu1 %v1833_v62  ;;  %3566 = vmatpush.msrb.mxu3 %v1738_v0 }
 0x3de   : > { %3567 = vmatmul.f32.vlgmr.msrb.gmra.mxu3 %v4798_v40  ;;  %3505 = vmatpush.msrb.mxu0 %v1257_v1 }
 0x3df   : > { %3524 = vmatpush.msrb.mxu1 %v1801_v2 }
 0x3e0   : > { %3506 = vmatpush.msrb.mxu0 %v1225_v3 }
 0x3e1   : > { %3525 = vmatpush.msrb.mxu1 %v1769_v4  ;;  %3507 = vmatmul.f32.vlgmr.msrb.gmra.mxu0 %v4796_v34  ;;  %v2222_v34 = vld [vmem:[#allocation11 + $0x18] sm:$0xff] }
 0x3e2   : > { %v2251_v18 = vperm.slane %v2222_v34, 0  ;;  %v2254_v25 = vperm.slane %v2222_v34, 3  ;;  %v2253_v26 = vperm.slane %v2222_v34, 2  ;;  %v2256_v36 = vperm.slane %v2222_v34, 5 }
 0x3e3   : > { %3526 = vmatpush.msrb.mxu1 %v1737_v5  ;;  %v2255_v37 = vperm.slane %v2222_v34, 4  ;;  %v2257_v47 = vperm.slane %v2222_v34, 6  ;;  %v2258_v48 = vperm.slane %v2222_v34, 7 }
 0x3e4   : > { %3527 = vmatmul.f32.vlgmr.msrb.gmra.mxu1 %v4798_v40  ;;  %v2252_v40 = vperm.slane %v2222_v34, 1 }
 0x3f7   : > { %v3228_v9 = vpop.f32.mrf.mxu2 }
 0x3f8   : > { %v3188_v10 = vpop.f32.mrf.mxu0  ;;  %v3229_v11 = vadd.f32 %v3228_v9, %v2250_v6 }
 0x3f9   : > { %v3189_v12 = vadd.f32 %v3188_v10, %v2249_v7 }
 0x3fa   : > { %v3248_v13 = vpop.f32.mrf.mxu3 }
 0x3fb   : > { %v3208_v14 = vpop.f32.mrf.mxu1  ;;  %v3249_v15 = vadd.f32 %v3248_v13, %v3229_v11 }
 0x3fc   : > { %v3209_v16 = vadd.f32 %v3208_v14, %v3189_v12 }
 0x3fd   : > { %3594 = vst [vmem:[%s5010_s7 + $0xb8] sm:$0xff] %v3249_v15 }
 0x3fe   : > { %3593 = vst [vmem:[%s5010_s7 + $0xb0] sm:$0xff] %v3209_v16 }
 0x419   : > { %v3308_v8 = vpop.f32.mrf.mxu2 }
 0x41a   : > { %v3268_v17 = vpop.f32.mrf.mxu0  ;;  %v3309_v19 = vadd.f32 %v3308_v8, %v2252_v40 }
 0x41b   : > { %v3269_v20 = vadd.f32 %v3268_v17, %v2251_v18 }
 0x41c   : > { %v3328_v21 = vpop.f32.mrf.mxu3 }
 0x41d   : > { %v3288_v22 = vpop.f32.mrf.mxu1  ;;  %v3329_v23 = vadd.f32 %v3328_v21, %v3309_v19 }
 0x41e   : > { %v3289_v24 = vadd.f32 %v3288_v22, %v3269_v20 }
 0x41f   : > { %3596 = vst [vmem:[%s5010_s7 + $0xc8] sm:$0xff] %v3329_v23 }
 0x420   : > { %3595 = vst [vmem:[%s5010_s7 + $0xc0] sm:$0xff] %v3289_v24 }
 0x43b   : > { %v3388_v28 = vpop.f32.mrf.mxu2 }
 0x43c   : > { %v3348_v27 = vpop.f32.mrf.mxu0  ;;  %v3389_v29 = vadd.f32 %v3388_v28, %v2254_v25 }
 0x43d   : > { %v3349_v30 = vadd.f32 %v3348_v27, %v2253_v26 }
 0x43e   : > { %v3408_v31 = vpop.f32.mrf.mxu3 }
 0x43f   : > { %v3368_v32 = vpop.f32.mrf.mxu1  ;;  %v3409_v33 = vadd.f32 %v3408_v31, %v3389_v29 }
 0x440   : > { %v3369_v35 = vadd.f32 %v3368_v32, %v3349_v30 }
 0x441   : > { %3598 = vst [vmem:[%s5010_s7 + $0xd8] sm:$0xff] %v3409_v33 }
 0x442   : > { %3597 = vst [vmem:[%s5010_s7 + $0xd0] sm:$0xff] %v3369_v35 }
 0x455   : > { %v3468_v38 = vpop.f32.mrf.mxu2 }
 0x456   : > { %v3428_v39 = vpop.f32.mrf.mxu0  ;;  %v3469_v41 = vadd.f32 %v3468_v38, %v2256_v36 }
 0x457   : > { %v3429_v42 = vadd.f32 %v3428_v39, %v2255_v37 }
 0x458   : > { %v3488_v43 = vpop.f32.mrf.mxu3  ;;  %v3448_v44 = vpop.f32.mrf.mxu1 }
 0x459   : > { %v3489_v45 = vadd.f32 %v3488_v43, %v3469_v41  ;;  %v3449_v46 = vadd.f32 %v3448_v44, %v3429_v42 }
 0x45b   : > { %3600 = vst [vmem:[%s5010_s7 + $0xe8] sm:$0xff] %v3489_v45 }
 0x45c   : > { %3599 = vst [vmem:[%s5010_s7 + $0xe0] sm:$0xff] %v3449_v46 }
 0x45e   : > { %v3508_v49 = vpop.f32.mrf.mxu0 }
 0x45f   : > { %v3548_v50 = vpop.f32.mrf.mxu2  ;;  %v3509_v51 = vadd.f32 %v3508_v49, %v2257_v47 }
 0x460   : > { %v3549_v52 = vadd.f32 %v3548_v50, %v2258_v48 }
 0x461   : > { %v3528_v53 = vpop.f32.mrf.mxu1  ;;  %v3568_v54 = vpop.f32.mrf.mxu3 }
 0x462   : > { %v3529_v55 = vadd.f32 %v3528_v53, %v3509_v51  ;;  %v3569_v56 = vadd.f32 %v3568_v54, %v3549_v52 }
 0x464   : > { %3601 = vst [vmem:[%s5010_s7 + $0xf0] sm:$0xff] %v3529_v55 }
 0x465   : > { %3602 = vst [vmem:[%s5010_s7 + $0xf8] sm:$0xff] %v3569_v56 }
 0x466 PF: > { %s5026_s4 = sld [smem:[#allocation17_spill]]  ;;  %p22_p4 = scmp.ge.s32.totalorder %s4548_s14, 6  }
 0x467   : > { %s5027_s24 = smov %s4440_s25  ;;  %s5028_s25 = smov %s4444_s26 }
 0x468   : > { %s5030_s27 = smov %s4548_s14  ;;  %24 = sbr.rel (!%p22_p4) target bundleno = 12 (0xc), region = 128 }
 0x46c   : > { %s5029_s26 = smov %s5026_s4 }
 0x46d   :  { %3614 = vsyncpa [#allocation4], 1 }
 0x46e   :  { %3616 = vsyncpa [#allocation4 + $0x1], 1 }
 0x46f   :  { %3617 = vsyncpa [#allocation6], 1 }
 0x470   :  { %3619 = vsyncpa [#allocation6 + $0x1], 1 }
 0x471   :  { %3620 = vsyncpa [#allocation9], 1 }
 0x472   :  { %3621 = vsyncpa [#allocation12], 1 }

</bundles_post_ra>
